<compile_context>
chip_gen: v6e
topology: v6e:2x2x1
jax: 0.10.0
libtpu: 0.0.40
codegen_flags: <defaults>
</compile_context>

<pallas_src>
import functools

import numpy as np
import jax
import jax.numpy as jnp
from jax import lax
from jax.experimental import pallas as pl
from jax.experimental.pallas import tpu as pltpu

HIDDEN = 1024
SIDE = 32            # 1024 = 32 * 32, matches x.view(-1, 32, 32)
L2_EPS = 1e-12       # F.normalize default eps

_VMEM = pl.BlockSpec(memory_space=pltpu.MemorySpace.VMEM)
_CPARAMS = pltpu.CompilerParams(vmem_limit_bytes=24 << 20)


# --------------------------------------------------------------------------
# Fused kernel: embed -> per-sample 32x32 matmul -> L2 norm -> 3-layer MLP
# --------------------------------------------------------------------------
def _fused_kernel(x1_ref, w1_ref, b1_ref, x2_ref, w2_ref, b2_ref,
                  wf1_ref, bf1_ref, wf2_ref, bf2_ref, wf3_ref, bf3_ref,
                  out_ref,
                  h1_flat, h2_flat, h1_3d, h2_3d, m3_s, m_flat):
    # ---- 1) Embedding projections: h = x @ W + b (bf16 MXU, fp32 accum) ----
    x1 = x1_ref[...].astype(jnp.bfloat16)
    x2 = x2_ref[...].astype(jnp.bfloat16)
    h1_flat[...] = (jnp.dot(x1, w1_ref[...], preferred_element_type=jnp.float32)
                    + b1_ref[...])
    h2_flat[...] = (jnp.dot(x2, w2_ref[...], preferred_element_type=jnp.float32)
                    + b2_ref[...])

    # ---- 2) x.view(-1, 32, 32): reshape through VMEM scratch.
    #         Static ref-window load + indexed store per 32-lane row block;
    #         avoids any in-kernel lane-splitting shape_cast. ----
    for r in range(SIDE):
        h1_3d[:, r, :] = h1_flat[:, r * SIDE:(r + 1) * SIDE]
        h2_3d[:, r, :] = h2_flat[:, r * SIDE:(r + 1) * SIDE]

    # ---- 3) torch.matmul(x1, x2): one batched bf16 contraction ----
    m3_s[...] = jnp.einsum(
        "bij,bjk->bik",
        h1_3d[...].astype(jnp.bfloat16),
        h2_3d[...].astype(jnp.bfloat16),
        preferred_element_type=jnp.float32)

    # ---- 4) x_matmul.view(-1, 1024): flatten back through scratch ----
    for r in range(SIDE):
        m_flat[:, r * SIDE:(r + 1) * SIDE] = m3_s[:, r, :]

    # ---- 5) F.normalize(p=2, dim=1): rsqrt on the EUP.
    #         1/max(||m||, eps) == rsqrt(max(||m||^2, eps^2)). ----
    m = m_flat[...]
    ssq = jnp.sum(m * m, axis=1, keepdims=True)           # [B, 1]
    inv = lax.rsqrt(jnp.maximum(ssq, L2_EPS * L2_EPS))
    mn = (m * inv).astype(jnp.bfloat16)

    # ---- 6) fusion_fc MLP (Dropout layers are identity in eval mode) ----
    z1 = (jnp.dot(mn, wf1_ref[...], preferred_element_type=jnp.float32)
          + bf1_ref[...])
    z1 = jnp.maximum(z1, 0.0).astype(jnp.bfloat16)
    z2 = (jnp.dot(z1, wf2_ref[...], preferred_element_type=jnp.float32)
          + bf2_ref[...])
    z2 = jnp.maximum(z2, 0.0).astype(jnp.bfloat16)
    out_ref[...] = (jnp.dot(z2, wf3_ref[...], preferred_element_type=jnp.float32)
                    + bf3_ref[...])


# --------------------------------------------------------------------------
# Host-side wrappers
# --------------------------------------------------------------------------
def prepare_params(params):
    """One-time weight prep (off the hot path): transpose PyTorch [out,in]
    weights to [in,out], cast to bf16, pad fc3 to a 128-lane multiple."""
    c = params["fc3_w"].shape[0]
    c_pad = ((c + 127) // 128) * 128
    wf3 = jnp.zeros((256, c_pad), jnp.float32).at[:, :c].set(params["fc3_w"].T)
    bf3 = jnp.zeros((1, c_pad), jnp.float32).at[:, :c].set(params["fc3_b"])
    return {
        "w1": params["decrease_w"].T.astype(jnp.bfloat16),
        "b1": params["decrease_b"].astype(jnp.float32)[None, :],
        "w2": params["smaller_w"].T.astype(jnp.bfloat16),
        "b2": params["smaller_b"].astype(jnp.float32)[None, :],
        "wf1": params["fc1_w"].T.astype(jnp.bfloat16),
        "bf1": params["fc1_b"].astype(jnp.float32)[None, :],
        "wf2": params["fc2_w"].T.astype(jnp.bfloat16),
        "bf2": params["fc2_b"].astype(jnp.float32)[None, :],
        "wf3": wf3.astype(jnp.bfloat16),
        "bf3": bf3,
    }


@functools.partial(jax.jit, static_argnames=("num_classes",))
def two_embedding_matmul_forward(x1, x2, prep, num_classes):
    B = x1.shape[0]
    c_pad = prep["wf3"].shape[1]

    out = pl.pallas_call(
        _fused_kernel,
        out_shape=jax.ShapeDtypeStruct((B, c_pad), jnp.float32),
        in_specs=[_VMEM] * 12,
        out_specs=_VMEM,
        scratch_shapes=[
            pltpu.VMEM((B, HIDDEN), jnp.float32),       # h1 flat
            pltpu.VMEM((B, HIDDEN), jnp.float32),       # h2 flat
            pltpu.VMEM((B, SIDE, SIDE), jnp.float32),   # h1 as (B,32,32)
            pltpu.VMEM((B, SIDE, SIDE), jnp.float32),   # h2 as (B,32,32)
            pltpu.VMEM((B, SIDE, SIDE), jnp.float32),   # per-sample matmul
            pltpu.VMEM((B, HIDDEN), jnp.float32),       # m flat
        ],
        compiler_params=_CPARAMS,
    )(x1, prep["w1"], prep["b1"], x2, prep["w2"], prep["b2"],
      prep["wf1"], prep["bf1"], prep["wf2"], prep["bf2"],
      prep["wf3"], prep["bf3"])

    return out[:, :num_classes]


# --------------------------------------------------------------------------
# Pure-JAX reference (fp32, replicates the PyTorch forward exactly)
# --------------------------------------------------------------------------
def _reference_forward(x1, x2, p):
    B = x1.shape[0]
    h1 = x1 @ p["decrease_w"].T + p["decrease_b"]
    h2 = x2 @ p["smaller_w"].T + p["smaller_b"]
    m = jnp.einsum("bij,bjk->bik",
                   h1.reshape(B, SIDE, SIDE),
                   h2.reshape(B, SIDE, SIDE)).reshape(B, HIDDEN)
    norm = jnp.sqrt(jnp.sum(m * m, axis=1, keepdims=True))
    mn = m / jnp.maximum(norm, L2_EPS)
    z1 = jnp.maximum(mn @ p["fc1_w"].T + p["fc1_b"], 0.0)
    z2 = jnp.maximum(z1 @ p["fc2_w"].T + p["fc2_b"], 0.0)
    return z2 @ p["fc3_w"].T + p["fc3_b"]


def _init_params(key, embed_dim1, embed_dim2, num_classes):
    """Deterministic PyTorch-style init: U(-1/sqrt(fan_in), 1/sqrt(fan_in))."""
    def linear(k, out_dim, in_dim):
        kw, kb = jax.random.split(k)
        bound = 1.0 / np.sqrt(in_dim)
        w = jax.random.uniform(kw, (out_dim, in_dim), jnp.float32, -bound, bound)
        b = jax.random.uniform(kb, (out_dim,), jnp.float32, -bound, bound)
        return w, b

    keys = jax.random.split(key, 5)
    p = {}
    p["decrease_w"], p["decrease_b"] = linear(keys[0], HIDDEN, embed_dim1)
    p["smaller_w"], p["smaller_b"] = linear(keys[1], HIDDEN, embed_dim2)
    p["fc1_w"], p["fc1_b"] = linear(keys[2], 1024, 1024)
    p["fc2_w"], p["fc2_b"] = linear(keys[3], 256, 1024)
    p["fc3_w"], p["fc3_b"] = linear(keys[4], num_classes, 256)
    return p


if __name__ == "__main__":
    B = 8
    embed_dim1 = 256
    embed_dim2 = 128
    num_classes = 16

    root = jax.random.PRNGKey(0)
    kx1, kx2, kp = jax.random.split(root, 3)
    x1 = jax.random.normal(kx1, (B, embed_dim1), jnp.float32)
    x2 = jax.random.normal(kx2, (B, embed_dim2), jnp.float32)
    params = _init_params(kp, embed_dim1, embed_dim2, num_classes)

    prep = prepare_params(params)   # one-time weight prep (not per call)
    out = two_embedding_matmul_forward(x1, x2, prep, num_classes=num_classes)
    out = jax.block_until_ready(out)

    ref = jax.block_until_ready(_reference_forward(x1, x2, params))
    assert out.shape == (B, num_classes)
    assert np.all(np.isfinite(np.asarray(out)))
    # bf16 weights/activations with fp32 accumulation vs the fp32 reference.
    np.testing.assert_allclose(np.asarray(out), np.asarray(ref),
                               rtol=2e-2, atol=2e-2)

    print("KERNEL_OK")
</pallas_src>

<mosaic_0001>
module attributes {stable_mosaic.version = 11 : i64} {
  func.func @_fused_kernel(%arg0: memref<8x256xf32, #tpu.memory_space<vmem>>, %arg1: memref<256x1024xbf16, #tpu.memory_space<vmem>>, %arg2: memref<1x1024xf32, #tpu.memory_space<vmem>>, %arg3: memref<8x128xf32, #tpu.memory_space<vmem>>, %arg4: memref<128x1024xbf16, #tpu.memory_space<vmem>>, %arg5: memref<1x1024xf32, #tpu.memory_space<vmem>>, %arg6: memref<1024x1024xbf16, #tpu.memory_space<vmem>>, %arg7: memref<1x1024xf32, #tpu.memory_space<vmem>>, %arg8: memref<1024x256xbf16, #tpu.memory_space<vmem>>, %arg9: memref<1x256xf32, #tpu.memory_space<vmem>>, %arg10: memref<256x128xbf16, #tpu.memory_space<vmem>>, %arg11: memref<1x128xf32, #tpu.memory_space<vmem>>, %arg12: memref<8x128xf32, #tpu.memory_space<vmem>>, %arg13: memref<8x1024xf32, #tpu.memory_space<vmem>>, %arg14: memref<8x1024xf32, #tpu.memory_space<vmem>>, %arg15: memref<8x32x32xf32, #tpu.memory_space<vmem>>, %arg16: memref<8x32x32xf32, #tpu.memory_space<vmem>>, %arg17: memref<8x32x32xf32, #tpu.memory_space<vmem>>, %arg18: memref<8x1024xf32, #tpu.memory_space<vmem>>) attributes {dimension_semantics = [], scalar_prefetch = 0 : i64, scratch_operands = 6 : i64, tpu.core_type = #tpu.core_type<tc>} {
    %c0 = arith.constant 0 : index
    %c0_0 = arith.constant 0 : index
    %0 = vector.load %arg0[%c0, %c0_0] : memref<8x256xf32, #tpu.memory_space<vmem>>, vector<8x256xf32>
    %1 = arith.truncf %0 : vector<8x256xf32> to vector<8x256xbf16>
    %c0_1 = arith.constant 0 : index
    %c0_2 = arith.constant 0 : index
    %2 = vector.load %arg3[%c0_1, %c0_2] : memref<8x128xf32, #tpu.memory_space<vmem>>, vector<8x128xf32>
    %3 = arith.truncf %2 : vector<8x128xf32> to vector<8x128xbf16>
    %c0_3 = arith.constant 0 : index
    %c0_4 = arith.constant 0 : index
    %4 = vector.load %arg1[%c0_3, %c0_4] : memref<256x1024xbf16, #tpu.memory_space<vmem>>, vector<256x1024xbf16>
    %cst = arith.constant dense<0.000000e+00> : vector<8x1024xf32>
    %5 = tpu.matmul %1, %4, %cst {dimension_numbers = #tpu.dot_dimension_numbers<[1], [0], [0], [1], [0, 0, 1, 1], [], []>} : vector<8x256xbf16>, vector<256x1024xbf16>, vector<8x1024xf32> -> vector<8x1024xf32>
    %c0_5 = arith.constant 0 : index
    %c0_6 = arith.constant 0 : index
    %6 = vector.load %arg2[%c0_5, %c0_6] : memref<1x1024xf32, #tpu.memory_space<vmem>>, vector<1x1024xf32>
    %7 = vector.broadcast %6 : vector<1x1024xf32> to vector<8x1024xf32>
    %8 = arith.addf %5, %7 : vector<8x1024xf32>
    %c0_7 = arith.constant 0 : index
    %c0_8 = arith.constant 0 : index
    %9 = vector.load %arg13[%c0_7, %c0_8] : memref<8x1024xf32, #tpu.memory_space<vmem>>, vector<8x1024xf32>
    tpu.vector_store %arg13[%c0_7, %c0_8], %8 {strides = array<i32>} : memref<8x1024xf32, #tpu.memory_space<vmem>>, vector<8x1024xf32>,
    %c0_9 = arith.constant 0 : index
    %c0_10 = arith.constant 0 : index
    %10 = vector.load %arg4[%c0_9, %c0_10] : memref<128x1024xbf16, #tpu.memory_space<vmem>>, vector<128x1024xbf16>
    %cst_11 = arith.constant dense<0.000000e+00> : vector<8x1024xf32>
    %11 = tpu.matmul %3, %10, %cst_11 {dimension_numbers = #tpu.dot_dimension_numbers<[1], [0], [0], [1], [0, 0, 1, 1], [], []>} : vector<8x128xbf16>, vector<128x1024xbf16>, vector<8x1024xf32> -> vector<8x1024xf32>
    %c0_12 = arith.constant 0 : index
    %c0_13 = arith.constant 0 : index
    %12 = vector.load %arg5[%c0_12, %c0_13] : memref<1x1024xf32, #tpu.memory_space<vmem>>, vector<1x1024xf32>
    %13 = vector.broadcast %12 : vector<1x1024xf32> to vector<8x1024xf32>
    %14 = arith.addf %11, %13 : vector<8x1024xf32>
    %c0_14 = arith.constant 0 : index
    %c0_15 = arith.constant 0 : index
    %15 = vector.load %arg14[%c0_14, %c0_15] : memref<8x1024xf32, #tpu.memory_space<vmem>>, vector<8x1024xf32>
    tpu.vector_store %arg14[%c0_14, %c0_15], %14 {strides = array<i32>} : memref<8x1024xf32, #tpu.memory_space<vmem>>, vector<8x1024xf32>,
    %c0_16 = arith.constant 0 : index
    %c0_17 = arith.constant 0 : index
    %16 = vector.load %arg13[%c0_16, %c0_17] : memref<8x1024xf32, #tpu.memory_space<vmem>>, vector<8x32xf32>
    %c0_18 = arith.constant 0 : index
    %c0_19 = arith.constant 0 : index
    %c0_20 = arith.constant 0 : index
    %17 = vector.load %arg15[%c0_18, %c0_19, %c0_20] : memref<8x32x32xf32, #tpu.memory_space<vmem>>, vector<8x1x32xf32>
    %18 = vector.shape_cast %17 : vector<8x1x32xf32> to vector<8x32xf32>
    %19 = vector.shape_cast %16 : vector<8x32xf32> to vector<8x1x32xf32>
    tpu.vector_store %arg15[%c0_18, %c0_19, %c0_20], %19 {strides = array<i32>} : memref<8x32x32xf32, #tpu.memory_space<vmem>>, vector<8x1x32xf32>,
    %c0_21 = arith.constant 0 : index
    %c0_22 = arith.constant 0 : index
    %20 = vector.load %arg14[%c0_21, %c0_22] : memref<8x1024xf32, #tpu.memory_space<vmem>>, vector<8x32xf32>
    %c0_23 = arith.constant 0 : index
    %c0_24 = arith.constant 0 : index
    %c0_25 = arith.constant 0 : index
    %21 = vector.load %arg16[%c0_23, %c0_24, %c0_25] : memref<8x32x32xf32, #tpu.memory_space<vmem>>, vector<8x1x32xf32>
    %22 = vector.shape_cast %21 : vector<8x1x32xf32> to vector<8x32xf32>
    %23 = vector.shape_cast %20 : vector<8x32xf32> to vector<8x1x32xf32>
    tpu.vector_store %arg16[%c0_23, %c0_24, %c0_25], %23 {strides = array<i32>} : memref<8x32x32xf32, #tpu.memory_space<vmem>>, vector<8x1x32xf32>,
    %c0_26 = arith.constant 0 : index
    %c32 = arith.constant 32 : index
    %24 = vector.load %arg13[%c0_26, %c32] : memref<8x1024xf32, #tpu.memory_space<vmem>>, vector<8x32xf32>
    %c0_27 = arith.constant 0 : index
    %c1 = arith.constant 1 : index
    %c0_28 = arith.constant 0 : index
    %25 = vector.load %arg15[%c0_27, %c1, %c0_28] : memref<8x32x32xf32, #tpu.memory_space<vmem>>, vector<8x1x32xf32>
    %26 = vector.shape_cast %25 : vector<8x1x32xf32> to vector<8x32xf32>
    %27 = vector.shape_cast %24 : vector<8x32xf32> to vector<8x1x32xf32>
    tpu.vector_store %arg15[%c0_27, %c1, %c0_28], %27 {strides = array<i32>} : memref<8x32x32xf32, #tpu.memory_space<vmem>>, vector<8x1x32xf32>,
    %c0_29 = arith.constant 0 : index
    %c32_30 = arith.constant 32 : index
    %28 = vector.load %arg14[%c0_29, %c32_30] : memref<8x1024xf32, #tpu.memory_space<vmem>>, vector<8x32xf32>
    %c0_31 = arith.constant 0 : index
    %c1_32 = arith.constant 1 : index
    %c0_33 = arith.constant 0 : index
    %29 = vector.load %arg16[%c0_31, %c1_32, %c0_33] : memref<8x32x32xf32, #tpu.memory_space<vmem>>, vector<8x1x32xf32>
    %30 = vector.shape_cast %29 : vector<8x1x32xf32> to vector<8x32xf32>
    %31 = vector.shape_cast %28 : vector<8x32xf32> to vector<8x1x32xf32>
    tpu.vector_store %arg16[%c0_31, %c1_32, %c0_33], %31 {strides = array<i32>} : memref<8x32x32xf32, #tpu.memory_space<vmem>>, vector<8x1x32xf32>,
    %c0_34 = arith.constant 0 : index
    %c64 = arith.constant 64 : index
    %32 = vector.load %arg13[%c0_34, %c64] : memref<8x1024xf32, #tpu.memory_space<vmem>>, vector<8x32xf32>
    %c0_35 = arith.constant 0 : index
    %c2 = arith.constant 2 : index
    %c0_36 = arith.constant 0 : index
    %33 = vector.load %arg15[%c0_35, %c2, %c0_36] : memref<8x32x32xf32, #tpu.memory_space<vmem>>, vector<8x1x32xf32>
    %34 = vector.shape_cast %33 : vector<8x1x32xf32> to vector<8x32xf32>
    %35 = vector.shape_cast %32 : vector<8x32xf32> to vector<8x1x32xf32>
    tpu.vector_store %arg15[%c0_35, %c2, %c0_36], %35 {strides = array<i32>} : memref<8x32x32xf32, #tpu.memory_space<vmem>>, vector<8x1x32xf32>,
    %c0_37 = arith.constant 0 : index
    %c64_38 = arith.constant 64 : index
    %36 = vector.load %arg14[%c0_37, %c64_38] : memref<8x1024xf32, #tpu.memory_space<vmem>>, vector<8x32xf32>
    %c0_39 = arith.constant 0 : index
    %c2_40 = arith.constant 2 : index
    %c0_41 = arith.constant 0 : index
    %37 = vector.load %arg16[%c0_39, %c2_40, %c0_41] : memref<8x32x32xf32, #tpu.memory_space<vmem>>, vector<8x1x32xf32>
    %38 = vector.shape_cast %37 : vector<8x1x32xf32> to vector<8x32xf32>
    %39 = vector.shape_cast %36 : vector<8x32xf32> to vector<8x1x32xf32>
    tpu.vector_store %arg16[%c0_39, %c2_40, %c0_41], %39 {strides = array<i32>} : memref<8x32x32xf32, #tpu.memory_space<vmem>>, vector<8x1x32xf32>,
    %c0_42 = arith.constant 0 : index
    %c96 = arith.constant 96 : index
    %40 = vector.load %arg13[%c0_42, %c96] : memref<8x1024xf32, #tpu.memory_space<vmem>>, vector<8x32xf32>
    %c0_43 = arith.constant 0 : index
    %c3 = arith.constant 3 : index
    %c0_44 = arith.constant 0 : index
    %41 = vector.load %arg15[%c0_43, %c3, %c0_44] : memref<8x32x32xf32, #tpu.memory_space<vmem>>, vector<8x1x32xf32>
    %42 = vector.shape_cast %41 : vector<8x1x32xf32> to vector<8x32xf32>
    %43 = vector.shape_cast %40 : vector<8x32xf32> to vector<8x1x32xf32>
    tpu.vector_store %arg15[%c0_43, %c3, %c0_44], %43 {strides = array<i32>} : memref<8x32x32xf32, #tpu.memory_space<vmem>>, vector<8x1x32xf32>,
    %c0_45 = arith.constant 0 : index
    %c96_46 = arith.constant 96 : index
    %44 = vector.load %arg14[%c0_45, %c96_46] : memref<8x1024xf32, #tpu.memory_space<vmem>>, vector<8x32xf32>
    %c0_47 = arith.constant 0 : index
    %c3_48 = arith.constant 3 : index
    %c0_49 = arith.constant 0 : index
    %45 = vector.load %arg16[%c0_47, %c3_48, %c0_49] : memref<8x32x32xf32, #tpu.memory_space<vmem>>, vector<8x1x32xf32>
    %46 = vector.shape_cast %45 : vector<8x1x32xf32> to vector<8x32xf32>
    %47 = vector.shape_cast %44 : vector<8x32xf32> to vector<8x1x32xf32>
    tpu.vector_store %arg16[%c0_47, %c3_48, %c0_49], %47 {strides = array<i32>} : memref<8x32x32xf32, #tpu.memory_space<vmem>>, vector<8x1x32xf32>,
    %c0_50 = arith.constant 0 : index
    %c128 = arith.constant 128 : index
    %48 = vector.load %arg13[%c0_50, %c128] : memref<8x1024xf32, #tpu.memory_space<vmem>>, vector<8x32xf32>
    %c0_51 = arith.constant 0 : index
    %c4 = arith.constant 4 : index
    %c0_52 = arith.constant 0 : index
    %49 = vector.load %arg15[%c0_51, %c4, %c0_52] : memref<8x32x32xf32, #tpu.memory_space<vmem>>, vector<8x1x32xf32>
    %50 = vector.shape_cast %49 : vector<8x1x32xf32> to vector<8x32xf32>
    %51 = vector.shape_cast %48 : vector<8x32xf32> to vector<8x1x32xf32>
    tpu.vector_store %arg15[%c0_51, %c4, %c0_52], %51 {strides = array<i32>} : memref<8x32x32xf32, #tpu.memory_space<vmem>>, vector<8x1x32xf32>,
    %c0_53 = arith.constant 0 : index
    %c128_54 = arith.constant 128 : index
    %52 = vector.load %arg14[%c0_53, %c128_54] : memref<8x1024xf32, #tpu.memory_space<vmem>>, vector<8x32xf32>
    %c0_55 = arith.constant 0 : index
    %c4_56 = arith.constant 4 : index
    %c0_57 = arith.constant 0 : index
    %53 = vector.load %arg16[%c0_55, %c4_56, %c0_57] : memref<8x32x32xf32, #tpu.memory_space<vmem>>, vector<8x1x32xf32>
    %54 = vector.shape_cast %53 : vector<8x1x32xf32> to vector<8x32xf32>
    %55 = vector.shape_cast %52 : vector<8x32xf32> to vector<8x1x32xf32>
    tpu.vector_store %arg16[%c0_55, %c4_56, %c0_57], %55 {strides = array<i32>} : memref<8x32x32xf32, #tpu.memory_space<vmem>>, vector<8x1x32xf32>,
    %c0_58 = arith.constant 0 : index
    %c160 = arith.constant 160 : index
    %56 = vector.load %arg13[%c0_58, %c160] : memref<8x1024xf32, #tpu.memory_space<vmem>>, vector<8x32xf32>
    %c0_59 = arith.constant 0 : index
    %c5 = arith.constant 5 : index
    %c0_60 = arith.constant 0 : index
    %57 = vector.load %arg15[%c0_59, %c5, %c0_60] : memref<8x32x32xf32, #tpu.memory_space<vmem>>, vector<8x1x32xf32>
    %58 = vector.shape_cast %57 : vector<8x1x32xf32> to vector<8x32xf32>
    %59 = vector.shape_cast %56 : vector<8x32xf32> to vector<8x1x32xf32>
    tpu.vector_store %arg15[%c0_59, %c5, %c0_60], %59 {strides = array<i32>} : memref<8x32x32xf32, #tpu.memory_space<vmem>>, vector<8x1x32xf32>,
    %c0_61 = arith.constant 0 : index
    %c160_62 = arith.constant 160 : index
    %60 = vector.load %arg14[%c0_61, %c160_62] : memref<8x1024xf32, #tpu.memory_space<vmem>>, vector<8x32xf32>
    %c0_63 = arith.constant 0 : index
    %c5_64 = arith.constant 5 : index
    %c0_65 = arith.constant 0 : index
    %61 = vector.load %arg16[%c0_63, %c5_64, %c0_65] : memref<8x32x32xf32, #tpu.memory_space<vmem>>, vector<8x1x32xf32>
    %62 = vector.shape_cast %61 : vector<8x1x32xf32> to vector<8x32xf32>
    %63 = vector.shape_cast %60 : vector<8x32xf32> to vector<8x1x32xf32>
    tpu.vector_store %arg16[%c0_63, %c5_64, %c0_65], %63 {strides = array<i32>} : memref<8x32x32xf32, #tpu.memory_space<vmem>>, vector<8x1x32xf32>,
    %c0_66 = arith.constant 0 : index
    %c192 = arith.constant 192 : index
    %64 = vector.load %arg13[%c0_66, %c192] : memref<8x1024xf32, #tpu.memory_space<vmem>>, vector<8x32xf32>
    %c0_67 = arith.constant 0 : index
    %c6 = arith.constant 6 : index
    %c0_68 = arith.constant 0 : index
    %65 = vector.load %arg15[%c0_67, %c6, %c0_68] : memref<8x32x32xf32, #tpu.memory_space<vmem>>, vector<8x1x32xf32>
    %66 = vector.shape_cast %65 : vector<8x1x32xf32> to vector<8x32xf32>
    %67 = vector.shape_cast %64 : vector<8x32xf32> to vector<8x1x32xf32>
    tpu.vector_store %arg15[%c0_67, %c6, %c0_68], %67 {strides = array<i32>} : memref<8x32x32xf32, #tpu.memory_space<vmem>>, vector<8x1x32xf32>,
    %c0_69 = arith.constant 0 : index
    %c192_70 = arith.constant 192 : index
    %68 = vector.load %arg14[%c0_69, %c192_70] : memref<8x1024xf32, #tpu.memory_space<vmem>>, vector<8x32xf32>
    %c0_71 = arith.constant 0 : index
    %c6_72 = arith.constant 6 : index
    %c0_73 = arith.constant 0 : index
    %69 = vector.load %arg16[%c0_71, %c6_72, %c0_73] : memref<8x32x32xf32, #tpu.memory_space<vmem>>, vector<8x1x32xf32>
    %70 = vector.shape_cast %69 : vector<8x1x32xf32> to vector<8x32xf32>
    %71 = vector.shape_cast %68 : vector<8x32xf32> to vector<8x1x32xf32>
    tpu.vector_store %arg16[%c0_71, %c6_72, %c0_73], %71 {strides = array<i32>} : memref<8x32x32xf32, #tpu.memory_space<vmem>>, vector<8x1x32xf32>,
    %c0_74 = arith.constant 0 : index
    %c224 = arith.constant 224 : index
    %72 = vector.load %arg13[%c0_74, %c224] : memref<8x1024xf32, #tpu.memory_space<vmem>>, vector<8x32xf32>
    %c0_75 = arith.constant 0 : index
    %c7 = arith.constant 7 : index
    %c0_76 = arith.constant 0 : index
    %73 = vector.load %arg15[%c0_75, %c7, %c0_76] : memref<8x32x32xf32, #tpu.memory_space<vmem>>, vector<8x1x32xf32>
    %74 = vector.shape_cast %73 : vector<8x1x32xf32> to vector<8x32xf32>
    %75 = vector.shape_cast %72 : vector<8x32xf32> to vector<8x1x32xf32>
    tpu.vector_store %arg15[%c0_75, %c7, %c0_76], %75 {strides = array<i32>} : memref<8x32x32xf32, #tpu.memory_space<vmem>>, vector<8x1x32xf32>,
    %c0_77 = arith.constant 0 : index
    %c224_78 = arith.constant 224 : index
    %76 = vector.load %arg14[%c0_77, %c224_78] : memref<8x1024xf32, #tpu.memory_space<vmem>>, vector<8x32xf32>
    %c0_79 = arith.constant 0 : index
    %c7_80 = arith.constant 7 : index
    %c0_81 = arith.constant 0 : index
    %77 = vector.load %arg16[%c0_79, %c7_80, %c0_81] : memref<8x32x32xf32, #tpu.memory_space<vmem>>, vector<8x1x32xf32>
    %78 = vector.shape_cast %77 : vector<8x1x32xf32> to vector<8x32xf32>
    %79 = vector.shape_cast %76 : vector<8x32xf32> to vector<8x1x32xf32>
    tpu.vector_store %arg16[%c0_79, %c7_80, %c0_81], %79 {strides = array<i32>} : memref<8x32x32xf32, #tpu.memory_space<vmem>>, vector<8x1x32xf32>,
    %c0_82 = arith.constant 0 : index
    %c256 = arith.constant 256 : index
    %80 = vector.load %arg13[%c0_82, %c256] : memref<8x1024xf32, #tpu.memory_space<vmem>>, vector<8x32xf32>
    %c0_83 = arith.constant 0 : index
    %c8 = arith.constant 8 : index
    %c0_84 = arith.constant 0 : index
    %81 = vector.load %arg15[%c0_83, %c8, %c0_84] : memref<8x32x32xf32, #tpu.memory_space<vmem>>, vector<8x1x32xf32>
    %82 = vector.shape_cast %81 : vector<8x1x32xf32> to vector<8x32xf32>
    %83 = vector.shape_cast %80 : vector<8x32xf32> to vector<8x1x32xf32>
    tpu.vector_store %arg15[%c0_83, %c8, %c0_84], %83 {strides = array<i32>} : memref<8x32x32xf32, #tpu.memory_space<vmem>>, vector<8x1x32xf32>,
    %c0_85 = arith.constant 0 : index
    %c256_86 = arith.constant 256 : index
    %84 = vector.load %arg14[%c0_85, %c256_86] : memref<8x1024xf32, #tpu.memory_space<vmem>>, vector<8x32xf32>
    %c0_87 = arith.constant 0 : index
    %c8_88 = arith.constant 8 : index
    %c0_89 = arith.constant 0 : index
    %85 = vector.load %arg16[%c0_87, %c8_88, %c0_89] : memref<8x32x32xf32, #tpu.memory_space<vmem>>, vector<8x1x32xf32>
    %86 = vector.shape_cast %85 : vector<8x1x32xf32> to vector<8x32xf32>
    %87 = vector.shape_cast %84 : vector<8x32xf32> to vector<8x1x32xf32>
    tpu.vector_store %arg16[%c0_87, %c8_88, %c0_89], %87 {strides = array<i32>} : memref<8x32x32xf32, #tpu.memory_space<vmem>>, vector<8x1x32xf32>,
    %c0_90 = arith.constant 0 : index
    %c288 = arith.constant 288 : index
    %88 = vector.load %arg13[%c0_90, %c288] : memref<8x1024xf32, #tpu.memory_space<vmem>>, vector<8x32xf32>
    %c0_91 = arith.constant 0 : index
    %c9 = arith.constant 9 : index
    %c0_92 = arith.constant 0 : index
    %89 = vector.load %arg15[%c0_91, %c9, %c0_92] : memref<8x32x32xf32, #tpu.memory_space<vmem>>, vector<8x1x32xf32>
    %90 = vector.shape_cast %89 : vector<8x1x32xf32> to vector<8x32xf32>
    %91 = vector.shape_cast %88 : vector<8x32xf32> to vector<8x1x32xf32>
    tpu.vector_store %arg15[%c0_91, %c9, %c0_92], %91 {strides = array<i32>} : memref<8x32x32xf32, #tpu.memory_space<vmem>>, vector<8x1x32xf32>,
    %c0_93 = arith.constant 0 : index
    %c288_94 = arith.constant 288 : index
    %92 = vector.load %arg14[%c0_93, %c288_94] : memref<8x1024xf32, #tpu.memory_space<vmem>>, vector<8x32xf32>
    %c0_95 = arith.constant 0 : index
    %c9_96 = arith.constant 9 : index
    %c0_97 = arith.constant 0 : index
    %93 = vector.load %arg16[%c0_95, %c9_96, %c0_97] : memref<8x32x32xf32, #tpu.memory_space<vmem>>, vector<8x1x32xf32>
    %94 = vector.shape_cast %93 : vector<8x1x32xf32> to vector<8x32xf32>
    %95 = vector.shape_cast %92 : vector<8x32xf32> to vector<8x1x32xf32>
    tpu.vector_store %arg16[%c0_95, %c9_96, %c0_97], %95 {strides = array<i32>} : memref<8x32x32xf32, #tpu.memory_space<vmem>>, vector<8x1x32xf32>,
    %c0_98 = arith.constant 0 : index
    %c320 = arith.constant 320 : index
    %96 = vector.load %arg13[%c0_98, %c320] : memref<8x1024xf32, #tpu.memory_space<vmem>>, vector<8x32xf32>
    %c0_99 = arith.constant 0 : index
    %c10 = arith.constant 10 : index
    %c0_100 = arith.constant 0 : index
    %97 = vector.load %arg15[%c0_99, %c10, %c0_100] : memref<8x32x32xf32, #tpu.memory_space<vmem>>, vector<8x1x32xf32>
    %98 = vector.shape_cast %97 : vector<8x1x32xf32> to vector<8x32xf32>
    %99 = vector.shape_cast %96 : vector<8x32xf32> to vector<8x1x32xf32>
    tpu.vector_store %arg15[%c0_99, %c10, %c0_100], %99 {strides = array<i32>} : memref<8x32x32xf32, #tpu.memory_space<vmem>>, vector<8x1x32xf32>,
    %c0_101 = arith.constant 0 : index
    %c320_102 = arith.constant 320 : index
    %100 = vector.load %arg14[%c0_101, %c320_102] : memref<8x1024xf32, #tpu.memory_space<vmem>>, vector<8x32xf32>
    %c0_103 = arith.constant 0 : index
    %c10_104 = arith.constant 10 : index
    %c0_105 = arith.constant 0 : index
    %101 = vector.load %arg16[%c0_103, %c10_104, %c0_105] : memref<8x32x32xf32, #tpu.memory_space<vmem>>, vector<8x1x32xf32>
    %102 = vector.shape_cast %101 : vector<8x1x32xf32> to vector<8x32xf32>
    %103 = vector.shape_cast %100 : vector<8x32xf32> to vector<8x1x32xf32>
    tpu.vector_store %arg16[%c0_103, %c10_104, %c0_105], %103 {strides = array<i32>} : memref<8x32x32xf32, #tpu.memory_space<vmem>>, vector<8x1x32xf32>,
    %c0_106 = arith.constant 0 : index
    %c352 = arith.constant 352 : index
    %104 = vector.load %arg13[%c0_106, %c352] : memref<8x1024xf32, #tpu.memory_space<vmem>>, vector<8x32xf32>
    %c0_107 = arith.constant 0 : index
    %c11 = arith.constant 11 : index
    %c0_108 = arith.constant 0 : index
    %105 = vector.load %arg15[%c0_107, %c11, %c0_108] : memref<8x32x32xf32, #tpu.memory_space<vmem>>, vector<8x1x32xf32>
    %106 = vector.shape_cast %105 : vector<8x1x32xf32> to vector<8x32xf32>
    %107 = vector.shape_cast %104 : vector<8x32xf32> to vector<8x1x32xf32>
    tpu.vector_store %arg15[%c0_107, %c11, %c0_108], %107 {strides = array<i32>} : memref<8x32x32xf32, #tpu.memory_space<vmem>>, vector<8x1x32xf32>,
    %c0_109 = arith.constant 0 : index
    %c352_110 = arith.constant 352 : index
    %108 = vector.load %arg14[%c0_109, %c352_110] : memref<8x1024xf32, #tpu.memory_space<vmem>>, vector<8x32xf32>
    %c0_111 = arith.constant 0 : index
    %c11_112 = arith.constant 11 : index
    %c0_113 = arith.constant 0 : index
    %109 = vector.load %arg16[%c0_111, %c11_112, %c0_113] : memref<8x32x32xf32, #tpu.memory_space<vmem>>, vector<8x1x32xf32>
    %110 = vector.shape_cast %109 : vector<8x1x32xf32> to vector<8x32xf32>
    %111 = vector.shape_cast %108 : vector<8x32xf32> to vector<8x1x32xf32>
    tpu.vector_store %arg16[%c0_111, %c11_112, %c0_113], %111 {strides = array<i32>} : memref<8x32x32xf32, #tpu.memory_space<vmem>>, vector<8x1x32xf32>,
    %c0_114 = arith.constant 0 : index
    %c384 = arith.constant 384 : index
    %112 = vector.load %arg13[%c0_114, %c384] : memref<8x1024xf32, #tpu.memory_space<vmem>>, vector<8x32xf32>
    %c0_115 = arith.constant 0 : index
    %c12 = arith.constant 12 : index
    %c0_116 = arith.constant 0 : index
    %113 = vector.load %arg15[%c0_115, %c12, %c0_116] : memref<8x32x32xf32, #tpu.memory_space<vmem>>, vector<8x1x32xf32>
    %114 = vector.shape_cast %113 : vector<8x1x32xf32> to vector<8x32xf32>
    %115 = vector.shape_cast %112 : vector<8x32xf32> to vector<8x1x32xf32>
    tpu.vector_store %arg15[%c0_115, %c12, %c0_116], %115 {strides = array<i32>} : memref<8x32x32xf32, #tpu.memory_space<vmem>>, vector<8x1x32xf32>,
    %c0_117 = arith.constant 0 : index
    %c384_118 = arith.constant 384 : index
    %116 = vector.load %arg14[%c0_117, %c384_118] : memref<8x1024xf32, #tpu.memory_space<vmem>>, vector<8x32xf32>
    %c0_119 = arith.constant 0 : index
    %c12_120 = arith.constant 12 : index
    %c0_121 = arith.constant 0 : index
    %117 = vector.load %arg16[%c0_119, %c12_120, %c0_121] : memref<8x32x32xf32, #tpu.memory_space<vmem>>, vector<8x1x32xf32>
    %118 = vector.shape_cast %117 : vector<8x1x32xf32> to vector<8x32xf32>
    %119 = vector.shape_cast %116 : vector<8x32xf32> to vector<8x1x32xf32>
    tpu.vector_store %arg16[%c0_119, %c12_120, %c0_121], %119 {strides = array<i32>} : memref<8x32x32xf32, #tpu.memory_space<vmem>>, vector<8x1x32xf32>,
    %c0_122 = arith.constant 0 : index
    %c416 = arith.constant 416 : index
    %120 = vector.load %arg13[%c0_122, %c416] : memref<8x1024xf32, #tpu.memory_space<vmem>>, vector<8x32xf32>
    %c0_123 = arith.constant 0 : index
    %c13 = arith.constant 13 : index
    %c0_124 = arith.constant 0 : index
    %121 = vector.load %arg15[%c0_123, %c13, %c0_124] : memref<8x32x32xf32, #tpu.memory_space<vmem>>, vector<8x1x32xf32>
    %122 = vector.shape_cast %121 : vector<8x1x32xf32> to vector<8x32xf32>
    %123 = vector.shape_cast %120 : vector<8x32xf32> to vector<8x1x32xf32>
    tpu.vector_store %arg15[%c0_123, %c13, %c0_124], %123 {strides = array<i32>} : memref<8x32x32xf32, #tpu.memory_space<vmem>>, vector<8x1x32xf32>,
    %c0_125 = arith.constant 0 : index
    %c416_126 = arith.constant 416 : index
    %124 = vector.load %arg14[%c0_125, %c416_126] : memref<8x1024xf32, #tpu.memory_space<vmem>>, vector<8x32xf32>
    %c0_127 = arith.constant 0 : index
    %c13_128 = arith.constant 13 : index
    %c0_129 = arith.constant 0 : index
    %125 = vector.load %arg16[%c0_127, %c13_128, %c0_129] : memref<8x32x32xf32, #tpu.memory_space<vmem>>, vector<8x1x32xf32>
    %126 = vector.shape_cast %125 : vector<8x1x32xf32> to vector<8x32xf32>
    %127 = vector.shape_cast %124 : vector<8x32xf32> to vector<8x1x32xf32>
    tpu.vector_store %arg16[%c0_127, %c13_128, %c0_129], %127 {strides = array<i32>} : memref<8x32x32xf32, #tpu.memory_space<vmem>>, vector<8x1x32xf32>,
    %c0_130 = arith.constant 0 : index
    %c448 = arith.constant 448 : index
    %128 = vector.load %arg13[%c0_130, %c448] : memref<8x1024xf32, #tpu.memory_space<vmem>>, vector<8x32xf32>
    %c0_131 = arith.constant 0 : index
    %c14 = arith.constant 14 : index
    %c0_132 = arith.constant 0 : index
    %129 = vector.load %arg15[%c0_131, %c14, %c0_132] : memref<8x32x32xf32, #tpu.memory_space<vmem>>, vector<8x1x32xf32>
    %130 = vector.shape_cast %129 : vector<8x1x32xf32> to vector<8x32xf32>
    %131 = vector.shape_cast %128 : vector<8x32xf32> to vector<8x1x32xf32>
    tpu.vector_store %arg15[%c0_131, %c14, %c0_132], %131 {strides = array<i32>} : memref<8x32x32xf32, #tpu.memory_space<vmem>>, vector<8x1x32xf32>,
    %c0_133 = arith.constant 0 : index
    %c448_134 = arith.constant 448 : index
    %132 = vector.load %arg14[%c0_133, %c448_134] : memref<8x1024xf32, #tpu.memory_space<vmem>>, vector<8x32xf32>
    %c0_135 = arith.constant 0 : index
    %c14_136 = arith.constant 14 : index
    %c0_137 = arith.constant 0 : index
    %133 = vector.load %arg16[%c0_135, %c14_136, %c0_137] : memref<8x32x32xf32, #tpu.memory_space<vmem>>, vector<8x1x32xf32>
    %134 = vector.shape_cast %133 : vector<8x1x32xf32> to vector<8x32xf32>
    %135 = vector.shape_cast %132 : vector<8x32xf32> to vector<8x1x32xf32>
    tpu.vector_store %arg16[%c0_135, %c14_136, %c0_137], %135 {strides = array<i32>} : memref<8x32x32xf32, #tpu.memory_space<vmem>>, vector<8x1x32xf32>,
    %c0_138 = arith.constant 0 : index
    %c480 = arith.constant 480 : index
    %136 = vector.load %arg13[%c0_138, %c480] : memref<8x1024xf32, #tpu.memory_space<vmem>>, vector<8x32xf32>
    %c0_139 = arith.constant 0 : index
    %c15 = arith.constant 15 : index
    %c0_140 = arith.constant 0 : index
    %137 = vector.load %arg15[%c0_139, %c15, %c0_140] : memref<8x32x32xf32, #tpu.memory_space<vmem>>, vector<8x1x32xf32>
    %138 = vector.shape_cast %137 : vector<8x1x32xf32> to vector<8x32xf32>
    %139 = vector.shape_cast %136 : vector<8x32xf32> to vector<8x1x32xf32>
    tpu.vector_store %arg15[%c0_139, %c15, %c0_140], %139 {strides = array<i32>} : memref<8x32x32xf32, #tpu.memory_space<vmem>>, vector<8x1x32xf32>,
    %c0_141 = arith.constant 0 : index
    %c480_142 = arith.constant 480 : index
    %140 = vector.load %arg14[%c0_141, %c480_142] : memref<8x1024xf32, #tpu.memory_space<vmem>>, vector<8x32xf32>
    %c0_143 = arith.constant 0 : index
    %c15_144 = arith.constant 15 : index
    %c0_145 = arith.constant 0 : index
    %141 = vector.load %arg16[%c0_143, %c15_144, %c0_145] : memref<8x32x32xf32, #tpu.memory_space<vmem>>, vector<8x1x32xf32>
    %142 = vector.shape_cast %141 : vector<8x1x32xf32> to vector<8x32xf32>
    %143 = vector.shape_cast %140 : vector<8x32xf32> to vector<8x1x32xf32>
    tpu.vector_store %arg16[%c0_143, %c15_144, %c0_145], %143 {strides = array<i32>} : memref<8x32x32xf32, #tpu.memory_space<vmem>>, vector<8x1x32xf32>,
    %c0_146 = arith.constant 0 : index
    %c512 = arith.constant 512 : index
    %144 = vector.load %arg13[%c0_146, %c512] : memref<8x1024xf32, #tpu.memory_space<vmem>>, vector<8x32xf32>
    %c0_147 = arith.constant 0 : index
    %c16 = arith.constant 16 : index
    %c0_148 = arith.constant 0 : index
    %145 = vector.load %arg15[%c0_147, %c16, %c0_148] : memref<8x32x32xf32, #tpu.memory_space<vmem>>, vector<8x1x32xf32>
    %146 = vector.shape_cast %145 : vector<8x1x32xf32> to vector<8x32xf32>
    %147 = vector.shape_cast %144 : vector<8x32xf32> to vector<8x1x32xf32>
    tpu.vector_store %arg15[%c0_147, %c16, %c0_148], %147 {strides = array<i32>} : memref<8x32x32xf32, #tpu.memory_space<vmem>>, vector<8x1x32xf32>,
    %c0_149 = arith.constant 0 : index
    %c512_150 = arith.constant 512 : index
    %148 = vector.load %arg14[%c0_149, %c512_150] : memref<8x1024xf32, #tpu.memory_space<vmem>>, vector<8x32xf32>
    %c0_151 = arith.constant 0 : index
    %c16_152 = arith.constant 16 : index
    %c0_153 = arith.constant 0 : index
    %149 = vector.load %arg16[%c0_151, %c16_152, %c0_153] : memref<8x32x32xf32, #tpu.memory_space<vmem>>, vector<8x1x32xf32>
    %150 = vector.shape_cast %149 : vector<8x1x32xf32> to vector<8x32xf32>
    %151 = vector.shape_cast %148 : vector<8x32xf32> to vector<8x1x32xf32>
    tpu.vector_store %arg16[%c0_151, %c16_152, %c0_153], %151 {strides = array<i32>} : memref<8x32x32xf32, #tpu.memory_space<vmem>>, vector<8x1x32xf32>,
    %c0_154 = arith.constant 0 : index
    %c544 = arith.constant 544 : index
    %152 = vector.load %arg13[%c0_154, %c544] : memref<8x1024xf32, #tpu.memory_space<vmem>>, vector<8x32xf32>
    %c0_155 = arith.constant 0 : index
    %c17 = arith.constant 17 : index
    %c0_156 = arith.constant 0 : index
    %153 = vector.load %arg15[%c0_155, %c17, %c0_156] : memref<8x32x32xf32, #tpu.memory_space<vmem>>, vector<8x1x32xf32>
    %154 = vector.shape_cast %153 : vector<8x1x32xf32> to vector<8x32xf32>
    %155 = vector.shape_cast %152 : vector<8x32xf32> to vector<8x1x32xf32>
    tpu.vector_store %arg15[%c0_155, %c17, %c0_156], %155 {strides = array<i32>} : memref<8x32x32xf32, #tpu.memory_space<vmem>>, vector<8x1x32xf32>,
    %c0_157 = arith.constant 0 : index
    %c544_158 = arith.constant 544 : index
    %156 = vector.load %arg14[%c0_157, %c544_158] : memref<8x1024xf32, #tpu.memory_space<vmem>>, vector<8x32xf32>
    %c0_159 = arith.constant 0 : index
    %c17_160 = arith.constant 17 : index
    %c0_161 = arith.constant 0 : index
    %157 = vector.load %arg16[%c0_159, %c17_160, %c0_161] : memref<8x32x32xf32, #tpu.memory_space<vmem>>, vector<8x1x32xf32>
    %158 = vector.shape_cast %157 : vector<8x1x32xf32> to vector<8x32xf32>
    %159 = vector.shape_cast %156 : vector<8x32xf32> to vector<8x1x32xf32>
    tpu.vector_store %arg16[%c0_159, %c17_160, %c0_161], %159 {strides = array<i32>} : memref<8x32x32xf32, #tpu.memory_space<vmem>>, vector<8x1x32xf32>,
    %c0_162 = arith.constant 0 : index
    %c576 = arith.constant 576 : index
    %160 = vector.load %arg13[%c0_162, %c576] : memref<8x1024xf32, #tpu.memory_space<vmem>>, vector<8x32xf32>
    %c0_163 = arith.constant 0 : index
    %c18 = arith.constant 18 : index
    %c0_164 = arith.constant 0 : index
    %161 = vector.load %arg15[%c0_163, %c18, %c0_164] : memref<8x32x32xf32, #tpu.memory_space<vmem>>, vector<8x1x32xf32>
    %162 = vector.shape_cast %161 : vector<8x1x32xf32> to vector<8x32xf32>
    %163 = vector.shape_cast %160 : vector<8x32xf32> to vector<8x1x32xf32>
    tpu.vector_store %arg15[%c0_163, %c18, %c0_164], %163 {strides = array<i32>} : memref<8x32x32xf32, #tpu.memory_space<vmem>>, vector<8x1x32xf32>,
    %c0_165 = arith.constant 0 : index
    %c576_166 = arith.constant 576 : index
    %164 = vector.load %arg14[%c0_165, %c576_166] : memref<8x1024xf32, #tpu.memory_space<vmem>>, vector<8x32xf32>
    %c0_167 = arith.constant 0 : index
    %c18_168 = arith.constant 18 : index
    %c0_169 = arith.constant 0 : index
    %165 = vector.load %arg16[%c0_167, %c18_168, %c0_169] : memref<8x32x32xf32, #tpu.memory_space<vmem>>, vector<8x1x32xf32>
    %166 = vector.shape_cast %165 : vector<8x1x32xf32> to vector<8x32xf32>
    %167 = vector.shape_cast %164 : vector<8x32xf32> to vector<8x1x32xf32>
    tpu.vector_store %arg16[%c0_167, %c18_168, %c0_169], %167 {strides = array<i32>} : memref<8x32x32xf32, #tpu.memory_space<vmem>>, vector<8x1x32xf32>,
    %c0_170 = arith.constant 0 : index
    %c608 = arith.constant 608 : index
    %168 = vector.load %arg13[%c0_170, %c608] : memref<8x1024xf32, #tpu.memory_space<vmem>>, vector<8x32xf32>
    %c0_171 = arith.constant 0 : index
    %c19 = arith.constant 19 : index
    %c0_172 = arith.constant 0 : index
    %169 = vector.load %arg15[%c0_171, %c19, %c0_172] : memref<8x32x32xf32, #tpu.memory_space<vmem>>, vector<8x1x32xf32>
    %170 = vector.shape_cast %169 : vector<8x1x32xf32> to vector<8x32xf32>
    %171 = vector.shape_cast %168 : vector<8x32xf32> to vector<8x1x32xf32>
    tpu.vector_store %arg15[%c0_171, %c19, %c0_172], %171 {strides = array<i32>} : memref<8x32x32xf32, #tpu.memory_space<vmem>>, vector<8x1x32xf32>,
    %c0_173 = arith.constant 0 : index
    %c608_174 = arith.constant 608 : index
    %172 = vector.load %arg14[%c0_173, %c608_174] : memref<8x1024xf32, #tpu.memory_space<vmem>>, vector<8x32xf32>
    %c0_175 = arith.constant 0 : index
    %c19_176 = arith.constant 19 : index
    %c0_177 = arith.constant 0 : index
    %173 = vector.load %arg16[%c0_175, %c19_176, %c0_177] : memref<8x32x32xf32, #tpu.memory_space<vmem>>, vector<8x1x32xf32>
    %174 = vector.shape_cast %173 : vector<8x1x32xf32> to vector<8x32xf32>
    %175 = vector.shape_cast %172 : vector<8x32xf32> to vector<8x1x32xf32>
    tpu.vector_store %arg16[%c0_175, %c19_176, %c0_177], %175 {strides = array<i32>} : memref<8x32x32xf32, #tpu.memory_space<vmem>>, vector<8x1x32xf32>,
    %c0_178 = arith.constant 0 : index
    %c640 = arith.constant 640 : index
    %176 = vector.load %arg13[%c0_178, %c640] : memref<8x1024xf32, #tpu.memory_space<vmem>>, vector<8x32xf32>
    %c0_179 = arith.constant 0 : index
    %c20 = arith.constant 20 : index
    %c0_180 = arith.constant 0 : index
    %177 = vector.load %arg15[%c0_179, %c20, %c0_180] : memref<8x32x32xf32, #tpu.memory_space<vmem>>, vector<8x1x32xf32>
    %178 = vector.shape_cast %177 : vector<8x1x32xf32> to vector<8x32xf32>
    %179 = vector.shape_cast %176 : vector<8x32xf32> to vector<8x1x32xf32>
    tpu.vector_store %arg15[%c0_179, %c20, %c0_180], %179 {strides = array<i32>} : memref<8x32x32xf32, #tpu.memory_space<vmem>>, vector<8x1x32xf32>,
    %c0_181 = arith.constant 0 : index
    %c640_182 = arith.constant 640 : index
    %180 = vector.load %arg14[%c0_181, %c640_182] : memref<8x1024xf32, #tpu.memory_space<vmem>>, vector<8x32xf32>
    %c0_183 = arith.constant 0 : index
    %c20_184 = arith.constant 20 : index
    %c0_185 = arith.constant 0 : index
    %181 = vector.load %arg16[%c0_183, %c20_184, %c0_185] : memref<8x32x32xf32, #tpu.memory_space<vmem>>, vector<8x1x32xf32>
    %182 = vector.shape_cast %181 : vector<8x1x32xf32> to vector<8x32xf32>
    %183 = vector.shape_cast %180 : vector<8x32xf32> to vector<8x1x32xf32>
    tpu.vector_store %arg16[%c0_183, %c20_184, %c0_185], %183 {strides = array<i32>} : memref<8x32x32xf32, #tpu.memory_space<vmem>>, vector<8x1x32xf32>,
    %c0_186 = arith.constant 0 : index
    %c672 = arith.constant 672 : index
    %184 = vector.load %arg13[%c0_186, %c672] : memref<8x1024xf32, #tpu.memory_space<vmem>>, vector<8x32xf32>
    %c0_187 = arith.constant 0 : index
    %c21 = arith.constant 21 : index
    %c0_188 = arith.constant 0 : index
    %185 = vector.load %arg15[%c0_187, %c21, %c0_188] : memref<8x32x32xf32, #tpu.memory_space<vmem>>, vector<8x1x32xf32>
    %186 = vector.shape_cast %185 : vector<8x1x32xf32> to vector<8x32xf32>
    %187 = vector.shape_cast %184 : vector<8x32xf32> to vector<8x1x32xf32>
    tpu.vector_store %arg15[%c0_187, %c21, %c0_188], %187 {strides = array<i32>} : memref<8x32x32xf32, #tpu.memory_space<vmem>>, vector<8x1x32xf32>,
    %c0_189 = arith.constant 0 : index
    %c672_190 = arith.constant 672 : index
    %188 = vector.load %arg14[%c0_189, %c672_190] : memref<8x1024xf32, #tpu.memory_space<vmem>>, vector<8x32xf32>
    %c0_191 = arith.constant 0 : index
    %c21_192 = arith.constant 21 : index
    %c0_193 = arith.constant 0 : index
    %189 = vector.load %arg16[%c0_191, %c21_192, %c0_193] : memref<8x32x32xf32, #tpu.memory_space<vmem>>, vector<8x1x32xf32>
    %190 = vector.shape_cast %189 : vector<8x1x32xf32> to vector<8x32xf32>
    %191 = vector.shape_cast %188 : vector<8x32xf32> to vector<8x1x32xf32>
    tpu.vector_store %arg16[%c0_191, %c21_192, %c0_193], %191 {strides = array<i32>} : memref<8x32x32xf32, #tpu.memory_space<vmem>>, vector<8x1x32xf32>,
    %c0_194 = arith.constant 0 : index
    %c704 = arith.constant 704 : index
    %192 = vector.load %arg13[%c0_194, %c704] : memref<8x1024xf32, #tpu.memory_space<vmem>>, vector<8x32xf32>
    %c0_195 = arith.constant 0 : index
    %c22 = arith.constant 22 : index
    %c0_196 = arith.constant 0 : index
    %193 = vector.load %arg15[%c0_195, %c22, %c0_196] : memref<8x32x32xf32, #tpu.memory_space<vmem>>, vector<8x1x32xf32>
    %194 = vector.shape_cast %193 : vector<8x1x32xf32> to vector<8x32xf32>
    %195 = vector.shape_cast %192 : vector<8x32xf32> to vector<8x1x32xf32>
    tpu.vector_store %arg15[%c0_195, %c22, %c0_196], %195 {strides = array<i32>} : memref<8x32x32xf32, #tpu.memory_space<vmem>>, vector<8x1x32xf32>,
    %c0_197 = arith.constant 0 : index
    %c704_198 = arith.constant 704 : index
    %196 = vector.load %arg14[%c0_197, %c704_198] : memref<8x1024xf32, #tpu.memory_space<vmem>>, vector<8x32xf32>
    %c0_199 = arith.constant 0 : index
    %c22_200 = arith.constant 22 : index
    %c0_201 = arith.constant 0 : index
    %197 = vector.load %arg16[%c0_199, %c22_200, %c0_201] : memref<8x32x32xf32, #tpu.memory_space<vmem>>, vector<8x1x32xf32>
    %198 = vector.shape_cast %197 : vector<8x1x32xf32> to vector<8x32xf32>
    %199 = vector.shape_cast %196 : vector<8x32xf32> to vector<8x1x32xf32>
    tpu.vector_store %arg16[%c0_199, %c22_200, %c0_201], %199 {strides = array<i32>} : memref<8x32x32xf32, #tpu.memory_space<vmem>>, vector<8x1x32xf32>,
    %c0_202 = arith.constant 0 : index
    %c736 = arith.constant 736 : index
    %200 = vector.load %arg13[%c0_202, %c736] : memref<8x1024xf32, #tpu.memory_space<vmem>>, vector<8x32xf32>
    %c0_203 = arith.constant 0 : index
    %c23 = arith.constant 23 : index
    %c0_204 = arith.constant 0 : index
    %201 = vector.load %arg15[%c0_203, %c23, %c0_204] : memref<8x32x32xf32, #tpu.memory_space<vmem>>, vector<8x1x32xf32>
    %202 = vector.shape_cast %201 : vector<8x1x32xf32> to vector<8x32xf32>
    %203 = vector.shape_cast %200 : vector<8x32xf32> to vector<8x1x32xf32>
    tpu.vector_store %arg15[%c0_203, %c23, %c0_204], %203 {strides = array<i32>} : memref<8x32x32xf32, #tpu.memory_space<vmem>>, vector<8x1x32xf32>,
    %c0_205 = arith.constant 0 : index
    %c736_206 = arith.constant 736 : index
    %204 = vector.load %arg14[%c0_205, %c736_206] : memref<8x1024xf32, #tpu.memory_space<vmem>>, vector<8x32xf32>
    %c0_207 = arith.constant 0 : index
    %c23_208 = arith.constant 23 : index
    %c0_209 = arith.constant 0 : index
    %205 = vector.load %arg16[%c0_207, %c23_208, %c0_209] : memref<8x32x32xf32, #tpu.memory_space<vmem>>, vector<8x1x32xf32>
    %206 = vector.shape_cast %205 : vector<8x1x32xf32> to vector<8x32xf32>
    %207 = vector.shape_cast %204 : vector<8x32xf32> to vector<8x1x32xf32>
    tpu.vector_store %arg16[%c0_207, %c23_208, %c0_209], %207 {strides = array<i32>} : memref<8x32x32xf32, #tpu.memory_space<vmem>>, vector<8x1x32xf32>,
    %c0_210 = arith.constant 0 : index
    %c768 = arith.constant 768 : index
    %208 = vector.load %arg13[%c0_210, %c768] : memref<8x1024xf32, #tpu.memory_space<vmem>>, vector<8x32xf32>
    %c0_211 = arith.constant 0 : index
    %c24 = arith.constant 24 : index
    %c0_212 = arith.constant 0 : index
    %209 = vector.load %arg15[%c0_211, %c24, %c0_212] : memref<8x32x32xf32, #tpu.memory_space<vmem>>, vector<8x1x32xf32>
    %210 = vector.shape_cast %209 : vector<8x1x32xf32> to vector<8x32xf32>
    %211 = vector.shape_cast %208 : vector<8x32xf32> to vector<8x1x32xf32>
    tpu.vector_store %arg15[%c0_211, %c24, %c0_212], %211 {strides = array<i32>} : memref<8x32x32xf32, #tpu.memory_space<vmem>>, vector<8x1x32xf32>,
    %c0_213 = arith.constant 0 : index
    %c768_214 = arith.constant 768 : index
    %212 = vector.load %arg14[%c0_213, %c768_214] : memref<8x1024xf32, #tpu.memory_space<vmem>>, vector<8x32xf32>
    %c0_215 = arith.constant 0 : index
    %c24_216 = arith.constant 24 : index
    %c0_217 = arith.constant 0 : index
    %213 = vector.load %arg16[%c0_215, %c24_216, %c0_217] : memref<8x32x32xf32, #tpu.memory_space<vmem>>, vector<8x1x32xf32>
    %214 = vector.shape_cast %213 : vector<8x1x32xf32> to vector<8x32xf32>
    %215 = vector.shape_cast %212 : vector<8x32xf32> to vector<8x1x32xf32>
    tpu.vector_store %arg16[%c0_215, %c24_216, %c0_217], %215 {strides = array<i32>} : memref<8x32x32xf32, #tpu.memory_space<vmem>>, vector<8x1x32xf32>,
    %c0_218 = arith.constant 0 : index
    %c800 = arith.constant 800 : index
    %216 = vector.load %arg13[%c0_218, %c800] : memref<8x1024xf32, #tpu.memory_space<vmem>>, vector<8x32xf32>
    %c0_219 = arith.constant 0 : index
    %c25 = arith.constant 25 : index
    %c0_220 = arith.constant 0 : index
    %217 = vector.load %arg15[%c0_219, %c25, %c0_220] : memref<8x32x32xf32, #tpu.memory_space<vmem>>, vector<8x1x32xf32>
    %218 = vector.shape_cast %217 : vector<8x1x32xf32> to vector<8x32xf32>
    %219 = vector.shape_cast %216 : vector<8x32xf32> to vector<8x1x32xf32>
    tpu.vector_store %arg15[%c0_219, %c25, %c0_220], %219 {strides = array<i32>} : memref<8x32x32xf32, #tpu.memory_space<vmem>>, vector<8x1x32xf32>,
    %c0_221 = arith.constant 0 : index
    %c800_222 = arith.constant 800 : index
    %220 = vector.load %arg14[%c0_221, %c800_222] : memref<8x1024xf32, #tpu.memory_space<vmem>>, vector<8x32xf32>
    %c0_223 = arith.constant 0 : index
    %c25_224 = arith.constant 25 : index
    %c0_225 = arith.constant 0 : index
    %221 = vector.load %arg16[%c0_223, %c25_224, %c0_225] : memref<8x32x32xf32, #tpu.memory_space<vmem>>, vector<8x1x32xf32>
    %222 = vector.shape_cast %221 : vector<8x1x32xf32> to vector<8x32xf32>
    %223 = vector.shape_cast %220 : vector<8x32xf32> to vector<8x1x32xf32>
    tpu.vector_store %arg16[%c0_223, %c25_224, %c0_225], %223 {strides = array<i32>} : memref<8x32x32xf32, #tpu.memory_space<vmem>>, vector<8x1x32xf32>,
    %c0_226 = arith.constant 0 : index
    %c832 = arith.constant 832 : index
    %224 = vector.load %arg13[%c0_226, %c832] : memref<8x1024xf32, #tpu.memory_space<vmem>>, vector<8x32xf32>
    %c0_227 = arith.constant 0 : index
    %c26 = arith.constant 26 : index
    %c0_228 = arith.constant 0 : index
    %225 = vector.load %arg15[%c0_227, %c26, %c0_228] : memref<8x32x32xf32, #tpu.memory_space<vmem>>, vector<8x1x32xf32>
    %226 = vector.shape_cast %225 : vector<8x1x32xf32> to vector<8x32xf32>
    %227 = vector.shape_cast %224 : vector<8x32xf32> to vector<8x1x32xf32>
    tpu.vector_store %arg15[%c0_227, %c26, %c0_228], %227 {strides = array<i32>} : memref<8x32x32xf32, #tpu.memory_space<vmem>>, vector<8x1x32xf32>,
    %c0_229 = arith.constant 0 : index
    %c832_230 = arith.constant 832 : index
    %228 = vector.load %arg14[%c0_229, %c832_230] : memref<8x1024xf32, #tpu.memory_space<vmem>>, vector<8x32xf32>
    %c0_231 = arith.constant 0 : index
    %c26_232 = arith.constant 26 : index
    %c0_233 = arith.constant 0 : index
    %229 = vector.load %arg16[%c0_231, %c26_232, %c0_233] : memref<8x32x32xf32, #tpu.memory_space<vmem>>, vector<8x1x32xf32>
    %230 = vector.shape_cast %229 : vector<8x1x32xf32> to vector<8x32xf32>
    %231 = vector.shape_cast %228 : vector<8x32xf32> to vector<8x1x32xf32>
    tpu.vector_store %arg16[%c0_231, %c26_232, %c0_233], %231 {strides = array<i32>} : memref<8x32x32xf32, #tpu.memory_space<vmem>>, vector<8x1x32xf32>,
    %c0_234 = arith.constant 0 : index
    %c864 = arith.constant 864 : index
    %232 = vector.load %arg13[%c0_234, %c864] : memref<8x1024xf32, #tpu.memory_space<vmem>>, vector<8x32xf32>
    %c0_235 = arith.constant 0 : index
    %c27 = arith.constant 27 : index
    %c0_236 = arith.constant 0 : index
    %233 = vector.load %arg15[%c0_235, %c27, %c0_236] : memref<8x32x32xf32, #tpu.memory_space<vmem>>, vector<8x1x32xf32>
    %234 = vector.shape_cast %233 : vector<8x1x32xf32> to vector<8x32xf32>
    %235 = vector.shape_cast %232 : vector<8x32xf32> to vector<8x1x32xf32>
    tpu.vector_store %arg15[%c0_235, %c27, %c0_236], %235 {strides = array<i32>} : memref<8x32x32xf32, #tpu.memory_space<vmem>>, vector<8x1x32xf32>,
    %c0_237 = arith.constant 0 : index
    %c864_238 = arith.constant 864 : index
    %236 = vector.load %arg14[%c0_237, %c864_238] : memref<8x1024xf32, #tpu.memory_space<vmem>>, vector<8x32xf32>
    %c0_239 = arith.constant 0 : index
    %c27_240 = arith.constant 27 : index
    %c0_241 = arith.constant 0 : index
    %237 = vector.load %arg16[%c0_239, %c27_240, %c0_241] : memref<8x32x32xf32, #tpu.memory_space<vmem>>, vector<8x1x32xf32>
    %238 = vector.shape_cast %237 : vector<8x1x32xf32> to vector<8x32xf32>
    %239 = vector.shape_cast %236 : vector<8x32xf32> to vector<8x1x32xf32>
    tpu.vector_store %arg16[%c0_239, %c27_240, %c0_241], %239 {strides = array<i32>} : memref<8x32x32xf32, #tpu.memory_space<vmem>>, vector<8x1x32xf32>,
    %c0_242 = arith.constant 0 : index
    %c896 = arith.constant 896 : index
    %240 = vector.load %arg13[%c0_242, %c896] : memref<8x1024xf32, #tpu.memory_space<vmem>>, vector<8x32xf32>
    %c0_243 = arith.constant 0 : index
    %c28 = arith.constant 28 : index
    %c0_244 = arith.constant 0 : index
    %241 = vector.load %arg15[%c0_243, %c28, %c0_244] : memref<8x32x32xf32, #tpu.memory_space<vmem>>, vector<8x1x32xf32>
    %242 = vector.shape_cast %241 : vector<8x1x32xf32> to vector<8x32xf32>
    %243 = vector.shape_cast %240 : vector<8x32xf32> to vector<8x1x32xf32>
    tpu.vector_store %arg15[%c0_243, %c28, %c0_244], %243 {strides = array<i32>} : memref<8x32x32xf32, #tpu.memory_space<vmem>>, vector<8x1x32xf32>,
    %c0_245 = arith.constant 0 : index
    %c896_246 = arith.constant 896 : index
    %244 = vector.load %arg14[%c0_245, %c896_246] : memref<8x1024xf32, #tpu.memory_space<vmem>>, vector<8x32xf32>
    %c0_247 = arith.constant 0 : index
    %c28_248 = arith.constant 28 : index
    %c0_249 = arith.constant 0 : index
    %245 = vector.load %arg16[%c0_247, %c28_248, %c0_249] : memref<8x32x32xf32, #tpu.memory_space<vmem>>, vector<8x1x32xf32>
    %246 = vector.shape_cast %245 : vector<8x1x32xf32> to vector<8x32xf32>
    %247 = vector.shape_cast %244 : vector<8x32xf32> to vector<8x1x32xf32>
    tpu.vector_store %arg16[%c0_247, %c28_248, %c0_249], %247 {strides = array<i32>} : memref<8x32x32xf32, #tpu.memory_space<vmem>>, vector<8x1x32xf32>,
    %c0_250 = arith.constant 0 : index
    %c928 = arith.constant 928 : index
    %248 = vector.load %arg13[%c0_250, %c928] : memref<8x1024xf32, #tpu.memory_space<vmem>>, vector<8x32xf32>
    %c0_251 = arith.constant 0 : index
    %c29 = arith.constant 29 : index
    %c0_252 = arith.constant 0 : index
    %249 = vector.load %arg15[%c0_251, %c29, %c0_252] : memref<8x32x32xf32, #tpu.memory_space<vmem>>, vector<8x1x32xf32>
    %250 = vector.shape_cast %249 : vector<8x1x32xf32> to vector<8x32xf32>
    %251 = vector.shape_cast %248 : vector<8x32xf32> to vector<8x1x32xf32>
    tpu.vector_store %arg15[%c0_251, %c29, %c0_252], %251 {strides = array<i32>} : memref<8x32x32xf32, #tpu.memory_space<vmem>>, vector<8x1x32xf32>,
    %c0_253 = arith.constant 0 : index
    %c928_254 = arith.constant 928 : index
    %252 = vector.load %arg14[%c0_253, %c928_254] : memref<8x1024xf32, #tpu.memory_space<vmem>>, vector<8x32xf32>
    %c0_255 = arith.constant 0 : index
    %c29_256 = arith.constant 29 : index
    %c0_257 = arith.constant 0 : index
    %253 = vector.load %arg16[%c0_255, %c29_256, %c0_257] : memref<8x32x32xf32, #tpu.memory_space<vmem>>, vector<8x1x32xf32>
    %254 = vector.shape_cast %253 : vector<8x1x32xf32> to vector<8x32xf32>
    %255 = vector.shape_cast %252 : vector<8x32xf32> to vector<8x1x32xf32>
    tpu.vector_store %arg16[%c0_255, %c29_256, %c0_257], %255 {strides = array<i32>} : memref<8x32x32xf32, #tpu.memory_space<vmem>>, vector<8x1x32xf32>,
    %c0_258 = arith.constant 0 : index
    %c960 = arith.constant 960 : index
    %256 = vector.load %arg13[%c0_258, %c960] : memref<8x1024xf32, #tpu.memory_space<vmem>>, vector<8x32xf32>
    %c0_259 = arith.constant 0 : index
    %c30 = arith.constant 30 : index
    %c0_260 = arith.constant 0 : index
    %257 = vector.load %arg15[%c0_259, %c30, %c0_260] : memref<8x32x32xf32, #tpu.memory_space<vmem>>, vector<8x1x32xf32>
    %258 = vector.shape_cast %257 : vector<8x1x32xf32> to vector<8x32xf32>
    %259 = vector.shape_cast %256 : vector<8x32xf32> to vector<8x1x32xf32>
    tpu.vector_store %arg15[%c0_259, %c30, %c0_260], %259 {strides = array<i32>} : memref<8x32x32xf32, #tpu.memory_space<vmem>>, vector<8x1x32xf32>,
    %c0_261 = arith.constant 0 : index
    %c960_262 = arith.constant 960 : index
    %260 = vector.load %arg14[%c0_261, %c960_262] : memref<8x1024xf32, #tpu.memory_space<vmem>>, vector<8x32xf32>
    %c0_263 = arith.constant 0 : index
    %c30_264 = arith.constant 30 : index
    %c0_265 = arith.constant 0 : index
    %261 = vector.load %arg16[%c0_263, %c30_264, %c0_265] : memref<8x32x32xf32, #tpu.memory_space<vmem>>, vector<8x1x32xf32>
    %262 = vector.shape_cast %261 : vector<8x1x32xf32> to vector<8x32xf32>
    %263 = vector.shape_cast %260 : vector<8x32xf32> to vector<8x1x32xf32>
    tpu.vector_store %arg16[%c0_263, %c30_264, %c0_265], %263 {strides = array<i32>} : memref<8x32x32xf32, #tpu.memory_space<vmem>>, vector<8x1x32xf32>,
    %c0_266 = arith.constant 0 : index
    %c992 = arith.constant 992 : index
    %264 = vector.load %arg13[%c0_266, %c992] : memref<8x1024xf32, #tpu.memory_space<vmem>>, vector<8x32xf32>
    %c0_267 = arith.constant 0 : index
    %c31 = arith.constant 31 : index
    %c0_268 = arith.constant 0 : index
    %265 = vector.load %arg15[%c0_267, %c31, %c0_268] : memref<8x32x32xf32, #tpu.memory_space<vmem>>, vector<8x1x32xf32>
    %266 = vector.shape_cast %265 : vector<8x1x32xf32> to vector<8x32xf32>
    %267 = vector.shape_cast %264 : vector<8x32xf32> to vector<8x1x32xf32>
    tpu.vector_store %arg15[%c0_267, %c31, %c0_268], %267 {strides = array<i32>} : memref<8x32x32xf32, #tpu.memory_space<vmem>>, vector<8x1x32xf32>,
    %c0_269 = arith.constant 0 : index
    %c992_270 = arith.constant 992 : index
    %268 = vector.load %arg14[%c0_269, %c992_270] : memref<8x1024xf32, #tpu.memory_space<vmem>>, vector<8x32xf32>
    %c0_271 = arith.constant 0 : index
    %c31_272 = arith.constant 31 : index
    %c0_273 = arith.constant 0 : index
    %269 = vector.load %arg16[%c0_271, %c31_272, %c0_273] : memref<8x32x32xf32, #tpu.memory_space<vmem>>, vector<8x1x32xf32>
    %270 = vector.shape_cast %269 : vector<8x1x32xf32> to vector<8x32xf32>
    %271 = vector.shape_cast %268 : vector<8x32xf32> to vector<8x1x32xf32>
    tpu.vector_store %arg16[%c0_271, %c31_272, %c0_273], %271 {strides = array<i32>} : memref<8x32x32xf32, #tpu.memory_space<vmem>>, vector<8x1x32xf32>,
    %c0_274 = arith.constant 0 : index
    %c0_275 = arith.constant 0 : index
    %c0_276 = arith.constant 0 : index
    %272 = vector.load %arg15[%c0_274, %c0_275, %c0_276] : memref<8x32x32xf32, #tpu.memory_space<vmem>>, vector<8x32x32xf32>
    %273 = arith.truncf %272 : vector<8x32x32xf32> to vector<8x32x32xbf16>
    %c0_277 = arith.constant 0 : index
    %c0_278 = arith.constant 0 : index
    %c0_279 = arith.constant 0 : index
    %274 = vector.load %arg16[%c0_277, %c0_278, %c0_279] : memref<8x32x32xf32, #tpu.memory_space<vmem>>, vector<8x32x32xf32>
    %275 = arith.truncf %274 : vector<8x32x32xf32> to vector<8x32x32xbf16>
    "tpu.trace_start"() <{level = 10 : i32, message = "bij,bjk->bik"}> : () -> ()
    %cst_280 = arith.constant dense<0.000000e+00> : vector<8x32x32xf32>
    %276 = tpu.matmul %273, %275, %cst_280 {dimension_numbers = #tpu.dot_dimension_numbers<[2], [1], [1], [2], [0, 0, 0, 1, 1, 2], [0], [0]>} : vector<8x32x32xbf16>, vector<8x32x32xbf16>, vector<8x32x32xf32> -> vector<8x32x32xf32>
    "tpu.trace_stop"() : () -> ()
    %c0_281 = arith.constant 0 : index
    %c0_282 = arith.constant 0 : index
    %c0_283 = arith.constant 0 : index
    %277 = vector.load %arg17[%c0_281, %c0_282, %c0_283] : memref<8x32x32xf32, #tpu.memory_space<vmem>>, vector<8x32x32xf32>
    tpu.vector_store %arg17[%c0_281, %c0_282, %c0_283], %276 {strides = array<i32>} : memref<8x32x32xf32, #tpu.memory_space<vmem>>, vector<8x32x32xf32>,
    %c0_284 = arith.constant 0 : index
    %c0_285 = arith.constant 0 : index
    %c0_286 = arith.constant 0 : index
    %278 = vector.load %arg17[%c0_284, %c0_285, %c0_286] : memref<8x32x32xf32, #tpu.memory_space<vmem>>, vector<8x1x32xf32>
    %279 = vector.shape_cast %278 : vector<8x1x32xf32> to vector<8x32xf32>
    %c0_287 = arith.constant 0 : index
    %c0_288 = arith.constant 0 : index
    %280 = vector.load %arg18[%c0_287, %c0_288] : memref<8x1024xf32, #tpu.memory_space<vmem>>, vector<8x32xf32>
    tpu.vector_store %arg18[%c0_287, %c0_288], %279 {strides = array<i32>} : memref<8x1024xf32, #tpu.memory_space<vmem>>, vector<8x32xf32>,
    %c0_289 = arith.constant 0 : index
    %c1_290 = arith.constant 1 : index
    %c0_291 = arith.constant 0 : index
    %281 = vector.load %arg17[%c0_289, %c1_290, %c0_291] : memref<8x32x32xf32, #tpu.memory_space<vmem>>, vector<8x1x32xf32>
    %282 = vector.shape_cast %281 : vector<8x1x32xf32> to vector<8x32xf32>
    %c0_292 = arith.constant 0 : index
    %c32_293 = arith.constant 32 : index
    %283 = vector.load %arg18[%c0_292, %c32_293] : memref<8x1024xf32, #tpu.memory_space<vmem>>, vector<8x32xf32>
    tpu.vector_store %arg18[%c0_292, %c32_293], %282 {strides = array<i32>} : memref<8x1024xf32, #tpu.memory_space<vmem>>, vector<8x32xf32>,
    %c0_294 = arith.constant 0 : index
    %c2_295 = arith.constant 2 : index
    %c0_296 = arith.constant 0 : index
    %284 = vector.load %arg17[%c0_294, %c2_295, %c0_296] : memref<8x32x32xf32, #tpu.memory_space<vmem>>, vector<8x1x32xf32>
    %285 = vector.shape_cast %284 : vector<8x1x32xf32> to vector<8x32xf32>
    %c0_297 = arith.constant 0 : index
    %c64_298 = arith.constant 64 : index
    %286 = vector.load %arg18[%c0_297, %c64_298] : memref<8x1024xf32, #tpu.memory_space<vmem>>, vector<8x32xf32>
    tpu.vector_store %arg18[%c0_297, %c64_298], %285 {strides = array<i32>} : memref<8x1024xf32, #tpu.memory_space<vmem>>, vector<8x32xf32>,
    %c0_299 = arith.constant 0 : index
    %c3_300 = arith.constant 3 : index
    %c0_301 = arith.constant 0 : index
    %287 = vector.load %arg17[%c0_299, %c3_300, %c0_301] : memref<8x32x32xf32, #tpu.memory_space<vmem>>, vector<8x1x32xf32>
    %288 = vector.shape_cast %287 : vector<8x1x32xf32> to vector<8x32xf32>
    %c0_302 = arith.constant 0 : index
    %c96_303 = arith.constant 96 : index
    %289 = vector.load %arg18[%c0_302, %c96_303] : memref<8x1024xf32, #tpu.memory_space<vmem>>, vector<8x32xf32>
    tpu.vector_store %arg18[%c0_302, %c96_303], %288 {strides = array<i32>} : memref<8x1024xf32, #tpu.memory_space<vmem>>, vector<8x32xf32>,
    %c0_304 = arith.constant 0 : index
    %c4_305 = arith.constant 4 : index
    %c0_306 = arith.constant 0 : index
    %290 = vector.load %arg17[%c0_304, %c4_305, %c0_306] : memref<8x32x32xf32, #tpu.memory_space<vmem>>, vector<8x1x32xf32>
    %291 = vector.shape_cast %290 : vector<8x1x32xf32> to vector<8x32xf32>
    %c0_307 = arith.constant 0 : index
    %c128_308 = arith.constant 128 : index
    %292 = vector.load %arg18[%c0_307, %c128_308] : memref<8x1024xf32, #tpu.memory_space<vmem>>, vector<8x32xf32>
    tpu.vector_store %arg18[%c0_307, %c128_308], %291 {strides = array<i32>} : memref<8x1024xf32, #tpu.memory_space<vmem>>, vector<8x32xf32>,
    %c0_309 = arith.constant 0 : index
    %c5_310 = arith.constant 5 : index
    %c0_311 = arith.constant 0 : index
    %293 = vector.load %arg17[%c0_309, %c5_310, %c0_311] : memref<8x32x32xf32, #tpu.memory_space<vmem>>, vector<8x1x32xf32>
    %294 = vector.shape_cast %293 : vector<8x1x32xf32> to vector<8x32xf32>
    %c0_312 = arith.constant 0 : index
    %c160_313 = arith.constant 160 : index
    %295 = vector.load %arg18[%c0_312, %c160_313] : memref<8x1024xf32, #tpu.memory_space<vmem>>, vector<8x32xf32>
    tpu.vector_store %arg18[%c0_312, %c160_313], %294 {strides = array<i32>} : memref<8x1024xf32, #tpu.memory_space<vmem>>, vector<8x32xf32>,
    %c0_314 = arith.constant 0 : index
    %c6_315 = arith.constant 6 : index
    %c0_316 = arith.constant 0 : index
    %296 = vector.load %arg17[%c0_314, %c6_315, %c0_316] : memref<8x32x32xf32, #tpu.memory_space<vmem>>, vector<8x1x32xf32>
    %297 = vector.shape_cast %296 : vector<8x1x32xf32> to vector<8x32xf32>
    %c0_317 = arith.constant 0 : index
    %c192_318 = arith.constant 192 : index
    %298 = vector.load %arg18[%c0_317, %c192_318] : memref<8x1024xf32, #tpu.memory_space<vmem>>, vector<8x32xf32>
    tpu.vector_store %arg18[%c0_317, %c192_318], %297 {strides = array<i32>} : memref<8x1024xf32, #tpu.memory_space<vmem>>, vector<8x32xf32>,
    %c0_319 = arith.constant 0 : index
    %c7_320 = arith.constant 7 : index
    %c0_321 = arith.constant 0 : index
    %299 = vector.load %arg17[%c0_319, %c7_320, %c0_321] : memref<8x32x32xf32, #tpu.memory_space<vmem>>, vector<8x1x32xf32>
    %300 = vector.shape_cast %299 : vector<8x1x32xf32> to vector<8x32xf32>
    %c0_322 = arith.constant 0 : index
    %c224_323 = arith.constant 224 : index
    %301 = vector.load %arg18[%c0_322, %c224_323] : memref<8x1024xf32, #tpu.memory_space<vmem>>, vector<8x32xf32>
    tpu.vector_store %arg18[%c0_322, %c224_323], %300 {strides = array<i32>} : memref<8x1024xf32, #tpu.memory_space<vmem>>, vector<8x32xf32>,
    %c0_324 = arith.constant 0 : index
    %c8_325 = arith.constant 8 : index
    %c0_326 = arith.constant 0 : index
    %302 = vector.load %arg17[%c0_324, %c8_325, %c0_326] : memref<8x32x32xf32, #tpu.memory_space<vmem>>, vector<8x1x32xf32>
    %303 = vector.shape_cast %302 : vector<8x1x32xf32> to vector<8x32xf32>
    %c0_327 = arith.constant 0 : index
    %c256_328 = arith.constant 256 : index
    %304 = vector.load %arg18[%c0_327, %c256_328] : memref<8x1024xf32, #tpu.memory_space<vmem>>, vector<8x32xf32>
    tpu.vector_store %arg18[%c0_327, %c256_328], %303 {strides = array<i32>} : memref<8x1024xf32, #tpu.memory_space<vmem>>, vector<8x32xf32>,
    %c0_329 = arith.constant 0 : index
    %c9_330 = arith.constant 9 : index
    %c0_331 = arith.constant 0 : index
    %305 = vector.load %arg17[%c0_329, %c9_330, %c0_331] : memref<8x32x32xf32, #tpu.memory_space<vmem>>, vector<8x1x32xf32>
    %306 = vector.shape_cast %305 : vector<8x1x32xf32> to vector<8x32xf32>
    %c0_332 = arith.constant 0 : index
    %c288_333 = arith.constant 288 : index
    %307 = vector.load %arg18[%c0_332, %c288_333] : memref<8x1024xf32, #tpu.memory_space<vmem>>, vector<8x32xf32>
    tpu.vector_store %arg18[%c0_332, %c288_333], %306 {strides = array<i32>} : memref<8x1024xf32, #tpu.memory_space<vmem>>, vector<8x32xf32>,
    %c0_334 = arith.constant 0 : index
    %c10_335 = arith.constant 10 : index
    %c0_336 = arith.constant 0 : index
    %308 = vector.load %arg17[%c0_334, %c10_335, %c0_336] : memref<8x32x32xf32, #tpu.memory_space<vmem>>, vector<8x1x32xf32>
    %309 = vector.shape_cast %308 : vector<8x1x32xf32> to vector<8x32xf32>
    %c0_337 = arith.constant 0 : index
    %c320_338 = arith.constant 320 : index
    %310 = vector.load %arg18[%c0_337, %c320_338] : memref<8x1024xf32, #tpu.memory_space<vmem>>, vector<8x32xf32>
    tpu.vector_store %arg18[%c0_337, %c320_338], %309 {strides = array<i32>} : memref<8x1024xf32, #tpu.memory_space<vmem>>, vector<8x32xf32>,
    %c0_339 = arith.constant 0 : index
    %c11_340 = arith.constant 11 : index
    %c0_341 = arith.constant 0 : index
    %311 = vector.load %arg17[%c0_339, %c11_340, %c0_341] : memref<8x32x32xf32, #tpu.memory_space<vmem>>, vector<8x1x32xf32>
    %312 = vector.shape_cast %311 : vector<8x1x32xf32> to vector<8x32xf32>
    %c0_342 = arith.constant 0 : index
    %c352_343 = arith.constant 352 : index
    %313 = vector.load %arg18[%c0_342, %c352_343] : memref<8x1024xf32, #tpu.memory_space<vmem>>, vector<8x32xf32>
    tpu.vector_store %arg18[%c0_342, %c352_343], %312 {strides = array<i32>} : memref<8x1024xf32, #tpu.memory_space<vmem>>, vector<8x32xf32>,
    %c0_344 = arith.constant 0 : index
    %c12_345 = arith.constant 12 : index
    %c0_346 = arith.constant 0 : index
    %314 = vector.load %arg17[%c0_344, %c12_345, %c0_346] : memref<8x32x32xf32, #tpu.memory_space<vmem>>, vector<8x1x32xf32>
    %315 = vector.shape_cast %314 : vector<8x1x32xf32> to vector<8x32xf32>
    %c0_347 = arith.constant 0 : index
    %c384_348 = arith.constant 384 : index
    %316 = vector.load %arg18[%c0_347, %c384_348] : memref<8x1024xf32, #tpu.memory_space<vmem>>, vector<8x32xf32>
    tpu.vector_store %arg18[%c0_347, %c384_348], %315 {strides = array<i32>} : memref<8x1024xf32, #tpu.memory_space<vmem>>, vector<8x32xf32>,
    %c0_349 = arith.constant 0 : index
    %c13_350 = arith.constant 13 : index
    %c0_351 = arith.constant 0 : index
    %317 = vector.load %arg17[%c0_349, %c13_350, %c0_351] : memref<8x32x32xf32, #tpu.memory_space<vmem>>, vector<8x1x32xf32>
    %318 = vector.shape_cast %317 : vector<8x1x32xf32> to vector<8x32xf32>
    %c0_352 = arith.constant 0 : index
    %c416_353 = arith.constant 416 : index
    %319 = vector.load %arg18[%c0_352, %c416_353] : memref<8x1024xf32, #tpu.memory_space<vmem>>, vector<8x32xf32>
    tpu.vector_store %arg18[%c0_352, %c416_353], %318 {strides = array<i32>} : memref<8x1024xf32, #tpu.memory_space<vmem>>, vector<8x32xf32>,
    %c0_354 = arith.constant 0 : index
    %c14_355 = arith.constant 14 : index
    %c0_356 = arith.constant 0 : index
    %320 = vector.load %arg17[%c0_354, %c14_355, %c0_356] : memref<8x32x32xf32, #tpu.memory_space<vmem>>, vector<8x1x32xf32>
    %321 = vector.shape_cast %320 : vector<8x1x32xf32> to vector<8x32xf32>
    %c0_357 = arith.constant 0 : index
    %c448_358 = arith.constant 448 : index
    %322 = vector.load %arg18[%c0_357, %c448_358] : memref<8x1024xf32, #tpu.memory_space<vmem>>, vector<8x32xf32>
    tpu.vector_store %arg18[%c0_357, %c448_358], %321 {strides = array<i32>} : memref<8x1024xf32, #tpu.memory_space<vmem>>, vector<8x32xf32>,
    %c0_359 = arith.constant 0 : index
    %c15_360 = arith.constant 15 : index
    %c0_361 = arith.constant 0 : index
    %323 = vector.load %arg17[%c0_359, %c15_360, %c0_361] : memref<8x32x32xf32, #tpu.memory_space<vmem>>, vector<8x1x32xf32>
    %324 = vector.shape_cast %323 : vector<8x1x32xf32> to vector<8x32xf32>
    %c0_362 = arith.constant 0 : index
    %c480_363 = arith.constant 480 : index
    %325 = vector.load %arg18[%c0_362, %c480_363] : memref<8x1024xf32, #tpu.memory_space<vmem>>, vector<8x32xf32>
    tpu.vector_store %arg18[%c0_362, %c480_363], %324 {strides = array<i32>} : memref<8x1024xf32, #tpu.memory_space<vmem>>, vector<8x32xf32>,
    %c0_364 = arith.constant 0 : index
    %c16_365 = arith.constant 16 : index
    %c0_366 = arith.constant 0 : index
    %326 = vector.load %arg17[%c0_364, %c16_365, %c0_366] : memref<8x32x32xf32, #tpu.memory_space<vmem>>, vector<8x1x32xf32>
    %327 = vector.shape_cast %326 : vector<8x1x32xf32> to vector<8x32xf32>
    %c0_367 = arith.constant 0 : index
    %c512_368 = arith.constant 512 : index
    %328 = vector.load %arg18[%c0_367, %c512_368] : memref<8x1024xf32, #tpu.memory_space<vmem>>, vector<8x32xf32>
    tpu.vector_store %arg18[%c0_367, %c512_368], %327 {strides = array<i32>} : memref<8x1024xf32, #tpu.memory_space<vmem>>, vector<8x32xf32>,
    %c0_369 = arith.constant 0 : index
    %c17_370 = arith.constant 17 : index
    %c0_371 = arith.constant 0 : index
    %329 = vector.load %arg17[%c0_369, %c17_370, %c0_371] : memref<8x32x32xf32, #tpu.memory_space<vmem>>, vector<8x1x32xf32>
    %330 = vector.shape_cast %329 : vector<8x1x32xf32> to vector<8x32xf32>
    %c0_372 = arith.constant 0 : index
    %c544_373 = arith.constant 544 : index
    %331 = vector.load %arg18[%c0_372, %c544_373] : memref<8x1024xf32, #tpu.memory_space<vmem>>, vector<8x32xf32>
    tpu.vector_store %arg18[%c0_372, %c544_373], %330 {strides = array<i32>} : memref<8x1024xf32, #tpu.memory_space<vmem>>, vector<8x32xf32>,
    %c0_374 = arith.constant 0 : index
    %c18_375 = arith.constant 18 : index
    %c0_376 = arith.constant 0 : index
    %332 = vector.load %arg17[%c0_374, %c18_375, %c0_376] : memref<8x32x32xf32, #tpu.memory_space<vmem>>, vector<8x1x32xf32>
    %333 = vector.shape_cast %332 : vector<8x1x32xf32> to vector<8x32xf32>
    %c0_377 = arith.constant 0 : index
    %c576_378 = arith.constant 576 : index
    %334 = vector.load %arg18[%c0_377, %c576_378] : memref<8x1024xf32, #tpu.memory_space<vmem>>, vector<8x32xf32>
    tpu.vector_store %arg18[%c0_377, %c576_378], %333 {strides = array<i32>} : memref<8x1024xf32, #tpu.memory_space<vmem>>, vector<8x32xf32>,
    %c0_379 = arith.constant 0 : index
    %c19_380 = arith.constant 19 : index
    %c0_381 = arith.constant 0 : index
    %335 = vector.load %arg17[%c0_379, %c19_380, %c0_381] : memref<8x32x32xf32, #tpu.memory_space<vmem>>, vector<8x1x32xf32>
    %336 = vector.shape_cast %335 : vector<8x1x32xf32> to vector<8x32xf32>
    %c0_382 = arith.constant 0 : index
    %c608_383 = arith.constant 608 : index
    %337 = vector.load %arg18[%c0_382, %c608_383] : memref<8x1024xf32, #tpu.memory_space<vmem>>, vector<8x32xf32>
    tpu.vector_store %arg18[%c0_382, %c608_383], %336 {strides = array<i32>} : memref<8x1024xf32, #tpu.memory_space<vmem>>, vector<8x32xf32>,
    %c0_384 = arith.constant 0 : index
    %c20_385 = arith.constant 20 : index
    %c0_386 = arith.constant 0 : index
    %338 = vector.load %arg17[%c0_384, %c20_385, %c0_386] : memref<8x32x32xf32, #tpu.memory_space<vmem>>, vector<8x1x32xf32>
    %339 = vector.shape_cast %338 : vector<8x1x32xf32> to vector<8x32xf32>
    %c0_387 = arith.constant 0 : index
    %c640_388 = arith.constant 640 : index
    %340 = vector.load %arg18[%c0_387, %c640_388] : memref<8x1024xf32, #tpu.memory_space<vmem>>, vector<8x32xf32>
    tpu.vector_store %arg18[%c0_387, %c640_388], %339 {strides = array<i32>} : memref<8x1024xf32, #tpu.memory_space<vmem>>, vector<8x32xf32>,
    %c0_389 = arith.constant 0 : index
    %c21_390 = arith.constant 21 : index
    %c0_391 = arith.constant 0 : index
    %341 = vector.load %arg17[%c0_389, %c21_390, %c0_391] : memref<8x32x32xf32, #tpu.memory_space<vmem>>, vector<8x1x32xf32>
    %342 = vector.shape_cast %341 : vector<8x1x32xf32> to vector<8x32xf32>
    %c0_392 = arith.constant 0 : index
    %c672_393 = arith.constant 672 : index
    %343 = vector.load %arg18[%c0_392, %c672_393] : memref<8x1024xf32, #tpu.memory_space<vmem>>, vector<8x32xf32>
    tpu.vector_store %arg18[%c0_392, %c672_393], %342 {strides = array<i32>} : memref<8x1024xf32, #tpu.memory_space<vmem>>, vector<8x32xf32>,
    %c0_394 = arith.constant 0 : index
    %c22_395 = arith.constant 22 : index
    %c0_396 = arith.constant 0 : index
    %344 = vector.load %arg17[%c0_394, %c22_395, %c0_396] : memref<8x32x32xf32, #tpu.memory_space<vmem>>, vector<8x1x32xf32>
    %345 = vector.shape_cast %344 : vector<8x1x32xf32> to vector<8x32xf32>
    %c0_397 = arith.constant 0 : index
    %c704_398 = arith.constant 704 : index
    %346 = vector.load %arg18[%c0_397, %c704_398] : memref<8x1024xf32, #tpu.memory_space<vmem>>, vector<8x32xf32>
    tpu.vector_store %arg18[%c0_397, %c704_398], %345 {strides = array<i32>} : memref<8x1024xf32, #tpu.memory_space<vmem>>, vector<8x32xf32>,
    %c0_399 = arith.constant 0 : index
    %c23_400 = arith.constant 23 : index
    %c0_401 = arith.constant 0 : index
    %347 = vector.load %arg17[%c0_399, %c23_400, %c0_401] : memref<8x32x32xf32, #tpu.memory_space<vmem>>, vector<8x1x32xf32>
    %348 = vector.shape_cast %347 : vector<8x1x32xf32> to vector<8x32xf32>
    %c0_402 = arith.constant 0 : index
    %c736_403 = arith.constant 736 : index
    %349 = vector.load %arg18[%c0_402, %c736_403] : memref<8x1024xf32, #tpu.memory_space<vmem>>, vector<8x32xf32>
    tpu.vector_store %arg18[%c0_402, %c736_403], %348 {strides = array<i32>} : memref<8x1024xf32, #tpu.memory_space<vmem>>, vector<8x32xf32>,
    %c0_404 = arith.constant 0 : index
    %c24_405 = arith.constant 24 : index
    %c0_406 = arith.constant 0 : index
    %350 = vector.load %arg17[%c0_404, %c24_405, %c0_406] : memref<8x32x32xf32, #tpu.memory_space<vmem>>, vector<8x1x32xf32>
    %351 = vector.shape_cast %350 : vector<8x1x32xf32> to vector<8x32xf32>
    %c0_407 = arith.constant 0 : index
    %c768_408 = arith.constant 768 : index
    %352 = vector.load %arg18[%c0_407, %c768_408] : memref<8x1024xf32, #tpu.memory_space<vmem>>, vector<8x32xf32>
    tpu.vector_store %arg18[%c0_407, %c768_408], %351 {strides = array<i32>} : memref<8x1024xf32, #tpu.memory_space<vmem>>, vector<8x32xf32>,
    %c0_409 = arith.constant 0 : index
    %c25_410 = arith.constant 25 : index
    %c0_411 = arith.constant 0 : index
    %353 = vector.load %arg17[%c0_409, %c25_410, %c0_411] : memref<8x32x32xf32, #tpu.memory_space<vmem>>, vector<8x1x32xf32>
    %354 = vector.shape_cast %353 : vector<8x1x32xf32> to vector<8x32xf32>
    %c0_412 = arith.constant 0 : index
    %c800_413 = arith.constant 800 : index
    %355 = vector.load %arg18[%c0_412, %c800_413] : memref<8x1024xf32, #tpu.memory_space<vmem>>, vector<8x32xf32>
    tpu.vector_store %arg18[%c0_412, %c800_413], %354 {strides = array<i32>} : memref<8x1024xf32, #tpu.memory_space<vmem>>, vector<8x32xf32>,
    %c0_414 = arith.constant 0 : index
    %c26_415 = arith.constant 26 : index
    %c0_416 = arith.constant 0 : index
    %356 = vector.load %arg17[%c0_414, %c26_415, %c0_416] : memref<8x32x32xf32, #tpu.memory_space<vmem>>, vector<8x1x32xf32>
    %357 = vector.shape_cast %356 : vector<8x1x32xf32> to vector<8x32xf32>
    %c0_417 = arith.constant 0 : index
    %c832_418 = arith.constant 832 : index
    %358 = vector.load %arg18[%c0_417, %c832_418] : memref<8x1024xf32, #tpu.memory_space<vmem>>, vector<8x32xf32>
    tpu.vector_store %arg18[%c0_417, %c832_418], %357 {strides = array<i32>} : memref<8x1024xf32, #tpu.memory_space<vmem>>, vector<8x32xf32>,
    %c0_419 = arith.constant 0 : index
    %c27_420 = arith.constant 27 : index
    %c0_421 = arith.constant 0 : index
    %359 = vector.load %arg17[%c0_419, %c27_420, %c0_421] : memref<8x32x32xf32, #tpu.memory_space<vmem>>, vector<8x1x32xf32>
    %360 = vector.shape_cast %359 : vector<8x1x32xf32> to vector<8x32xf32>
    %c0_422 = arith.constant 0 : index
    %c864_423 = arith.constant 864 : index
    %361 = vector.load %arg18[%c0_422, %c864_423] : memref<8x1024xf32, #tpu.memory_space<vmem>>, vector<8x32xf32>
    tpu.vector_store %arg18[%c0_422, %c864_423], %360 {strides = array<i32>} : memref<8x1024xf32, #tpu.memory_space<vmem>>, vector<8x32xf32>,
    %c0_424 = arith.constant 0 : index
    %c28_425 = arith.constant 28 : index
    %c0_426 = arith.constant 0 : index
    %362 = vector.load %arg17[%c0_424, %c28_425, %c0_426] : memref<8x32x32xf32, #tpu.memory_space<vmem>>, vector<8x1x32xf32>
    %363 = vector.shape_cast %362 : vector<8x1x32xf32> to vector<8x32xf32>
    %c0_427 = arith.constant 0 : index
    %c896_428 = arith.constant 896 : index
    %364 = vector.load %arg18[%c0_427, %c896_428] : memref<8x1024xf32, #tpu.memory_space<vmem>>, vector<8x32xf32>
    tpu.vector_store %arg18[%c0_427, %c896_428], %363 {strides = array<i32>} : memref<8x1024xf32, #tpu.memory_space<vmem>>, vector<8x32xf32>,
    %c0_429 = arith.constant 0 : index
    %c29_430 = arith.constant 29 : index
    %c0_431 = arith.constant 0 : index
    %365 = vector.load %arg17[%c0_429, %c29_430, %c0_431] : memref<8x32x32xf32, #tpu.memory_space<vmem>>, vector<8x1x32xf32>
    %366 = vector.shape_cast %365 : vector<8x1x32xf32> to vector<8x32xf32>
    %c0_432 = arith.constant 0 : index
    %c928_433 = arith.constant 928 : index
    %367 = vector.load %arg18[%c0_432, %c928_433] : memref<8x1024xf32, #tpu.memory_space<vmem>>, vector<8x32xf32>
    tpu.vector_store %arg18[%c0_432, %c928_433], %366 {strides = array<i32>} : memref<8x1024xf32, #tpu.memory_space<vmem>>, vector<8x32xf32>,
    %c0_434 = arith.constant 0 : index
    %c30_435 = arith.constant 30 : index
    %c0_436 = arith.constant 0 : index
    %368 = vector.load %arg17[%c0_434, %c30_435, %c0_436] : memref<8x32x32xf32, #tpu.memory_space<vmem>>, vector<8x1x32xf32>
    %369 = vector.shape_cast %368 : vector<8x1x32xf32> to vector<8x32xf32>
    %c0_437 = arith.constant 0 : index
    %c960_438 = arith.constant 960 : index
    %370 = vector.load %arg18[%c0_437, %c960_438] : memref<8x1024xf32, #tpu.memory_space<vmem>>, vector<8x32xf32>
    tpu.vector_store %arg18[%c0_437, %c960_438], %369 {strides = array<i32>} : memref<8x1024xf32, #tpu.memory_space<vmem>>, vector<8x32xf32>,
    %c0_439 = arith.constant 0 : index
    %c31_440 = arith.constant 31 : index
    %c0_441 = arith.constant 0 : index
    %371 = vector.load %arg17[%c0_439, %c31_440, %c0_441] : memref<8x32x32xf32, #tpu.memory_space<vmem>>, vector<8x1x32xf32>
    %372 = vector.shape_cast %371 : vector<8x1x32xf32> to vector<8x32xf32>
    %c0_442 = arith.constant 0 : index
    %c992_443 = arith.constant 992 : index
    %373 = vector.load %arg18[%c0_442, %c992_443] : memref<8x1024xf32, #tpu.memory_space<vmem>>, vector<8x32xf32>
    tpu.vector_store %arg18[%c0_442, %c992_443], %372 {strides = array<i32>} : memref<8x1024xf32, #tpu.memory_space<vmem>>, vector<8x32xf32>,
    %c0_444 = arith.constant 0 : index
    %c0_445 = arith.constant 0 : index
    %374 = vector.load %arg18[%c0_444, %c0_445] : memref<8x1024xf32, #tpu.memory_space<vmem>>, vector<8x1024xf32>
    %375 = arith.mulf %374, %374 : vector<8x1024xf32>
    %cst_446 = arith.constant dense<0.000000e+00> : vector<8xf32>
    %376 = vector.multi_reduction <add>, %375, %cst_446 [1] : vector<8x1024xf32> to vector<8xf32>
    %377 = vector.shape_cast %376 : vector<8xf32> to vector<8x1xf32>
    %cst_447 = arith.constant 1.000000e-24 : f32
    %378 = vector.broadcast %cst_447 : f32 to vector<8x1xf32>
    %379 = arith.maximumf %377, %378 : vector<8x1xf32>
    %380 = math.rsqrt %379 : vector<8x1xf32>
    %381 = vector.broadcast %380 : vector<8x1xf32> to vector<8x1024xf32>
    %382 = arith.mulf %374, %381 : vector<8x1024xf32>
    %383 = arith.truncf %382 : vector<8x1024xf32> to vector<8x1024xbf16>
    %c0_448 = arith.constant 0 : index
    %c0_449 = arith.constant 0 : index
    %384 = vector.load %arg6[%c0_448, %c0_449] : memref<1024x1024xbf16, #tpu.memory_space<vmem>>, vector<1024x1024xbf16>
    %cst_450 = arith.constant dense<0.000000e+00> : vector<8x1024xf32>
    %385 = tpu.matmul %383, %384, %cst_450 {dimension_numbers = #tpu.dot_dimension_numbers<[1], [0], [0], [1], [0, 0, 1, 1], [], []>} : vector<8x1024xbf16>, vector<1024x1024xbf16>, vector<8x1024xf32> -> vector<8x1024xf32>
    %c0_451 = arith.constant 0 : index
    %c0_452 = arith.constant 0 : index
    %386 = vector.load %arg7[%c0_451, %c0_452] : memref<1x1024xf32, #tpu.memory_space<vmem>>, vector<1x1024xf32>
    %387 = vector.broadcast %386 : vector<1x1024xf32> to vector<8x1024xf32>
    %388 = arith.addf %385, %387 : vector<8x1024xf32>
    %cst_453 = arith.constant 0.000000e+00 : f32
    %389 = vector.broadcast %cst_453 : f32 to vector<8x1024xf32>
    %390 = arith.maximumf %388, %389 : vector<8x1024xf32>
    %391 = arith.truncf %390 : vector<8x1024xf32> to vector<8x1024xbf16>
    %c0_454 = arith.constant 0 : index
    %c0_455 = arith.constant 0 : index
    %392 = vector.load %arg8[%c0_454, %c0_455] : memref<1024x256xbf16, #tpu.memory_space<vmem>>, vector<1024x256xbf16>
    %cst_456 = arith.constant dense<0.000000e+00> : vector<8x256xf32>
    %393 = tpu.matmul %391, %392, %cst_456 {dimension_numbers = #tpu.dot_dimension_numbers<[1], [0], [0], [1], [0, 0, 1, 1], [], []>} : vector<8x1024xbf16>, vector<1024x256xbf16>, vector<8x256xf32> -> vector<8x256xf32>
    %c0_457 = arith.constant 0 : index
    %c0_458 = arith.constant 0 : index
    %394 = vector.load %arg9[%c0_457, %c0_458] : memref<1x256xf32, #tpu.memory_space<vmem>>, vector<1x256xf32>
    %395 = vector.broadcast %394 : vector<1x256xf32> to vector<8x256xf32>
    %396 = arith.addf %393, %395 : vector<8x256xf32>
    %cst_459 = arith.constant 0.000000e+00 : f32
    %397 = vector.broadcast %cst_459 : f32 to vector<8x256xf32>
    %398 = arith.maximumf %396, %397 : vector<8x256xf32>
    %399 = arith.truncf %398 : vector<8x256xf32> to vector<8x256xbf16>
    %c0_460 = arith.constant 0 : index
    %c0_461 = arith.constant 0 : index
    %400 = vector.load %arg10[%c0_460, %c0_461] : memref<256x128xbf16, #tpu.memory_space<vmem>>, vector<256x128xbf16>
    %cst_462 = arith.constant dense<0.000000e+00> : vector<8x128xf32>
    %401 = tpu.matmul %399, %400, %cst_462 {dimension_numbers = #tpu.dot_dimension_numbers<[1], [0], [0], [1], [0, 0, 1, 1], [], []>} : vector<8x256xbf16>, vector<256x128xbf16>, vector<8x128xf32> -> vector<8x128xf32>
    %c0_463 = arith.constant 0 : index
    %c0_464 = arith.constant 0 : index
    %402 = vector.load %arg11[%c0_463, %c0_464] : memref<1x128xf32, #tpu.memory_space<vmem>>, vector<1x128xf32>
    %403 = vector.broadcast %402 : vector<1x128xf32> to vector<8x128xf32>
    %404 = arith.addf %401, %403 : vector<8x128xf32>
    %c0_465 = arith.constant 0 : index
    %c0_466 = arith.constant 0 : index
    %405 = vector.load %arg12[%c0_465, %c0_466] : memref<8x128xf32, #tpu.memory_space<vmem>>, vector<8x128xf32>
    tpu.vector_store %arg12[%c0_465, %c0_466], %404 {strides = array<i32>} : memref<8x128xf32, #tpu.memory_space<vmem>>, vector<8x128xf32>,
    return
  }
}

</mosaic_0001>

<bundles_post_ra>
// kernel: two_embedding_matmul_forward.1
= control target key start
LH: loop header
LB: loop body
LE: loop exit
PB: predicated region body
PF: predicated region fallthrough
CT: control target
= control target key end

     0   :  { %17 = vsyncpa [#allocation9], 0  ;;  %s19881_s0 = inlined_call_operand.hbm [shape: f32[8,256], index: 0, kind: input, shape index: {}]   ;;  %s19882_s1 = inlined_call_operand.hbm [shape: bf16[256,1024], index: 1, kind: input, shape index: {}]   ;;  %s19883_s2 = inlined_call_operand.hbm [shape: f32[1,1024], index: 2, kind: input, shape index: {}]   ;;  %s19884_s3 = inlined_call_operand.hbm [shape: f32[8,128], index: 3, kind: input, shape index: {}]   ;;  %s19885_s4 = inlined_call_operand.hbm [shape: bf16[128,1024], index: 4, kind: input, shape index: {}]   ;;  %s19886_s5 = inlined_call_operand.hbm [shape: f32[1,1024], index: 5, kind: input, shape index: {}]   ;;  %s19887_s6 = inlined_call_operand.hbm [shape: bf16[1024,1024], index: 6, kind: input, shape index: {}]   ;;  %s19888_s7 = inlined_call_operand.hbm [shape: f32[1,1024], index: 7, kind: input, shape index: {}]   ;;  %s19889_s8 = inlined_call_operand.hbm [shape: bf16[1024,256], index: 8, kind: input, shape index: {}]   ;;  %s19890_s9 = inlined_call_operand.hbm [shape: f32[1,256], index: 9, kind: input, shape index: {}]   ;;  %s19891_s10 = inlined_call_operand.hbm [shape: bf16[256,128], index: 10, kind: input, shape index: {}]   ;;  %s19892_s11 = inlined_call_operand.hbm [shape: f32[1,128], index: 11, kind: input, shape index: {}]   ;;  %s19893_s12 = inlined_call_operand.hbm [shape: f32[8,128], index: 12, kind: output, shape index: {}]  }
   0x1   :  { %18 = vsyncpa [#allocation12], 0 }
   0x2   :  { %19 = vsyncpa [#allocation15], 0 }
   0x3   :  { %20 = vsyncpa [#allocation18], 0 }
   0x4   :  { %21 = vsyncpa [#allocation21], 0 }
   0x5   :  { %22 = vsyncpa [#allocation24], 0 }
   0x6   :  { %23 = vsyncpa [#allocation27], 0 }
   0x7   :  { %24 = vsyncpa [#allocation10], 0  ;;  %s16488_s21 = smov [#allocation11]  }
   0x8   :  { %s40_s22 = sshll.u32 %s16488_s21, 4  ;;  %s41_s22 = int_to_ptr.vmem [resolvable:$true] %s40_s22 }
   0x9   :  { %s16220_s23 = scalar_lea.vmem %s41_s22, 16384  ;;  %p16225_p1 = scmp.lt.s32.totalorder %s41_s22, %s41_s22 }
   0xa   :  { %p16221_p0 = scmp.ne.s32.totalorder %s41_s22, %s16220_s23  ;;  %p16226_p2 = scmp.lt.s32.totalorder %s16220_s23, %s16220_s23 }
   0xc   :  { %p16227_p3 = por %p16226_p2, %p16225_p1 }
   0xe   :  { %p16228_p4 = pnand %p16227_p3, %p16221_p0 }
  0x10   :  { %16231 = shalt.err (!%p16228_p4)
}
  0x11   :  { %s16489_s24 = smov 512   ;;  %s16490_s25 = smov 32  }
  0x12   :  { %46 = dma.hbm_to_vmem [thread:$0]  %s19882_s1, 16384, %s41_s22, [#allocation12], %s16489_s24, %s16489_s24, %s16490_s25  }
  0x13   :  { %s16491_s28 = smov [#allocation14]   ;;  %s16492_s30 = smov [#allocation17]  }
  0x14   :  { %s63_s29 = sshll.u32 %s16491_s28, 4  ;;  %s85_s13 = sshll.u32 %s16492_s30, 4  ;;  %s64_s29 = int_to_ptr.vmem [resolvable:$true] %s63_s29  ;;  %s86_s13 = int_to_ptr.vmem [resolvable:$true] %s85_s13 }
  0x15   :  { %s16240_s14 = scalar_lea.vmem %s64_s29, 128  ;;  %p16245_p6 = scmp.lt.s32.totalorder %s64_s29, %s64_s29 }
  0x16   :  { %p16241_p5 = scmp.ne.s32.totalorder %s64_s29, %s16240_s14  ;;  %p16246_p7 = scmp.lt.s32.totalorder %s16240_s14, %s16240_s14 }
  0x18   :  { %p16247_p8 = por %p16246_p7, %p16245_p6 }
  0x1a   :  { %p16248_p9 = pnand %p16247_p8, %p16241_p5 }
  0x1c   :  { %16251 = shalt.err (!%p16248_p9)
}
  0x1d   :  { %66 = dma.hbm_to_vmem [thread:$0]  %s19884_s3, 128, %s64_s29, [#allocation15]  }
  0x1e   :  { %s16260_s17 = scalar_lea.vmem %s86_s13, 128  ;;  %p16265_p11 = scmp.lt.s32.totalorder %s86_s13, %s86_s13 }
  0x1f   :  { %p16261_p10 = scmp.ne.s32.totalorder %s86_s13, %s16260_s17  ;;  %p16266_p12 = scmp.lt.s32.totalorder %s16260_s17, %s16260_s17 }
  0x21   :  { %p16267_p13 = por %p16266_p12, %p16265_p11 }
  0x23   :  { %p16268_p0 = pnand %p16267_p13, %p16261_p10 }
  0x25   :  { %16271 = shalt.err (!%p16268_p0)
}
  0x26   :  { %88 = dma.hbm_to_vmem [thread:$0]  %s19886_s5, 128, %s86_s13, [#allocation18]  }
  0x27   :  { %s16493_s19 = smov [#allocation20]   ;;  %s16494_s21 = smov [#allocation23]  }
  0x28   :  { %s107_s20 = sshll.u32 %s16493_s19, 4  ;;  %s129_s22 = sshll.u32 %s16494_s21, 4  ;;  %s108_s20 = int_to_ptr.vmem [resolvable:$true] %s107_s20  ;;  %s130_s22 = int_to_ptr.vmem [resolvable:$true] %s129_s22 }
  0x29   :  { %s16280_s23 = scalar_lea.vmem %s108_s20, 128  ;;  %p16285_p2 = scmp.lt.s32.totalorder %s108_s20, %s108_s20 }
  0x2a   :  { %p16281_p1 = scmp.ne.s32.totalorder %s108_s20, %s16280_s23  ;;  %p16286_p3 = scmp.lt.s32.totalorder %s16280_s23, %s16280_s23 }
  0x2c   :  { %p16287_p4 = por %p16286_p3, %p16285_p2 }
  0x2e   :  { %p16288_p5 = pnand %p16287_p4, %p16281_p1 }
  0x30   :  { %16291 = shalt.err (!%p16288_p5)
}
  0x31   :  { %110 = dma.hbm_to_vmem [thread:$0]  %s19888_s7, 128, %s108_s20, [#allocation21]  }
  0x32   :  { %s16300_s27 = scalar_lea.vmem %s130_s22, 32  ;;  %p16305_p7 = scmp.lt.s32.totalorder %s130_s22, %s130_s22 }
  0x33   :  { %p16301_p6 = scmp.ne.s32.totalorder %s130_s22, %s16300_s27  ;;  %p16306_p8 = scmp.lt.s32.totalorder %s16300_s27, %s16300_s27 }
  0x35   :  { %p16307_p9 = por %p16306_p8, %p16305_p7 }
  0x37   :  { %p16308_p10 = pnand %p16307_p9, %p16301_p6 }
  0x39   :  { %16311 = shalt.err (!%p16308_p10)
}
  0x3a   :  { %132 = dma.hbm_to_vmem [thread:$0]  %s19890_s9, 32, %s130_s22, [#allocation24]  }
  0x3b   :  { %s16495_s29 = smov [#allocation8]   ;;  %s16496_s13 = smov [#allocation13]  }
  0x3c   :  { %s31_s30 = sshll.u32 %s16495_s29, 4  ;;  %s53_s14 = sshll.u32 %s16496_s13, 4  ;;  %s32_s30 = int_to_ptr.vmem [resolvable:$true] %s31_s30  ;;  %s54_s14 = int_to_ptr.vmem [resolvable:$true] %s53_s14 }
  0x3d   :  { %s16320_s15 = scalar_lea.vmem %s32_s30, 256  ;;  %p16325_p12 = scmp.lt.s32.totalorder %s32_s30, %s32_s30 }
  0x3e   :  { %p16321_p11 = scmp.ne.s32.totalorder %s32_s30, %s16320_s15  ;;  %p16326_p13 = scmp.lt.s32.totalorder %s16320_s15, %s16320_s15 }
  0x40   :  { %p16327_p0 = por %p16326_p13, %p16325_p12 }
  0x42   :  { %p16328_p1 = pnand %p16327_p0, %p16321_p11 }
  0x44   :  { %16331 = shalt.err (!%p16328_p1)
}
  0x45   :  { %34 = dma.hbm_to_vmem [thread:$0]  %s19881_s0, 256, %s32_s30, [#allocation9]  }
  0x46   :  { %s16340_s17 = scalar_lea.vmem %s54_s14, 128  ;;  %p16345_p3 = scmp.lt.s32.totalorder %s54_s14, %s54_s14 }
  0x47   :  { %p16341_p2 = scmp.ne.s32.totalorder %s54_s14, %s16340_s17  ;;  %p16346_p4 = scmp.lt.s32.totalorder %s16340_s17, %s16340_s17 }
  0x49   :  { %p16347_p5 = por %p16346_p4, %p16345_p3 }
  0x4b   :  { %p16348_p6 = pnand %p16347_p5, %p16341_p2 }
  0x4d   :  { %16351 = shalt.err (!%p16348_p6)
}
  0x4e   :  { %56 = dma.hbm_to_vmem [thread:$0]  %s19883_s2, 128, %s54_s14, [#allocation12]  }
  0x4f   :  { %s16497_s18 = smov [#allocation16]   ;;  %s16498_s20 = smov [#allocation19]  }
  0x50   :  { %s72_s19 = sshll.u32 %s16497_s18, 4  ;;  %s94_s21 = sshll.u32 %s16498_s20, 4  ;;  %s73_s19 = int_to_ptr.vmem [resolvable:$true] %s72_s19  ;;  %s95_s21 = int_to_ptr.vmem [resolvable:$true] %s94_s21 }
  0x51   :  { %s16360_s22 = scalar_lea.vmem %s73_s19, 8192  ;;  %p16365_p8 = scmp.lt.s32.totalorder %s73_s19, %s73_s19 }
  0x52   :  { %p16361_p7 = scmp.ne.s32.totalorder %s73_s19, %s16360_s22  ;;  %p16366_p9 = scmp.lt.s32.totalorder %s16360_s22, %s16360_s22 }
  0x54   :  { %p16367_p10 = por %p16366_p9, %p16365_p8 }
  0x56   :  { %p16368_p11 = pnand %p16367_p10, %p16361_p7 }
  0x58   :  { %16371 = shalt.err (!%p16368_p11)
}
  0x59   :  { %78 = dma.hbm_to_vmem [thread:$0]  %s19885_s4, 8192, %s73_s19, [#allocation15], %s16489_s24, %s16489_s24, %s16490_s25  }
  0x5a   :  { %s16380_s2 = scalar_lea.vmem %s95_s21, 65536  ;;  %p16385_p13 = scmp.lt.s32.totalorder %s95_s21, %s95_s21 }
  0x5b   :  { %p16381_p12 = scmp.ne.s32.totalorder %s95_s21, %s16380_s2  ;;  %p16386_p0 = scmp.lt.s32.totalorder %s16380_s2, %s16380_s2 }
  0x5d   :  { %p16387_p1 = por %p16386_p0, %p16385_p13 }
  0x5f   :  { %p16388_p2 = pnand %p16387_p1, %p16381_p12 }
  0x61   :  { %16391 = shalt.err (!%p16388_p2)
}
  0x62   :  { %100 = dma.hbm_to_vmem [thread:$0]  %s19887_s6, 65536, %s95_s21, [#allocation18], %s16489_s24, %s16489_s24, %s16490_s25  }
  0x63   :  { %s16499_s27 = smov [#allocation22]  }
  0x64   :  { %s116_s5 = sshll.u32 %s16499_s27, 4  ;;  %s117_s5 = int_to_ptr.vmem [resolvable:$true] %s116_s5 }
  0x65   :  { %s16400_s28 = scalar_lea.vmem %s117_s5, 16384  ;;  %p16405_p4 = scmp.lt.s32.totalorder %s117_s5, %s117_s5 }
  0x66   :  { %p16401_p3 = scmp.ne.s32.totalorder %s117_s5, %s16400_s28  ;;  %p16406_p5 = scmp.lt.s32.totalorder %s16400_s28, %s16400_s28 }
  0x68   :  { %p16407_p6 = por %p16406_p5, %p16405_p4 }
  0x6a   :  { %p16408_p7 = pnand %p16407_p6, %p16401_p3 }
  0x6c   :  { %16411 = shalt.err (!%p16408_p7)
}
  0x6d   :  { %s16500_s4 = smov 128   ;;  %s16501_s29 = smov 8  }
  0x6e   :  { %122 = dma.hbm_to_vmem [thread:$0]  %s19889_s8, 16384, %s117_s5, [#allocation21], %s16500_s4, %s16500_s4, %s16501_s29  }
  0x6f   :  { %s16502_s14 = smov [#allocation25]  }
  0x70   :  { %s138_s15 = sshll.u32 %s16502_s14, 4  ;;  %s139_s15 = int_to_ptr.vmem [resolvable:$true] %s138_s15 }
  0x71   :  { %s16420_s6 = scalar_lea.vmem %s139_s15, 2048  ;;  %p16425_p9 = scmp.lt.s32.totalorder %s139_s15, %s139_s15 }
  0x72   :  { %p16421_p8 = scmp.ne.s32.totalorder %s139_s15, %s16420_s6  ;;  %p16426_p10 = scmp.lt.s32.totalorder %s16420_s6, %s16420_s6 }
  0x74   :  { %p16427_p11 = por %p16426_p10, %p16425_p9 }
  0x76   :  { %p16428_p12 = pnand %p16427_p11, %p16421_p8 }
  0x78   :  { %16431 = shalt.err (!%p16428_p12)
}
  0x79   :  { %s16503_s24 = smov 64   ;;  %s16504_s7 = smov 4  }
  0x7a   :  { %144 = dma.hbm_to_vmem [thread:$0]  %s19891_s10, 2048, %s139_s15, [#allocation24], %s16503_s24, %s16503_s24, %s16504_s7  }
  0x7b   :  { %s16505_s9 = smov [#allocation26]  }
  0x7c   :  { %s151_s8 = sshll.u32 %s16505_s9, 4  ;;  %s152_s8 = int_to_ptr.vmem [resolvable:$true] %s151_s8 }
  0x7d   :  { %s16440_s1 = scalar_lea.vmem %s152_s8, 16  ;;  %s16444_s18 = scalar_lea.vmem %s152_s8, 32 }
  0x7e   :  { %p16441_p13 = scmp.ne.s32.totalorder %s152_s8, %s16440_s1  ;;  %p16445_p0 = scmp.lt.s32.totalorder %s152_s8, %s152_s8 }
  0x7f   :  { %p16446_p1 = scmp.lt.s32.totalorder %s16444_s18, %s16440_s1 }
  0x81   :  { %p16447_p2 = por %p16446_p1, %p16445_p0 }
  0x83   :  { %p16448_p3 = pnand %p16447_p2, %p16441_p13 }
  0x85   :  { %16451 = shalt.err (!%p16448_p3)
}
  0x86   :  { %154 = dma.hbm_to_vmem [thread:$0]  %s19892_s11, 16, %s152_s8, [#allocation27]  }
  0x87   :  { %16472 = dma.done.wait [#allocation9], 256  }
  0x88   :  { %16473 = vsyncadd [#allocation9], 4294967040 }
  0x89   :  { %16474 = dma.done.wait [#allocation12], 16512  }
  0x8a   :  { %16475 = vsyncadd [#allocation12], 4294950784 }
  0x8b   :  { %16476 = dma.done.wait [#allocation15], 8320  }
  0x8c   :  { %16477 = vsyncadd [#allocation15], 4294958976 }
  0x8d   :  { %16478 = dma.done.wait [#allocation18], 65664  }
  0x8e   :  { %16479 = vsyncadd [#allocation18], 4294901632 }
  0x8f   :  { %16480 = dma.done.wait [#allocation21], 16512  }
  0x90   :  { %16481 = vsyncadd [#allocation21], 4294950784 }
  0x91   :  { %16482 = dma.done.wait [#allocation24], 2080  }
  0x92   :  { %16483 = vsyncadd [#allocation24], 4294965216 }
  0x93   :  { %16484 = dma.done.wait [#allocation27], 16  }
  0x94   :  { %16485 = vsyncadd [#allocation27], 4294967280  ;;  %v254_v0 = vld [vmem:[#allocation11 + $0x1c0] sm:$0xff]  ;;  %v255_v2 = vld [vmem:[#allocation11 + $0x1c8] sm:$0xff]  ;;  %vm1837_vm0 = vcmask 253952   ;;  %s16508_s10 = smov 96  }
  0x95   :  { %v258_v1 = vld [vmem:[#allocation11 + $0x1e0] sm:$0xff]  ;;  %v259_v4 = vld [vmem:[#allocation11 + $0x1e8] sm:$0xff]  ;;  %v193_v53 = vld [vmem:[#allocation8 + $0x8] sm:$0xff]  ;;  %vm8467_vm1 = vcmask 261120   ;;  %vm8957_vm2 = vcmask 1041409   ;;  %vm8960_vm3 = vcmask 1042434  }
  0x96   :  { %v15053_v3 = vcombine.high %v254_v0, %v258_v1  ;;  %v15052_v5 = vcombine.low %v254_v0, %v258_v1  ;;  %v246_v6 = vld [vmem:[#allocation11 + $0x180] sm:$0xff]  ;;  %v15055_v8 = vcombine.high %v255_v2, %v259_v4  ;;  %v15054_v9 = vcombine.low %v255_v2, %v259_v4  ;;  %v247_v11 = vld [vmem:[#allocation11 + $0x188] sm:$0xff]  ;;  %s16509_s11 = smov [#allocation28]  }
  0x97   :  { %v250_v7 = vld [vmem:[#allocation11 + $0x1a0] sm:$0xff]  ;;  %v251_v12 = vld [vmem:[#allocation11 + $0x1a8] sm:$0xff]  ;;  %v16622_v57 = vpack.c.bf16 %v193_v53, %v193_v53  ;;  %vm8963_vm4 = vcmask 1043459   ;;  %vm8966_vm5 = vcmask 1044484   ;;  %vm8969_vm6 = vcmask 1045509  }
  0x98   :  { %v15045_v10 = vcombine.high %v246_v6, %v250_v7  ;;  %v238_v13 = vld [vmem:[#allocation11 + $0x140] sm:$0xff]  ;;  %1008 = vmatprep.subr.bf16.mxu0 %v15053_v3  ;;  %v15047_v14 = vcombine.high %v247_v11, %v251_v12  ;;  %v239_v16 = vld [vmem:[#allocation11 + $0x148] sm:$0xff]  ;;  %1049 = vmatprep.subr.bf16.mxu1 %v15055_v8  ;;  %v15044_v18 = vcombine.low %v246_v6, %v250_v7  ;;  %vm8972_vm7 = vcmask 1046534  }
  0x99   :  { %v242_v15 = vld [vmem:[#allocation11 + $0x160] sm:$0xff]  ;;  %v243_v17 = vld [vmem:[#allocation11 + $0x168] sm:$0xff]  ;;  %1009 = vmatpush1.bf16.msra.mxu0 %v15052_v5  ;;  %1050 = vmatpush1.bf16.msra.mxu1 %v15054_v9  ;;  %v15046_v19 = vcombine.low %v247_v11, %v251_v12  ;;  %vm8975_vm8 = vcmask 1047559   ;;  %vm9012_vm9 = vcmask 523520   ;;  %vm9047_vm10 = vcmask 785920  }
  0x9a   :  { %1010 = vmatprep.subr.bf16.mxu0 %v15045_v10  ;;  %v15037_v20 = vcombine.high %v238_v13, %v242_v15  ;;  %1051 = vmatprep.subr.bf16.mxu1 %v15047_v14  ;;  %v15039_v21 = vcombine.high %v239_v16, %v243_v17  ;;  %v230_v22 = vld [vmem:[#allocation11 + $0x100] sm:$0xff]  ;;  %v231_v24 = vld [vmem:[#allocation11 + $0x108] sm:$0xff]  ;;  %v15036_v26 = vcombine.low %v238_v13, %v242_v15  ;;  %vm9082_vm11 = vcmask 1048320  }
  0x9b   :  { %v234_v23 = vld [vmem:[#allocation11 + $0x120] sm:$0xff]  ;;  %v235_v25 = vld [vmem:[#allocation11 + $0x128] sm:$0xff]  ;;  %v15038_v27 = vcombine.low %v239_v16, %v243_v17  ;;  %1040 = vmatprep.mubr.bf16.mxu0 %v16622_v57  ;;  %1081 = vmatprep.mubr.bf16.mxu1 %v16622_v57 }
  0x9c   :  { %v15029_v28 = vcombine.high %v230_v22, %v234_v23  ;;  %v15031_v29 = vcombine.high %v231_v24, %v235_v25  ;;  %v222_v30 = vld [vmem:[#allocation11 + $0xc0] sm:$0xff]  ;;  %v223_v32 = vld [vmem:[#allocation11 + $0xc8] sm:$0xff]  ;;  %v15028_v34 = vcombine.low %v230_v22, %v234_v23  ;;  %v15030_v35 = vcombine.low %v231_v24, %v235_v25 }
  0x9d   :  { %1011 = vmatpush1.bf16.msra.mxu0 %v15044_v18  ;;  %1052 = vmatpush1.bf16.msra.mxu1 %v15046_v19  ;;  %v226_v31 = vld [vmem:[#allocation11 + $0xe0] sm:$0xff]  ;;  %v227_v33 = vld [vmem:[#allocation11 + $0xe8] sm:$0xff] }
  0x9e   :  { %1012 = vmatprep.subr.bf16.mxu0 %v15037_v20  ;;  %1053 = vmatprep.subr.bf16.mxu1 %v15039_v21  ;;  %v15021_v36 = vcombine.high %v222_v30, %v226_v31  ;;  %v15023_v37 = vcombine.high %v223_v32, %v227_v33  ;;  %v214_v38 = vld [vmem:[#allocation11 + $0x80] sm:$0xff]  ;;  %v215_v40 = vld [vmem:[#allocation11 + $0x88] sm:$0xff]  ;;  %v15020_v42 = vcombine.low %v222_v30, %v226_v31 }
  0x9f   :  { %v218_v39 = vld [vmem:[#allocation11 + $0xa0] sm:$0xff]  ;;  %v219_v41 = vld [vmem:[#allocation11 + $0xa8] sm:$0xff]  ;;  %v15022_v43 = vcombine.low %v223_v32, %v227_v33 }
  0xa0   :  { %v15013_v44 = vcombine.high %v214_v38, %v218_v39  ;;  %v15015_v45 = vcombine.high %v215_v40, %v219_v41  ;;  %v206_v46 = vld [vmem:[#allocation11 + $0x40] sm:$0xff]  ;;  %v207_v48 = vld [vmem:[#allocation11 + $0x48] sm:$0xff]  ;;  %v15012_v50 = vcombine.low %v214_v38, %v218_v39  ;;  %v15014_v51 = vcombine.low %v215_v40, %v219_v41 }
  0xa1   :  { %1013 = vmatpush1.bf16.msra.mxu0 %v15036_v26  ;;  %1054 = vmatpush1.bf16.msra.mxu1 %v15038_v27  ;;  %v210_v47 = vld [vmem:[#allocation11 + $0x60] sm:$0xff]  ;;  %v211_v49 = vld [vmem:[#allocation11 + $0x68] sm:$0xff] }
  0xa2   :  { %1014 = vmatprep.subr.bf16.mxu0 %v15029_v28  ;;  %1055 = vmatprep.subr.bf16.mxu1 %v15031_v29  ;;  %v15005_v52 = vcombine.high %v206_v46, %v210_v47  ;;  %v15007_v54 = vcombine.high %v207_v48, %v211_v49  ;;  %v198_v55 = vld [vmem:[#allocation11] sm:$0xff]  ;;  %v199_v58 = vld [vmem:[#allocation11 + $0x8] sm:$0xff]  ;;  %v15004_v60 = vcombine.low %v206_v46, %v210_v47 }
  0xa3   :  { %v202_v56 = vld [vmem:[#allocation11 + $0x20] sm:$0xff]  ;;  %v203_v59 = vld [vmem:[#allocation11 + $0x28] sm:$0xff]  ;;  %v15006_v61 = vcombine.low %v207_v48, %v211_v49 }
  0xa4   :  { %v14997_v62 = vcombine.high %v198_v55, %v202_v56  ;;  %v14999_v63 = vcombine.high %v199_v58, %v203_v59  ;;  %v318_v0 = vld [vmem:[#allocation11 + $0x3c0] sm:$0xff]  ;;  %v319_v2 = vld [vmem:[#allocation11 + $0x3c8] sm:$0xff]  ;;  %v14996_v4 = vcombine.low %v198_v55, %v202_v56  ;;  %v14998_v5 = vcombine.low %v199_v58, %v203_v59 }
  0xa5   :  { %1015 = vmatpush1.bf16.msra.mxu0 %v15028_v34  ;;  %1056 = vmatpush1.bf16.msra.mxu1 %v15030_v35  ;;  %v322_v1 = vld [vmem:[#allocation11 + $0x3e0] sm:$0xff]  ;;  %v323_v3 = vld [vmem:[#allocation11 + $0x3e8] sm:$0xff] }
  0xa6   :  { %1016 = vmatprep.subr.bf16.mxu0 %v15021_v36  ;;  %1057 = vmatprep.subr.bf16.mxu1 %v15023_v37  ;;  %v15117_v6 = vcombine.high %v318_v0, %v322_v1  ;;  %v15119_v7 = vcombine.high %v319_v2, %v323_v3  ;;  %v310_v8 = vld [vmem:[#allocation11 + $0x380] sm:$0xff]  ;;  %v311_v10 = vld [vmem:[#allocation11 + $0x388] sm:$0xff]  ;;  %v15116_v12 = vcombine.low %v318_v0, %v322_v1  ;;  %v256_v1 = vld [vmem:[#allocation11 + $0x1d0] sm:$0xff] }
  0xa7   :  { %v314_v9 = vld [vmem:[#allocation11 + $0x3a0] sm:$0xff]  ;;  %v315_v11 = vld [vmem:[#allocation11 + $0x3a8] sm:$0xff]  ;;  %v15118_v13 = vcombine.low %v319_v2, %v323_v3  ;;  %v260_v2 = vld [vmem:[#allocation11 + $0x1f0] sm:$0xff] }
  0xa8   :  { %v15109_v14 = vcombine.high %v310_v8, %v314_v9  ;;  %v15111_v15 = vcombine.high %v311_v10, %v315_v11  ;;  %v302_v16 = vld [vmem:[#allocation11 + $0x340] sm:$0xff]  ;;  %v303_v18 = vld [vmem:[#allocation11 + $0x348] sm:$0xff]  ;;  %v15108_v20 = vcombine.low %v310_v8, %v314_v9  ;;  %v15110_v21 = vcombine.low %v311_v10, %v315_v11  ;;  %v257_v3 = vld [vmem:[#allocation11 + $0x1d8] sm:$0xff] }
  0xa9   :  { %1017 = vmatpush1.bf16.msra.mxu0 %v15020_v42  ;;  %1058 = vmatpush1.bf16.msra.mxu1 %v15022_v43  ;;  %v306_v17 = vld [vmem:[#allocation11 + $0x360] sm:$0xff]  ;;  %v307_v19 = vld [vmem:[#allocation11 + $0x368] sm:$0xff]  ;;  %v15057_v8 = vcombine.high %v256_v1, %v260_v2  ;;  %v248_v10 = vld [vmem:[#allocation11 + $0x190] sm:$0xff] }
  0xaa   :  { %1018 = vmatprep.subr.bf16.mxu0 %v15013_v44  ;;  %1059 = vmatprep.subr.bf16.mxu1 %v15015_v45  ;;  %v15101_v22 = vcombine.high %v302_v16, %v306_v17  ;;  %v15103_v23 = vcombine.high %v303_v18, %v307_v19  ;;  %v294_v24 = vld [vmem:[#allocation11 + $0x300] sm:$0xff]  ;;  %v295_v26 = vld [vmem:[#allocation11 + $0x308] sm:$0xff]  ;;  %v15100_v28 = vcombine.low %v302_v16, %v306_v17  ;;  %v252_v11 = vld [vmem:[#allocation11 + $0x1b0] sm:$0xff] }
  0xab   :  { %v298_v25 = vld [vmem:[#allocation11 + $0x320] sm:$0xff]  ;;  %v299_v27 = vld [vmem:[#allocation11 + $0x328] sm:$0xff]  ;;  %v15102_v29 = vcombine.low %v303_v18, %v307_v19  ;;  %v240_v16 = vld [vmem:[#allocation11 + $0x150] sm:$0xff]  ;;  %v15049_v19 = vcombine.high %v248_v10, %v252_v11 }
  0xac   :  { %v15093_v30 = vcombine.high %v294_v24, %v298_v25  ;;  %v15095_v31 = vcombine.high %v295_v26, %v299_v27  ;;  %v286_v32 = vld [vmem:[#allocation11 + $0x2c0] sm:$0xff]  ;;  %v287_v34 = vld [vmem:[#allocation11 + $0x2c8] sm:$0xff]  ;;  %v15092_v36 = vcombine.low %v294_v24, %v298_v25  ;;  %v15094_v37 = vcombine.low %v295_v26, %v299_v27  ;;  %v244_v17 = vld [vmem:[#allocation11 + $0x170] sm:$0xff] }
  0xad   :  { %1019 = vmatpush1.bf16.msra.mxu0 %v15012_v50  ;;  %1060 = vmatpush1.bf16.msra.mxu1 %v15014_v51  ;;  %v290_v33 = vld [vmem:[#allocation11 + $0x2e0] sm:$0xff]  ;;  %v291_v35 = vld [vmem:[#allocation11 + $0x2e8] sm:$0xff]  ;;  %v232_v24 = vld [vmem:[#allocation11 + $0x110] sm:$0xff]  ;;  %v15041_v27 = vcombine.high %v240_v16, %v244_v17 }
  0xae   :  { %1020 = vmatprep.subr.bf16.mxu0 %v15005_v52  ;;  %1061 = vmatprep.subr.bf16.mxu1 %v15007_v54  ;;  %v15085_v38 = vcombine.high %v286_v32, %v290_v33  ;;  %v15087_v39 = vcombine.high %v287_v34, %v291_v35  ;;  %v278_v40 = vld [vmem:[#allocation11 + $0x280] sm:$0xff]  ;;  %v279_v42 = vld [vmem:[#allocation11 + $0x288] sm:$0xff]  ;;  %v15084_v44 = vcombine.low %v286_v32, %v290_v33  ;;  %v236_v25 = vld [vmem:[#allocation11 + $0x130] sm:$0xff] }
  0xaf   :  { %v282_v41 = vld [vmem:[#allocation11 + $0x2a0] sm:$0xff]  ;;  %v283_v43 = vld [vmem:[#allocation11 + $0x2a8] sm:$0xff]  ;;  %v15086_v45 = vcombine.low %v287_v34, %v291_v35  ;;  %v224_v32 = vld [vmem:[#allocation11 + $0xd0] sm:$0xff]  ;;  %v15033_v35 = vcombine.high %v232_v24, %v236_v25 }
  0xb0   :  { %v15077_v46 = vcombine.high %v278_v40, %v282_v41  ;;  %v15079_v47 = vcombine.high %v279_v42, %v283_v43  ;;  %v270_v48 = vld [vmem:[#allocation11 + $0x240] sm:$0xff]  ;;  %v271_v50 = vld [vmem:[#allocation11 + $0x248] sm:$0xff]  ;;  %v15076_v52 = vcombine.low %v278_v40, %v282_v41  ;;  %v15078_v53 = vcombine.low %v279_v42, %v283_v43  ;;  %v228_v33 = vld [vmem:[#allocation11 + $0xf0] sm:$0xff] }
  0xb1   :  { %1021 = vmatpush1.bf16.msra.mxu0 %v15004_v60  ;;  %1062 = vmatpush1.bf16.msra.mxu1 %v15006_v61  ;;  %v274_v49 = vld [vmem:[#allocation11 + $0x260] sm:$0xff]  ;;  %v275_v51 = vld [vmem:[#allocation11 + $0x268] sm:$0xff]  ;;  %v216_v40 = vld [vmem:[#allocation11 + $0x90] sm:$0xff] }
  0xb2   :  { %1022 = vmatprep.subr.bf16.mxu0 %v14997_v62  ;;  %1063 = vmatprep.subr.bf16.mxu1 %v14999_v63  ;;  %v15069_v54 = vcombine.high %v270_v48, %v274_v49  ;;  %v15071_v55 = vcombine.high %v271_v50, %v275_v51  ;;  %v262_v56 = vld [vmem:[#allocation11 + $0x200] sm:$0xff]  ;;  %v263_v59 = vld [vmem:[#allocation11 + $0x208] sm:$0xff]  ;;  %v15068_v61 = vcombine.low %v270_v48, %v274_v49  ;;  %v220_v41 = vld [vmem:[#allocation11 + $0xb0] sm:$0xff] }
  0xb3   :  { %v266_v58 = vld [vmem:[#allocation11 + $0x220] sm:$0xff]  ;;  %v267_v60 = vld [vmem:[#allocation11 + $0x228] sm:$0xff]  ;;  %v15070_v62 = vcombine.low %v271_v50, %v275_v51  ;;  %v217_v43 = vld [vmem:[#allocation11 + $0x98] sm:$0xff]  ;;  %v15017_v50 = vcombine.high %v216_v40, %v220_v41 }
  0xb4   :  { %v15061_v63 = vcombine.high %v262_v56, %v266_v58  ;;  %v15063_v0 = vcombine.high %v263_v59, %v267_v60  ;;  %v212_v48 = vld [vmem:[#allocation11 + $0x70] sm:$0xff]  ;;  %v209_v51 = vld [vmem:[#allocation11 + $0x58] sm:$0xff] }
  0xb5   :  { %1023 = vmatpush1.bf16.msra.mxu0 %v14996_v4  ;;  %1064 = vmatpush1.bf16.msra.mxu1 %v14998_v5  ;;  %v261_v4 = vld [vmem:[#allocation11 + $0x1f8] sm:$0xff]  ;;  %v15060_v5 = vcombine.low %v262_v56, %v266_v58  ;;  %v204_v56 = vld [vmem:[#allocation11 + $0x30] sm:$0xff] }
  0xb6   :  { %1024 = vmatprep.subr.bf16.mxu0 %v15117_v6  ;;  %1065 = vmatprep.subr.bf16.mxu1 %v15119_v7  ;;  %v192_v6 = vld [vmem:[#allocation8] sm:$0xff]  ;;  %v15062_v7 = vcombine.low %v263_v59, %v267_v60  ;;  %v15059_v9 = vcombine.high %v257_v3, %v261_v4  ;;  %v15058_v18 = vcombine.low %v257_v3, %v261_v4  ;;  %v201_v60 = vld [vmem:[#allocation11 + $0x18] sm:$0xff] }
  0xb7   :  { %v321_v4 = vld [vmem:[#allocation11 + $0x3d8] sm:$0xff] }
  0xb9   :  { %1025 = vmatpush2.bf16.msra.mxu0 %v15116_v12  ;;  %1066 = vmatpush2.bf16.msra.mxu1 %v15118_v13  ;;  %v16626_v12 = vpack.c.bf16 %v192_v6, %v192_v6  ;;  %v249_v13 = vld [vmem:[#allocation11 + $0x198] sm:$0xff] }
  0xba   :  { %1026 = vmatprep.subr.bf16.mxu0 %v15109_v14  ;;  %1067 = vmatprep.subr.bf16.mxu1 %v15111_v15  ;;  %v253_v14 = vld [vmem:[#allocation11 + $0x1b8] sm:$0xff]  ;;  %v15056_v15 = vcombine.low %v256_v1, %v260_v2  ;;  %v324_v1 = vld [vmem:[#allocation11 + $0x3f0] sm:$0xff] }
  0xbb   :  { %v15050_v26 = vcombine.low %v249_v13, %v253_v14 }
  0xbd   :  { %1027 = vmatpush2.bf16.msra.mxu0 %v15108_v20  ;;  %1068 = vmatpush2.bf16.msra.mxu1 %v15110_v21  ;;  %v15051_v20 = vcombine.high %v249_v13, %v253_v14  ;;  %v241_v21 = vld [vmem:[#allocation11 + $0x158] sm:$0xff] }
  0xbe   :  { %1028 = vmatprep.subr.bf16.mxu0 %v15101_v22  ;;  %1069 = vmatprep.subr.bf16.mxu1 %v15103_v23  ;;  %v245_v22 = vld [vmem:[#allocation11 + $0x178] sm:$0xff]  ;;  %v15048_v23 = vcombine.low %v248_v10, %v252_v11 }
  0xbf   :  { %v15042_v34 = vcombine.low %v241_v21, %v245_v22  ;;  %v313_v13 = vld [vmem:[#allocation11 + $0x398] sm:$0xff] }
  0xc0   :  { %v317_v14 = vld [vmem:[#allocation11 + $0x3b8] sm:$0xff] }
  0xc1   :  { %1029 = vmatpush2.bf16.msra.mxu0 %v15100_v28  ;;  %1070 = vmatpush2.bf16.msra.mxu1 %v15102_v29  ;;  %v233_v28 = vld [vmem:[#allocation11 + $0x118] sm:$0xff] }
  0xc2   :  { %1030 = vmatprep.subr.bf16.mxu0 %v15093_v30  ;;  %1071 = vmatprep.subr.bf16.mxu1 %v15095_v31  ;;  %v237_v29 = vld [vmem:[#allocation11 + $0x138] sm:$0xff]  ;;  %v15043_v30 = vcombine.high %v241_v21, %v245_v22  ;;  %v15040_v31 = vcombine.low %v240_v16, %v244_v17  ;;  %v304_v17 = vld [vmem:[#allocation11 + $0x350] sm:$0xff] }
  0xc3   :  { %v15034_v42 = vcombine.low %v233_v28, %v237_v29  ;;  %v305_v21 = vld [vmem:[#allocation11 + $0x358] sm:$0xff] }
  0xc4   :  { %v309_v22 = vld [vmem:[#allocation11 + $0x378] sm:$0xff] }
  0xc5   :  { %1031 = vmatpush2.bf16.msra.mxu0 %v15092_v36  ;;  %1072 = vmatpush2.bf16.msra.mxu1 %v15094_v37  ;;  %v225_v36 = vld [vmem:[#allocation11 + $0xd8] sm:$0xff] }
  0xc6   :  { %1032 = vmatprep.subr.bf16.mxu0 %v15085_v38  ;;  %1073 = vmatprep.subr.bf16.mxu1 %v15087_v39  ;;  %v229_v37 = vld [vmem:[#allocation11 + $0xf8] sm:$0xff]  ;;  %v15035_v38 = vcombine.high %v233_v28, %v237_v29  ;;  %v15032_v39 = vcombine.low %v232_v24, %v236_v25  ;;  %v296_v25 = vld [vmem:[#allocation11 + $0x310] sm:$0xff] }
  0xc7   :  { %v15026_v49 = vcombine.low %v225_v36, %v229_v37  ;;  %v297_v29 = vld [vmem:[#allocation11 + $0x318] sm:$0xff] }
  0xc9   :  { %1033 = vmatpush2.bf16.msra.mxu0 %v15084_v44  ;;  %1074 = vmatpush2.bf16.msra.mxu1 %v15086_v45  ;;  %v221_v44 = vld [vmem:[#allocation11 + $0xb8] sm:$0xff]  ;;  %v15027_v45 = vcombine.high %v225_v36, %v229_v37 }
  0xca   :  { %1034 = vmatprep.subr.bf16.mxu0 %v15077_v46  ;;  %1075 = vmatprep.subr.bf16.mxu1 %v15079_v47  ;;  %v15024_v46 = vcombine.low %v224_v32, %v228_v33  ;;  %v208_v47 = vld [vmem:[#allocation11 + $0x50] sm:$0xff]  ;;  %v15018_v58 = vcombine.low %v217_v43, %v221_v44  ;;  %v289_v37 = vld [vmem:[#allocation11 + $0x2d8] sm:$0xff] }
  0xcb   :  { %v15009_v59 = vcombine.high %v208_v47, %v212_v48 }
  0xcd   :  { %1035 = vmatpush2.bf16.msra.mxu0 %v15076_v52  ;;  %1076 = vmatpush2.bf16.msra.mxu1 %v15078_v53  ;;  %v213_v52 = vld [vmem:[#allocation11 + $0x78] sm:$0xff]  ;;  %v15019_v53 = vcombine.high %v217_v43, %v221_v44 }
  0xce   :  { %1036 = vmatprep.subr.bf16.mxu0 %v15069_v54  ;;  %1077 = vmatprep.subr.bf16.mxu1 %v15071_v55  ;;  %v15016_v54 = vcombine.low %v216_v40, %v220_v41  ;;  %v200_v55 = vld [vmem:[#allocation11 + $0x10] sm:$0xff]  ;;  %v15010_v2 = vcombine.low %v209_v51, %v213_v52  ;;  %v281_v44 = vld [vmem:[#allocation11 + $0x298] sm:$0xff] }
  0xcf   :  { %v15001_v3 = vcombine.high %v200_v55, %v204_v56  ;;  %v280_v41 = vld [vmem:[#allocation11 + $0x290] sm:$0xff] }
  0xd1   :  { %1037 = vmatpush2.bf16.msra.mxu0 %v15068_v61  ;;  %1078 = vmatpush2.bf16.msra.mxu1 %v15070_v62  ;;  %v205_v61 = vld [vmem:[#allocation11 + $0x38] sm:$0xff]  ;;  %v15011_v62 = vcombine.high %v209_v51, %v213_v52 }
  0xd2   :  { %1038 = vmatprep.subr.bf16.mxu0 %v15061_v63  ;;  %1079 = vmatprep.subr.bf16.mxu1 %v15063_v0  ;;  %v15008_v63 = vcombine.low %v208_v47, %v212_v48  ;;  %v320_v0 = vld [vmem:[#allocation11 + $0x3d0] sm:$0xff]  ;;  %v15003_v6 = vcombine.high %v201_v60, %v205_v61  ;;  %v15002_v10 = vcombine.low %v201_v60, %v205_v61  ;;  %v273_v52 = vld [vmem:[#allocation11 + $0x258] sm:$0xff] }
  0xd3   :  { %v15121_v11 = vcombine.high %v320_v0, %v324_v1  ;;  %v15120_v16 = vcombine.low %v320_v0, %v324_v1  ;;  %v272_v48 = vld [vmem:[#allocation11 + $0x250] sm:$0xff] }
  0xd4   :  { %v268_v61 = vld [vmem:[#allocation11 + $0x230] sm:$0xff] }
  0xd5   :  { %1039 = vmatpush2.bf16.msra.mxu0 %v15060_v5  ;;  %1080 = vmatpush2.bf16.msra.mxu1 %v15062_v7  ;;  %v325_v5 = vld [vmem:[#allocation11 + $0x3f8] sm:$0xff]  ;;  %v15000_v7 = vcombine.low %v200_v55, %v204_v56  ;;  %v264_v56 = vld [vmem:[#allocation11 + $0x210] sm:$0xff] }
  0xd6   :  { %1090 = vmatprep.subr.bf16.mxu0 %v15057_v8  ;;  %1131 = vmatprep.subr.bf16.mxu1 %v15059_v9  ;;  %v312_v8 = vld [vmem:[#allocation11 + $0x390] sm:$0xff] }
  0xd7   :  { %v316_v9 = vld [vmem:[#allocation11 + $0x3b0] sm:$0xff] }
  0xd8   :  { %1041 = vmatmul.mubr.bf16.vlgmr.msra.gmra.mxu0 %v16626_v12  ;;  %1082 = vmatmul.mubr.bf16.vlgmr.msra.gmra.mxu1 %v16626_v12  ;;  %v15112_v24 = vcombine.low %v312_v8, %v316_v9 }
  0xd9   :  { %1091 = vmatpush1.bf16.msra.mxu0 %v15056_v15  ;;  %1132 = vmatpush1.bf16.msra.mxu1 %v15058_v18  ;;  %v15123_v15 = vcombine.high %v321_v4, %v325_v5  ;;  %v308_v18 = vld [vmem:[#allocation11 + $0x370] sm:$0xff] }
  0xda   :  { %1092 = vmatprep.subr.bf16.mxu0 %v15049_v19  ;;  %1133 = vmatprep.subr.bf16.mxu1 %v15051_v20  ;;  %v15122_v19 = vcombine.low %v321_v4, %v325_v5  ;;  %v15113_v20 = vcombine.high %v312_v8, %v316_v9  ;;  %v15105_v28 = vcombine.high %v304_v17, %v308_v18  ;;  %v1236_v4 = vld [vmem:[#allocation16 + $0x1c0] sm:$0xff] }
  0xdb   :  { %1122 = vmatprep.mubr.bf16.mxu0 %v16622_v57  ;;  %1163 = vmatprep.mubr.bf16.mxu1 %v16622_v57  ;;  %v15025_v57 = vcombine.high %v224_v32, %v228_v33  ;;  %v15104_v32 = vcombine.low %v304_v17, %v308_v18  ;;  %v288_v33 = vld [vmem:[#allocation11 + $0x2d0] sm:$0xff]  ;;  %v15064_v8 = vcombine.low %v264_v56, %v268_v61 }
  0xdc   :  { %v1240_v5 = vld [vmem:[#allocation16 + $0x1e0] sm:$0xff] }
  0xdd   :  { %1093 = vmatpush1.bf16.msra.mxu0 %v15048_v23  ;;  %1134 = vmatpush1.bf16.msra.mxu1 %v15050_v26  ;;  %v15115_v23 = vcombine.high %v313_v13, %v317_v14  ;;  %v300_v26 = vld [vmem:[#allocation11 + $0x330] sm:$0xff]  ;;  %v15180_v17 = vcombine.low %v1236_v4, %v1240_v5 }
  0xde   :  { %1094 = vmatprep.subr.bf16.mxu0 %v15041_v27  ;;  %1135 = vmatprep.subr.bf16.mxu1 %v15043_v30  ;;  %v15114_v27 = vcombine.low %v313_v13, %v317_v14  ;;  %v301_v30 = vld [vmem:[#allocation11 + $0x338] sm:$0xff]  ;;  %v15097_v36 = vcombine.high %v296_v25, %v300_v26  ;;  %v15096_v40 = vcombine.low %v296_v25, %v300_v26  ;;  %v1228_v13 = vld [vmem:[#allocation16 + $0x180] sm:$0xff] }
  0xdf   :  { %v1232_v14 = vld [vmem:[#allocation16 + $0x1a0] sm:$0xff] }
  0xe0   :  { %v15172_v25 = vcombine.low %v1228_v13, %v1232_v14 }
  0xe1   :  { %1095 = vmatpush1.bf16.msra.mxu0 %v15040_v31  ;;  %1136 = vmatpush1.bf16.msra.mxu1 %v15042_v34  ;;  %v15107_v31 = vcombine.high %v305_v21, %v309_v22  ;;  %v292_v34 = vld [vmem:[#allocation11 + $0x2f0] sm:$0xff] }
  0xe2   :  { %1096 = vmatprep.subr.bf16.mxu0 %v15033_v35  ;;  %1137 = vmatprep.subr.bf16.mxu1 %v15035_v38  ;;  %v15106_v35 = vcombine.low %v305_v21, %v309_v22  ;;  %v293_v38 = vld [vmem:[#allocation11 + $0x2f8] sm:$0xff]  ;;  %v15089_v43 = vcombine.high %v288_v33, %v292_v34  ;;  %v15088_v47 = vcombine.low %v288_v33, %v292_v34  ;;  %v1220_v21 = vld [vmem:[#allocation16 + $0x140] sm:$0xff] }
  0xe3   :  { %v1224_v22 = vld [vmem:[#allocation16 + $0x160] sm:$0xff]  ;;  %v1217_v33 = vld [vmem:[#allocation16 + $0x128] sm:$0xff] }
  0xe4   :  { %v15164_v34 = vcombine.low %v1220_v21, %v1224_v22 }
  0xe5   :  { %1097 = vmatpush1.bf16.msra.mxu0 %v15032_v39  ;;  %1138 = vmatpush1.bf16.msra.mxu1 %v15034_v42  ;;  %v15099_v39 = vcombine.high %v297_v29, %v301_v30  ;;  %v284_v42 = vld [vmem:[#allocation11 + $0x2b0] sm:$0xff] }
  0xe6   :  { %1098 = vmatprep.subr.bf16.mxu0 %v15025_v57  ;;  %1139 = vmatprep.subr.bf16.mxu1 %v15027_v45  ;;  %v15098_v57 = vcombine.low %v297_v29, %v301_v30  ;;  %v285_v45 = vld [vmem:[#allocation11 + $0x2b8] sm:$0xff]  ;;  %v15081_v51 = vcombine.high %v280_v41, %v284_v42  ;;  %v15080_v55 = vcombine.low %v280_v41, %v284_v42  ;;  %v1212_v29 = vld [vmem:[#allocation16 + $0x100] sm:$0xff] }
  0xe7   :  { %v1216_v30 = vld [vmem:[#allocation16 + $0x120] sm:$0xff] }
  0xe8   :  { %v15156_v41 = vcombine.low %v1212_v29, %v1216_v30 }
  0xe9   :  { %1099 = vmatpush1.bf16.msra.mxu0 %v15024_v46  ;;  %1140 = vmatpush1.bf16.msra.mxu1 %v15026_v49  ;;  %v15091_v46 = vcombine.high %v289_v37, %v293_v38  ;;  %v276_v49 = vld [vmem:[#allocation11 + $0x270] sm:$0xff] }
  0xea   :  { %1100 = vmatprep.subr.bf16.mxu0 %v15017_v50  ;;  %1141 = vmatprep.subr.bf16.mxu1 %v15019_v53  ;;  %v15090_v50 = vcombine.low %v289_v37, %v293_v38  ;;  %v277_v53 = vld [vmem:[#allocation11 + $0x278] sm:$0xff]  ;;  %v15072_v0 = vcombine.low %v272_v48, %v276_v49  ;;  %v1204_v37 = vld [vmem:[#allocation16 + $0xc0] sm:$0xff] }
  0xeb   :  { %v15075_v60 = vcombine.high %v273_v52, %v277_v53  ;;  %v15074_v1 = vcombine.low %v273_v52, %v277_v53  ;;  %v1208_v38 = vld [vmem:[#allocation16 + $0xe0] sm:$0xff] }
  0xec   :  { %v1188_v52 = vld [vmem:[#allocation16 + $0x40] sm:$0xff] }
  0xed   :  { %1101 = vmatpush1.bf16.msra.mxu0 %v15016_v54  ;;  %1142 = vmatpush1.bf16.msra.mxu1 %v15018_v58  ;;  %v15083_v54 = vcombine.high %v281_v44, %v285_v45  ;;  %v15082_v58 = vcombine.low %v281_v44, %v285_v45  ;;  %v1196_v44 = vld [vmem:[#allocation16 + $0x80] sm:$0xff] }
  0xee   :  { %1102 = vmatprep.subr.bf16.mxu0 %v15009_v59  ;;  %1143 = vmatprep.subr.bf16.mxu1 %v15011_v62  ;;  %v15073_v59 = vcombine.high %v272_v48, %v276_v49  ;;  %v265_v62 = vld [vmem:[#allocation11 + $0x218] sm:$0xff]  ;;  %v1200_v45 = vld [vmem:[#allocation16 + $0xa0] sm:$0xff]  ;;  %v15148_v48 = vcombine.low %v1204_v37, %v1208_v38 }
  0xef   :  { %v1192_v53 = vld [vmem:[#allocation16 + $0x60] sm:$0xff] }
  0xf1   :  { %1103 = vmatpush1.bf16.msra.mxu0 %v15008_v63  ;;  %1144 = vmatpush1.bf16.msra.mxu1 %v15010_v2  ;;  %v269_v63 = vld [vmem:[#allocation11 + $0x238] sm:$0xff]  ;;  %v15065_v2 = vcombine.high %v264_v56, %v268_v61  ;;  %v15140_v56 = vcombine.low %v1196_v44, %v1200_v45  ;;  %v1180_v61 = vld [vmem:[#allocation16] sm:$0xff] }
  0xf2   :  { %1104 = vmatprep.subr.bf16.mxu0 %v15001_v3  ;;  %1145 = vmatprep.subr.bf16.mxu1 %v15003_v6  ;;  %v15067_v3 = vcombine.high %v265_v62, %v269_v63  ;;  %v1237_v6 = vld [vmem:[#allocation16 + $0x1c8] sm:$0xff]  ;;  %v15066_v9 = vcombine.low %v265_v62, %v269_v63  ;;  %v1184_v62 = vld [vmem:[#allocation16 + $0x20] sm:$0xff] }
  0xf3   :  { %v1181_v63 = vld [vmem:[#allocation16 + $0x8] sm:$0xff] }
  0xf5   :  { %1105 = vmatpush1.bf16.msra.mxu0 %v15000_v7  ;;  %1146 = vmatpush1.bf16.msra.mxu1 %v15002_v10  ;;  %v1241_v7 = vld [vmem:[#allocation16 + $0x1e8] sm:$0xff]  ;;  %v15181_v10 = vcombine.high %v1236_v4, %v1240_v5  ;;  %v1238_v5 = vld [vmem:[#allocation16 + $0x1d0] sm:$0xff] }
  0xf6   :  { %1106 = vmatprep.subr.bf16.mxu0 %v15121_v11  ;;  %1147 = vmatprep.subr.bf16.mxu1 %v15123_v15  ;;  %v15183_v11 = vcombine.high %v1237_v6, %v1241_v7  ;;  %v1229_v15 = vld [vmem:[#allocation16 + $0x188] sm:$0xff]  ;;  %v15182_v18 = vcombine.low %v1237_v6, %v1241_v7  ;;  %v1242_v6 = vld [vmem:[#allocation16 + $0x1f0] sm:$0xff]  ;;  %v1239_v7 = vld [vmem:[#allocation16 + $0x1d8] sm:$0xff] }
  0xf9   :  { %1107 = vmatpush2.bf16.msra.mxu0 %v15120_v16  ;;  %1148 = vmatpush2.bf16.msra.mxu1 %v15122_v19  ;;  %v1233_v16 = vld [vmem:[#allocation16 + $0x1a8] sm:$0xff]  ;;  %v15173_v19 = vcombine.high %v1228_v13, %v1232_v14  ;;  %v15185_v13 = vcombine.high %v1238_v5, %v1242_v6  ;;  %v1230_v14 = vld [vmem:[#allocation16 + $0x190] sm:$0xff] }
  0xfa   :  { %1108 = vmatprep.subr.bf16.mxu0 %v15113_v20  ;;  %1149 = vmatprep.subr.bf16.mxu1 %v15115_v23  ;;  %v15175_v20 = vcombine.high %v1229_v15, %v1233_v16  ;;  %v1221_v23 = vld [vmem:[#allocation16 + $0x148] sm:$0xff]  ;;  %v15174_v26 = vcombine.low %v1229_v15, %v1233_v16  ;;  %v1234_v15 = vld [vmem:[#allocation16 + $0x1b0] sm:$0xff] }
  0xfd   :  { %1109 = vmatpush2.bf16.msra.mxu0 %v15112_v24  ;;  %1150 = vmatpush2.bf16.msra.mxu1 %v15114_v27  ;;  %v1225_v24 = vld [vmem:[#allocation16 + $0x168] sm:$0xff]  ;;  %v15165_v27 = vcombine.high %v1220_v21, %v1224_v22  ;;  %v15177_v21 = vcombine.high %v1230_v14, %v1234_v15 }
  0xfe   :  { %1110 = vmatprep.subr.bf16.mxu0 %v15105_v28  ;;  %1151 = vmatprep.subr.bf16.mxu1 %v15107_v31  ;;  %v15167_v28 = vcombine.high %v1221_v23, %v1225_v24  ;;  %v16506_v31 = vmov 0  }
 0x101   :  { %1111 = vmatpush2.bf16.msra.mxu0 %v15104_v32  ;;  %1152 = vmatpush2.bf16.msra.mxu1 %v15106_v35  ;;  %v1213_v32 = vld [vmem:[#allocation16 + $0x108] sm:$0xff]  ;;  %v15157_v35 = vcombine.high %v1212_v29, %v1216_v30 }
 0x102   :  { %1112 = vmatprep.subr.bf16.mxu0 %v15097_v36  ;;  %1153 = vmatprep.subr.bf16.mxu1 %v15099_v39  ;;  %v15159_v36 = vcombine.high %v1213_v32, %v1217_v33  ;;  %v1205_v39 = vld [vmem:[#allocation16 + $0xc8] sm:$0xff]  ;;  %v15158_v42 = vcombine.low %v1213_v32, %v1217_v33  ;;  %v1214_v32 = vld [vmem:[#allocation16 + $0x110] sm:$0xff] }
 0x103   :  { %v1218_v33 = vld [vmem:[#allocation16 + $0x130] sm:$0xff] }
 0x105   :  { %1113 = vmatpush2.bf16.msra.mxu0 %v15096_v40  ;;  %1154 = vmatpush2.bf16.msra.mxu1 %v15098_v57  ;;  %v1209_v40 = vld [vmem:[#allocation16 + $0xe8] sm:$0xff]  ;;  %v15149_v57 = vcombine.high %v1204_v37, %v1208_v38  ;;  %v15161_v37 = vcombine.high %v1214_v32, %v1218_v33 }
 0x106   :  { %1114 = vmatprep.subr.bf16.mxu0 %v15089_v43  ;;  %1155 = vmatprep.subr.bf16.mxu1 %v15091_v46  ;;  %v15151_v43 = vcombine.high %v1205_v39, %v1209_v40  ;;  %v1197_v46 = vld [vmem:[#allocation16 + $0x88] sm:$0xff]  ;;  %v15150_v49 = vcombine.low %v1205_v39, %v1209_v40  ;;  %v1206_v39 = vld [vmem:[#allocation16 + $0xd0] sm:$0xff] }
 0x107   :  { %v1210_v40 = vld [vmem:[#allocation16 + $0xf0] sm:$0xff] }
 0x109   :  { %1115 = vmatpush2.bf16.msra.mxu0 %v15088_v47  ;;  %1156 = vmatpush2.bf16.msra.mxu1 %v15090_v50  ;;  %v1201_v47 = vld [vmem:[#allocation16 + $0xa8] sm:$0xff]  ;;  %v15141_v50 = vcombine.high %v1196_v44, %v1200_v45  ;;  %v15153_v44 = vcombine.high %v1206_v39, %v1210_v40 }
 0x10a   :  { %1116 = vmatprep.subr.bf16.mxu0 %v15081_v51  ;;  %1157 = vmatprep.subr.bf16.mxu1 %v15083_v54  ;;  %v15143_v51 = vcombine.high %v1197_v46, %v1201_v47  ;;  %v1189_v54 = vld [vmem:[#allocation16 + $0x48] sm:$0xff] }
 0x10d   :  { %1117 = vmatpush2.bf16.msra.mxu0 %v15080_v55  ;;  %1158 = vmatpush2.bf16.msra.mxu1 %v15082_v58  ;;  %v1193_v55 = vld [vmem:[#allocation16 + $0x68] sm:$0xff]  ;;  %v15142_v58 = vcombine.low %v1197_v46, %v1201_v47  ;;  %v1202_v46 = vld [vmem:[#allocation16 + $0xb0] sm:$0xff] }
 0x10e   :  { %1118 = vmatprep.subr.bf16.mxu0 %v15073_v59  ;;  %1159 = vmatprep.subr.bf16.mxu1 %v15075_v60  ;;  %v15133_v59 = vcombine.high %v1188_v52, %v1192_v53  ;;  %v15135_v60 = vcombine.high %v1189_v54, %v1193_v55 }
 0x111   :  { %1119 = vmatpush2.bf16.msra.mxu0 %v15072_v0  ;;  %1160 = vmatpush2.bf16.msra.mxu1 %v15074_v1  ;;  %v1185_v0 = vld [vmem:[#allocation16 + $0x28] sm:$0xff]  ;;  %v15132_v1 = vcombine.low %v1188_v52, %v1192_v53  ;;  %v1190_v53 = vld [vmem:[#allocation16 + $0x50] sm:$0xff] }
 0x112   :  { %1120 = vmatprep.subr.bf16.mxu0 %v15065_v2  ;;  %1161 = vmatprep.subr.bf16.mxu1 %v15067_v3  ;;  %v15134_v2 = vcombine.low %v1189_v54, %v1193_v55  ;;  %v15125_v3 = vcombine.high %v1180_v61, %v1184_v62  ;;  %v15127_v4 = vcombine.high %v1181_v63, %v1185_v0  ;;  %v1194_v54 = vld [vmem:[#allocation16 + $0x70] sm:$0xff] }
 0x115   :  { %1121 = vmatpush2.bf16.msra.mxu0 %v15064_v8  ;;  %1162 = vmatpush2.bf16.msra.mxu1 %v15066_v9  ;;  %v1243_v8 = vld [vmem:[#allocation16 + $0x1f8] sm:$0xff]  ;;  %v15124_v9 = vcombine.low %v1180_v61, %v1184_v62  ;;  %v1182_v62 = vld [vmem:[#allocation16 + $0x10] sm:$0xff] }
 0x116   :  { %1606 = vmatprep.subr.bf16.mxu0 %v15181_v10  ;;  %1647 = vmatprep.subr.bf16.mxu1 %v15183_v11  ;;  %v196_v10 = vld [vmem:[#allocation14] sm:$0xff]  ;;  %v15126_v11 = vcombine.low %v1181_v63, %v1185_v0  ;;  %v15187_v16 = vcombine.high %v1239_v7, %v1243_v8  ;;  %v15186_v22 = vcombine.low %v1239_v7, %v1243_v8  ;;  %v1186_v63 = vld [vmem:[#allocation16 + $0x30] sm:$0xff] }
 0x117   :  { %v15128_v7 = vcombine.low %v1182_v62, %v1186_v63 }
 0x118   :  { %1123 = vmatmul.mubr.bf16.vlgmr.msra.gmra.mxu0 %v16626_v12  ;;  %1164 = vmatmul.mubr.bf16.vlgmr.msra.gmra.mxu1 %v16626_v12  ;;  %v15166_v12 = vcombine.low %v1221_v23, %v1225_v24  ;;  %v1222_v23 = vld [vmem:[#allocation16 + $0x150] sm:$0xff] }
 0x119   :  { %1607 = vmatpush1.bf16.msra.mxu0 %v15180_v17  ;;  %1648 = vmatpush1.bf16.msra.mxu1 %v15182_v18  ;;  %v16636_v17 = vpack.c.bf16 %v196_v10, %v196_v10  ;;  %v1231_v18 = vld [vmem:[#allocation16 + $0x198] sm:$0xff]  ;;  %v1226_v24 = vld [vmem:[#allocation16 + $0x170] sm:$0xff] }
 0x11a   :  { %1608 = vmatprep.subr.bf16.mxu0 %v15173_v19  ;;  %1649 = vmatprep.subr.bf16.mxu1 %v15175_v20  ;;  %v1235_v19 = vld [vmem:[#allocation16 + $0x1b8] sm:$0xff]  ;;  %v15184_v20 = vcombine.low %v1238_v5, %v1242_v6  ;;  %v15169_v29 = vcombine.high %v1222_v23, %v1226_v24 }
 0x11b   :  { %1638 = vmatprep.mubr.bf16.mxu0 %v16506_v31  ;;  %1679 = vmatprep.mubr.bf16.mxu1 %v16506_v31  ;;  %v15178_v30 = vcombine.low %v1231_v18, %v1235_v19 }
 0x11d   :  { %1609 = vmatpush1.bf16.msra.mxu0 %v15172_v25  ;;  %1650 = vmatpush1.bf16.msra.mxu1 %v15174_v26  ;;  %v15179_v25 = vcombine.high %v1231_v18, %v1235_v19  ;;  %v1223_v26 = vld [vmem:[#allocation16 + $0x158] sm:$0xff] }
 0x11e   :  { %1610 = vmatprep.subr.bf16.mxu0 %v15165_v27  ;;  %1651 = vmatprep.subr.bf16.mxu1 %v15167_v28  ;;  %v1227_v27 = vld [vmem:[#allocation16 + $0x178] sm:$0xff]  ;;  %v15176_v28 = vcombine.low %v1230_v14, %v1234_v15  ;;  %v16649_v15 = vld [vmem:[#allocation13] sm:$0xff] }
 0x11f   :  { %v15170_v38 = vcombine.low %v1223_v26, %v1227_v27 }
 0x121   :  { %1611 = vmatpush1.bf16.msra.mxu0 %v15164_v34  ;;  %1652 = vmatpush1.bf16.msra.mxu1 %v15166_v12  ;;  %v15171_v34 = vcombine.high %v1223_v26, %v1227_v27  ;;  %v1215_v12 = vld [vmem:[#allocation16 + $0x118] sm:$0xff] }
 0x122   :  { %1612 = vmatprep.subr.bf16.mxu0 %v15157_v35  ;;  %1653 = vmatprep.subr.bf16.mxu1 %v15159_v36  ;;  %v1219_v35 = vld [vmem:[#allocation16 + $0x138] sm:$0xff]  ;;  %v15168_v36 = vcombine.low %v1222_v23, %v1226_v24 }
 0x123   :  { %v15162_v45 = vcombine.low %v1215_v12, %v1219_v35 }
 0x125   :  { %1613 = vmatpush1.bf16.msra.mxu0 %v15156_v41  ;;  %1654 = vmatpush1.bf16.msra.mxu1 %v15158_v42  ;;  %v15163_v41 = vcombine.high %v1215_v12, %v1219_v35  ;;  %v1207_v42 = vld [vmem:[#allocation16 + $0xd8] sm:$0xff] }
 0x126   :  { %1614 = vmatprep.subr.bf16.mxu0 %v15149_v57  ;;  %1655 = vmatprep.subr.bf16.mxu1 %v15151_v43  ;;  %v1211_v57 = vld [vmem:[#allocation16 + $0xf8] sm:$0xff]  ;;  %v15160_v43 = vcombine.low %v1214_v32, %v1218_v33 }
 0x127   :  { %v15155_v47 = vcombine.high %v1207_v42, %v1211_v57  ;;  %v15154_v52 = vcombine.low %v1207_v42, %v1211_v57 }
 0x129   :  { %1615 = vmatpush1.bf16.msra.mxu0 %v15148_v48  ;;  %1656 = vmatpush1.bf16.msra.mxu1 %v15150_v49  ;;  %v1199_v48 = vld [vmem:[#allocation16 + $0x98] sm:$0xff] }
 0x12a   :  { %1616 = vmatprep.subr.bf16.mxu0 %v15141_v50  ;;  %1657 = vmatprep.subr.bf16.mxu1 %v15143_v51  ;;  %v1203_v49 = vld [vmem:[#allocation16 + $0xb8] sm:$0xff]  ;;  %v15152_v50 = vcombine.low %v1206_v39, %v1210_v40 }
 0x12b   :  { %v15147_v55 = vcombine.high %v1199_v48, %v1203_v49  ;;  %v15146_v61 = vcombine.low %v1199_v48, %v1203_v49 }
 0x12d   :  { %1617 = vmatpush1.bf16.msra.mxu0 %v15140_v56  ;;  %1658 = vmatpush1.bf16.msra.mxu1 %v15142_v58  ;;  %v1191_v56 = vld [vmem:[#allocation16 + $0x58] sm:$0xff] }
 0x12e   :  { %1618 = vmatprep.subr.bf16.mxu0 %v15133_v59  ;;  %1659 = vmatprep.subr.bf16.mxu1 %v15135_v60  ;;  %v1195_v58 = vld [vmem:[#allocation16 + $0x78] sm:$0xff]  ;;  %v15137_v60 = vcombine.high %v1190_v53, %v1194_v54 }
 0x12f   :  { %v15139_v0 = vcombine.high %v1191_v56, %v1195_v58  ;;  %v15138_v5 = vcombine.low %v1191_v56, %v1195_v58 }
 0x131   :  { %1619 = vmatpush1.bf16.msra.mxu0 %v15132_v1  ;;  %1660 = vmatpush1.bf16.msra.mxu1 %v15134_v2  ;;  %v1183_v1 = vld [vmem:[#allocation16 + $0x18] sm:$0xff] }
 0x132   :  { %1620 = vmatprep.subr.bf16.mxu0 %v15125_v3  ;;  %1661 = vmatprep.subr.bf16.mxu1 %v15127_v4  ;;  %v1187_v2 = vld [vmem:[#allocation16 + $0x38] sm:$0xff]  ;;  %v15136_v3 = vcombine.low %v1190_v53, %v1194_v54  ;;  %v15129_v4 = vcombine.high %v1182_v62, %v1186_v63 }
 0x133   :  { %v15131_v6 = vcombine.high %v1183_v1, %v1187_v2  ;;  %v15130_v8 = vcombine.low %v1183_v1, %v1187_v2 }
 0x135   :  { %1621 = vmatpush1.bf16.msra.mxu0 %v15124_v9  ;;  %1662 = vmatpush1.bf16.msra.mxu1 %v15126_v11  ;;  %v328_v9 = vlaneseq  ;;  %v16507_v11 = vmov 1966171168  }
 0x136   :  { %1688 = vmatprep.subr.bf16.mxu0 %v15185_v13  ;;  %1729 = vmatprep.subr.bf16.mxu1 %v15187_v16  ;;  %v1782_v13 = vunpack.c.l.s4 %v16507_v11 }
 0x137   :  { %v16644_v10 = vshrl.u32 %v328_v9, 7 }
 0x138   :  { %1639 = vmatmul.mubr.bf16.vlgmr.msra.gmra.mxu0 %v16636_v17  ;;  %1680 = vmatmul.mubr.bf16.vlgmr.msra.gmra.mxu1 %v16636_v17  ;;  %v1783_v18 = vunpack.c.0.s8 %v1782_v13 }
 0x139   :  { %1689 = vmatpush1.bf16.msra.mxu0 %v15184_v20  ;;  %1730 = vmatpush1.bf16.msra.mxu1 %v15186_v22  ;;  %v16647_v14 = vsub.s32 0, %v16644_v10  ;;  %v16652_v16 = vsub.s32 2, %v16644_v10  ;;  %v16655_v19 = vsub.s32 1, %v16644_v10  ;;  %v16658_v20 = vsub.s32 3, %v16644_v10 }
 0x13a   :  { %1690 = vmatprep.subr.bf16.mxu0 %v15177_v21  ;;  %1731 = vmatprep.subr.bf16.mxu1 %v15179_v25  ;;  %v16665_v22 = vsub.s32 %v1783_v18, %v16644_v10 }
 0x13b   :  { %1720 = vmatprep.mubr.bf16.mxu0 %v16506_v31  ;;  %1761 = vmatprep.mubr.bf16.mxu1 %v16506_v31  ;;  %v1198_v31 = vld [vmem:[#allocation16 + $0x90] sm:$0xff]  ;;  %19959 = vst [vmem:[#allocation37_spill] sm:$0xff] %v16647_v14  ;;  %19960 = vst [vmem:[#allocation38_spill] sm:$0xff] %v16652_v16  ;;  %v339_v21 = vrot.slane %v16649_v15, %v16652_v16  ;;  %v335_v23 = vrot.slane %v16649_v15, %v16655_v19 }
 0x13c   :  { %v15145_v51 = vcombine.high %v1198_v31, %v1202_v46  ;;  %v15144_v59 = vcombine.low %v1198_v31, %v1202_v46  ;;  %19961 = vst [vmem:[#allocation39_spill] sm:$0xff] %v16655_v19  ;;  %19962 = vst [vmem:[#allocation40_spill] sm:$0xff] %v16658_v20  ;;  %v343_v25 = vrot.slane %v16649_v15, %v16658_v20 }
 0x13d   :  { %1691 = vmatpush1.bf16.msra.mxu0 %v15176_v28  ;;  %1732 = vmatpush1.bf16.msra.mxu1 %v15178_v30 }
 0x13e   :  { %1692 = vmatprep.subr.bf16.mxu0 %v15169_v29  ;;  %1733 = vmatprep.subr.bf16.mxu1 %v15171_v34 }
 0x141   :  { %1693 = vmatpush1.bf16.msra.mxu0 %v15168_v36  ;;  %1734 = vmatpush1.bf16.msra.mxu1 %v15170_v38 }
 0x142   :  { %1694 = vmatprep.subr.bf16.mxu0 %v15161_v37  ;;  %1735 = vmatprep.subr.bf16.mxu1 %v15163_v41 }
 0x145   :  { %1695 = vmatpush1.bf16.msra.mxu0 %v15160_v43  ;;  %1736 = vmatpush1.bf16.msra.mxu1 %v15162_v45 }
 0x146   :  { %1696 = vmatprep.subr.bf16.mxu0 %v15153_v44  ;;  %1737 = vmatprep.subr.bf16.mxu1 %v15155_v47 }
 0x149   :  { %1697 = vmatpush1.bf16.msra.mxu0 %v15152_v50  ;;  %1738 = vmatpush1.bf16.msra.mxu1 %v15154_v52 }
 0x14a   :  { %1698 = vmatprep.subr.bf16.mxu0 %v15145_v51  ;;  %1739 = vmatprep.subr.bf16.mxu1 %v15147_v55 }
 0x14d   :  { %1699 = vmatpush1.bf16.msra.mxu0 %v15144_v59  ;;  %1740 = vmatpush1.bf16.msra.mxu1 %v15146_v61 }
 0x14e   :  { %1700 = vmatprep.subr.bf16.mxu0 %v15137_v60  ;;  %1741 = vmatprep.subr.bf16.mxu1 %v15139_v0 }
 0x151   :  { %1701 = vmatpush1.bf16.msra.mxu0 %v15136_v3  ;;  %1742 = vmatpush1.bf16.msra.mxu1 %v15138_v5 }
 0x152   :  { %1702 = vmatprep.subr.bf16.mxu0 %v15129_v4  ;;  %1743 = vmatprep.subr.bf16.mxu1 %v15131_v6 }
 0x155   :  { %1703 = vmatpush1.bf16.msra.mxu0 %v15128_v7  ;;  %1744 = vmatpush1.bf16.msra.mxu1 %v15130_v8 }
 0x158   :  { %1721 = vmatmul.mubr.bf16.vlgmr.msra.gmra.mxu0 %v16636_v17  ;;  %1762 = vmatmul.mubr.bf16.vlgmr.msra.gmra.mxu1 %v16636_v17  ;;  %v331_v17 = vrot.slane %v16649_v15, %v16647_v14 }
 0x198   :  { %v1042_v24 = vpop.f32.mrf.mxu0  ;;  %v1083_v27 = vpop.f32.mrf.mxu1 }
 0x199   :  { %v1043_v26 = vadd.f32 %v1042_v24, %v331_v17  ;;  %v1084_v28 = vadd.f32 %v1083_v27, %v339_v21 }
 0x19a   :  { %v1044_v29 = vpop.f32.mrf.mxu0  ;;  %v1085_v34 = vpop.f32.mrf.mxu1 }
 0x19b   :  { %v1780_v30 = vcombine.high %v1043_v26, %v1043_v26  ;;  %v1787_v32 = vrot.slane %v1043_v26, %v16665_v22  ;;  %v1045_v33 = vadd.f32 %v1044_v29, %v335_v23  ;;  %v3429_v12 = vcombine.high %v1084_v28, %v1084_v28 }
 0x19c   :  { %v3436_v35 = vrot.slane %v1084_v28, %v16665_v22  ;;  %v1086_v36 = vadd.f32 %v1085_v34, %v343_v25  ;;  %v1046_v37 = vpop.f32.mrf.mxu0  ;;  %v1087_v42 = vpop.f32.mrf.mxu1 }
 0x19d   :  { %v16674_v38 = vrot.slane %v1780_v30, %v16665_v22  ;;  %v1795_v39 = vcombine.high %v1787_v32, %v1787_v32  ;;  %v1803_v40 = vrot.slane %v1787_v32, %v16665_v22  ;;  %v2605_v41 = vcombine.high %v1045_v33, %v1045_v33 }
 0x19e   :  { %v16678_v57 = vrot.slane %v3429_v12, %v16665_v22  ;;  %v3444_v43 = vcombine.high %v3436_v35, %v3436_v35  ;;  %v3452_v44 = vrot.slane %v3436_v35, %v16665_v22  ;;  %v2612_v45 = vrot.slane %v1045_v33, %v16665_v22  ;;  %v1047_v31 = vpop.f32.mrf.mxu0  ;;  %v1088_v49 = vpop.f32.mrf.mxu1 }
 0x19f   :  { %v16684_v46 = vrot.slane %v16674_v38, %v16665_v22  ;;  %v16687_v47 = vrot.slane %v1795_v39, %v16665_v22  ;;  %1838 = vst.msk [vmem:[#allocation4] sm:$0x1] %vm1837_vm0, %v1803_v40  ;;  %v2619_v48 = vrot.slane %v2605_v41, %v16665_v22  ;;  %v4253_v56 = vcombine.high %v1086_v36, %v1086_v36 }
 0x1a0   :  { %v16693_v50 = vrot.slane %v16678_v57, %v16665_v22  ;;  %v16696_v51 = vrot.slane %v3444_v43, %v16665_v22  ;;  %3486 = vst.msk [vmem:[#allocation4 + $0x8] sm:$0x1] %vm1837_vm0, %v3452_v44  ;;  %v2620_v52 = vcombine.high %v2612_v45, %v2612_v45  ;;  %v2628_v54 = vrot.slane %v2612_v45, %v16665_v22 }
 0x1a1   :  { %19963 = vst [vmem:[#allocation41_spill] sm:$0xff] %v16684_v46  ;;  %1839 = vst.msk [vmem:[#allocation4 + $0x20] sm:$0x1] %vm1837_vm0, %v16687_v47  ;;  %v2621_v53 = vcombine.high %v2619_v48, %v2619_v48  ;;  %v16705_v55 = vrot.slane %v2619_v48, %v16665_v22  ;;  %v4260_v59 = vrot.slane %v1086_v36, %v16665_v22  ;;  %v16880_v41 = vsub.s32 4, %v16644_v10 }
 0x1a2   :  { %19964 = vst [vmem:[#allocation42_spill] sm:$0xff] %v16693_v50  ;;  %1842 = vst.msk [vmem:[#allocation4 + $0x80] sm:$0x1] %vm1837_vm0, %v16684_v46  ;;  %v16712_v58 = vrot.slane %v2620_v52, %v16665_v22  ;;  %v1967_v60 = vrot.slane %v1803_v40, %v16647_v14  ;;  %v4267_v62 = vrot.slane %v4253_v56, %v16665_v22  ;;  %v16888_v43 = vsub.s32 5, %v16644_v10 }
 0x1a3   :  { %19965 = vst [vmem:[#allocation43_spill] sm:$0xff] %v16705_v55  ;;  %3487 = vst.msk [vmem:[#allocation4 + $0x28] sm:$0x1] %vm1837_vm0, %v16696_v51  ;;  %v16717_v61 = vrot.slane %v2621_v53, %v16665_v22  ;;  %v4268_v63 = vcombine.high %v4260_v59, %v4260_v59  ;;  %v4276_v0 = vrot.slane %v4260_v59, %v16665_v22 }
 0x1a4   :  { %3490 = vst.msk [vmem:[#allocation4 + $0x88] sm:$0x1] %vm1837_vm0, %v16693_v50  ;;  %2662 = vst.msk [vmem:[#allocation4 + $0x4] sm:$0x1] %vm1837_vm0, %v2628_v54  ;;  %2226 = vrot.lane.b32.xlu1 %v1967_v60, %s16503_s24  ;;  %1996 = vrot.lane.b32.xlu0 %v1967_v60, %s16508_s10  ;;  %v3615_v1 = vrot.slane %v3452_v44, %v16647_v14  ;;  %v4269_v2 = vcombine.high %v4267_v62, %v4267_v62 }
 0x1a5   :  { %19966 = vst [vmem:[#allocation44_spill] sm:$0xff] %v16717_v61  ;;  %2666 = vst.msk [vmem:[#allocation4 + $0x84] sm:$0x1] %vm1837_vm0, %v16705_v55  ;;  %v16732_v3 = vrot.slane %v4267_v62, %v16665_v22  ;;  %v1825_v4 = vcombine.high %v1803_v40, %v1803_v40  ;;  %v16734_v5 = vcombine.high %v3452_v44, %v3452_v44  ;;  %v16893_v44 = vsub.s32 7, %v16644_v10 }
 0x1a6   :  { %2663 = vst.msk [vmem:[#allocation4 + $0x24] sm:$0x1] %vm1837_vm0, %v16712_v58  ;;  %2667 = vst.msk [vmem:[#allocation4 + $0xa4] sm:$0x1] %vm1837_vm0, %v16717_v61  ;;  %v16737_v6 = vrot.slane %v4268_v63, %v16665_v22  ;;  %v16740_v7 = vcombine.high %v2628_v54, %v2628_v54  ;;  %v16743_v8 = vrot.slane %v4269_v2, %v16665_v22 }
 0x1a7   :  { %19967 = vst [vmem:[#allocation45_spill] sm:$0xff] %v16732_v3  ;;  %4310 = vst.msk [vmem:[#allocation4 + $0xc] sm:$0x1] %vm1837_vm0, %v4276_v0  ;;  %v16750_v9 = vcombine.high %v4276_v0, %v4276_v0  ;;  %v1796_v11 = vcombine.high %v16674_v38, %v16674_v38  ;;  %v3445_v13 = vcombine.high %v16678_v57, %v16678_v57  ;;  %v16885_v57 = vsub.s32 6, %v16644_v10 }
 0x1a8   :  { %19968 = vst [vmem:[#allocation46_spill] sm:$0xff] %v16743_v8  ;;  %4314 = vst.msk [vmem:[#allocation4 + $0x8c] sm:$0x1] %vm1837_vm0, %v16732_v3  ;;  %3874 = vrot.lane.b32.xlu1 %v3615_v1, %s16503_s24  ;;  %2456 = vrot.lane.b32.xlu0 %v1967_v60, %s16490_s25  ;;  %v16764_v18 = vcombine.high %v16687_v47, %v16687_v47  ;;  %v16772_v17 = vcombine.high %v16696_v51, %v16696_v51 }
 0x1a9   :  { %1840 = vst.msk [vmem:[#allocation4 + $0x40] sm:$0x1] %vm1837_vm0, %v1825_v4  ;;  %3488 = vst.msk [vmem:[#allocation4 + $0x48] sm:$0x1] %vm1837_vm0, %v16734_v5  ;;  %v16776_v21 = vcombine.high %v16712_v58, %v16712_v58  ;;  %v16780_v23 = vcombine.high %v16737_v6, %v16737_v6  ;;  %v2791_v24 = vrot.slane %v2628_v54, %v16647_v14 }
 0x1aa   :  { %4311 = vst.msk [vmem:[#allocation4 + $0x2c] sm:$0x1] %vm1837_vm0, %v16737_v6  ;;  %2664 = vst.msk [vmem:[#allocation4 + $0x44] sm:$0x1] %vm1837_vm0, %v16740_v7  ;;  %v16794_v25 = vrot.slane %v1796_v11, %v16665_v22  ;;  %v16797_v26 = vrot.slane %v3445_v13, %v16665_v22  ;;  %v16801_v27 = vcombine.high %v16684_v46, %v16684_v46 }
 0x1ab   :  { %4315 = vst.msk [vmem:[#allocation4 + $0xac] sm:$0x1] %vm1837_vm0, %v16743_v8  ;;  %4312 = vst.msk [vmem:[#allocation4 + $0x4c] sm:$0x1] %vm1837_vm0, %v16750_v9  ;;  %v16805_v28 = vcombine.high %v16705_v55, %v16705_v55  ;;  %v16809_v29 = vcombine.high %v16693_v50, %v16693_v50  ;;  %v16817_v30 = vcombine.high %v16732_v3, %v16732_v3 }
 0x1ac   :  { %1841 = vst.msk [vmem:[#allocation4 + $0x60] sm:$0x1] %vm1837_vm0, %v16764_v18  ;;  %3489 = vst.msk [vmem:[#allocation4 + $0x68] sm:$0x1] %vm1837_vm0, %v16772_v17  ;;  %2820 = vrot.lane.b32.xlu1 %v2791_v24, %s16508_s10  ;;  %3644 = vrot.lane.b32.xlu0 %v3615_v1, %s16508_s10  ;;  %v16821_v32 = vcombine.high %v16794_v25, %v16794_v25  ;;  %v16831_v33 = vcombine.high %v16717_v61, %v16717_v61 }
 0x1ad   :  { %2665 = vst.msk [vmem:[#allocation4 + $0x64] sm:$0x1] %vm1837_vm0, %v16776_v21  ;;  %4313 = vst.msk [vmem:[#allocation4 + $0x6c] sm:$0x1] %vm1837_vm0, %v16780_v23  ;;  %v16841_v34 = vcombine.high %v16797_v26, %v16797_v26  ;;  %v16847_v12 = vcombine.high %v16743_v8, %v16743_v8  ;;  %v4439_v35 = vrot.slane %v4276_v0, %v16647_v14 }
 0x1ae   :  { %19969 = vst [vmem:[#allocation47_spill] sm:$0xff] %v16794_v25  ;;  %19970 = vst [vmem:[#allocation48_spill] sm:$0xff] %v16797_v26  ;;  %v1971_v36 = vrot.slane %v16687_v47, %v16647_v14  ;;  %v3619_v37 = vrot.slane %v16696_v51, %v16647_v14  ;;  %v1975_v38 = vrot.slane %v1825_v4, %v16647_v14 }
 0x1af   :  { %19971 = vst [vmem:[#allocation49_spill] sm:$0xff] %v16801_v27  ;;  %19972 = vst [vmem:[#allocation50_spill] sm:$0xff] %v16805_v28  ;;  %v3623_v39 = vrot.slane %v16734_v5, %v16647_v14  ;;  %v2795_v40 = vrot.slane %v16712_v58, %v16647_v14  ;;  %v4443_v42 = vrot.slane %v16737_v6, %v16647_v14 }
 0x1b0   :  { %19973 = vst [vmem:[#allocation51_spill] sm:$0xff] %v16809_v29  ;;  %1843 = vst.msk [vmem:[#allocation4 + $0xa0] sm:$0x1] %vm1837_vm0, %v16794_v25  ;;  %3280 = vrot.lane.b32.xlu1 %v2791_v24, %s16490_s25  ;;  %4104 = vrot.lane.b32.xlu0 %v3615_v1, %s16490_s25  ;;  %v347_v45 = vrot.slane %v16649_v15, %v16880_v41  ;;  %v355_v31 = vrot.slane %v16649_v15, %v16885_v57 }
 0x1b1   :  { %3491 = vst.msk [vmem:[#allocation4 + $0xa8] sm:$0x1] %vm1837_vm0, %v16797_v26  ;;  %19974 = vst [vmem:[#allocation52_spill] sm:$0xff] %v16817_v30  ;;  %v351_v47 = vrot.slane %v16649_v15, %v16888_v43  ;;  %v359_v49 = vrot.slane %v16649_v15, %v16893_v44  ;;  %v2799_v53 = vrot.slane %v16740_v7, %v16647_v14 }
 0x1b2   :  { %19975 = vst [vmem:[#allocation53_spill] sm:$0xff] %v16821_v32  ;;  %1844 = vst.msk [vmem:[#allocation4 + $0xc0] sm:$0x1] %vm1837_vm0, %v16801_v27  ;;  %v16910_v62 = vrot.slane %v16750_v9, %v16647_v14 }
 0x1b3   :  { %2668 = vst.msk [vmem:[#allocation4 + $0xc4] sm:$0x1] %vm1837_vm0, %v16805_v28  ;;  %3492 = vst.msk [vmem:[#allocation4 + $0xc8] sm:$0x1] %vm1837_vm0, %v16809_v29 }
 0x1b4   :  { %19976 = vst [vmem:[#allocation54_spill] sm:$0xff] %v16831_v33  ;;  %4316 = vst.msk [vmem:[#allocation4 + $0xcc] sm:$0x1] %vm1837_vm0, %v16817_v30  ;;  %4468 = vrot.lane.b32.xlu1 %v4439_v35, %s16508_s10  ;;  %3050 = vrot.lane.b32.xlu0 %v2791_v24, %s16503_s24 }
 0x1b5   :  { %1845 = vst.msk [vmem:[#allocation4 + $0xe0] sm:$0x1] %vm1837_vm0, %v16821_v32  ;;  %19977 = vst [vmem:[#allocation55_spill] sm:$0xff] %v16841_v34 }
 0x1b6   :  { %2669 = vst.msk [vmem:[#allocation4 + $0xe4] sm:$0x1] %vm1837_vm0, %v16831_v33  ;;  %19978 = vst [vmem:[#allocation56_spill] sm:$0xff] %v16847_v12 }
 0x1b7   :  { %3493 = vst.msk [vmem:[#allocation4 + $0xe8] sm:$0x1] %vm1837_vm0, %v16841_v34  ;;  %4317 = vst.msk [vmem:[#allocation4 + $0xec] sm:$0x1] %vm1837_vm0, %v16847_v12 }
 0x1b8   :  { %4928 = vrot.lane.b32.xlu1 %v4439_v35, %s16490_s25  ;;  %4698 = vrot.lane.b32.xlu0 %v4439_v35, %s16503_s24  ;;  %19979 = vst [vmem:[#allocation57_spill] sm:$0xff] %v16880_v41  ;;  %19980 = vst [vmem:[#allocation58_spill] sm:$0xff] %v16885_v57 }
 0x1b9   :  { %19981 = vst [vmem:[#allocation59_spill] sm:$0xff] %v16888_v43  ;;  %19982 = vst [vmem:[#allocation60_spill] sm:$0xff] %v16893_v44 }
 0x1bc   :  { %2228 = vrot.lane.b32.xlu1 %v1971_v36, %s16503_s24  ;;  %1998 = vrot.lane.b32.xlu0 %v1971_v36, %s16508_s10 }
 0x1c0   :  { %3876 = vrot.lane.b32.xlu1 %v3619_v37, %s16503_s24  ;;  %2458 = vrot.lane.b32.xlu0 %v1971_v36, %s16490_s25 }
 0x1c4   :  { %2230 = vrot.lane.b32.xlu1 %v1975_v38, %s16503_s24  ;;  %3646 = vrot.lane.b32.xlu0 %v3619_v37, %s16508_s10 }
 0x1c8   :  { %3878 = vrot.lane.b32.xlu1 %v3623_v39, %s16503_s24  ;;  %4106 = vrot.lane.b32.xlu0 %v3619_v37, %s16490_s25 }
 0x1cc   :  { %2822 = vrot.lane.b32.xlu1 %v2795_v40, %s16508_s10  ;;  %2000 = vrot.lane.b32.xlu0 %v1975_v38, %s16508_s10 }
 0x1d0   :  { %3282 = vrot.lane.b32.xlu1 %v2795_v40, %s16490_s25  ;;  %2460 = vrot.lane.b32.xlu0 %v1975_v38, %s16490_s25 }
 0x1d4   :  { %4470 = vrot.lane.b32.xlu1 %v4443_v42, %s16508_s10  ;;  %3648 = vrot.lane.b32.xlu0 %v3623_v39, %s16508_s10 }
 0x1d8   :  { %4930 = vrot.lane.b32.xlu1 %v4443_v42, %s16490_s25  ;;  %4108 = vrot.lane.b32.xlu0 %v3623_v39, %s16490_s25  ;;  %v1124_v48 = vpop.f32.mrf.mxu0  ;;  %v1165_v10 = vpop.f32.mrf.mxu1 }
 0x1d9   :  { %v1125_v51 = vadd.f32 %v1124_v48, %v347_v45  ;;  %v1166_v52 = vadd.f32 %v1165_v10, %v355_v31 }
 0x1da   :  { %v1126_v54 = vpop.f32.mrf.mxu0  ;;  %v1167_v60 = vpop.f32.mrf.mxu1 }
 0x1db   :  { %v5077_v56 = vcombine.high %v1125_v51, %v1125_v51  ;;  %v5084_v58 = vrot.slane %v1125_v51, %v16665_v22  ;;  %v1127_v59 = vadd.f32 %v1126_v54, %v351_v47  ;;  %v6725_v63 = vcombine.high %v1166_v52, %v1166_v52 }
 0x1dc   :  { %v6732_v0 = vrot.slane %v1166_v52, %v16665_v22  ;;  %2824 = vrot.lane.b32.xlu1 %v2799_v53, %s16508_s10  ;;  %3052 = vrot.lane.b32.xlu0 %v2795_v40, %s16503_s24  ;;  %v1168_v15 = vadd.f32 %v1167_v60, %v359_v49  ;;  %v1128_v1 = vpop.f32.mrf.mxu0  ;;  %v1169_v7 = vpop.f32.mrf.mxu1 }
 0x1dd   :  { %v5091_v2 = vrot.slane %v5077_v56, %v16665_v22  ;;  %v5092_v4 = vcombine.high %v5084_v58, %v5084_v58  ;;  %v16917_v5 = vrot.slane %v5084_v58, %v16665_v22  ;;  %v5901_v6 = vcombine.high %v1127_v59, %v1127_v59 }
 0x1de   :  { %v6739_v9 = vrot.slane %v6725_v63, %v16665_v22  ;;  %v6740_v11 = vcombine.high %v6732_v0, %v6732_v0  ;;  %v16921_v13 = vrot.slane %v6732_v0, %v16665_v22  ;;  %v5908_v24 = vrot.slane %v1127_v59, %v16665_v22  ;;  %v1129_v35 = vpop.f32.mrf.mxu0  ;;  %v1170_v40 = vpop.f32.mrf.mxu1 }
 0x1df   :  { %v5093_v36 = vcombine.high %v5091_v2, %v5091_v2  ;;  %v16925_v37 = vrot.slane %v5091_v2, %v16665_v22  ;;  %v16928_v38 = vrot.slane %v5092_v4, %v16665_v22  ;;  %5134 = vst.msk [vmem:[#allocation4 + $0x10] sm:$0x1] %vm1837_vm0, %v16917_v5  ;;  %v5915_v39 = vrot.slane %v5901_v6, %v16665_v22 }
 0x1e0   :  { %v6741_v45 = vcombine.high %v6739_v9, %v6739_v9  ;;  %v16934_v31 = vrot.slane %v6739_v9, %v16665_v22  ;;  %v16937_v47 = vrot.slane %v6740_v11, %v16665_v22  ;;  %6782 = vst.msk [vmem:[#allocation4 + $0x18] sm:$0x1] %vm1837_vm0, %v16921_v13  ;;  %v5916_v48 = vcombine.high %v5908_v24, %v5908_v24 }
 0x1e1   :  { %19983 = vst [vmem:[#allocation61_spill] sm:$0xff] %v16925_v37  ;;  %3284 = vrot.lane.b32.xlu1 %v2799_v53, %s16490_s25  ;;  %v16943_v49 = vrot.slane %v5093_v36, %v16665_v22  ;;  %5135 = vst.msk [vmem:[#allocation4 + $0x30] sm:$0x1] %vm1837_vm0, %v16928_v38  ;;  %v5917_v51 = vcombine.high %v5915_v39, %v5915_v39  ;;  %v16950_v10 = vrot.slane %v5908_v24, %v16665_v22 }
 0x1e2   :  { %19984 = vst [vmem:[#allocation62_spill] sm:$0xff] %v16934_v31  ;;  %5138 = vst.msk [vmem:[#allocation4 + $0x90] sm:$0x1] %vm1837_vm0, %v16925_v37  ;;  %v16953_v52 = vrot.slane %v5915_v39, %v16665_v22  ;;  %4700 = vrot.lane.b32.xlu0 %v4443_v42, %s16503_s24  ;;  %v16957_v54 = vrot.slane %v6741_v45, %v16665_v22  ;;  %v16964_v56 = vrot.slane %v5916_v48, %v16665_v22 }
 0x1e3   :  { %19985 = vst [vmem:[#allocation63_spill] sm:$0xff] %v16943_v49  ;;  %6783 = vst.msk [vmem:[#allocation4 + $0x38] sm:$0x1] %vm1837_vm0, %v16937_v47  ;;  %v7549_v58 = vcombine.high %v1168_v15, %v1168_v15  ;;  %v7556_v59 = vrot.slane %v1168_v15, %v16665_v22  ;;  %v16970_v42 = vrot.slane %v5917_v51, %v16665_v22 }
 0x1e4   :  { %19986 = vst [vmem:[#allocation64_spill] sm:$0xff] %v16953_v52  ;;  %19987 = vst [vmem:[#allocation65_spill] sm:$0xff] %v16957_v54  ;;  %v16974_v60 = vcombine.high %v16950_v10, %v16950_v10  ;;  %v16997_v1 = vcombine.high %v16917_v5, %v16917_v5  ;;  %v17001_v2 = vcombine.high %v16921_v13, %v16921_v13 }
 0x1e5   :  { %6786 = vst.msk [vmem:[#allocation4 + $0x98] sm:$0x1] %vm1837_vm0, %v16934_v31  ;;  %5139 = vst.msk [vmem:[#allocation4 + $0xb0] sm:$0x1] %vm1837_vm0, %v16943_v49  ;;  %v7563_v63 = vrot.slane %v7549_v58, %v16665_v22  ;;  %v7564_v0 = vcombine.high %v7556_v59, %v7556_v59  ;;  %v16986_v15 = vrot.slane %v7556_v59, %v16665_v22  ;;  %4472 = vrot.lane.b32.xlu1 %v16910_v62, %s16508_s10 }
 0x1e6   :  { %19988 = vst [vmem:[#allocation66_spill] sm:$0xff] %v16970_v42  ;;  %5958 = vst.msk [vmem:[#allocation4 + $0x14] sm:$0x1] %vm1837_vm0, %v16950_v10  ;;  %3054 = vrot.lane.b32.xlu0 %v2799_v53, %s16503_s24  ;;  %v17034_v11 = vcombine.high %v16928_v38, %v16928_v38  ;;  %v17038_v24 = vcombine.high %v16964_v56, %v16964_v56  ;;  %v17042_v35 = vcombine.high %v16937_v47, %v16937_v47 }
 0x1e7   :  { %5962 = vst.msk [vmem:[#allocation4 + $0x94] sm:$0x1] %vm1837_vm0, %v16953_v52  ;;  %6787 = vst.msk [vmem:[#allocation4 + $0xb8] sm:$0x1] %vm1837_vm0, %v16957_v54  ;;  %v7565_v4 = vcombine.high %v7563_v63, %v7563_v63  ;;  %v17004_v6 = vrot.slane %v7563_v63, %v16665_v22  ;;  %v17007_v7 = vrot.slane %v7564_v0, %v16665_v22  ;;  %v17116_v0 = vld [vmem:[#allocation17] sm:$0xff] }
 0x1e8   :  { %5959 = vst.msk [vmem:[#allocation4 + $0x34] sm:$0x1] %vm1837_vm0, %v16964_v56  ;;  %5960 = vst.msk [vmem:[#allocation4 + $0x54] sm:$0x1] %vm1837_vm0, %v16974_v60  ;;  %v17011_v9 = vcombine.high %v16986_v15, %v16986_v15  ;;  %v1979_v36 = vrot.slane %v16764_v18, %v16647_v14  ;;  %v3627_v18 = vrot.slane %v16772_v17, %v16647_v14 }
 0x1e9   :  { %5963 = vst.msk [vmem:[#allocation4 + $0xb4] sm:$0x1] %vm1837_vm0, %v16970_v42  ;;  %19989 = vst [vmem:[#allocation67_spill] sm:$0xff] %v17004_v6  ;;  %v17020_v53 = vrot.slane %v7565_v4, %v16665_v22  ;;  %4932 = vrot.lane.b32.xlu1 %v16910_v62, %s16490_s25  ;;  %v17066_v39 = vcombine.high %v16925_v37, %v16925_v37  ;;  %v17070_v40 = vcombine.high %v16953_v52, %v16953_v52 }
 0x1ea   :  { %7606 = vst.msk [vmem:[#allocation4 + $0x1c] sm:$0x1] %vm1837_vm0, %v16986_v15  ;;  %5136 = vst.msk [vmem:[#allocation4 + $0x50] sm:$0x1] %vm1837_vm0, %v16997_v1  ;;  %4702 = vrot.lane.b32.xlu0 %v16910_v62, %s16503_s24  ;;  %v17050_v62 = vcombine.high %v17007_v7, %v17007_v7  ;;  %v17074_v45 = vcombine.high %v16934_v31, %v16934_v31  ;;  %v17078_v48 = vcombine.high %v17004_v6, %v17004_v6 }
 0x1eb   :  { %6784 = vst.msk [vmem:[#allocation4 + $0x58] sm:$0x1] %vm1837_vm0, %v17001_v2  ;;  %19990 = vst [vmem:[#allocation68_spill] sm:$0xff] %v17020_v53  ;;  %v17082_v51 = vcombine.high %v16943_v49, %v16943_v49  ;;  %v17086_v17 = vcombine.high %v16970_v42, %v16970_v42  ;;  %v17090_v58 = vcombine.high %v16957_v54, %v16957_v54 }
 0x1ec   :  { %7607 = vst.msk [vmem:[#allocation4 + $0x3c] sm:$0x1] %vm1837_vm0, %v17007_v7  ;;  %7608 = vst.msk [vmem:[#allocation4 + $0x5c] sm:$0x1] %vm1837_vm0, %v17011_v9  ;;  %v17100_v59 = vcombine.high %v17020_v53, %v17020_v53  ;;  %v2803_v63 = vrot.slane %v16776_v21, %v16647_v14  ;;  %v1249_v4 = vrot.slane %v17116_v0, %v16647_v14 }
 0x1ed   :  { %7610 = vst.msk [vmem:[#allocation4 + $0x9c] sm:$0x1] %vm1837_vm0, %v17004_v6  ;;  %7611 = vst.msk [vmem:[#allocation4 + $0xbc] sm:$0x1] %vm1837_vm0, %v17020_v53  ;;  %2232 = vrot.lane.b32.xlu1 %v1979_v36, %s16503_s24  ;;  %v1261_v21 = vrot.slane %v17116_v0, %v16658_v20  ;;  %v6911_v6 = vrot.slane %v16921_v13, %v16647_v14  ;;  %v1277_v31 = vrot.slane %v17116_v0, %v16893_v44 }
 0x1ee   :  { %5137 = vst.msk [vmem:[#allocation4 + $0x70] sm:$0x1] %vm1837_vm0, %v17034_v11  ;;  %5961 = vst.msk [vmem:[#allocation4 + $0x74] sm:$0x1] %vm1837_vm0, %v17038_v24  ;;  %2002 = vrot.lane.b32.xlu0 %v1979_v36, %s16508_s10 }
 0x1ef   :  { %6785 = vst.msk [vmem:[#allocation4 + $0x78] sm:$0x1] %vm1837_vm0, %v17042_v35  ;;  %7609 = vst.msk [vmem:[#allocation4 + $0x7c] sm:$0x1] %vm1837_vm0, %v17050_v62 }
 0x1f0   :  { %19991 = vst [vmem:[#allocation69_spill] sm:$0xff] %v17066_v39  ;;  %19992 = vst [vmem:[#allocation70_spill] sm:$0xff] %v17070_v40 }
 0x1f1   :  { %19993 = vst [vmem:[#allocation71_spill] sm:$0xff] %v17074_v45  ;;  %19994 = vst [vmem:[#allocation72_spill] sm:$0xff] %v17078_v48  ;;  %3880 = vrot.lane.b32.xlu1 %v3627_v18, %s16503_s24 }
 0x1f2   :  { %19995 = vst [vmem:[#allocation73_spill] sm:$0xff] %v17082_v51  ;;  %19996 = vst [vmem:[#allocation74_spill] sm:$0xff] %v17086_v17  ;;  %2462 = vrot.lane.b32.xlu0 %v1979_v36, %s16490_s25  ;;  %v1253_v36 = vrot.slane %v17116_v0, %v16655_v19 }
 0x1f3   :  { %19997 = vst [vmem:[#allocation75_spill] sm:$0xff] %v17090_v58  ;;  %5140 = vst.msk [vmem:[#allocation4 + $0xd0] sm:$0x1] %vm1837_vm0, %v17066_v39 }
 0x1f4   :  { %5964 = vst.msk [vmem:[#allocation4 + $0xd4] sm:$0x1] %vm1837_vm0, %v17070_v40  ;;  %6788 = vst.msk [vmem:[#allocation4 + $0xd8] sm:$0x1] %vm1837_vm0, %v17074_v45  ;;  %v4451_v45 = vrot.slane %v16780_v23, %v16647_v14 }
 0x1f5   :  { %19998 = vst [vmem:[#allocation76_spill] sm:$0xff] %v17100_v59  ;;  %7612 = vst.msk [vmem:[#allocation4 + $0xdc] sm:$0x1] %vm1837_vm0, %v17078_v48  ;;  %2826 = vrot.lane.b32.xlu1 %v2803_v63, %s16508_s10 }
 0x1f6   :  { %5141 = vst.msk [vmem:[#allocation4 + $0xf0] sm:$0x1] %vm1837_vm0, %v17082_v51  ;;  %5965 = vst.msk [vmem:[#allocation4 + $0xf4] sm:$0x1] %vm1837_vm0, %v17086_v17  ;;  %3650 = vrot.lane.b32.xlu0 %v3627_v18, %s16508_s10 }
 0x1f7   :  { %6789 = vst.msk [vmem:[#allocation4 + $0xf8] sm:$0x1] %vm1837_vm0, %v17090_v58  ;;  %7613 = vst.msk [vmem:[#allocation4 + $0xfc] sm:$0x1] %vm1837_vm0, %v17100_v59  ;;  %v1257_v58 = vrot.slane %v17116_v0, %v16652_v16 }
 0x1f8   :  { %v1640_v59 = vpop.f32.mrf.mxu0  ;;  %v1681_v51 = vpop.f32.mrf.mxu1 }
 0x1f9   :  { %3286 = vrot.lane.b32.xlu1 %v2803_v63, %s16490_s25  ;;  %v1641_v17 = vadd.f32 %v1640_v59, %v1249_v4  ;;  %v1682_v48 = vadd.f32 %v1681_v51, %v1257_v58 }
 0x1fa   :  { %4110 = vrot.lane.b32.xlu0 %v3627_v18, %s16490_s25  ;;  %v1642_v40 = vpop.f32.mrf.mxu0  ;;  %v1683_v19 = vpop.f32.mrf.mxu1 }
 0x1fb   :  { %v1848_v39 = vcombine.high %v1641_v17, %v1641_v17  ;;  %v1855_v16 = vrot.slane %v1641_v17, %v16665_v22  ;;  %v1643_v12 = vadd.f32 %v1642_v40, %v1253_v36  ;;  %v3496_v34 = vcombine.high %v1682_v48, %v1682_v48 }
 0x1fc   :  { %v3503_v33 = vrot.slane %v1682_v48, %v16665_v22  ;;  %v1684_v20 = vadd.f32 %v1683_v19, %v1261_v21  ;;  %v1644_v32 = vpop.f32.mrf.mxu0  ;;  %v1685_v59 = vpop.f32.mrf.mxu1 }
 0x1fd   :  { %4474 = vrot.lane.b32.xlu1 %v4451_v45, %s16508_s10  ;;  %v17136_v18 = vrot.slane %v1848_v39, %v16665_v22  ;;  %v1863_v51 = vcombine.high %v1855_v16, %v1855_v16  ;;  %v1871_v58 = vrot.slane %v1855_v16, %v16665_v22  ;;  %v2672_v23 = vcombine.high %v1643_v12, %v1643_v12 }
 0x1fe   :  { %3056 = vrot.lane.b32.xlu0 %v2803_v63, %s16503_s24  ;;  %v17141_v40 = vrot.slane %v3496_v34, %v16665_v22  ;;  %v3511_v17 = vcombine.high %v3503_v33, %v3503_v33  ;;  %v3519_v48 = vrot.slane %v3503_v33, %v16665_v22  ;;  %v2679_v4 = vrot.slane %v1643_v12, %v16665_v22  ;;  %v1645_v19 = vpop.f32.mrf.mxu0  ;;  %v1686_v63 = vpop.f32.mrf.mxu1 }
 0x1ff   :  { %v17147_v32 = vrot.slane %v17136_v18, %v16665_v22  ;;  %v17150_v39 = vrot.slane %v1863_v51, %v16665_v22  ;;  %1905 = vst.msk [vmem:[#allocation5] sm:$0x1] %vm1837_vm0, %v1871_v58  ;;  %v2686_v16 = vrot.slane %v2672_v23, %v16665_v22  ;;  %v4320_v23 = vcombine.high %v1684_v20, %v1684_v20 }
 0x200   :  { %v17156_v34 = vrot.slane %v17141_v40, %v16665_v22  ;;  %v17159_v33 = vrot.slane %v3511_v17, %v16665_v22  ;;  %3553 = vst.msk [vmem:[#allocation5 + $0x8] sm:$0x1] %vm1837_vm0, %v3519_v48  ;;  %v2687_v12 = vcombine.high %v2679_v4, %v2679_v4  ;;  %v2695_v21 = vrot.slane %v2679_v4, %v16665_v22 }
 0x201   :  { %4934 = vrot.lane.b32.xlu1 %v4451_v45, %s16490_s25  ;;  %1906 = vst.msk [vmem:[#allocation5 + $0x20] sm:$0x1] %vm1837_vm0, %v17150_v39  ;;  %1909 = vst.msk [vmem:[#allocation5 + $0x80] sm:$0x1] %vm1837_vm0, %v17147_v32  ;;  %v2688_v36 = vcombine.high %v2686_v16, %v2686_v16  ;;  %v17169_v51 = vrot.slane %v2686_v16, %v16665_v22  ;;  %v4327_v17 = vrot.slane %v1684_v20, %v16665_v22 }
 0x202   :  { %19999 = vst [vmem:[#allocation77_spill] sm:$0xff] %v17156_v34  ;;  %4704 = vrot.lane.b32.xlu0 %v4451_v45, %s16503_s24  ;;  %3554 = vst.msk [vmem:[#allocation5 + $0x28] sm:$0x1] %vm1837_vm0, %v17159_v33  ;;  %v17177_v59 = vrot.slane %v2687_v12, %v16665_v22  ;;  %v17181_v19 = vrot.slane %v1871_v58, %v16647_v14  ;;  %v4334_v45 = vrot.slane %v4320_v23, %v16665_v22 }
 0x203   :  { %20000 = vst [vmem:[#allocation78_spill] sm:$0xff] %v17169_v51  ;;  %3557 = vst.msk [vmem:[#allocation5 + $0x88] sm:$0x1] %vm1837_vm0, %v17156_v34  ;;  %v17184_v4 = vrot.slane %v2688_v36, %v16665_v22  ;;  %v5263_v16 = vrot.slane %v16917_v5, %v16647_v14  ;;  %v4335_v20 = vcombine.high %v4327_v17, %v4327_v17 }
 0x204   :  { %2729 = vst.msk [vmem:[#allocation5 + $0x4] sm:$0x1] %vm1837_vm0, %v2695_v21  ;;  %2733 = vst.msk [vmem:[#allocation5 + $0x84] sm:$0x1] %vm1837_vm0, %v17169_v51  ;;  %v4343_v63 = vrot.slane %v4327_v17, %v16665_v22  ;;  %v17198_v12 = vrot.slane %v3519_v48, %v16647_v14  ;;  %v17200_v36 = vcombine.high %v1871_v58, %v1871_v58 }
 0x205   :  { %20001 = vst [vmem:[#allocation79_spill] sm:$0xff] %v17184_v4  ;;  %2730 = vst.msk [vmem:[#allocation5 + $0x24] sm:$0x1] %vm1837_vm0, %v17177_v59  ;;  %2341 = vrot.lane.b32.xlu1 %v17181_v19, %s16503_s24  ;;  %v4336_v23 = vcombine.high %v4334_v45, %v4334_v45  ;;  %v17205_v5 = vrot.slane %v4334_v45, %v16665_v22  ;;  %v17208_v30 = vcombine.high %v3519_v48, %v3519_v48 }
 0x206   :  { %2734 = vst.msk [vmem:[#allocation5 + $0xa4] sm:$0x1] %vm1837_vm0, %v17184_v4  ;;  %5292 = vrot.lane.b32.xlu0 %v5263_v16, %s16508_s10  ;;  %v17211_v17 = vrot.slane %v4335_v20, %v16665_v22  ;;  %4377 = vst.msk [vmem:[#allocation5 + $0xc] sm:$0x1] %vm1837_vm0, %v4343_v63  ;;  %v17216_v58 = vcombine.high %v2695_v21, %v2695_v21  ;;  %v1864_v29 = vcombine.high %v17136_v18, %v17136_v18 }
 0x207   :  { %20002 = vst [vmem:[#allocation80_spill] sm:$0xff] %v17205_v5  ;;  %1907 = vst.msk [vmem:[#allocation5 + $0x40] sm:$0x1] %vm1837_vm0, %v17200_v36  ;;  %v17221_v45 = vrot.slane %v4336_v23, %v16665_v22  ;;  %v17227_v48 = vcombine.high %v4343_v63, %v4343_v63  ;;  %v17231_v20 = vcombine.high %v17150_v39, %v17150_v39 }
 0x208   :  { %4381 = vst.msk [vmem:[#allocation5 + $0x8c] sm:$0x1] %vm1837_vm0, %v17205_v5  ;;  %3555 = vst.msk [vmem:[#allocation5 + $0x48] sm:$0x1] %vm1837_vm0, %v17208_v30  ;;  %v3512_v28 = vcombine.high %v17141_v40, %v17141_v40  ;;  %v17243_v18 = vcombine.high %v17159_v33, %v17159_v33  ;;  %v17247_v23 = vcombine.high %v17177_v59, %v17177_v59 }
 0x209   :  { %20003 = vst [vmem:[#allocation81_spill] sm:$0xff] %v17221_v45  ;;  %4378 = vst.msk [vmem:[#allocation5 + $0x2c] sm:$0x1] %vm1837_vm0, %v17211_v17  ;;  %3989 = vrot.lane.b32.xlu1 %v17198_v12, %s16503_s24  ;;  %v17258_v40 = vcombine.high %v17211_v17, %v17211_v17  ;;  %v17261_v27 = vrot.slane %v2695_v21, %v16647_v14  ;;  %v17270_v53 = vrot.slane %v1864_v29, %v16665_v22 }
 0x20a   :  { %2731 = vst.msk [vmem:[#allocation5 + $0x44] sm:$0x1] %vm1837_vm0, %v17216_v58  ;;  %4382 = vst.msk [vmem:[#allocation5 + $0xac] sm:$0x1] %vm1837_vm0, %v17221_v45  ;;  %5522 = vrot.lane.b32.xlu0 %v5263_v16, %s16503_s24  ;;  %v17275_v54 = vrot.slane %v3512_v28, %v16665_v22  ;;  %v17279_v21 = vcombine.high %v17147_v32, %v17147_v32  ;;  %v17283_v42 = vcombine.high %v17169_v51, %v17169_v51 }
 0x20b   :  { %4379 = vst.msk [vmem:[#allocation5 + $0x4c] sm:$0x1] %vm1837_vm0, %v17227_v48  ;;  %1908 = vst.msk [vmem:[#allocation5 + $0x60] sm:$0x1] %vm1837_vm0, %v17231_v20  ;;  %v17290_v29 = vcombine.high %v17156_v34, %v17156_v34  ;;  %v17294_v28 = vcombine.high %v17205_v5, %v17205_v5  ;;  %v17298_v49 = vcombine.high %v17270_v53, %v17270_v53 }
 0x20c   :  { %3556 = vst.msk [vmem:[#allocation5 + $0x68] sm:$0x1] %vm1837_vm0, %v17243_v18  ;;  %2732 = vst.msk [vmem:[#allocation5 + $0x64] sm:$0x1] %vm1837_vm0, %v17247_v23  ;;  %v17328_v13 = vcombine.high %v17221_v45, %v17221_v45  ;;  %v17477_v55 = vrot.slane %v17208_v30, %v16647_v14 }
 0x20d   :  { %4380 = vst.msk [vmem:[#allocation5 + $0x6c] sm:$0x1] %vm1837_vm0, %v17258_v40  ;;  %20004 = vst [vmem:[#allocation82_spill] sm:$0xff] %v17270_v53  ;;  %2935 = vrot.lane.b32.xlu1 %v17261_v27, %s16508_s10 }
 0x20e   :  { %20005 = vst [vmem:[#allocation83_spill] sm:$0xff] %v17275_v54  ;;  %20006 = vst [vmem:[#allocation84_spill] sm:$0xff] %v17279_v21  ;;  %5752 = vrot.lane.b32.xlu0 %v5263_v16, %s16490_s25  ;;  %v17308_v16 = vcombine.high %v17184_v4, %v17184_v4 }
 0x20f   :  { %20007 = vst [vmem:[#allocation85_spill] sm:$0xff] %v17283_v42  ;;  %1910 = vst.msk [vmem:[#allocation5 + $0xa0] sm:$0x1] %vm1837_vm0, %v17270_v53 }
 0x210   :  { %20008 = vst [vmem:[#allocation86_spill] sm:$0xff] %v17290_v29  ;;  %20009 = vst [vmem:[#allocation87_spill] sm:$0xff] %v17294_v28 }
 0x211   :  { %20010 = vst [vmem:[#allocation88_spill] sm:$0xff] %v17298_v49  ;;  %3558 = vst.msk [vmem:[#allocation5 + $0xa8] sm:$0x1] %vm1837_vm0, %v17275_v54  ;;  %3395 = vrot.lane.b32.xlu1 %v17261_v27, %s16490_s25 }
 0x212   :  { %1911 = vst.msk [vmem:[#allocation5 + $0xc0] sm:$0x1] %vm1837_vm0, %v17279_v21  ;;  %2735 = vst.msk [vmem:[#allocation5 + $0xc4] sm:$0x1] %vm1837_vm0, %v17283_v42  ;;  %v17320_v21 = vcombine.high %v17275_v54, %v17275_v54  ;;  %6940 = vrot.lane.b32.xlu0 %v6911_v6, %s16508_s10  ;;  %v1273_v42 = vrot.slane %v17116_v0, %v16885_v57 }
 0x213   :  { %20011 = vst [vmem:[#allocation89_spill] sm:$0xff] %v17308_v16  ;;  %3559 = vst.msk [vmem:[#allocation5 + $0xc8] sm:$0x1] %vm1837_vm0, %v17290_v29 }
 0x214   :  { %4383 = vst.msk [vmem:[#allocation5 + $0xcc] sm:$0x1] %vm1837_vm0, %v17294_v28  ;;  %1912 = vst.msk [vmem:[#allocation5 + $0xe0] sm:$0x1] %vm1837_vm0, %v17298_v49  ;;  %v17334_v49 = vrot.slane %v4343_v63, %v16647_v14 }
 0x215   :  { %20012 = vst [vmem:[#allocation90_spill] sm:$0xff] %v17320_v21  ;;  %2736 = vst.msk [vmem:[#allocation5 + $0xe4] sm:$0x1] %vm1837_vm0, %v17308_v16  ;;  %v1265_v16 = vrot.slane %v17116_v0, %v16880_v41 }
 0x216   :  { %20013 = vst [vmem:[#allocation91_spill] sm:$0xff] %v17328_v13  ;;  %3560 = vst.msk [vmem:[#allocation5 + $0xe8] sm:$0x1] %vm1837_vm0, %v17320_v21  ;;  %4583 = vrot.lane.b32.xlu1 %v17334_v49, %s16508_s10  ;;  %7170 = vrot.lane.b32.xlu0 %v6911_v6, %s16503_s24  ;;  %v2227_v28 = vpop.permute.xlu1 %2226  ;;  %v1997_v29 = vpop.permute.xlu0 %1996 }
 0x217   :  { %4384 = vst.msk [vmem:[#allocation5 + $0xec] sm:$0x1] %vm1837_vm0, %v17328_v13  ;;  %2250 = vst.msk [vmem:[#allocation4 + $0x2] sm:$0x1] %vm1837_vm0, %v2227_v28  ;;  %v1269_v13 = vrot.slane %v17116_v0, %v16888_v43  ;;  %v17356_v28 = vrot.slane %v17150_v39, %v16647_v14  ;;  %v17362_v43 = vrot.slane %v16950_v10, %v16647_v14 }
 0x218   :  { %2020 = vst.msk [vmem:[#allocation4 + $0x1] sm:$0x1] %vm1837_vm0, %v1997_v29  ;;  %v1722_v63 = vpop.f32.mrf.mxu0  ;;  %v1763_v41 = vpop.f32.mrf.mxu1 }
 0x219   :  { %v1723_v21 = vadd.f32 %v1722_v63, %v1265_v16  ;;  %v1764_v29 = vadd.f32 %v1763_v41, %v1273_v42  ;;  %v17373_v41 = vrot.slane %v17200_v36, %v16647_v14 }
 0x21a   :  { %5043 = vrot.lane.b32.xlu1 %v17334_v49, %s16490_s25  ;;  %7400 = vrot.lane.b32.xlu0 %v6911_v6, %s16490_s25  ;;  %v3875_v52 = vpop.permute.xlu1 %3874  ;;  %v2457_v57 = vpop.permute.xlu0 %2456  ;;  %v17366_v6 = vrot.slane %v17159_v33, %v16647_v14 }
 0x21b   :  { %3898 = vst.msk [vmem:[#allocation4 + $0xa] sm:$0x1] %vm1837_vm0, %v3875_v52  ;;  %2480 = vst.msk [vmem:[#allocation4 + $0x3] sm:$0x1] %vm1837_vm0, %v2457_v57  ;;  %v5144_v0 = vcombine.high %v1723_v21, %v1723_v21  ;;  %v5151_v16 = vrot.slane %v1723_v21, %v16665_v22  ;;  %v1724_v63 = vpop.f32.mrf.mxu0  ;;  %v1765_v44 = vpop.f32.mrf.mxu1  ;;  %v6792_v52 = vcombine.high %v1764_v29, %v1764_v29 }
 0x21c   :  { %v1725_v57 = vadd.f32 %v1724_v63, %v1269_v13  ;;  %v6799_v10 = vrot.slane %v1764_v29, %v16665_v22  ;;  %v1766_v37 = vadd.f32 %v1765_v44, %v1277_v31 }
 0x21d   :  { %v5158_v42 = vrot.slane %v5144_v0, %v16665_v22  ;;  %v5159_v39 = vcombine.high %v5151_v16, %v5151_v16  ;;  %v17380_v33 = vrot.slane %v5151_v16, %v16665_v22  ;;  %v1726_v21 = vpop.f32.mrf.mxu0  ;;  %v1767_v8 = vpop.f32.mrf.mxu1  ;;  %v6806_v63 = vrot.slane %v6792_v52, %v16665_v22 }
 0x21e   :  { %2343 = vrot.lane.b32.xlu1 %v17356_v28, %s16503_s24  ;;  %6116 = vrot.lane.b32.xlu0 %v17362_v43, %s16508_s10  ;;  %v2821_v26 = vpop.permute.xlu1 %2820  ;;  %v3645_v61 = vpop.permute.xlu0 %3644  ;;  %v5968_v36 = vcombine.high %v1725_v57, %v1725_v57  ;;  %v5975_v13 = vrot.slane %v1725_v57, %v16665_v22  ;;  %v6807_v29 = vcombine.high %v6799_v10, %v6799_v10 }
 0x21f   :  { %2844 = vst.msk [vmem:[#allocation4 + $0x5] sm:$0x1] %vm1837_vm0, %v2821_v26  ;;  %3668 = vst.msk [vmem:[#allocation4 + $0x9] sm:$0x1] %vm1837_vm0, %v3645_v61  ;;  %v5160_v0 = vcombine.high %v5158_v42, %v5158_v42  ;;  %v17387_v25 = vrot.slane %v5158_v42, %v16665_v22  ;;  %v17390_v16 = vrot.slane %v5159_v39, %v16665_v22  ;;  %v1727_v44 = vpop.f32.mrf.mxu0  ;;  %v1768_v31 = vpop.f32.mrf.mxu1 }
 0x220   :  { %v17394_v8 = vcombine.high %v17380_v33, %v17380_v33  ;;  %5201 = vst.msk [vmem:[#allocation5 + $0x10] sm:$0x1] %vm1837_vm0, %v17380_v33  ;;  %v5982_v61 = vrot.slane %v5968_v36, %v16665_v22  ;;  %v5983_v26 = vcombine.high %v5975_v13, %v5975_v13  ;;  %v17402_v57 = vrot.slane %v5975_v13, %v16665_v22 }
 0x221   :  { %v6808_v52 = vcombine.high %v6806_v63, %v6806_v63  ;;  %v17407_v42 = vrot.slane %v5160_v0, %v16665_v22  ;;  %5202 = vst.msk [vmem:[#allocation5 + $0x30] sm:$0x1] %vm1837_vm0, %v17390_v16  ;;  %5205 = vst.msk [vmem:[#allocation5 + $0x90] sm:$0x1] %vm1837_vm0, %v17387_v25  ;;  %v17416_v39 = vrot.slane %v6799_v10, %v16665_v22 }
 0x222   :  { %3991 = vrot.lane.b32.xlu1 %v17366_v6, %s16503_s24  ;;  %6346 = vrot.lane.b32.xlu0 %v17362_v43, %s16503_s24  ;;  %5203 = vst.msk [vmem:[#allocation5 + $0x50] sm:$0x1] %vm1837_vm0, %v17394_v8  ;;  %v17419_v21 = vrot.slane %v6806_v63, %v16665_v22  ;;  %v17422_v36 = vrot.slane %v6807_v29, %v16665_v22  ;;  %v3281_v13 = vpop.permute.xlu1 %3280  ;;  %v4105_v0 = vpop.permute.xlu0 %4104  ;;  %6025 = vst.msk [vmem:[#allocation5 + $0x14] sm:$0x1] %vm1837_vm0, %v17402_v57 }
 0x223   :  { %v5984_v44 = vcombine.high %v5982_v61, %v5982_v61  ;;  %v17425_v31 = vrot.slane %v5982_v61, %v16665_v22  ;;  %v17428_v3 = vrot.slane %v5983_v26, %v16665_v22  ;;  %v17432_v50 = vcombine.high %v17402_v57, %v17402_v57  ;;  %3304 = vst.msk [vmem:[#allocation4 + $0x7] sm:$0x1] %vm1837_vm0, %v3281_v13 }
 0x224   :  { %4128 = vst.msk [vmem:[#allocation4 + $0xb] sm:$0x1] %vm1837_vm0, %v4105_v0  ;;  %5206 = vst.msk [vmem:[#allocation5 + $0xb0] sm:$0x1] %vm1837_vm0, %v17407_v42  ;;  %v17441_v10 = vrot.slane %v6808_v52, %v16665_v22  ;;  %v17445_v63 = vcombine.high %v17416_v39, %v17416_v39  ;;  %v7616_v29 = vcombine.high %v1766_v37, %v1766_v37 }
 0x225   :  { %6849 = vst.msk [vmem:[#allocation5 + $0x18] sm:$0x1] %vm1837_vm0, %v17416_v39  ;;  %6850 = vst.msk [vmem:[#allocation5 + $0x38] sm:$0x1] %vm1837_vm0, %v17422_v36  ;;  %v7623_v61 = vrot.slane %v1766_v37, %v16665_v22  ;;  %v17457_v26 = vrot.slane %v5984_v44, %v16665_v22  ;;  %v17554_v45 = vcombine.high %v17419_v21, %v17419_v21 }
 0x226   :  { %6853 = vst.msk [vmem:[#allocation5 + $0x98] sm:$0x1] %vm1837_vm0, %v17419_v21  ;;  %2345 = vrot.lane.b32.xlu1 %v17373_v41, %s16503_s24  ;;  %6026 = vst.msk [vmem:[#allocation5 + $0x34] sm:$0x1] %vm1837_vm0, %v17428_v3  ;;  %6576 = vrot.lane.b32.xlu0 %v17362_v43, %s16490_s25  ;;  %v7630_v37 = vrot.slane %v7616_v29, %v16665_v22  ;;  %v4469_v0 = vpop.permute.xlu1 %4468  ;;  %v3051_v44 = vpop.permute.xlu0 %3050  ;;  %v7735_v43 = vrot.slane %v16986_v15, %v16647_v14 }
 0x227   :  { %6027 = vst.msk [vmem:[#allocation5 + $0x54] sm:$0x1] %vm1837_vm0, %v17432_v50  ;;  %6029 = vst.msk [vmem:[#allocation5 + $0x94] sm:$0x1] %vm1837_vm0, %v17425_v31  ;;  %v7631_v52 = vcombine.high %v7623_v61, %v7623_v61  ;;  %v17473_v13 = vrot.slane %v7623_v61, %v16665_v22  ;;  %v17564_v5 = vcombine.high %v17407_v42, %v17407_v42 }
 0x228   :  { %6851 = vst.msk [vmem:[#allocation5 + $0x58] sm:$0x1] %vm1837_vm0, %v17445_v63  ;;  %6854 = vst.msk [vmem:[#allocation5 + $0xb8] sm:$0x1] %vm1837_vm0, %v17441_v10  ;;  %v7632_v29 = vcombine.high %v7630_v37, %v7630_v37  ;;  %v17486_v61 = vrot.slane %v7630_v37, %v16665_v22  ;;  %v17511_v37 = vcombine.high %v17390_v16, %v17390_v16 }
 0x229   :  { %6030 = vst.msk [vmem:[#allocation5 + $0xb4] sm:$0x1] %vm1837_vm0, %v17457_v26  ;;  %4492 = vst.msk [vmem:[#allocation4 + $0xd] sm:$0x1] %vm1837_vm0, %v4469_v0  ;;  %v17489_v46 = vrot.slane %v7631_v52, %v16665_v22  ;;  %v17493_v30 = vcombine.high %v17473_v13, %v17473_v13  ;;  %v17568_v34 = vcombine.high %v17457_v26, %v17457_v26 }
 0x22a   :  { %3074 = vst.msk [vmem:[#allocation4 + $0x6] sm:$0x1] %vm1837_vm0, %v3051_v44  ;;  %7673 = vst.msk [vmem:[#allocation5 + $0x1c] sm:$0x1] %vm1837_vm0, %v17473_v13  ;;  %3993 = vrot.lane.b32.xlu1 %v17477_v55, %s16503_s24  ;;  %7764 = vrot.lane.b32.xlu0 %v7735_v43, %s16508_s10  ;;  %v17501_v15 = vrot.slane %v7632_v29, %v16665_v22  ;;  %v4929_v52 = vpop.permute.xlu1 %4928  ;;  %v4699_v0 = vpop.permute.xlu0 %4698  ;;  %v17515_v44 = vrot.slane %v17177_v59, %v16647_v14 }
 0x22b   :  { %7674 = vst.msk [vmem:[#allocation5 + $0x3c] sm:$0x1] %vm1837_vm0, %v17489_v46  ;;  %7675 = vst.msk [vmem:[#allocation5 + $0x5c] sm:$0x1] %vm1837_vm0, %v17493_v30  ;;  %v17519_v22 = vcombine.high %v17422_v36, %v17422_v36  ;;  %v17529_v29 = vcombine.high %v17428_v3, %v17428_v3  ;;  %v17533_v59 = vcombine.high %v17489_v46, %v17489_v46 }
 0x22c   :  { %7677 = vst.msk [vmem:[#allocation5 + $0x9c] sm:$0x1] %vm1837_vm0, %v17486_v61  ;;  %4952 = vst.msk [vmem:[#allocation4 + $0xf] sm:$0x1] %vm1837_vm0, %v4929_v52  ;;  %v17541_v52 = vcombine.high %v17387_v25, %v17387_v25  ;;  %v17560_v53 = vcombine.high %v17486_v61, %v17486_v61  ;;  %v17582_v51 = vcombine.high %v17501_v15, %v17501_v15 }
 0x22d   :  { %4722 = vst.msk [vmem:[#allocation4 + $0xe] sm:$0x1] %vm1837_vm0, %v4699_v0  ;;  %7678 = vst.msk [vmem:[#allocation5 + $0xbc] sm:$0x1] %vm1837_vm0, %v17501_v15  ;;  %v17550_v0 = vcombine.high %v17425_v31, %v17425_v31 }
 0x22e   :  { %5204 = vst.msk [vmem:[#allocation5 + $0x70] sm:$0x1] %vm1837_vm0, %v17511_v37  ;;  %2937 = vrot.lane.b32.xlu1 %v17515_v44, %s16508_s10  ;;  %6852 = vst.msk [vmem:[#allocation5 + $0x78] sm:$0x1] %vm1837_vm0, %v17519_v22  ;;  %7994 = vrot.lane.b32.xlu0 %v7735_v43, %s16503_s24  ;;  %v2229_v54 = vpop.permute.xlu1 %2228  ;;  %v1999_v4 = vpop.permute.xlu0 %1998 }
 0x22f   :  { %20014 = vst [vmem:[#allocation92_spill] sm:$0xff] %v17541_v52  ;;  %6028 = vst.msk [vmem:[#allocation5 + $0x74] sm:$0x1] %vm1837_vm0, %v17529_v29 }
 0x230   :  { %7676 = vst.msk [vmem:[#allocation5 + $0x7c] sm:$0x1] %vm1837_vm0, %v17533_v59  ;;  %20015 = vst [vmem:[#allocation93_spill] sm:$0xff] %v17550_v0 }
 0x231   :  { %20016 = vst [vmem:[#allocation94_spill] sm:$0xff] %v17554_v45  ;;  %5207 = vst.msk [vmem:[#allocation5 + $0xd0] sm:$0x1] %vm1837_vm0, %v17541_v52  ;;  %v17578_v52 = vcombine.high %v17441_v10, %v17441_v10 }
 0x232   :  { %20017 = vst [vmem:[#allocation95_spill] sm:$0xff] %v17560_v53  ;;  %2251 = vst.msk [vmem:[#allocation4 + $0x22] sm:$0x1] %vm1837_vm0, %v2229_v54  ;;  %3397 = vrot.lane.b32.xlu1 %v17515_v44, %s16490_s25  ;;  %8224 = vrot.lane.b32.xlu0 %v7735_v43, %s16490_s25  ;;  %v3877_v54 = vpop.permute.xlu1 %3876  ;;  %v5267_v43 = vrot.slane %v16928_v38, %v16647_v14 }
 0x233   :  { %2021 = vst.msk [vmem:[#allocation4 + $0x21] sm:$0x1] %vm1837_vm0, %v1999_v4  ;;  %6031 = vst.msk [vmem:[#allocation5 + $0xd4] sm:$0x1] %vm1837_vm0, %v17550_v0  ;;  %v2459_v4 = vpop.permute.xlu0 %2458 }
 0x234   :  { %6855 = vst.msk [vmem:[#allocation5 + $0xd8] sm:$0x1] %vm1837_vm0, %v17554_v45  ;;  %20018 = vst [vmem:[#allocation96_spill] sm:$0xff] %v17578_v52  ;;  %v17599_v45 = vrot.slane %v17211_v17, %v16647_v14  ;;  %v8372_v0 = vld [vmem:[#allocation4 + $0x8] sm:$0xff] }
 0x235   :  { %20019 = vst [vmem:[#allocation97_spill] sm:$0xff] %v17582_v51  ;;  %7679 = vst.msk [vmem:[#allocation5 + $0xdc] sm:$0x1] %vm1837_vm0, %v17560_v53  ;;  %v8371_v53 = vld [vmem:[#allocation4] sm:$0xff] }
 0x236   :  { %5208 = vst.msk [vmem:[#allocation5 + $0xf0] sm:$0x1] %vm1837_vm0, %v17564_v5  ;;  %6032 = vst.msk [vmem:[#allocation5 + $0xf4] sm:$0x1] %vm1837_vm0, %v17568_v34  ;;  %4585 = vrot.lane.b32.xlu1 %v17599_v45, %s16508_s10  ;;  %5294 = vrot.lane.b32.xlu0 %v5267_v43, %s16508_s10  ;;  %v2231_v17 = vpop.permute.xlu1 %2230 }
 0x237   :  { %6856 = vst.msk [vmem:[#allocation5 + $0xf8] sm:$0x1] %vm1837_vm0, %v17578_v52  ;;  %7680 = vst.msk [vmem:[#allocation5 + $0xfc] sm:$0x1] %vm1837_vm0, %v17582_v51  ;;  %v8403_v52 = vpack.c.bf16 %v8372_v0, %v8371_v53  ;;  %v3647_v51 = vpop.permute.xlu0 %3646  ;;  %v17616_v0 = vrot.slane %v17216_v58, %v16647_v14 }
 0x238   :  { %3899 = vst.msk [vmem:[#allocation4 + $0x2a] sm:$0x1] %vm1837_vm0, %v3877_v54  ;;  %2481 = vst.msk [vmem:[#allocation4 + $0x23] sm:$0x1] %vm1837_vm0, %v2459_v4  ;;  %v6915_v54 = vrot.slane %v16937_v47, %v16647_v14 }
 0x239   :  { %15919 = vmatprep.mubr.msk.bf16.mxu1 %vm8467_vm1, %v8403_v52  ;;  %2252 = vst.msk [vmem:[#allocation4 + $0x42] sm:$0x1] %vm1837_vm0, %v2231_v17  ;;  %3669 = vst.msk [vmem:[#allocation4 + $0x29] sm:$0x1] %vm1837_vm0, %v3647_v51  ;;  %v17632_v17 = vrot.slane %v17227_v48, %v16647_v14 }
 0x23a   :  { %5045 = vrot.lane.b32.xlu1 %v17599_v45, %s16490_s25  ;;  %5524 = vrot.lane.b32.xlu0 %v5267_v43, %s16503_s24  ;;  %v3879_v38 = vpop.permute.xlu1 %3878 }
 0x23b   :  { %v4107_v53 = vpop.permute.xlu0 %4106  ;;  %3900 = vst.msk [vmem:[#allocation4 + $0x4a] sm:$0x1] %vm1837_vm0, %v3879_v38 }
 0x23c   :  { %4129 = vst.msk [vmem:[#allocation4 + $0x2b] sm:$0x1] %vm1837_vm0, %v4107_v53  ;;  %v17646_v53 = vrot.slane %v17231_v20, %v16647_v14  ;;  %v17666_v20 = vrot.slane %v17247_v23, %v16647_v14 }
 0x23e   :  { %2939 = vrot.lane.b32.xlu1 %v17616_v0, %s16508_s10  ;;  %5754 = vrot.lane.b32.xlu0 %v5267_v43, %s16490_s25  ;;  %v2823_v51 = vpop.permute.xlu1 %2822 }
 0x23f   :  { %v2001_v52 = vpop.permute.xlu0 %2000  ;;  %2845 = vst.msk [vmem:[#allocation4 + $0x25] sm:$0x1] %vm1837_vm0, %v2823_v51  ;;  %v5271_v51 = vrot.slane %v16997_v1, %v16647_v14 }
 0x240   :  { %2022 = vst.msk [vmem:[#allocation4 + $0x41] sm:$0x1] %vm1837_vm0, %v2001_v52 }
 0x242   :  { %3399 = vrot.lane.b32.xlu1 %v17616_v0, %s16490_s25  ;;  %6942 = vrot.lane.b32.xlu0 %v6915_v54, %s16508_s10  ;;  %v3283_v58 = vpop.permute.xlu1 %3282 }
 0x243   :  { %v2461_v4 = vpop.permute.xlu0 %2460  ;;  %3305 = vst.msk [vmem:[#allocation4 + $0x27] sm:$0x1] %vm1837_vm0, %v3283_v58  ;;  %v17657_v58 = vrot.slane %v17243_v18, %v16647_v14 }
 0x244   :  { %2482 = vst.msk [vmem:[#allocation4 + $0x43] sm:$0x1] %vm1837_vm0, %v2461_v4 }
 0x246   :  { %4587 = vrot.lane.b32.xlu1 %v17632_v17, %s16508_s10  ;;  %7172 = vrot.lane.b32.xlu0 %v6915_v54, %s16503_s24  ;;  %v4471_v47 = vpop.permute.xlu1 %4470 }
 0x247   :  { %v3649_v43 = vpop.permute.xlu0 %3648  ;;  %4493 = vst.msk [vmem:[#allocation4 + $0x2d] sm:$0x1] %vm1837_vm0, %v4471_v47 }
 0x248   :  { %3670 = vst.msk [vmem:[#allocation4 + $0x49] sm:$0x1] %vm1837_vm0, %v3649_v43  ;;  %v6919_v43 = vrot.slane %v17001_v2, %v16647_v14 }
 0x24a   :  { %5047 = vrot.lane.b32.xlu1 %v17632_v17, %s16490_s25  ;;  %7402 = vrot.lane.b32.xlu0 %v6915_v54, %s16490_s25  ;;  %v4931_v48 = vpop.permute.xlu1 %4930 }
 0x24b   :  { %v4109_v38 = vpop.permute.xlu0 %4108  ;;  %4953 = vst.msk [vmem:[#allocation4 + $0x2f] sm:$0x1] %vm1837_vm0, %v4931_v48  ;;  %v17682_v48 = vrot.slane %v17258_v40, %v16647_v14  ;;  %v17695_v40 = vrot.slane %v17380_v33, %v16647_v14 }
 0x24c   :  { %4130 = vst.msk [vmem:[#allocation4 + $0x4b] sm:$0x1] %vm1837_vm0, %v4109_v38 }
 0x24e   :  { %2347 = vrot.lane.b32.xlu1 %v17646_v53, %s16503_s24  ;;  %5296 = vrot.lane.b32.xlu0 %v5271_v51, %s16508_s10  ;;  %v2825_v52 = vpop.permute.xlu1 %2824 }
 0x24f   :  { %v3053_v54 = vpop.permute.xlu0 %3052  ;;  %2846 = vst.msk [vmem:[#allocation4 + $0x45] sm:$0x1] %vm1837_vm0, %v2825_v52 }
 0x250   :  { %3075 = vst.msk [vmem:[#allocation4 + $0x26] sm:$0x1] %vm1837_vm0, %v3053_v54 }
 0x252   :  { %3995 = vrot.lane.b32.xlu1 %v17657_v58, %s16503_s24  ;;  %5526 = vrot.lane.b32.xlu0 %v5271_v51, %s16503_s24 }
 0x253   :  { %v3285_v1 = vpop.permute.xlu1 %3284 }
 0x254   :  { %3306 = vst.msk [vmem:[#allocation4 + $0x47] sm:$0x1] %vm1837_vm0, %v3285_v1  ;;  %v4701_v4 = vpop.permute.xlu0 %4700  ;;  %v6091_v1 = vrot.slane %v16964_v56, %v16647_v14 }
 0x255   :  { %4723 = vst.msk [vmem:[#allocation4 + $0x2e] sm:$0x1] %vm1837_vm0, %v4701_v4  ;;  %v17706_v4 = vrot.slane %v17416_v39, %v16647_v14 }
 0x256   :  { %2941 = vrot.lane.b32.xlu1 %v17666_v20, %s16508_s10  ;;  %5756 = vrot.lane.b32.xlu0 %v5271_v51, %s16490_s25 }
 0x257   :  { %v4473_v18 = vpop.permute.xlu1 %4472 }
 0x258   :  { %4494 = vst.msk [vmem:[#allocation4 + $0x4d] sm:$0x1] %vm1837_vm0, %v4473_v18  ;;  %v3055_v47 = vpop.permute.xlu0 %3054 }
 0x259   :  { %3076 = vst.msk [vmem:[#allocation4 + $0x46] sm:$0x1] %vm1837_vm0, %v3055_v47  ;;  %v17716_v47 = vrot.slane %v17402_v57, %v16647_v14 }
 0x25a   :  { %3401 = vrot.lane.b32.xlu1 %v17666_v20, %s16490_s25  ;;  %6944 = vrot.lane.b32.xlu0 %v6919_v43, %s16508_s10 }
 0x25b   :  { %v4933_v23 = vpop.permute.xlu1 %4932 }
 0x25c   :  { %4954 = vst.msk [vmem:[#allocation4 + $0x4f] sm:$0x1] %vm1837_vm0, %v4933_v23  ;;  %v4703_v38 = vpop.permute.xlu0 %4702 }
 0x25d   :  { %4724 = vst.msk [vmem:[#allocation4 + $0x4e] sm:$0x1] %vm1837_vm0, %v4703_v38  ;;  %v7739_v38 = vrot.slane %v17007_v7, %v16647_v14 }
 0x25e   :  { %4589 = vrot.lane.b32.xlu1 %v17682_v48, %s16508_s10  ;;  %7174 = vrot.lane.b32.xlu0 %v6919_v43, %s16503_s24 }
 0x25f   :  { %v2233_v2 = vpop.permute.xlu1 %2232 }
 0x260   :  { %2253 = vst.msk [vmem:[#allocation4 + $0x62] sm:$0x1] %vm1837_vm0, %v2233_v2  ;;  %v2003_v51 = vpop.permute.xlu0 %2002  ;;  %v17732_v2 = vrot.slane %v17473_v13, %v16647_v14 }
 0x261   :  { %2023 = vst.msk [vmem:[#allocation4 + $0x61] sm:$0x1] %vm1837_vm0, %v2003_v51 }
 0x262   :  { %5049 = vrot.lane.b32.xlu1 %v17682_v48, %s16490_s25  ;;  %7404 = vrot.lane.b32.xlu0 %v6919_v43, %s16490_s25 }
 0x263   :  { %v3881_v52 = vpop.permute.xlu1 %3880 }
 0x264   :  { %3901 = vst.msk [vmem:[#allocation4 + $0x6a] sm:$0x1] %vm1837_vm0, %v3881_v52  ;;  %v2463_v54 = vpop.permute.xlu0 %2462 }
 0x265   :  { %2483 = vst.msk [vmem:[#allocation4 + $0x63] sm:$0x1] %vm1837_vm0, %v2463_v54  ;;  %v5382_v54 = vrot.slane %v17390_v16, %v16647_v14 }
 0x266   :  { %5867 = vrot.lane.b32.xlu1 %v17695_v40, %s16490_s25  ;;  %6118 = vrot.lane.b32.xlu0 %v6091_v1, %s16508_s10 }
 0x267   :  { %v2827_v33 = vpop.permute.xlu1 %2826 }
 0x268   :  { %2847 = vst.msk [vmem:[#allocation4 + $0x65] sm:$0x1] %vm1837_vm0, %v2827_v33  ;;  %v3651_v18 = vpop.permute.xlu0 %3650  ;;  %v6095_v33 = vrot.slane %v16974_v60, %v16647_v14 }
 0x269   :  { %3671 = vst.msk [vmem:[#allocation4 + $0x69] sm:$0x1] %vm1837_vm0, %v3651_v18 }
 0x26a   :  { %7285 = vrot.lane.b32.xlu1 %v17706_v4, %s16503_s24  ;;  %6348 = vrot.lane.b32.xlu0 %v6091_v1, %s16503_s24 }
 0x26b   :  { %v3287_v56 = vpop.permute.xlu1 %3286 }
 0x26c   :  { %3307 = vst.msk [vmem:[#allocation4 + $0x67] sm:$0x1] %vm1837_vm0, %v3287_v56  ;;  %v4111_v39 = vpop.permute.xlu0 %4110 }
 0x26d   :  { %4131 = vst.msk [vmem:[#allocation4 + $0x6b] sm:$0x1] %vm1837_vm0, %v4111_v39 }
 0x26e   :  { %6231 = vrot.lane.b32.xlu1 %v17716_v47, %s16508_s10  ;;  %6578 = vrot.lane.b32.xlu0 %v6091_v1, %s16490_s25 }
 0x26f   :  { %v4475_v43 = vpop.permute.xlu1 %4474 }
 0x270   :  { %4495 = vst.msk [vmem:[#allocation4 + $0x6d] sm:$0x1] %vm1837_vm0, %v4475_v43  ;;  %v3057_v23 = vpop.permute.xlu0 %3056  ;;  %v7030_v43 = vrot.slane %v17422_v36, %v16647_v14 }
 0x271   :  { %3077 = vst.msk [vmem:[#allocation4 + $0x66] sm:$0x1] %vm1837_vm0, %v3057_v23 }
 0x272   :  { %6691 = vrot.lane.b32.xlu1 %v17716_v47, %s16490_s25  ;;  %7766 = vrot.lane.b32.xlu0 %v7739_v38, %s16508_s10 }
 0x273   :  { %v4935_v57 = vpop.permute.xlu1 %4934 }
 0x274   :  { %4955 = vst.msk [vmem:[#allocation4 + $0x6f] sm:$0x1] %vm1837_vm0, %v4935_v57  ;;  %v4705_v51 = vpop.permute.xlu0 %4704 }
 0x275   :  { %4725 = vst.msk [vmem:[#allocation4 + $0x6e] sm:$0x1] %vm1837_vm0, %v4705_v51 }
 0x276   :  { %7879 = vrot.lane.b32.xlu1 %v17732_v2, %s16508_s10  ;;  %7996 = vrot.lane.b32.xlu0 %v7739_v38, %s16503_s24 }
 0x277   :  { %v2342_v7 = vpop.permute.xlu1 %2341 }
 0x278   :  { %2365 = vst.msk [vmem:[#allocation5 + $0x2] sm:$0x1] %vm1837_vm0, %v2342_v7  ;;  %v5293_v52 = vpop.permute.xlu0 %5292 }
 0x279   :  { %5316 = vst.msk [vmem:[#allocation4 + $0x11] sm:$0x1] %vm1837_vm0, %v5293_v52  ;;  %v5386_v52 = vrot.slane %v17394_v8, %v16647_v14 }
 0x27a   :  { %8339 = vrot.lane.b32.xlu1 %v17732_v2, %s16490_s25  ;;  %8226 = vrot.lane.b32.xlu0 %v7739_v38, %s16490_s25  ;;  %v7743_v38 = vrot.slane %v17011_v9, %v16647_v14 }
 0x27b   :  { %v3990_v13 = vpop.permute.xlu1 %3989 }
 0x27c   :  { %4013 = vst.msk [vmem:[#allocation5 + $0xa] sm:$0x1] %vm1837_vm0, %v3990_v13  ;;  %v5523_v1 = vpop.permute.xlu0 %5522 }
 0x27d   :  { %5546 = vst.msk [vmem:[#allocation4 + $0x12] sm:$0x1] %vm1837_vm0, %v5523_v1 }
 0x27e   :  { %5409 = vrot.lane.b32.xlu1 %v5382_v54, %s16508_s10  ;;  %6120 = vrot.lane.b32.xlu0 %v6095_v33, %s16508_s10 }
 0x27f   :  { %v2936_v18 = vpop.permute.xlu1 %2935 }
 0x280   :  { %2959 = vst.msk [vmem:[#allocation5 + $0x5] sm:$0x1] %vm1837_vm0, %v2936_v18  ;;  %v5753_v56 = vpop.permute.xlu0 %5752 }
 0x281   :  { %5776 = vst.msk [vmem:[#allocation4 + $0x13] sm:$0x1] %vm1837_vm0, %v5753_v56  ;;  %v7034_v56 = vrot.slane %v17445_v63, %v16647_v14 }
 0x282   :  { %5639 = vrot.lane.b32.xlu1 %v5382_v54, %s16503_s24  ;;  %6350 = vrot.lane.b32.xlu0 %v6095_v33, %s16503_s24 }
 0x283   :  { %v3396_v16 = vpop.permute.xlu1 %3395 }
 0x284   :  { %3419 = vst.msk [vmem:[#allocation5 + $0x7] sm:$0x1] %vm1837_vm0, %v3396_v16  ;;  %v6941_v60 = vpop.permute.xlu0 %6940 }
 0x285   :  { %6964 = vst.msk [vmem:[#allocation4 + $0x19] sm:$0x1] %vm1837_vm0, %v6941_v60  ;;  %v6099_v60 = vrot.slane %v17038_v24, %v16647_v14 }
 0x286   :  { %5869 = vrot.lane.b32.xlu1 %v5382_v54, %s16490_s25  ;;  %6580 = vrot.lane.b32.xlu0 %v6095_v33, %s16490_s25  ;;  %v5275_v54 = vrot.slane %v17034_v11, %v16647_v14 }
 0x288   :  { %v4584_v39 = vpop.permute.xlu1 %4583  ;;  %v7171_v23 = vpop.permute.xlu0 %7170 }
 0x289   :  { %4607 = vst.msk [vmem:[#allocation5 + $0xd] sm:$0x1] %vm1837_vm0, %v4584_v39  ;;  %7194 = vst.msk [vmem:[#allocation4 + $0x1a] sm:$0x1] %vm1837_vm0, %v7171_v23 }
 0x28a   :  { %7057 = vrot.lane.b32.xlu1 %v7030_v43, %s16508_s10  ;;  %7768 = vrot.lane.b32.xlu0 %v7743_v38, %s16508_s10 }
 0x28c   :  { %v5044_v57 = vpop.permute.xlu1 %5043  ;;  %v7401_v51 = vpop.permute.xlu0 %7400 }
 0x28d   :  { %5067 = vst.msk [vmem:[#allocation5 + $0xf] sm:$0x1] %vm1837_vm0, %v5044_v57  ;;  %7424 = vst.msk [vmem:[#allocation4 + $0x1b] sm:$0x1] %vm1837_vm0, %v7401_v51 }
 0x28e   :  { %7287 = vrot.lane.b32.xlu1 %v7030_v43, %s16503_s24  ;;  %7998 = vrot.lane.b32.xlu0 %v7743_v38, %s16503_s24 }
 0x290   :  { %v2344_v36 = vpop.permute.xlu1 %2343  ;;  %v6117_v9 = vpop.permute.xlu0 %6116 }
 0x291   :  { %2366 = vst.msk [vmem:[#allocation5 + $0x22] sm:$0x1] %vm1837_vm0, %v2344_v36  ;;  %6140 = vst.msk [vmem:[#allocation4 + $0x15] sm:$0x1] %vm1837_vm0, %v6117_v9  ;;  %v17820_v36 = vrot.slane %v17419_v21, %v16647_v14 }
 0x292   :  { %7517 = vrot.lane.b32.xlu1 %v7030_v43, %s16490_s25  ;;  %8228 = vrot.lane.b32.xlu0 %v7743_v38, %s16490_s25  ;;  %v17810_v38 = vrot.slane %v17387_v25, %v16647_v14 }
 0x294   :  { %v3992_v7 = vpop.permute.xlu1 %3991  ;;  %v6347_v13 = vpop.permute.xlu0 %6346 }
 0x295   :  { %4014 = vst.msk [vmem:[#allocation5 + $0x2a] sm:$0x1] %vm1837_vm0, %v3992_v7  ;;  %6370 = vst.msk [vmem:[#allocation4 + $0x16] sm:$0x1] %vm1837_vm0, %v6347_v13  ;;  %v6206_v7 = vrot.slane %v17428_v3, %v16647_v14 }
 0x296   :  { %5411 = vrot.lane.b32.xlu1 %v5386_v52, %s16508_s10  ;;  %5298 = vrot.lane.b32.xlu0 %v5275_v54, %s16508_s10 }
 0x298   :  { %v2346_v1 = vpop.permute.xlu1 %2345  ;;  %v6577_v33 = vpop.permute.xlu0 %6576 }
 0x299   :  { %2367 = vst.msk [vmem:[#allocation5 + $0x42] sm:$0x1] %vm1837_vm0, %v2346_v1  ;;  %6600 = vst.msk [vmem:[#allocation4 + $0x17] sm:$0x1] %vm1837_vm0, %v6577_v33  ;;  %v7854_v1 = vrot.slane %v17489_v46, %v16647_v14 }
 0x29a   :  { %5641 = vrot.lane.b32.xlu1 %v5386_v52, %s16503_s24  ;;  %5528 = vrot.lane.b32.xlu0 %v5275_v54, %s16503_s24 }
 0x29c   :  { %v3994_v8 = vpop.permute.xlu1 %3993  ;;  %v7765_v11 = vpop.permute.xlu0 %7764 }
 0x29d   :  { %4015 = vst.msk [vmem:[#allocation5 + $0x4a] sm:$0x1] %vm1837_vm0, %v3994_v8  ;;  %7788 = vst.msk [vmem:[#allocation4 + $0x1d] sm:$0x1] %vm1837_vm0, %v7765_v11  ;;  %v6210_v11 = vrot.slane %v17432_v50, %v16647_v14 }
 0x29e   :  { %5871 = vrot.lane.b32.xlu1 %v5386_v52, %s16490_s25  ;;  %5758 = vrot.lane.b32.xlu0 %v5275_v54, %s16490_s25 }
 0x2a0   :  { %v2938_v18 = vpop.permute.xlu1 %2937  ;;  %v7995_v16 = vpop.permute.xlu0 %7994 }
 0x2a1   :  { %2960 = vst.msk [vmem:[#allocation5 + $0x25] sm:$0x1] %vm1837_vm0, %v2938_v18  ;;  %8018 = vst.msk [vmem:[#allocation4 + $0x1e] sm:$0x1] %vm1837_vm0, %v7995_v16 }
 0x2a2   :  { %7059 = vrot.lane.b32.xlu1 %v7034_v56, %s16508_s10  ;;  %6122 = vrot.lane.b32.xlu0 %v6099_v60, %s16508_s10 }
 0x2a4   :  { %v3398_v39 = vpop.permute.xlu1 %3397  ;;  %v8225_v43 = vpop.permute.xlu0 %8224 }
 0x2a5   :  { %3420 = vst.msk [vmem:[#allocation5 + $0x27] sm:$0x1] %vm1837_vm0, %v3398_v39  ;;  %8248 = vst.msk [vmem:[#allocation4 + $0x1f] sm:$0x1] %vm1837_vm0, %v8225_v43  ;;  %v7858_v39 = vrot.slane %v17493_v30, %v16647_v14 }
 0x2a6   :  { %7289 = vrot.lane.b32.xlu1 %v7034_v56, %s16503_s24  ;;  %6352 = vrot.lane.b32.xlu0 %v6099_v60, %s16503_s24 }
 0x2a8   :  { %v4586_v63 = vpop.permute.xlu1 %4585  ;;  %v5295_v24 = vpop.permute.xlu0 %5294 }
 0x2a9   :  { %4608 = vst.msk [vmem:[#allocation5 + $0x2d] sm:$0x1] %vm1837_vm0, %v4586_v63  ;;  %5317 = vst.msk [vmem:[#allocation4 + $0x31] sm:$0x1] %vm1837_vm0, %v5295_v24 }
 0x2aa   :  { %7519 = vrot.lane.b32.xlu1 %v7034_v56, %s16490_s25  ;;  %6582 = vrot.lane.b32.xlu0 %v6099_v60, %s16490_s25 }
 0x2ac   :  { %v5046_v23 = vpop.permute.xlu1 %5045  ;;  %v5525_v57 = vpop.permute.xlu0 %5524 }
 0x2ad   :  { %5068 = vst.msk [vmem:[#allocation5 + $0x2f] sm:$0x1] %vm1837_vm0, %v5046_v23  ;;  %5547 = vst.msk [vmem:[#allocation4 + $0x32] sm:$0x1] %vm1837_vm0, %v5525_v57  ;;  %v5390_v23 = vrot.slane %v17511_v37, %v16647_v14 }
 0x2ae   :  { %5645 = vrot.lane.b32.xlu1 %v17810_v38, %s16503_s24  ;;  %2111 = vrot.lane.b32.xlu0 %v17181_v19, %s16508_s10 }
 0x2b0   :  { %v2940_v51 = vpop.permute.xlu1 %2939  ;;  %v5755_v25 = vpop.permute.xlu0 %5754 }
 0x2b1   :  { %2961 = vst.msk [vmem:[#allocation5 + $0x45] sm:$0x1] %vm1837_vm0, %v2940_v51  ;;  %5777 = vst.msk [vmem:[#allocation4 + $0x33] sm:$0x1] %vm1837_vm0, %v5755_v25 }
 0x2b2   :  { %7293 = vrot.lane.b32.xlu1 %v17820_v36, %s16503_s24  ;;  %2571 = vrot.lane.b32.xlu0 %v17181_v19, %s16490_s25 }
 0x2b4   :  { %v3400_v9 = vpop.permute.xlu1 %3399  ;;  %v6943_v52 = vpop.permute.xlu0 %6942 }
 0x2b5   :  { %3421 = vst.msk [vmem:[#allocation5 + $0x47] sm:$0x1] %vm1837_vm0, %v3400_v9  ;;  %6965 = vst.msk [vmem:[#allocation4 + $0x39] sm:$0x1] %vm1837_vm0, %v6943_v52  ;;  %v7038_v9 = vrot.slane %v17519_v22, %v16647_v14 }
 0x2b6   :  { %6233 = vrot.lane.b32.xlu1 %v6206_v7, %s16508_s10  ;;  %3759 = vrot.lane.b32.xlu0 %v17198_v12, %s16508_s10 }
 0x2b8   :  { %v4588_v21 = vpop.permute.xlu1 %4587  ;;  %v7173_v13 = vpop.permute.xlu0 %7172 }
 0x2b9   :  { %4609 = vst.msk [vmem:[#allocation5 + $0x4d] sm:$0x1] %vm1837_vm0, %v4588_v21  ;;  %7195 = vst.msk [vmem:[#allocation4 + $0x3a] sm:$0x1] %vm1837_vm0, %v7173_v13  ;;  %v17932_v21 = vrot.slane %v17425_v31, %v16647_v14 }
 0x2ba   :  { %6463 = vrot.lane.b32.xlu1 %v6206_v7, %s16503_s24  ;;  %4219 = vrot.lane.b32.xlu0 %v17198_v12, %s16490_s25 }
 0x2bc   :  { %v5048_v3 = vpop.permute.xlu1 %5047  ;;  %v7403_v19 = vpop.permute.xlu0 %7402 }
 0x2bd   :  { %5069 = vst.msk [vmem:[#allocation5 + $0x4f] sm:$0x1] %vm1837_vm0, %v5048_v3  ;;  %7425 = vst.msk [vmem:[#allocation4 + $0x3b] sm:$0x1] %vm1837_vm0, %v7403_v19  ;;  %v17948_v19 = vrot.slane %v17486_v61, %v16647_v14 }
 0x2be   :  { %6693 = vrot.lane.b32.xlu1 %v6206_v7, %s16490_s25  ;;  %3165 = vrot.lane.b32.xlu0 %v17261_v27, %s16503_s24 }
 0x2c0   :  { %v2348_v54 = vpop.permute.xlu1 %2347  ;;  %v5297_v33 = vpop.permute.xlu0 %5296 }
 0x2c1   :  { %2368 = vst.msk [vmem:[#allocation5 + $0x62] sm:$0x1] %vm1837_vm0, %v2348_v54  ;;  %5318 = vst.msk [vmem:[#allocation4 + $0x51] sm:$0x1] %vm1837_vm0, %v5297_v33  ;;  %v5398_v33 = vrot.slane %v17407_v42, %v16647_v14 }
 0x2c2   :  { %7881 = vrot.lane.b32.xlu1 %v7854_v1, %s16508_s10  ;;  %4813 = vrot.lane.b32.xlu0 %v17334_v49, %s16503_s24 }
 0x2c4   :  { %v3996_v12 = vpop.permute.xlu1 %3995  ;;  %v5527_v8 = vpop.permute.xlu0 %5526 }
 0x2c5   :  { %4016 = vst.msk [vmem:[#allocation5 + $0x6a] sm:$0x1] %vm1837_vm0, %v3996_v12  ;;  %5548 = vst.msk [vmem:[#allocation4 + $0x52] sm:$0x1] %vm1837_vm0, %v5527_v8 }
 0x2c6   :  { %8111 = vrot.lane.b32.xlu1 %v7854_v1, %s16503_s24  ;;  %2113 = vrot.lane.b32.xlu0 %v17356_v28, %s16508_s10 }
 0x2c8   :  { %v2942_v46 = vpop.permute.xlu1 %2941  ;;  %v5757_v27 = vpop.permute.xlu0 %5756 }
 0x2c9   :  { %2962 = vst.msk [vmem:[#allocation5 + $0x65] sm:$0x1] %vm1837_vm0, %v2942_v46  ;;  %5778 = vst.msk [vmem:[#allocation4 + $0x53] sm:$0x1] %vm1837_vm0, %v5757_v27  ;;  %v17981_v27 = vrot.slane %v17441_v10, %v16647_v14 }
 0x2ca   :  { %8341 = vrot.lane.b32.xlu1 %v7854_v1, %s16490_s25  ;;  %2573 = vrot.lane.b32.xlu0 %v17356_v28, %s16490_s25 }
 0x2cc   :  { %v3402_v49 = vpop.permute.xlu1 %3401  ;;  %v6945_v18 = vpop.permute.xlu0 %6944 }
 0x2cd   :  { %3422 = vst.msk [vmem:[#allocation5 + $0x67] sm:$0x1] %vm1837_vm0, %v3402_v49  ;;  %6966 = vst.msk [vmem:[#allocation4 + $0x59] sm:$0x1] %vm1837_vm0, %v6945_v18 }
 0x2ce   :  { %6235 = vrot.lane.b32.xlu1 %v6210_v11, %s16508_s10  ;;  %3761 = vrot.lane.b32.xlu0 %v17366_v6, %s16508_s10 }
 0x2d0   :  { %v4590_v56 = vpop.permute.xlu1 %4589  ;;  %v7175_v16 = vpop.permute.xlu0 %7174 }
 0x2d1   :  { %4610 = vst.msk [vmem:[#allocation5 + $0x6d] sm:$0x1] %vm1837_vm0, %v4590_v56  ;;  %7196 = vst.msk [vmem:[#allocation4 + $0x5a] sm:$0x1] %vm1837_vm0, %v7175_v16  ;;  %v7862_v16 = vrot.slane %v17533_v59, %v16647_v14 }
 0x2d2   :  { %6465 = vrot.lane.b32.xlu1 %v6210_v11, %s16503_s24  ;;  %4221 = vrot.lane.b32.xlu0 %v17366_v6, %s16490_s25 }
 0x2d4   :  { %v5050_v50 = vpop.permute.xlu1 %5049  ;;  %v7405_v28 = vpop.permute.xlu0 %7404 }
 0x2d5   :  { %5070 = vst.msk [vmem:[#allocation5 + $0x6f] sm:$0x1] %vm1837_vm0, %v5050_v50  ;;  %7426 = vst.msk [vmem:[#allocation4 + $0x5b] sm:$0x1] %vm1837_vm0, %v7405_v28 }
 0x2d6   :  { %6695 = vrot.lane.b32.xlu1 %v6210_v11, %s16490_s25  ;;  %2115 = vrot.lane.b32.xlu0 %v17373_v41, %s16508_s10  ;;  %v6214_v11 = vrot.slane %v17529_v29, %v16647_v14 }
 0x2d8   :  { %v5868_v60 = vpop.permute.xlu1 %5867  ;;  %v6119_v43 = vpop.permute.xlu0 %6118 }
 0x2d9   :  { %5891 = vst.msk [vmem:[#allocation5 + $0x13] sm:$0x1] %vm1837_vm0, %v5868_v60  ;;  %6141 = vst.msk [vmem:[#allocation4 + $0x35] sm:$0x1] %vm1837_vm0, %v6119_v43 }
 0x2da   :  { %7883 = vrot.lane.b32.xlu1 %v7858_v39, %s16508_s10  ;;  %2575 = vrot.lane.b32.xlu0 %v17373_v41, %s16490_s25 }
 0x2dc   :  { %v7286_v6 = vpop.permute.xlu1 %7285  ;;  %v6349_v63 = vpop.permute.xlu0 %6348 }
 0x2dd   :  { %7309 = vst.msk [vmem:[#allocation5 + $0x1a] sm:$0x1] %vm1837_vm0, %v7286_v6  ;;  %6371 = vst.msk [vmem:[#allocation4 + $0x36] sm:$0x1] %vm1837_vm0, %v6349_v63 }
 0x2de   :  { %8113 = vrot.lane.b32.xlu1 %v7858_v39, %s16503_s24  ;;  %3763 = vrot.lane.b32.xlu0 %v17477_v55, %s16508_s10 }
 0x2e0   :  { %v6232_v30 = vpop.permute.xlu1 %6231  ;;  %v6579_v24 = vpop.permute.xlu0 %6578 }
 0x2e1   :  { %6255 = vst.msk [vmem:[#allocation5 + $0x15] sm:$0x1] %vm1837_vm0, %v6232_v30  ;;  %6601 = vst.msk [vmem:[#allocation4 + $0x37] sm:$0x1] %vm1837_vm0, %v6579_v24  ;;  %v6923_v30 = vrot.slane %v17042_v35, %v16647_v14 }
 0x2e2   :  { %8343 = vrot.lane.b32.xlu1 %v7858_v39, %s16490_s25  ;;  %4223 = vrot.lane.b32.xlu0 %v17477_v55, %s16490_s25  ;;  %v6222_v39 = vrot.slane %v17457_v26, %v16647_v14 }
 0x2e4   :  { %v6692_v41 = vpop.permute.xlu1 %6691  ;;  %v7767_v57 = vpop.permute.xlu0 %7766 }
 0x2e5   :  { %6715 = vst.msk [vmem:[#allocation5 + $0x17] sm:$0x1] %vm1837_vm0, %v6692_v41  ;;  %7789 = vst.msk [vmem:[#allocation4 + $0x3d] sm:$0x1] %vm1837_vm0, %v7767_v57 }
 0x2e6   :  { %5413 = vrot.lane.b32.xlu1 %v5390_v23, %s16508_s10  ;;  %3167 = vrot.lane.b32.xlu0 %v17515_v44, %s16503_s24 }
 0x2e8   :  { %v7880_v51 = vpop.permute.xlu1 %7879  ;;  %v7997_v25 = vpop.permute.xlu0 %7996 }
 0x2e9   :  { %7903 = vst.msk [vmem:[#allocation5 + $0x1d] sm:$0x1] %vm1837_vm0, %v7880_v51  ;;  %8019 = vst.msk [vmem:[#allocation4 + $0x3e] sm:$0x1] %vm1837_vm0, %v7997_v25  ;;  %v7870_v51 = vrot.slane %v17501_v15, %v16647_v14 }
 0x2ea   :  { %5643 = vrot.lane.b32.xlu1 %v5390_v23, %s16503_s24  ;;  %4815 = vrot.lane.b32.xlu0 %v17599_v45, %s16503_s24 }
 0x2ec   :  { %v8340_v55 = vpop.permute.xlu1 %8339  ;;  %v8227_v37 = vpop.permute.xlu0 %8226 }
 0x2ed   :  { %8363 = vst.msk [vmem:[#allocation5 + $0x1f] sm:$0x1] %vm1837_vm0, %v8340_v55  ;;  %8249 = vst.msk [vmem:[#allocation4 + $0x3f] sm:$0x1] %vm1837_vm0, %v8227_v37  ;;  %v7747_v55 = vrot.slane %v17050_v62, %v16647_v14 }
 0x2ee   :  { %5873 = vrot.lane.b32.xlu1 %v5390_v23, %s16490_s25  ;;  %3169 = vrot.lane.b32.xlu0 %v17616_v0, %s16503_s24 }
 0x2f0   :  { %v5410_v44 = vpop.permute.xlu1 %5409  ;;  %v6121_v7 = vpop.permute.xlu0 %6120 }
 0x2f1   :  { %5432 = vst.msk [vmem:[#allocation5 + $0x31] sm:$0x1] %vm1837_vm0, %v5410_v44  ;;  %6142 = vst.msk [vmem:[#allocation4 + $0x55] sm:$0x1] %vm1837_vm0, %v6121_v7  ;;  %v2098_v7 = vrot.slane %v17147_v32, %v16647_v14 }
 0x2f2   :  { %7061 = vrot.lane.b32.xlu1 %v7038_v9, %s16508_s10  ;;  %4817 = vrot.lane.b32.xlu0 %v17632_v17, %s16503_s24 }
 0x2f4   :  { %v5640_v45 = vpop.permute.xlu1 %5639  ;;  %v6351_v52 = vpop.permute.xlu0 %6350 }
 0x2f5   :  { %5662 = vst.msk [vmem:[#allocation5 + $0x32] sm:$0x1] %vm1837_vm0, %v5640_v45  ;;  %6372 = vst.msk [vmem:[#allocation4 + $0x56] sm:$0x1] %vm1837_vm0, %v6351_v52 }
 0x2f6   :  { %7291 = vrot.lane.b32.xlu1 %v7038_v9, %s16503_s24  ;;  %2117 = vrot.lane.b32.xlu0 %v17646_v53, %s16508_s10 }
 0x2f8   :  { %v5870_v22 = vpop.permute.xlu1 %5869  ;;  %v6581_v0 = vpop.permute.xlu0 %6580 }
 0x2f9   :  { %5892 = vst.msk [vmem:[#allocation5 + $0x33] sm:$0x1] %vm1837_vm0, %v5870_v22  ;;  %6602 = vst.msk [vmem:[#allocation4 + $0x57] sm:$0x1] %vm1837_vm0, %v6581_v0  ;;  %v20020_v22 = vld [vmem:[#allocation78_spill] sm:$0xff] }
 0x2fa   :  { %7521 = vrot.lane.b32.xlu1 %v7038_v9, %s16490_s25  ;;  %2577 = vrot.lane.b32.xlu0 %v17646_v53, %s16490_s25  ;;  %v2922_v0 = vrot.slane %v20020_v22, %v16647_v14 }
 0x2fc   :  { %v7058_v17 = vpop.permute.xlu1 %7057  ;;  %v7769_v13 = vpop.permute.xlu0 %7768 }
 0x2fd   :  { %7080 = vst.msk [vmem:[#allocation5 + $0x39] sm:$0x1] %vm1837_vm0, %v7058_v17  ;;  %7790 = vst.msk [vmem:[#allocation4 + $0x5d] sm:$0x1] %vm1837_vm0, %v7769_v13 }
 0x2fe   :  { %6239 = vrot.lane.b32.xlu1 %v17932_v21, %s16508_s10  ;;  %3765 = vrot.lane.b32.xlu0 %v17657_v58, %s16508_s10 }
 0x300   :  { %v7288_v3 = vpop.permute.xlu1 %7287  ;;  %v7999_v53 = vpop.permute.xlu0 %7998 }
 0x301   :  { %7310 = vst.msk [vmem:[#allocation5 + $0x3a] sm:$0x1] %vm1837_vm0, %v7288_v3  ;;  %8020 = vst.msk [vmem:[#allocation4 + $0x5e] sm:$0x1] %vm1837_vm0, %v7999_v53  ;;  %v20021_v3 = vld [vmem:[#allocation77_spill] sm:$0xff] }
 0x302   :  { %6699 = vrot.lane.b32.xlu1 %v17932_v21, %s16490_s25  ;;  %4225 = vrot.lane.b32.xlu0 %v17657_v58, %s16490_s25  ;;  %v3746_v53 = vrot.slane %v20021_v3, %v16647_v14 }
 0x304   :  { %v7518_v31 = vpop.permute.xlu1 %7517  ;;  %v8229_v54 = vpop.permute.xlu0 %8228 }
 0x305   :  { %7540 = vst.msk [vmem:[#allocation5 + $0x3b] sm:$0x1] %vm1837_vm0, %v7518_v31  ;;  %8250 = vst.msk [vmem:[#allocation4 + $0x5f] sm:$0x1] %vm1837_vm0, %v8229_v54  ;;  %v20022_v54 = vld [vmem:[#allocation80_spill] sm:$0xff] }
 0x306   :  { %7887 = vrot.lane.b32.xlu1 %v17948_v19, %s16508_s10  ;;  %3171 = vrot.lane.b32.xlu0 %v17666_v20, %s16503_s24 }
 0x308   :  { %v5412_v1 = vpop.permute.xlu1 %5411  ;;  %v5299_v58 = vpop.permute.xlu0 %5298 }
 0x309   :  { %5433 = vst.msk [vmem:[#allocation5 + $0x51] sm:$0x1] %vm1837_vm0, %v5412_v1  ;;  %5319 = vst.msk [vmem:[#allocation4 + $0x71] sm:$0x1] %vm1837_vm0, %v5299_v58  ;;  %v4570_v1 = vrot.slane %v20022_v54, %v16647_v14  ;;  %v8374_v54 = vld [vmem:[#allocation4 + $0x18] sm:$0xff] }
 0x30a   :  { %8347 = vrot.lane.b32.xlu1 %v17948_v19, %s16490_s25  ;;  %4819 = vrot.lane.b32.xlu0 %v17682_v48, %s16503_s24 }
 0x30c   :  { %v5642_v61 = vpop.permute.xlu1 %5641  ;;  %v5529_v12 = vpop.permute.xlu0 %5528 }
 0x30d   :  { %5663 = vst.msk [vmem:[#allocation5 + $0x52] sm:$0x1] %vm1837_vm0, %v5642_v61  ;;  %5549 = vst.msk [vmem:[#allocation4 + $0x72] sm:$0x1] %vm1837_vm0, %v5529_v12 }
 0x30e   :  { %5417 = vrot.lane.b32.xlu1 %v5398_v33, %s16508_s10  ;;  %5407 = vrot.lane.b32.xlu0 %v17695_v40, %s16508_s10 }
 0x310   :  { %v5872_v20 = vpop.permute.xlu1 %5871  ;;  %v5759_v8 = vpop.permute.xlu0 %5758 }
 0x311   :  { %5893 = vst.msk [vmem:[#allocation5 + $0x53] sm:$0x1] %vm1837_vm0, %v5872_v20  ;;  %5779 = vst.msk [vmem:[#allocation4 + $0x73] sm:$0x1] %vm1837_vm0, %v5759_v8  ;;  %v20023_v20 = vld [vmem:[#allocation82_spill] sm:$0xff] }
 0x312   :  { %5647 = vrot.lane.b32.xlu1 %v5398_v33, %s16503_s24  ;;  %5637 = vrot.lane.b32.xlu0 %v17695_v40, %s16503_s24  ;;  %v2102_v8 = vrot.slane %v20023_v20, %v16647_v14 }
 0x314   :  { %v7060_v42 = vpop.permute.xlu1 %7059  ;;  %v6123_v48 = vpop.permute.xlu0 %6122 }
 0x315   :  { %7081 = vst.msk [vmem:[#allocation5 + $0x59] sm:$0x1] %vm1837_vm0, %v7060_v42  ;;  %6143 = vst.msk [vmem:[#allocation4 + $0x75] sm:$0x1] %vm1837_vm0, %v6123_v48 }
 0x316   :  { %5877 = vrot.lane.b32.xlu1 %v5398_v33, %s16490_s25  ;;  %7055 = vrot.lane.b32.xlu0 %v17706_v4, %s16508_s10 }
 0x318   :  { %v7290_v46 = vpop.permute.xlu1 %7289  ;;  %v6353_v49 = vpop.permute.xlu0 %6352 }
 0x319   :  { %7311 = vst.msk [vmem:[#allocation5 + $0x5a] sm:$0x1] %vm1837_vm0, %v7290_v46  ;;  %6373 = vst.msk [vmem:[#allocation4 + $0x76] sm:$0x1] %vm1837_vm0, %v6353_v49  ;;  %v20024_v46 = vld [vmem:[#allocation79_spill] sm:$0xff] }
 0x31a   :  { %7065 = vrot.lane.b32.xlu1 %v17981_v27, %s16508_s10  ;;  %7515 = vrot.lane.b32.xlu0 %v17706_v4, %s16490_s25 }
 0x31c   :  { %v7520_v40 = vpop.permute.xlu1 %7519  ;;  %v6583_v18 = vpop.permute.xlu0 %6582 }
 0x31d   :  { %7541 = vst.msk [vmem:[#allocation5 + $0x5b] sm:$0x1] %vm1837_vm0, %v7520_v40  ;;  %6603 = vst.msk [vmem:[#allocation4 + $0x77] sm:$0x1] %vm1837_vm0, %v6583_v18 }
 0x31e   :  { %6237 = vrot.lane.b32.xlu1 %v6214_v11, %s16508_s10  ;;  %6461 = vrot.lane.b32.xlu0 %v17716_v47, %s16503_s24 }
 0x320   :  { %v5646_v10 = vpop.permute.xlu1 %5645  ;;  %v2112_v56 = vpop.permute.xlu0 %2111 }
 0x321   :  { %5665 = vst.msk [vmem:[#allocation5 + $0x92] sm:$0x1] %vm1837_vm0, %v5646_v10  ;;  %2135 = vst.msk [vmem:[#allocation5 + $0x1] sm:$0x1] %vm1837_vm0, %v2112_v56  ;;  %v20025_v10 = vld [vmem:[#allocation83_spill] sm:$0xff] }
 0x322   :  { %6467 = vrot.lane.b32.xlu1 %v6214_v11, %s16503_s24  ;;  %8109 = vrot.lane.b32.xlu0 %v17732_v2, %s16503_s24  ;;  %v3750_v56 = vrot.slane %v20025_v10, %v16647_v14 }
 0x324   :  { %v7294_v29 = vpop.permute.xlu1 %7293  ;;  %v2572_v4 = vpop.permute.xlu0 %2571 }
 0x325   :  { %7313 = vst.msk [vmem:[#allocation5 + $0x9a] sm:$0x1] %vm1837_vm0, %v7294_v29  ;;  %2595 = vst.msk [vmem:[#allocation5 + $0x3] sm:$0x1] %vm1837_vm0, %v2572_v4 }
 0x326   :  { %6697 = vrot.lane.b32.xlu1 %v6214_v11, %s16490_s25  ;;  %5415 = vrot.lane.b32.xlu0 %v17810_v38, %s16508_s10 }
 0x328   :  { %v6234_v47 = vpop.permute.xlu1 %6233  ;;  %v3760_v50 = vpop.permute.xlu0 %3759 }
 0x329   :  { %6256 = vst.msk [vmem:[#allocation5 + $0x35] sm:$0x1] %vm1837_vm0, %v6234_v47  ;;  %3783 = vst.msk [vmem:[#allocation5 + $0x9] sm:$0x1] %vm1837_vm0, %v3760_v50  ;;  %v20026_v47 = vld [vmem:[#allocation81_spill] sm:$0xff] }
 0x32a   :  { %7885 = vrot.lane.b32.xlu1 %v7862_v16, %s16508_s10  ;;  %5875 = vrot.lane.b32.xlu0 %v17810_v38, %s16490_s25 }
 0x32c   :  { %v6464_v2 = vpop.permute.xlu1 %6463  ;;  %v4220_v28 = vpop.permute.xlu0 %4219 }
 0x32d   :  { %6486 = vst.msk [vmem:[#allocation5 + $0x36] sm:$0x1] %vm1837_vm0, %v6464_v2  ;;  %4243 = vst.msk [vmem:[#allocation5 + $0xb] sm:$0x1] %vm1837_vm0, %v4220_v28 }
 0x32e   :  { %8115 = vrot.lane.b32.xlu1 %v7862_v16, %s16503_s24  ;;  %7063 = vrot.lane.b32.xlu0 %v17820_v36, %s16508_s10 }
 0x330   :  { %v6694_v59 = vpop.permute.xlu1 %6693  ;;  %v3166_v60 = vpop.permute.xlu0 %3165 }
 0x331   :  { %6716 = vst.msk [vmem:[#allocation5 + $0x37] sm:$0x1] %vm1837_vm0, %v6694_v59  ;;  %3189 = vst.msk [vmem:[#allocation5 + $0x6] sm:$0x1] %vm1837_vm0, %v3166_v60  ;;  %v20027_v60 = vld [vmem:[#allocation41_spill] sm:$0xff] }
 0x332   :  { %8345 = vrot.lane.b32.xlu1 %v7862_v16, %s16490_s25  ;;  %7523 = vrot.lane.b32.xlu0 %v17820_v36, %s16490_s25  ;;  %v4574_v16 = vrot.slane %v20026_v47, %v16647_v14 }
 0x334   :  { %v7882_v38 = vpop.permute.xlu1 %7881  ;;  %v4814_v43 = vpop.permute.xlu0 %4813 }
 0x335   :  { %7904 = vst.msk [vmem:[#allocation5 + $0x3d] sm:$0x1] %vm1837_vm0, %v7882_v38  ;;  %4837 = vst.msk [vmem:[#allocation5 + $0xe] sm:$0x1] %vm1837_vm0, %v4814_v43  ;;  %v1983_v38 = vrot.slane %v20027_v60, %v16647_v14 }
 0x336   :  { %6241 = vrot.lane.b32.xlu1 %v6222_v39, %s16508_s10  ;;  %6469 = vrot.lane.b32.xlu0 %v17932_v21, %s16503_s24 }
 0x338   :  { %v8112_v6 = vpop.permute.xlu1 %8111  ;;  %v2114_v63 = vpop.permute.xlu0 %2113 }
 0x339   :  { %8134 = vst.msk [vmem:[#allocation5 + $0x3e] sm:$0x1] %vm1837_vm0, %v8112_v6  ;;  %2136 = vst.msk [vmem:[#allocation5 + $0x21] sm:$0x1] %vm1837_vm0, %v2114_v63  ;;  %v20028_v6 = vld [vmem:[#allocation43_spill] sm:$0xff] }
 0x33a   :  { %6471 = vrot.lane.b32.xlu1 %v6222_v39, %s16503_s24  ;;  %8117 = vrot.lane.b32.xlu0 %v17948_v19, %s16503_s24  ;;  %v2807_v63 = vrot.slane %v20028_v6, %v16647_v14 }
 0x33c   :  { %v8342_v26 = vpop.permute.xlu1 %8341  ;;  %v2574_v36 = vpop.permute.xlu0 %2573  ;;  %v8420_v22 = vld [vmem:[#allocation5 + $0x8] sm:$0xff] }
 0x33d   :  { %8364 = vst.msk [vmem:[#allocation5 + $0x3f] sm:$0x1] %vm1837_vm0, %v8342_v26  ;;  %2596 = vst.msk [vmem:[#allocation5 + $0x23] sm:$0x1] %vm1837_vm0, %v2574_v36 }
 0x33e   :  { %6701 = vrot.lane.b32.xlu1 %v6222_v39, %s16490_s25  ;;  %6946 = vrot.lane.b32.xlu0 %v6923_v30, %s16508_s10 }
 0x340   :  { %v6236_v24 = vpop.permute.xlu1 %6235  ;;  %v3762_v41 = vpop.permute.xlu0 %3761 }
 0x341   :  { %6257 = vst.msk [vmem:[#allocation5 + $0x55] sm:$0x1] %vm1837_vm0, %v6236_v24  ;;  %3784 = vst.msk [vmem:[#allocation5 + $0x29] sm:$0x1] %vm1837_vm0, %v3762_v41  ;;  %v20029_v41 = vld [vmem:[#allocation42_spill] sm:$0xff] }
 0x342   :  { %7295 = vrot.lane.b32.xlu1 %v17981_v27, %s16503_s24  ;;  %7176 = vrot.lane.b32.xlu0 %v6923_v30, %s16503_s24 }
 0x344   :  { %v6466_v23 = vpop.permute.xlu1 %6465  ;;  %v4222_v35 = vpop.permute.xlu0 %4221 }
 0x345   :  { %6487 = vst.msk [vmem:[#allocation5 + $0x56] sm:$0x1] %vm1837_vm0, %v6466_v23  ;;  %4244 = vst.msk [vmem:[#allocation5 + $0x2b] sm:$0x1] %vm1837_vm0, %v4222_v35  ;;  %v3631_v23 = vrot.slane %v20029_v41, %v16647_v14  ;;  %v8382_v41 = vld [vmem:[#allocation4 + $0x58] sm:$0xff] }
 0x346   :  { %7525 = vrot.lane.b32.xlu1 %v17981_v27, %s16490_s25  ;;  %7406 = vrot.lane.b32.xlu0 %v6923_v30, %s16490_s25  ;;  %v2926_v27 = vrot.slane %v20024_v46, %v16647_v14 }
 0x348   :  { %v6696_v57 = vpop.permute.xlu1 %6695  ;;  %v2116_v25 = vpop.permute.xlu0 %2115 }
 0x349   :  { %6717 = vst.msk [vmem:[#allocation5 + $0x57] sm:$0x1] %vm1837_vm0, %v6696_v57  ;;  %2137 = vst.msk [vmem:[#allocation5 + $0x41] sm:$0x1] %vm1837_vm0, %v2116_v25 }
 0x34a   :  { %7889 = vrot.lane.b32.xlu1 %v7870_v51, %s16508_s10  ;;  %7770 = vrot.lane.b32.xlu0 %v7747_v55, %s16508_s10 }
 0x34c   :  { %v7884_v37 = vpop.permute.xlu1 %7883  ;;  %v2576_v44 = vpop.permute.xlu0 %2575 }
 0x34d   :  { %7905 = vst.msk [vmem:[#allocation5 + $0x5d] sm:$0x1] %vm1837_vm0, %v7884_v37  ;;  %2597 = vst.msk [vmem:[#allocation5 + $0x43] sm:$0x1] %vm1837_vm0, %v2576_v44 }
 0x34e   :  { %8119 = vrot.lane.b32.xlu1 %v7870_v51, %s16503_s24  ;;  %8000 = vrot.lane.b32.xlu0 %v7747_v55, %s16503_s24 }
 0x350   :  { %v8114_v15 = vpop.permute.xlu1 %8113  ;;  %v3764_v62 = vpop.permute.xlu0 %3763 }
 0x351   :  { %8135 = vst.msk [vmem:[#allocation5 + $0x5e] sm:$0x1] %vm1837_vm0, %v8114_v15  ;;  %3785 = vst.msk [vmem:[#allocation5 + $0x49] sm:$0x1] %vm1837_vm0, %v3764_v62  ;;  %v20031_v62 = vld [vmem:[#allocation47_spill] sm:$0xff] }
 0x352   :  { %8349 = vrot.lane.b32.xlu1 %v7870_v51, %s16490_s25  ;;  %8230 = vrot.lane.b32.xlu0 %v7747_v55, %s16490_s25  ;;  %v20030_v51 = vld [vmem:[#allocation45_spill] sm:$0xff] }
 0x353   :  { %v4455_v25 = vrot.slane %v20030_v51, %v16647_v14 }
 0x354   :  { %v8344_v9 = vpop.permute.xlu1 %8343  ;;  %v4224_v45 = vpop.permute.xlu0 %4223 }
 0x355   :  { %8365 = vst.msk [vmem:[#allocation5 + $0x5f] sm:$0x1] %vm1837_vm0, %v8344_v9  ;;  %4245 = vst.msk [vmem:[#allocation5 + $0x4b] sm:$0x1] %vm1837_vm0, %v4224_v45  ;;  %v1987_v9 = vrot.slane %v20031_v62, %v16647_v14 }
 0x356   :  { %2349 = vrot.lane.b32.xlu1 %v2098_v7, %s16503_s24  ;;  %2119 = vrot.lane.b32.xlu0 %v2098_v7, %s16508_s10 }
 0x358   :  { %v5414_v52 = vpop.permute.xlu1 %5413  ;;  %v3168_v17 = vpop.permute.xlu0 %3167 }
 0x359   :  { %5434 = vst.msk [vmem:[#allocation5 + $0x71] sm:$0x1] %vm1837_vm0, %v5414_v52  ;;  %3190 = vst.msk [vmem:[#allocation5 + $0x26] sm:$0x1] %vm1837_vm0, %v3168_v17  ;;  %v8419_v17 = vld [vmem:[#allocation5] sm:$0xff] }
 0x35a   :  { %2943 = vrot.lane.b32.xlu1 %v2922_v0, %s16508_s10  ;;  %2579 = vrot.lane.b32.xlu0 %v2098_v7, %s16490_s25 }
 0x35c   :  { %v5644_v32 = vpop.permute.xlu1 %5643  ;;  %v4816_v21 = vpop.permute.xlu0 %4815  ;;  %v8430_v10 = vld [vmem:[#allocation5 + $0x58] sm:$0xff] }
 0x35d   :  { %5664 = vst.msk [vmem:[#allocation5 + $0x72] sm:$0x1] %vm1837_vm0, %v5644_v32  ;;  %4838 = vst.msk [vmem:[#allocation5 + $0x2e] sm:$0x1] %vm1837_vm0, %v4816_v21  ;;  %v8451_v21 = vpack.c.bf16 %v8420_v22, %v8419_v17  ;;  %v8383_v22 = vld [vmem:[#allocation4 + $0x60] sm:$0xff] }
 0x35e   :  { %3403 = vrot.lane.b32.xlu1 %v2922_v0, %s16490_s25  ;;  %3173 = vrot.lane.b32.xlu0 %v2922_v0, %s16503_s24 }
 0x360   :  { %v5874_v13 = vpop.permute.xlu1 %5873  ;;  %v3170_v31 = vpop.permute.xlu0 %3169  ;;  %v8423_v46 = vld [vmem:[#allocation5 + $0x20] sm:$0xff] }
 0x361   :  { %5894 = vst.msk [vmem:[#allocation5 + $0x73] sm:$0x1] %vm1837_vm0, %v5874_v13  ;;  %3191 = vst.msk [vmem:[#allocation5 + $0x46] sm:$0x1] %vm1837_vm0, %v3170_v31  ;;  %v20032_v13 = vld [vmem:[#allocation44_spill] sm:$0xff] }
 0x362   :  { %3997 = vrot.lane.b32.xlu1 %v3746_v53, %s16503_s24  ;;  %3767 = vrot.lane.b32.xlu0 %v3746_v53, %s16508_s10  ;;  %v2811_v3 = vrot.slane %v20032_v13, %v16647_v14  ;;  %v8426_v31 = vld [vmem:[#allocation5 + $0x38] sm:$0xff] }
 0x364   :  { %v7062_v19 = vpop.permute.xlu1 %7061  ;;  %v4818_v58 = vpop.permute.xlu0 %4817  ;;  %v8424_v20 = vld [vmem:[#allocation5 + $0x28] sm:$0xff] }
 0x365   :  { %7082 = vst.msk [vmem:[#allocation5 + $0x79] sm:$0x1] %vm1837_vm0, %v7062_v19  ;;  %4839 = vst.msk [vmem:[#allocation5 + $0x4e] sm:$0x1] %vm1837_vm0, %v4818_v58  ;;  %v8425_v19 = vld [vmem:[#allocation5 + $0x30] sm:$0xff] }
 0x366   :  { %4591 = vrot.lane.b32.xlu1 %v4570_v1, %s16508_s10  ;;  %4227 = vrot.lane.b32.xlu0 %v3746_v53, %s16490_s25  ;;  %v8454_v58 = vpack.c.bf16 %v8426_v31, %v8425_v19 }
 0x368   :  { %v7292_v61 = vpop.permute.xlu1 %7291  ;;  %v2118_v33 = vpop.permute.xlu0 %2117  ;;  %v8427_v6 = vld [vmem:[#allocation5 + $0x40] sm:$0xff] }
 0x369   :  { %7312 = vst.msk [vmem:[#allocation5 + $0x7a] sm:$0x1] %vm1837_vm0, %v7292_v61  ;;  %2138 = vst.msk [vmem:[#allocation5 + $0x61] sm:$0x1] %vm1837_vm0, %v2118_v33  ;;  %v8376_v61 = vld [vmem:[#allocation4 + $0x28] sm:$0xff] }
 0x36a   :  { %5051 = vrot.lane.b32.xlu1 %v4570_v1, %s16490_s25  ;;  %4821 = vrot.lane.b32.xlu0 %v4570_v1, %s16503_s24 }
 0x36c   :  { %v7522_v12 = vpop.permute.xlu1 %7521  ;;  %v2578_v42 = vpop.permute.xlu0 %2577  ;;  %v8428_v60 = vld [vmem:[#allocation5 + $0x48] sm:$0xff] }
 0x36d   :  { %7542 = vst.msk [vmem:[#allocation5 + $0x7b] sm:$0x1] %vm1837_vm0, %v7522_v12  ;;  %2598 = vst.msk [vmem:[#allocation5 + $0x63] sm:$0x1] %vm1837_vm0, %v2578_v42  ;;  %v8373_v12 = vld [vmem:[#allocation4 + $0x10] sm:$0xff]  ;;  %v8375_v42 = vld [vmem:[#allocation4 + $0x20] sm:$0xff] }
 0x36e   :  { %2351 = vrot.lane.b32.xlu1 %v2102_v8, %s16503_s24  ;;  %2121 = vrot.lane.b32.xlu0 %v2102_v8, %s16508_s10 }
 0x370   :  { %v6240_v48 = vpop.permute.xlu1 %6239  ;;  %v3766_v49 = vpop.permute.xlu0 %3765 }
 0x371   :  { %6259 = vst.msk [vmem:[#allocation5 + $0x95] sm:$0x1] %vm1837_vm0, %v6240_v48  ;;  %3786 = vst.msk [vmem:[#allocation5 + $0x69] sm:$0x1] %vm1837_vm0, %v3766_v49  ;;  %v8405_v48 = vpack.c.bf16 %v8376_v61, %v8375_v42  ;;  %v8453_v49 = vpack.c.bf16 %v8424_v20, %v8423_v46 }
 0x372   :  { %2945 = vrot.lane.b32.xlu1 %v2926_v27, %s16508_s10  ;;  %2581 = vrot.lane.b32.xlu0 %v2102_v8, %s16490_s25  ;;  %v8404_v8 = vpack.c.bf16 %v8374_v54, %v8373_v12  ;;  %v20037_v54 = vld [vmem:[#allocation93_spill] sm:$0xff] }
 0x374   :  { %v6700_v40 = vpop.permute.xlu1 %6699  ;;  %v4226_v11 = vpop.permute.xlu0 %4225 }
 0x375   :  { %6719 = vst.msk [vmem:[#allocation5 + $0x97] sm:$0x1] %vm1837_vm0, %v6700_v40  ;;  %4246 = vst.msk [vmem:[#allocation5 + $0x6b] sm:$0x1] %vm1837_vm0, %v4226_v11  ;;  %v20033_v40 = vld [vmem:[#allocation48_spill] sm:$0xff] }
 0x376   :  { %3405 = vrot.lane.b32.xlu1 %v2926_v27, %s16490_s25  ;;  %3175 = vrot.lane.b32.xlu0 %v2926_v27, %s16503_s24  ;;  %v3635_v11 = vrot.slane %v20033_v40, %v16647_v14 }
 0x378   :  { %v7888_v18 = vpop.permute.xlu1 %7887  ;;  %v3172_v29 = vpop.permute.xlu0 %3171 }
 0x379   :  { %7907 = vst.msk [vmem:[#allocation5 + $0x9d] sm:$0x1] %vm1837_vm0, %v7888_v18  ;;  %3192 = vst.msk [vmem:[#allocation5 + $0x66] sm:$0x1] %vm1837_vm0, %v3172_v29  ;;  %v8378_v29 = vld [vmem:[#allocation4 + $0x38] sm:$0xff] }
 0x37a   :  { %3999 = vrot.lane.b32.xlu1 %v3750_v56, %s16503_s24  ;;  %3769 = vrot.lane.b32.xlu0 %v3750_v56, %s16508_s10 }
 0x37c   :  { %v8348_v4 = vpop.permute.xlu1 %8347  ;;  %v4820_v50 = vpop.permute.xlu0 %4819 }
 0x37d   :  { %8367 = vst.msk [vmem:[#allocation5 + $0x9f] sm:$0x1] %vm1837_vm0, %v8348_v4  ;;  %4840 = vst.msk [vmem:[#allocation5 + $0x6e] sm:$0x1] %vm1837_vm0, %v4820_v50 }
 0x37e   :  { %4593 = vrot.lane.b32.xlu1 %v4574_v16, %s16508_s10  ;;  %4229 = vrot.lane.b32.xlu0 %v3750_v56, %s16490_s25  ;;  %v8429_v56 = vld [vmem:[#allocation5 + $0x50] sm:$0xff] }
 0x37f   :  { %v8456_v47 = vpack.c.bf16 %v8430_v10, %v8429_v56  ;;  %v8385_v10 = vld [vmem:[#allocation4 + $0x70] sm:$0xff] }
 0x380   :  { %v5418_v2 = vpop.permute.xlu1 %5417  ;;  %v5408_v28 = vpop.permute.xlu0 %5407 }
 0x381   :  { %5436 = vst.msk [vmem:[#allocation5 + $0xb1] sm:$0x1] %vm1837_vm0, %v5418_v2  ;;  %5431 = vst.msk [vmem:[#allocation5 + $0x11] sm:$0x1] %vm1837_vm0, %v5408_v28  ;;  %v8380_v2 = vld [vmem:[#allocation4 + $0x48] sm:$0xff] }
 0x382   :  { %5053 = vrot.lane.b32.xlu1 %v4574_v16, %s16490_s25  ;;  %4823 = vrot.lane.b32.xlu0 %v4574_v16, %s16503_s24  ;;  %v20034_v16 = vld [vmem:[#allocation46_spill] sm:$0xff] }
 0x383   :  { %v4459_v50 = vrot.slane %v20034_v16, %v16647_v14 }
 0x384   :  { %v5648_v59 = vpop.permute.xlu1 %5647  ;;  %v5638_v39 = vpop.permute.xlu0 %5637 }
 0x385   :  { %5666 = vst.msk [vmem:[#allocation5 + $0xb2] sm:$0x1] %vm1837_vm0, %v5648_v59  ;;  %5661 = vst.msk [vmem:[#allocation5 + $0x12] sm:$0x1] %vm1837_vm0, %v5638_v39  ;;  %v8377_v59 = vld [vmem:[#allocation4 + $0x30] sm:$0xff]  ;;  %v8379_v39 = vld [vmem:[#allocation4 + $0x40] sm:$0xff] }
 0x386   :  { %2234 = vrot.lane.b32.xlu1 %v1983_v38, %s16503_s24  ;;  %2004 = vrot.lane.b32.xlu0 %v1983_v38, %s16508_s10 }
 0x388   :  { %v5878_v43 = vpop.permute.xlu1 %5877  ;;  %v7056_v26 = vpop.permute.xlu0 %7055 }
 0x389   :  { %5896 = vst.msk [vmem:[#allocation5 + $0xb3] sm:$0x1] %vm1837_vm0, %v5878_v43  ;;  %7079 = vst.msk [vmem:[#allocation5 + $0x19] sm:$0x1] %vm1837_vm0, %v7056_v26  ;;  %v8407_v43 = vpack.c.bf16 %v8380_v2, %v8379_v39  ;;  %v8455_v26 = vpack.c.bf16 %v8428_v60, %v8427_v6  ;;  %v20041_v60 = vld [vmem:[#allocation95_spill] sm:$0xff] }
 0x38a   :  { %2828 = vrot.lane.b32.xlu1 %v2807_v63, %s16508_s10  ;;  %2464 = vrot.lane.b32.xlu0 %v1983_v38, %s16490_s25  ;;  %v8406_v38 = vpack.c.bf16 %v8378_v29, %v8377_v59  ;;  %v20042_v39 = vld [vmem:[#allocation67_spill] sm:$0xff] }
 0x38c   :  { %v7066_v36 = vpop.permute.xlu1 %7065  ;;  %v7516_v30 = vpop.permute.xlu0 %7515 }
 0x38d   :  { %7084 = vst.msk [vmem:[#allocation5 + $0xb9] sm:$0x1] %vm1837_vm0, %v7066_v36  ;;  %7539 = vst.msk [vmem:[#allocation5 + $0x1b] sm:$0x1] %vm1837_vm0, %v7516_v30 }
 0x38e   :  { %3288 = vrot.lane.b32.xlu1 %v2807_v63, %s16490_s25  ;;  %3058 = vrot.lane.b32.xlu0 %v2807_v63, %s16503_s24 }
 0x390   :  { %v6238_v24 = vpop.permute.xlu1 %6237  ;;  %v6462_v35 = vpop.permute.xlu0 %6461 }
 0x391   :  { %6258 = vst.msk [vmem:[#allocation5 + $0x75] sm:$0x1] %vm1837_vm0, %v6238_v24  ;;  %6485 = vst.msk [vmem:[#allocation5 + $0x16] sm:$0x1] %vm1837_vm0, %v6462_v35 }
 0x392   :  { %3882 = vrot.lane.b32.xlu1 %v3631_v23, %s16503_s24  ;;  %3652 = vrot.lane.b32.xlu0 %v3631_v23, %s16508_s10 }
 0x394   :  { %v6468_v57 = vpop.permute.xlu1 %6467  ;;  %v8110_v55 = vpop.permute.xlu0 %8109 }
 0x395   :  { %6488 = vst.msk [vmem:[#allocation5 + $0x76] sm:$0x1] %vm1837_vm0, %v6468_v57  ;;  %8133 = vst.msk [vmem:[#allocation5 + $0x1e] sm:$0x1] %vm1837_vm0, %v8110_v55  ;;  %v20035_v57 = vld [vmem:[#allocation92_spill] sm:$0xff]  ;;  %v8384_v55 = vld [vmem:[#allocation4 + $0x68] sm:$0xff] }
 0x396   :  { %4476 = vrot.lane.b32.xlu1 %v4455_v25, %s16508_s10  ;;  %4112 = vrot.lane.b32.xlu0 %v3631_v23, %s16490_s25  ;;  %v5402_v51 = vrot.slane %v20035_v57, %v16647_v14 }
 0x398   :  { %v6698_v37 = vpop.permute.xlu1 %6697  ;;  %v5416_v44 = vpop.permute.xlu0 %5415  ;;  %v8421_v45 = vld [vmem:[#allocation5 + $0x10] sm:$0xff] }
 0x399   :  { %6718 = vst.msk [vmem:[#allocation5 + $0x77] sm:$0x1] %vm1837_vm0, %v6698_v37  ;;  %5435 = vst.msk [vmem:[#allocation5 + $0x91] sm:$0x1] %vm1837_vm0, %v5416_v44  ;;  %v20036_v44 = vld [vmem:[#allocation61_spill] sm:$0xff] }
 0x39a   :  { %4936 = vrot.lane.b32.xlu1 %v4455_v25, %s16490_s25  ;;  %4706 = vrot.lane.b32.xlu0 %v4455_v25, %s16503_s24  ;;  %v8381_v25 = vld [vmem:[#allocation4 + $0x50] sm:$0xff] }
 0x39c   :  { %v7886_v15 = vpop.permute.xlu1 %7885  ;;  %v5876_v7 = vpop.permute.xlu0 %5875  ;;  %v8422_v52 = vld [vmem:[#allocation5 + $0x18] sm:$0xff] }
 0x39d   :  { %7906 = vst.msk [vmem:[#allocation5 + $0x7d] sm:$0x1] %vm1837_vm0, %v7886_v15  ;;  %5895 = vst.msk [vmem:[#allocation5 + $0x93] sm:$0x1] %vm1837_vm0, %v5876_v7  ;;  %v8452_v0 = vpack.c.bf16 %v8422_v52, %v8421_v45  ;;  %v5279_v15 = vrot.slane %v20036_v44, %v16647_v14  ;;  %v8432_v7 = vld [vmem:[#allocation5 + $0x68] sm:$0xff]  ;;  %v8408_v45 = vpack.c.bf16 %v8382_v41, %v8381_v25 }
 0x39e   :  { %2236 = vrot.lane.b32.xlu1 %v1987_v9, %s16503_s24  ;;  %2006 = vrot.lane.b32.xlu0 %v1987_v9, %s16508_s10  ;;  %v5406_v41 = vrot.slane %v17564_v5, %v16647_v14 }
 0x39f   :  { %15915 = vmatprep.subr.bf16.mxu1 %v8452_v0 }
 0x3a0   :  { %v8116_v32 = vpop.permute.xlu1 %8115  ;;  %15916 = vmatpush3.bf16.msra.mxu1 %v8452_v0  ;;  %v7064_v53 = vpop.permute.xlu0 %7063  ;;  %v8433_v24 = vld [vmem:[#allocation5 + $0x70] sm:$0xff]  ;;  %v8431_v0 = vld [vmem:[#allocation5 + $0x60] sm:$0xff] }
 0x3a1   :  { %8136 = vst.msk [vmem:[#allocation5 + $0x7e] sm:$0x1] %vm1837_vm0, %v8116_v32  ;;  %7083 = vst.msk [vmem:[#allocation5 + $0x99] sm:$0x1] %vm1837_vm0, %v7064_v53  ;;  %15917 = vmatprep.subr.bf16.mxu1 %v8451_v21  ;;  %v8409_v32 = vpack.c.bf16 %v8384_v55, %v8383_v22 }
 0x3a2   :  { %2830 = vrot.lane.b32.xlu1 %v2811_v3, %s16508_s10  ;;  %2466 = vrot.lane.b32.xlu0 %v1987_v9, %s16490_s25 }
 0x3a4   :  { %v8346_v1 = vpop.permute.xlu1 %8345  ;;  %15918 = vmatpush3.bf16.msra.mxu1 %v8451_v21  ;;  %v7524_v33 = vpop.permute.xlu0 %7523  ;;  %v8457_v21 = vpack.c.bf16 %v8432_v7, %v8431_v0  ;;  %v20044_v7 = vld [vmem:[#allocation66_spill] sm:$0xff] }
 0x3a5   :  { %8366 = vst.msk [vmem:[#allocation5 + $0x7f] sm:$0x1] %vm1837_vm0, %v8346_v1  ;;  %7543 = vst.msk [vmem:[#allocation5 + $0x9b] sm:$0x1] %vm1837_vm0, %v7524_v33  ;;  %15923 = vmatprep.subr.bf16.mxu1 %v8454_v58  ;;  %v6226_v1 = vrot.slane %v20037_v54, %v16647_v14 }
 0x3a6   :  { %3290 = vrot.lane.b32.xlu1 %v2811_v3, %s16490_s25  ;;  %3060 = vrot.lane.b32.xlu0 %v2811_v3, %s16503_s24 }
 0x3a7   :  { %15920 = vmatmul.mubr.msk.bf16.vlgmr.msra.gmra.mxu1 %vm8467_vm1, %v8404_v8 }
 0x3a8   :  { %v6242_v27 = vpop.permute.xlu1 %6241  ;;  %15924 = vmatpush3.bf16.msra.mxu1 %v8454_v58  ;;  %15927 = vmatprep.mubr.msk.bf16.mxu1 %vm8467_vm1, %v8405_v48  ;;  %v6470_v18 = vpop.permute.xlu0 %6469  ;;  %v20038_v58 = vld [vmem:[#allocation64_spill] sm:$0xff] }
 0x3a9   :  { %6260 = vst.msk [vmem:[#allocation5 + $0xb5] sm:$0x1] %vm1837_vm0, %v6242_v27  ;;  %6489 = vst.msk [vmem:[#allocation5 + $0x96] sm:$0x1] %vm1837_vm0, %v6470_v18  ;;  %15925 = vmatprep.subr.bf16.mxu1 %v8453_v49  ;;  %v6103_v61 = vrot.slane %v20038_v58, %v16647_v14 }
 0x3aa   :  { %3884 = vrot.lane.b32.xlu1 %v3635_v11, %s16503_s24  ;;  %3654 = vrot.lane.b32.xlu0 %v3635_v11, %s16508_s10 }
 0x3ac   :  { %v6472_v4 = vpop.permute.xlu1 %6471  ;;  %15926 = vmatpush3.bf16.msra.mxu1 %v8453_v49  ;;  %v8118_v28 = vpop.permute.xlu0 %8117  ;;  %v8434_v30 = vld [vmem:[#allocation5 + $0x78] sm:$0xff]  ;;  %v20039_v49 = vld [vmem:[#allocation94_spill] sm:$0xff] }
 0x3ad   :  { %6490 = vst.msk [vmem:[#allocation5 + $0xb6] sm:$0x1] %vm1837_vm0, %v6472_v4  ;;  %8137 = vst.msk [vmem:[#allocation5 + $0x9e] sm:$0x1] %vm1837_vm0, %v8118_v28  ;;  %15931 = vmatprep.subr.bf16.mxu1 %v8456_v47  ;;  %v8458_v35 = vpack.c.bf16 %v8434_v30, %v8433_v24  ;;  %v7050_v40 = vrot.slane %v20039_v49, %v16647_v14 }
 0x3ae   :  { %4478 = vrot.lane.b32.xlu1 %v4459_v50, %s16508_s10  ;;  %4114 = vrot.lane.b32.xlu0 %v3635_v11, %s16490_s25  ;;  %v20040_v11 = vld [vmem:[#allocation62_spill] sm:$0xff] }
 0x3af   :  { %15928 = vmatmul.mubr.msk.bf16.vlgmr.msra.gmra.mxu1 %vm8467_vm1, %v8406_v38  ;;  %v6927_v18 = vrot.slane %v20040_v11, %v16647_v14  ;;  %v7874_v38 = vrot.slane %v20041_v60, %v16647_v14 }
 0x3b0   :  { %v6702_v63 = vpop.permute.xlu1 %6701  ;;  %15932 = vmatpush3.bf16.msra.mxu1 %v8456_v47  ;;  %15935 = vmatprep.mubr.msk.bf16.mxu1 %vm8467_vm1, %v8407_v43  ;;  %v6947_v36 = vpop.permute.xlu0 %6946  ;;  %v8437_v62 = vld [vmem:[#allocation5 + $0x90] sm:$0xff]  ;;  %v7751_v43 = vrot.slane %v20042_v39, %v16647_v14 }
 0x3b1   :  { %6720 = vst.msk [vmem:[#allocation5 + $0xb7] sm:$0x1] %vm1837_vm0, %v6702_v63  ;;  %6967 = vst.msk [vmem:[#allocation4 + $0x79] sm:$0x1] %vm1837_vm0, %v6947_v36  ;;  %15933 = vmatprep.subr.bf16.mxu1 %v8455_v26 }
 0x3b2   :  { %4938 = vrot.lane.b32.xlu1 %v4459_v50, %s16490_s25  ;;  %4708 = vrot.lane.b32.xlu0 %v4459_v50, %s16503_s24 }
 0x3b4   :  { %v7296_v23 = vpop.permute.xlu1 %7295  ;;  %15934 = vmatpush3.bf16.msra.mxu1 %v8455_v26  ;;  %v7177_v37 = vpop.permute.xlu0 %7176  ;;  %v8438_v9 = vld [vmem:[#allocation5 + $0x98] sm:$0xff] }
 0x3b5   :  { %7314 = vst.msk [vmem:[#allocation5 + $0xba] sm:$0x1] %vm1837_vm0, %v7296_v23  ;;  %7197 = vst.msk [vmem:[#allocation4 + $0x7a] sm:$0x1] %vm1837_vm0, %v7177_v37  ;;  %15939 = vmatprep.subr.bf16.mxu1 %v8458_v35  ;;  %v8460_v52 = vpack.c.bf16 %v8438_v9, %v8437_v62  ;;  %v20043_v23 = vld [vmem:[#allocation63_spill] sm:$0xff]  ;;  %v6230_v9 = vrot.slane %v17568_v34, %v16647_v14 }
 0x3b6   :  { %5419 = vrot.lane.b32.xlu1 %v5402_v51, %s16508_s10  ;;  %5300 = vrot.lane.b32.xlu0 %v5279_v15, %s16508_s10 }
 0x3b7   :  { %15936 = vmatmul.mubr.msk.bf16.vlgmr.msra.gmra.mxu1 %vm8467_vm1, %v8408_v45  ;;  %15947 = vmatprep.subr.bf16.mxu0 %v8460_v52  ;;  %v6107_v45 = vrot.slane %v20044_v7, %v16647_v14 }
 0x3b8   :  { %v7526_v17 = vpop.permute.xlu1 %7525  ;;  %15940 = vmatpush3.bf16.msra.mxu1 %v8458_v35  ;;  %15948 = vmatpush3.bf16.msra.mxu0 %v8460_v52  ;;  %v7407_v13 = vpop.permute.xlu0 %7406  ;;  %v8441_v48 = vld [vmem:[#allocation5 + $0xb0] sm:$0xff]  ;;  %v5283_v35 = vrot.slane %v20043_v23, %v16647_v14 }
 0x3b9   :  { %7544 = vst.msk [vmem:[#allocation5 + $0xbb] sm:$0x1] %vm1837_vm0, %v7526_v17  ;;  %7427 = vst.msk [vmem:[#allocation4 + $0x7b] sm:$0x1] %vm1837_vm0, %v7407_v13  ;;  %15943 = vmatprep.mubr.msk.bf16.mxu1 %vm8467_vm1, %v8409_v32  ;;  %15941 = vmatprep.subr.bf16.mxu1 %v8457_v21 }
 0x3ba   :  { %5649 = vrot.lane.b32.xlu1 %v5402_v51, %s16503_s24  ;;  %5530 = vrot.lane.b32.xlu0 %v5279_v15, %s16503_s24 }
 0x3bc   :  { %v7890_v3 = vpop.permute.xlu1 %7889  ;;  %15942 = vmatpush3.bf16.msra.mxu1 %v8457_v21  ;;  %v7771_v53 = vpop.permute.xlu0 %7770  ;;  %v20045_v21 = vld [vmem:[#allocation96_spill] sm:$0xff] }
 0x3bd   :  { %7908 = vst.msk [vmem:[#allocation5 + $0xbd] sm:$0x1] %vm1837_vm0, %v7890_v3  ;;  %7791 = vst.msk [vmem:[#allocation4 + $0x7d] sm:$0x1] %vm1837_vm0, %v7771_v53  ;;  %v7054_v13 = vrot.slane %v20045_v21, %v16647_v14  ;;  %v20046_v3 = vld [vmem:[#allocation65_spill] sm:$0xff]  ;;  %v20056_v21 = vld [vmem:[#allocation91_spill] sm:$0xff] }
 0x3be   :  { %5879 = vrot.lane.b32.xlu1 %v5402_v51, %s16490_s25  ;;  %5760 = vrot.lane.b32.xlu0 %v5279_v15, %s16490_s25  ;;  %v6931_v53 = vrot.slane %v20046_v3, %v16647_v14 }
 0x3c0   :  { %v8120_v31 = vpop.permute.xlu1 %8119  ;;  %v8001_v19 = vpop.permute.xlu0 %8000 }
 0x3c1   :  { %8138 = vst.msk [vmem:[#allocation5 + $0xbe] sm:$0x1] %vm1837_vm0, %v8120_v31  ;;  %8021 = vst.msk [vmem:[#allocation4 + $0x7e] sm:$0x1] %vm1837_vm0, %v8001_v19 }
 0x3c2   :  { %6243 = vrot.lane.b32.xlu1 %v6226_v1, %s16508_s10  ;;  %6124 = vrot.lane.b32.xlu0 %v6103_v61, %s16508_s10 }
 0x3c4   :  { %v8350_v33 = vpop.permute.xlu1 %8349  ;;  %v8231_v12 = vpop.permute.xlu0 %8230 }
 0x3c5   :  { %8368 = vst.msk [vmem:[#allocation5 + $0xbf] sm:$0x1] %vm1837_vm0, %v8350_v33  ;;  %8251 = vst.msk [vmem:[#allocation4 + $0x7f] sm:$0x1] %vm1837_vm0, %v8231_v12 }
 0x3c6   :  { %6473 = vrot.lane.b32.xlu1 %v6226_v1, %s16503_s24  ;;  %6354 = vrot.lane.b32.xlu0 %v6103_v61, %s16503_s24 }
 0x3c8   :  { %v2350_v20 = vpop.permute.xlu1 %2349  ;;  %v2120_v8 = vpop.permute.xlu0 %2119 }
 0x3c9   :  { %2369 = vst.msk [vmem:[#allocation5 + $0x82] sm:$0x1] %vm1837_vm0, %v2350_v20  ;;  %2139 = vst.msk [vmem:[#allocation5 + $0x81] sm:$0x1] %vm1837_vm0, %v2120_v8  ;;  %v20047_v8 = vld [vmem:[#allocation97_spill] sm:$0xff] }
 0x3ca   :  { %6703 = vrot.lane.b32.xlu1 %v6226_v1, %s16490_s25  ;;  %6584 = vrot.lane.b32.xlu0 %v6103_v61, %s16490_s25 }
 0x3cc   :  { %v2944_v42 = vpop.permute.xlu1 %2943  ;;  %v8442_v46 = vld [vmem:[#allocation5 + $0xb8] sm:$0xff]  ;;  %v2580_v27 = vpop.permute.xlu0 %2579 }
 0x3cd   :  { %2963 = vst.msk [vmem:[#allocation5 + $0x85] sm:$0x1] %vm1837_vm0, %v2944_v42  ;;  %v8386_v56 = vld [vmem:[#allocation4 + $0x78] sm:$0xff]  ;;  %v8462_v29 = vpack.c.bf16 %v8442_v46, %v8441_v48  ;;  %2599 = vst.msk [vmem:[#allocation5 + $0x83] sm:$0x1] %vm1837_vm0, %v2580_v27  ;;  %v7878_v42 = vrot.slane %v20047_v8, %v16647_v14 }
 0x3ce   :  { %v8410_v4 = vpack.c.bf16 %v8386_v56, %v8385_v10  ;;  %7067 = vrot.lane.b32.xlu1 %v7050_v40, %s16508_s10  ;;  %6948 = vrot.lane.b32.xlu0 %v6927_v18, %s16508_s10  ;;  %v20048_v48 = vld [vmem:[#allocation68_spill] sm:$0xff] }
 0x3cf   :  { %15955 = vmatprep.subr.bf16.mxu1 %v8462_v29  ;;  %v7755_v46 = vrot.slane %v20048_v48, %v16647_v14  ;;  %v20049_v56 = vld [vmem:[#allocation84_spill] sm:$0xff] }
 0x3d0   :  { %15944 = vmatmul.mubr.msk.bf16.vlgmr.msra.gmra.mxu1 %vm8467_vm1, %v8410_v4  ;;  %v3404_v47 = vpop.permute.xlu1 %3403  ;;  %v3174_v16 = vpop.permute.xlu0 %3173 }
 0x3d1   :  { %3423 = vst.msk [vmem:[#allocation5 + $0x87] sm:$0x1] %vm1837_vm0, %v3404_v47  ;;  %15956 = vmatpush3.bf16.msra.mxu1 %v8462_v29  ;;  %3193 = vst.msk [vmem:[#allocation5 + $0x86] sm:$0x1] %vm1837_vm0, %v3174_v16  ;;  %v2106_v29 = vrot.slane %v20049_v56, %v16647_v14 }
 0x3d2   :  { %7297 = vrot.lane.b32.xlu1 %v7050_v40, %s16503_s24  ;;  %7178 = vrot.lane.b32.xlu0 %v6927_v18, %s16503_s24 }
 0x3d4   :  { %v3998_v50 = vpop.permute.xlu1 %3997  ;;  %v3768_v2 = vpop.permute.xlu0 %3767 }
 0x3d5   :  { %4017 = vst.msk [vmem:[#allocation5 + $0x8a] sm:$0x1] %vm1837_vm0, %v3998_v50  ;;  %3787 = vst.msk [vmem:[#allocation5 + $0x89] sm:$0x1] %vm1837_vm0, %v3768_v2 }
 0x3d6   :  { %7527 = vrot.lane.b32.xlu1 %v7050_v40, %s16490_s25  ;;  %7408 = vrot.lane.b32.xlu0 %v6927_v18, %s16490_s25 }
 0x3d8   :  { %v4592_v28 = vpop.permute.xlu1 %4591  ;;  %v4228_v59 = vpop.permute.xlu0 %4227  ;;  %v8435_v57 = vld [vmem:[#allocation5 + $0x80] sm:$0xff] }
 0x3d9   :  { %4611 = vst.msk [vmem:[#allocation5 + $0x8d] sm:$0x1] %vm1837_vm0, %v4592_v28  ;;  %4247 = vst.msk [vmem:[#allocation5 + $0x8b] sm:$0x1] %vm1837_vm0, %v4228_v59  ;;  %v20050_v28 = vld [vmem:[#allocation85_spill] sm:$0xff] }
 0x3da   :  { %7891 = vrot.lane.b32.xlu1 %v7874_v38, %s16508_s10  ;;  %7772 = vrot.lane.b32.xlu0 %v7751_v43, %s16508_s10  ;;  %v2930_v59 = vrot.slane %v20050_v28, %v16647_v14 }
 0x3dc   :  { %v5052_v6 = vpop.permute.xlu1 %5051  ;;  %v4822_v63 = vpop.permute.xlu0 %4821 }
 0x3dd   :  { %5071 = vst.msk [vmem:[#allocation5 + $0x8f] sm:$0x1] %vm1837_vm0, %v5052_v6  ;;  %4841 = vst.msk [vmem:[#allocation5 + $0x8e] sm:$0x1] %vm1837_vm0, %v4822_v63  ;;  %v20051_v6 = vld [vmem:[#allocation86_spill] sm:$0xff] }
 0x3de   :  { %8121 = vrot.lane.b32.xlu1 %v7874_v38, %s16503_s24  ;;  %8002 = vrot.lane.b32.xlu0 %v7751_v43, %s16503_s24  ;;  %v3754_v63 = vrot.slane %v20051_v6, %v16647_v14  ;;  %v20062_v6 = vld [vmem:[#allocation54_spill] sm:$0xff] }
 0x3e0   :  { %v2352_v26 = vpop.permute.xlu1 %2351  ;;  %v2122_v36 = vpop.permute.xlu0 %2121 }
 0x3e1   :  { %2370 = vst.msk [vmem:[#allocation5 + $0xa2] sm:$0x1] %vm1837_vm0, %v2352_v26  ;;  %2140 = vst.msk [vmem:[#allocation5 + $0xa1] sm:$0x1] %vm1837_vm0, %v2122_v36 }
 0x3e2   :  { %8351 = vrot.lane.b32.xlu1 %v7874_v38, %s16490_s25  ;;  %8232 = vrot.lane.b32.xlu0 %v7751_v43, %s16490_s25 }
 0x3e4   :  { %v2946_v30 = vpop.permute.xlu1 %2945  ;;  %v2582_v24 = vpop.permute.xlu0 %2581  ;;  %v8436_v51 = vld [vmem:[#allocation5 + $0x88] sm:$0xff] }
 0x3e5   :  { %2964 = vst.msk [vmem:[#allocation5 + $0xa5] sm:$0x1] %vm1837_vm0, %v2946_v30  ;;  %2600 = vst.msk [vmem:[#allocation5 + $0xa3] sm:$0x1] %vm1837_vm0, %v2582_v24  ;;  %v8459_v25 = vpack.c.bf16 %v8436_v51, %v8435_v57  ;;  %v20052_v30 = vld [vmem:[#allocation87_spill] sm:$0xff]  ;;  %v20053_v51 = vld [vmem:[#allocation88_spill] sm:$0xff] }
 0x3e6   :  { %5421 = vrot.lane.b32.xlu1 %v5406_v41, %s16508_s10  ;;  %5302 = vrot.lane.b32.xlu0 %v5283_v35, %s16508_s10  ;;  %v4578_v24 = vrot.slane %v20052_v30, %v16647_v14 }
 0x3e7   :  { %15949 = vmatprep.subr.bf16.mxu0 %v8459_v25 }
 0x3e8   :  { %v3406_v55 = vpop.permute.xlu1 %3405  ;;  %15950 = vmatpush3.bf16.msra.mxu0 %v8459_v25  ;;  %v3176_v37 = vpop.permute.xlu0 %3175  ;;  %v2110_v25 = vrot.slane %v20053_v51, %v16647_v14 }
 0x3e9   :  { %3424 = vst.msk [vmem:[#allocation5 + $0xa7] sm:$0x1] %vm1837_vm0, %v3406_v55  ;;  %3194 = vst.msk [vmem:[#allocation5 + $0xa6] sm:$0x1] %vm1837_vm0, %v3176_v37 }
 0x3ea   :  { %5651 = vrot.lane.b32.xlu1 %v5406_v41, %s16503_s24  ;;  %5532 = vrot.lane.b32.xlu0 %v5283_v35, %s16503_s24 }
 0x3ec   :  { %v4000_v5 = vpop.permute.xlu1 %3999  ;;  %v3770_v44 = vpop.permute.xlu0 %3769 }
 0x3ed   :  { %4018 = vst.msk [vmem:[#allocation5 + $0xaa] sm:$0x1] %vm1837_vm0, %v4000_v5  ;;  %3788 = vst.msk [vmem:[#allocation5 + $0xa9] sm:$0x1] %vm1837_vm0, %v3770_v44 }
 0x3ee   :  { %5881 = vrot.lane.b32.xlu1 %v5406_v41, %s16490_s25  ;;  %5762 = vrot.lane.b32.xlu0 %v5283_v35, %s16490_s25 }
 0x3f0   :  { %v4594_v15 = vpop.permute.xlu1 %4593  ;;  %v4230_v62 = vpop.permute.xlu0 %4229  ;;  %v8439_v31 = vld [vmem:[#allocation5 + $0xa0] sm:$0xff] }
 0x3f1   :  { %4612 = vst.msk [vmem:[#allocation5 + $0xad] sm:$0x1] %vm1837_vm0, %v4594_v15  ;;  %4248 = vst.msk [vmem:[#allocation5 + $0xab] sm:$0x1] %vm1837_vm0, %v4230_v62  ;;  %v20054_v62 = vld [vmem:[#allocation89_spill] sm:$0xff] }
 0x3f2   :  { %6245 = vrot.lane.b32.xlu1 %v6230_v9, %s16508_s10  ;;  %6126 = vrot.lane.b32.xlu0 %v6107_v45, %s16508_s10 }
 0x3f4   :  { %v5054_v52 = vpop.permute.xlu1 %5053  ;;  %v4824_v22 = vpop.permute.xlu0 %4823 }
 0x3f5   :  { %5072 = vst.msk [vmem:[#allocation5 + $0xaf] sm:$0x1] %vm1837_vm0, %v5054_v52  ;;  %4842 = vst.msk [vmem:[#allocation5 + $0xae] sm:$0x1] %vm1837_vm0, %v4824_v22 }
 0x3f6   :  { %6475 = vrot.lane.b32.xlu1 %v6230_v9, %s16503_s24  ;;  %6356 = vrot.lane.b32.xlu0 %v6107_v45, %s16503_s24 }
 0x3f8   :  { %v2235_v34 = vpop.permute.xlu1 %2234  ;;  %v2005_v0 = vpop.permute.xlu0 %2004 }
 0x3f9   :  { %2254 = vst.msk [vmem:[#allocation4 + $0x82] sm:$0x1] %vm1837_vm0, %v2235_v34  ;;  %2024 = vst.msk [vmem:[#allocation4 + $0x81] sm:$0x1] %vm1837_vm0, %v2005_v0  ;;  %v20055_v34 = vld [vmem:[#allocation90_spill] sm:$0xff] }
 0x3fa   :  { %6705 = vrot.lane.b32.xlu1 %v6230_v9, %s16490_s25  ;;  %6586 = vrot.lane.b32.xlu0 %v6107_v45, %s16490_s25  ;;  %v2934_v9 = vrot.slane %v20054_v62, %v16647_v14  ;;  %v3758_v0 = vrot.slane %v20055_v34, %v16647_v14  ;;  %v20065_v34 = vld [vmem:[#allocation69_spill] sm:$0xff] }
 0x3fc   :  { %v2829_v17 = vpop.permute.xlu1 %2828  ;;  %v2465_v32 = vpop.permute.xlu0 %2464  ;;  %v8440_v19 = vld [vmem:[#allocation5 + $0xa8] sm:$0xff] }
 0x3fd   :  { %2848 = vst.msk [vmem:[#allocation4 + $0x85] sm:$0x1] %vm1837_vm0, %v2829_v17  ;;  %2484 = vst.msk [vmem:[#allocation4 + $0x83] sm:$0x1] %vm1837_vm0, %v2465_v32  ;;  %v8461_v54 = vpack.c.bf16 %v8440_v19, %v8439_v31 }
 0x3fe   :  { %7069 = vrot.lane.b32.xlu1 %v7054_v13, %s16508_s10  ;;  %6950 = vrot.lane.b32.xlu0 %v6931_v53, %s16508_s10 }
 0x3ff   :  { %15957 = vmatprep.subr.bf16.mxu1 %v8461_v54 }
 0x400   :  { %v3289_v1 = vpop.permute.xlu1 %3288  ;;  %15958 = vmatpush3.bf16.msra.mxu1 %v8461_v54  ;;  %v3059_v58 = vpop.permute.xlu0 %3058  ;;  %v20057_v54 = vld [vmem:[#allocation49_spill] sm:$0xff] }
 0x401   :  { %3308 = vst.msk [vmem:[#allocation4 + $0x87] sm:$0x1] %vm1837_vm0, %v3289_v1  ;;  %3078 = vst.msk [vmem:[#allocation4 + $0x86] sm:$0x1] %vm1837_vm0, %v3059_v58  ;;  %v1991_v1 = vrot.slane %v20057_v54, %v16647_v14 }
 0x402   :  { %7299 = vrot.lane.b32.xlu1 %v7054_v13, %s16503_s24  ;;  %7180 = vrot.lane.b32.xlu0 %v6931_v53, %s16503_s24 }
 0x404   :  { %v3883_v61 = vpop.permute.xlu1 %3882  ;;  %v3653_v33 = vpop.permute.xlu0 %3652 }
 0x405   :  { %3902 = vst.msk [vmem:[#allocation4 + $0x8a] sm:$0x1] %vm1837_vm0, %v3883_v61  ;;  %3672 = vst.msk [vmem:[#allocation4 + $0x89] sm:$0x1] %vm1837_vm0, %v3653_v33  ;;  %v20058_v33 = vld [vmem:[#allocation50_spill] sm:$0xff] }
 0x406   :  { %7529 = vrot.lane.b32.xlu1 %v7054_v13, %s16490_s25  ;;  %7410 = vrot.lane.b32.xlu0 %v6931_v53, %s16490_s25  ;;  %v4582_v13 = vrot.slane %v20056_v21, %v16647_v14 }
 0x408   :  { %v4477_v12 = vpop.permute.xlu1 %4476  ;;  %v4113_v20 = vpop.permute.xlu0 %4112  ;;  %v8387_v4 = vld [vmem:[#allocation4 + $0x80] sm:$0xff] }
 0x409   :  { %4496 = vst.msk [vmem:[#allocation4 + $0x8d] sm:$0x1] %vm1837_vm0, %v4477_v12  ;;  %4132 = vst.msk [vmem:[#allocation4 + $0x8b] sm:$0x1] %vm1837_vm0, %v4113_v20  ;;  %v2815_v12 = vrot.slane %v20058_v33, %v16647_v14 }
 0x40a   :  { %7893 = vrot.lane.b32.xlu1 %v7878_v42, %s16508_s10  ;;  %7774 = vrot.lane.b32.xlu0 %v7755_v46, %s16508_s10 }
 0x40c   :  { %v4937_v27 = vpop.permute.xlu1 %4936  ;;  %v4707_v49 = vpop.permute.xlu0 %4706 }
 0x40d   :  { %4956 = vst.msk [vmem:[#allocation4 + $0x8f] sm:$0x1] %vm1837_vm0, %v4937_v27  ;;  %4726 = vst.msk [vmem:[#allocation4 + $0x8e] sm:$0x1] %vm1837_vm0, %v4707_v49 }
 0x40e   :  { %8123 = vrot.lane.b32.xlu1 %v7878_v42, %s16503_s24  ;;  %8004 = vrot.lane.b32.xlu0 %v7755_v46, %s16503_s24 }
 0x410   :  { %v2237_v40 = vpop.permute.xlu1 %2236  ;;  %v2007_v11 = vpop.permute.xlu0 %2006 }
 0x411   :  { %2255 = vst.msk [vmem:[#allocation4 + $0xa2] sm:$0x1] %vm1837_vm0, %v2237_v40  ;;  %2025 = vst.msk [vmem:[#allocation4 + $0xa1] sm:$0x1] %vm1837_vm0, %v2007_v11  ;;  %v20060_v11 = vld [vmem:[#allocation52_spill] sm:$0xff] }
 0x412   :  { %8353 = vrot.lane.b32.xlu1 %v7878_v42, %s16490_s25  ;;  %8234 = vrot.lane.b32.xlu0 %v7755_v46, %s16490_s25  ;;  %v20059_v46 = vld [vmem:[#allocation51_spill] sm:$0xff] }
 0x413   :  { %v3639_v27 = vrot.slane %v20059_v46, %v16647_v14 }
 0x414   :  { %v2831_v18 = vpop.permute.xlu1 %2830  ;;  %v2467_v10 = vpop.permute.xlu0 %2466  ;;  %v8388_v47 = vld [vmem:[#allocation4 + $0x88] sm:$0xff] }
 0x415   :  { %2849 = vst.msk [vmem:[#allocation4 + $0xa5] sm:$0x1] %vm1837_vm0, %v2831_v18  ;;  %2485 = vst.msk [vmem:[#allocation4 + $0xa3] sm:$0x1] %vm1837_vm0, %v2467_v10  ;;  %v8411_v16 = vpack.c.bf16 %v8388_v47, %v8387_v4  ;;  %v4463_v18 = vrot.slane %v20060_v11, %v16647_v14 }
 0x416   :  { %2353 = vrot.lane.b32.xlu1 %v2106_v29, %s16503_s24  ;;  %2123 = vrot.lane.b32.xlu0 %v2106_v29, %s16508_s10 }
 0x417   :  { %15951 = vmatprep.mubr.msk.bf16.mxu0 %vm8467_vm1, %v8411_v16  ;;  %v20061_v16 = vld [vmem:[#allocation53_spill] sm:$0xff] }
 0x418   :  { %v3291_v50 = vpop.permute.xlu1 %3290  ;;  %v3061_v2 = vpop.permute.xlu0 %3060 }
 0x419   :  { %3309 = vst.msk [vmem:[#allocation4 + $0xa7] sm:$0x1] %vm1837_vm0, %v3291_v50  ;;  %3079 = vst.msk [vmem:[#allocation4 + $0xa6] sm:$0x1] %vm1837_vm0, %v3061_v2  ;;  %v1995_v50 = vrot.slane %v20061_v16, %v16647_v14 }
 0x41a   :  { %2947 = vrot.lane.b32.xlu1 %v2930_v59, %s16508_s10  ;;  %2583 = vrot.lane.b32.xlu0 %v2106_v29, %s16490_s25 }
 0x41c   :  { %v3885_v60 = vpop.permute.xlu1 %3884  ;;  %v3655_v38 = vpop.permute.xlu0 %3654 }
 0x41d   :  { %3903 = vst.msk [vmem:[#allocation4 + $0xaa] sm:$0x1] %vm1837_vm0, %v3885_v60  ;;  %3673 = vst.msk [vmem:[#allocation4 + $0xa9] sm:$0x1] %vm1837_vm0, %v3655_v38 }
 0x41e   :  { %3407 = vrot.lane.b32.xlu1 %v2930_v59, %s16490_s25  ;;  %3177 = vrot.lane.b32.xlu0 %v2930_v59, %s16503_s24 }
 0x420   :  { %v4479_v39 = vpop.permute.xlu1 %4478  ;;  %v4115_v43 = vpop.permute.xlu0 %4114  ;;  %v8391_v55 = vld [vmem:[#allocation4 + $0xa0] sm:$0xff] }
 0x421   :  { %4497 = vst.msk [vmem:[#allocation4 + $0xad] sm:$0x1] %vm1837_vm0, %v4479_v39  ;;  %4133 = vst.msk [vmem:[#allocation4 + $0xab] sm:$0x1] %vm1837_vm0, %v4115_v43 }
 0x422   :  { %4001 = vrot.lane.b32.xlu1 %v3754_v63, %s16503_s24  ;;  %3771 = vrot.lane.b32.xlu0 %v3754_v63, %s16508_s10 }
 0x424   :  { %v4939_v26 = vpop.permute.xlu1 %4938  ;;  %v4709_v36 = vpop.permute.xlu0 %4708 }
 0x425   :  { %4957 = vst.msk [vmem:[#allocation4 + $0xaf] sm:$0x1] %vm1837_vm0, %v4939_v26  ;;  %4727 = vst.msk [vmem:[#allocation4 + $0xae] sm:$0x1] %vm1837_vm0, %v4709_v36 }
 0x426   :  { %4595 = vrot.lane.b32.xlu1 %v4578_v24, %s16508_s10  ;;  %4231 = vrot.lane.b32.xlu0 %v3754_v63, %s16490_s25  ;;  %v2819_v63 = vrot.slane %v20062_v6, %v16647_v14 }
 0x428   :  { %v5420_v41 = vpop.permute.xlu1 %5419  ;;  %v5301_v23 = vpop.permute.xlu0 %5300 }
 0x429   :  { %5437 = vst.msk [vmem:[#allocation5 + $0xd1] sm:$0x1] %vm1837_vm0, %v5420_v41  ;;  %5320 = vst.msk [vmem:[#allocation4 + $0x91] sm:$0x1] %vm1837_vm0, %v5301_v23  ;;  %v20063_v23 = vld [vmem:[#allocation55_spill] sm:$0xff] }
 0x42a   :  { %5055 = vrot.lane.b32.xlu1 %v4578_v24, %s16490_s25  ;;  %4825 = vrot.lane.b32.xlu0 %v4578_v24, %s16503_s24 }
 0x42c   :  { %v5650_v35 = vpop.permute.xlu1 %5649  ;;  %v5531_v57 = vpop.permute.xlu0 %5530  ;;  %v8392_v37 = vld [vmem:[#allocation4 + $0xa8] sm:$0xff] }
 0x42d   :  { %5667 = vst.msk [vmem:[#allocation5 + $0xd2] sm:$0x1] %vm1837_vm0, %v5650_v35  ;;  %5550 = vst.msk [vmem:[#allocation4 + $0x92] sm:$0x1] %vm1837_vm0, %v5531_v57  ;;  %v8413_v5 = vpack.c.bf16 %v8392_v37, %v8391_v55  ;;  %v3643_v35 = vrot.slane %v20063_v23, %v16647_v14  ;;  %v20064_v37 = vld [vmem:[#allocation56_spill] sm:$0xff] }
 0x42e   :  { %2355 = vrot.lane.b32.xlu1 %v2110_v25, %s16503_s24  ;;  %2125 = vrot.lane.b32.xlu0 %v2110_v25, %s16508_s10 }
 0x42f   :  { %15959 = vmatprep.mubr.msk.bf16.mxu1 %vm8467_vm1, %v8413_v5  ;;  %v4467_v5 = vrot.slane %v20064_v37, %v16647_v14 }
 0x430   :  { %v5880_v44 = vpop.permute.xlu1 %5879  ;;  %v5761_v15 = vpop.permute.xlu0 %5760 }
 0x431   :  { %5897 = vst.msk [vmem:[#allocation5 + $0xd3] sm:$0x1] %vm1837_vm0, %v5880_v44  ;;  %5780 = vst.msk [vmem:[#allocation4 + $0x93] sm:$0x1] %vm1837_vm0, %v5761_v15 }
 0x432   :  { %2949 = vrot.lane.b32.xlu1 %v2934_v9, %s16508_s10  ;;  %2585 = vrot.lane.b32.xlu0 %v2110_v25, %s16490_s25 }
 0x434   :  { %v6244_v7 = vpop.permute.xlu1 %6243  ;;  %v6125_v45 = vpop.permute.xlu0 %6124 }
 0x435   :  { %6261 = vst.msk [vmem:[#allocation5 + $0xd5] sm:$0x1] %vm1837_vm0, %v6244_v7  ;;  %6144 = vst.msk [vmem:[#allocation4 + $0x95] sm:$0x1] %vm1837_vm0, %v6125_v45 }
 0x436   :  { %3409 = vrot.lane.b32.xlu1 %v2934_v9, %s16490_s25  ;;  %3179 = vrot.lane.b32.xlu0 %v2934_v9, %s16503_s24 }
 0x438   :  { %v6474_v52 = vpop.permute.xlu1 %6473  ;;  %v6355_v22 = vpop.permute.xlu0 %6354 }
 0x439   :  { %6491 = vst.msk [vmem:[#allocation5 + $0xd6] sm:$0x1] %vm1837_vm0, %v6474_v52  ;;  %6374 = vst.msk [vmem:[#allocation4 + $0x96] sm:$0x1] %vm1837_vm0, %v6355_v22 }
 0x43a   :  { %4003 = vrot.lane.b32.xlu1 %v3758_v0, %s16503_s24  ;;  %3773 = vrot.lane.b32.xlu0 %v3758_v0, %s16508_s10 }
 0x43c   :  { %v6704_v17 = vpop.permute.xlu1 %6703  ;;  %v6585_v32 = vpop.permute.xlu0 %6584 }
 0x43d   :  { %6721 = vst.msk [vmem:[#allocation5 + $0xd7] sm:$0x1] %vm1837_vm0, %v6704_v17  ;;  %6604 = vst.msk [vmem:[#allocation4 + $0x97] sm:$0x1] %vm1837_vm0, %v6585_v32 }
 0x43e   :  { %4597 = vrot.lane.b32.xlu1 %v4582_v13, %s16508_s10  ;;  %4233 = vrot.lane.b32.xlu0 %v3758_v0, %s16490_s25  ;;  %v5287_v0 = vrot.slane %v20065_v34, %v16647_v14 }
 0x440   :  { %v7068_v3 = vpop.permute.xlu1 %7067  ;;  %v6949_v53 = vpop.permute.xlu0 %6948 }
 0x441   :  { %7085 = vst.msk [vmem:[#allocation5 + $0xd9] sm:$0x1] %vm1837_vm0, %v7068_v3  ;;  %6968 = vst.msk [vmem:[#allocation4 + $0x99] sm:$0x1] %vm1837_vm0, %v6949_v53  ;;  %v20066_v3 = vld [vmem:[#allocation70_spill] sm:$0xff] }
 0x442   :  { %5057 = vrot.lane.b32.xlu1 %v4582_v13, %s16490_s25  ;;  %4827 = vrot.lane.b32.xlu0 %v4582_v13, %s16503_s24  ;;  %v6111_v53 = vrot.slane %v20066_v3, %v16647_v14 }
 0x444   :  { %v7298_v31 = vpop.permute.xlu1 %7297  ;;  %v7179_v19 = vpop.permute.xlu0 %7178  ;;  %v8389_v29 = vld [vmem:[#allocation4 + $0x90] sm:$0xff] }
 0x445   :  { %7315 = vst.msk [vmem:[#allocation5 + $0xda] sm:$0x1] %vm1837_vm0, %v7298_v31  ;;  %7198 = vst.msk [vmem:[#allocation4 + $0x9a] sm:$0x1] %vm1837_vm0, %v7179_v19  ;;  %v8445_v28 = vld [vmem:[#allocation5 + $0xd0] sm:$0xff] }
 0x446   :  { %2238 = vrot.lane.b32.xlu1 %v1991_v1, %s16503_s24  ;;  %2008 = vrot.lane.b32.xlu0 %v1991_v1, %s16508_s10 }
 0x448   :  { %v7528_v58 = vpop.permute.xlu1 %7527  ;;  %v7409_v61 = vpop.permute.xlu0 %7408 }
 0x449   :  { %7545 = vst.msk [vmem:[#allocation5 + $0xdb] sm:$0x1] %vm1837_vm0, %v7528_v58  ;;  %7428 = vst.msk [vmem:[#allocation4 + $0x9b] sm:$0x1] %vm1837_vm0, %v7409_v61 }
 0x44a   :  { %2832 = vrot.lane.b32.xlu1 %v2815_v12, %s16508_s10  ;;  %2468 = vrot.lane.b32.xlu0 %v1991_v1, %s16490_s25 }
 0x44c   :  { %v7892_v20 = vpop.permute.xlu1 %7891  ;;  %v7773_v8 = vpop.permute.xlu0 %7772 }
 0x44d   :  { %7909 = vst.msk [vmem:[#allocation5 + $0xdd] sm:$0x1] %vm1837_vm0, %v7892_v20  ;;  %7792 = vst.msk [vmem:[#allocation4 + $0x9d] sm:$0x1] %vm1837_vm0, %v7773_v8 }
 0x44e   :  { %3292 = vrot.lane.b32.xlu1 %v2815_v12, %s16490_s25  ;;  %3062 = vrot.lane.b32.xlu0 %v2815_v12, %s16503_s24  ;;  %v20067_v12 = vld [vmem:[#allocation71_spill] sm:$0xff] }
 0x44f   :  { %v6935_v20 = vrot.slane %v20067_v12, %v16647_v14 }
 0x450   :  { %v8122_v42 = vpop.permute.xlu1 %8121  ;;  %v8003_v48 = vpop.permute.xlu0 %8002 }
 0x451   :  { %8139 = vst.msk [vmem:[#allocation5 + $0xde] sm:$0x1] %vm1837_vm0, %v8122_v42  ;;  %8022 = vst.msk [vmem:[#allocation4 + $0x9e] sm:$0x1] %vm1837_vm0, %v8003_v48  ;;  %v20068_v48 = vld [vmem:[#allocation72_spill] sm:$0xff] }
 0x452   :  { %3886 = vrot.lane.b32.xlu1 %v3639_v27, %s16503_s24  ;;  %3656 = vrot.lane.b32.xlu0 %v3639_v27, %s16508_s10  ;;  %v7759_v46 = vrot.slane %v20068_v48, %v16647_v14 }
 0x454   :  { %v8352_v49 = vpop.permute.xlu1 %8351  ;;  %v8233_v40 = vpop.permute.xlu0 %8232 }
 0x455   :  { %8369 = vst.msk [vmem:[#allocation5 + $0xdf] sm:$0x1] %vm1837_vm0, %v8352_v49  ;;  %8252 = vst.msk [vmem:[#allocation4 + $0x9f] sm:$0x1] %vm1837_vm0, %v8233_v40 }
 0x456   :  { %4480 = vrot.lane.b32.xlu1 %v4463_v18, %s16508_s10  ;;  %4116 = vrot.lane.b32.xlu0 %v3639_v27, %s16490_s25 }
 0x458   :  { %v5422_v10 = vpop.permute.xlu1 %5421  ;;  %v5303_v56 = vpop.permute.xlu0 %5302 }
 0x459   :  { %5438 = vst.msk [vmem:[#allocation5 + $0xf1] sm:$0x1] %vm1837_vm0, %v5422_v10  ;;  %5321 = vst.msk [vmem:[#allocation4 + $0xb1] sm:$0x1] %vm1837_vm0, %v5303_v56  ;;  %v20069_v10 = vld [vmem:[#allocation73_spill] sm:$0xff] }
 0x45a   :  { %4940 = vrot.lane.b32.xlu1 %v4463_v18, %s16490_s25  ;;  %4710 = vrot.lane.b32.xlu0 %v4463_v18, %s16503_s24  ;;  %v5291_v56 = vrot.slane %v20069_v10, %v16647_v14 }
 0x45c   :  { %v5652_v4 = vpop.permute.xlu1 %5651  ;;  %v5533_v47 = vpop.permute.xlu0 %5532  ;;  %v8390_v2 = vld [vmem:[#allocation4 + $0x98] sm:$0xff] }
 0x45d   :  { %v8446_v59 = vld [vmem:[#allocation5 + $0xd8] sm:$0xff]  ;;  %5668 = vst.msk [vmem:[#allocation5 + $0xf2] sm:$0x1] %vm1837_vm0, %v5652_v4  ;;  %5551 = vst.msk [vmem:[#allocation4 + $0xb2] sm:$0x1] %vm1837_vm0, %v5533_v47  ;;  %v8412_v60 = vpack.c.bf16 %v8390_v2, %v8389_v29 }
 0x45e   :  { %v8464_v38 = vpack.c.bf16 %v8446_v59, %v8445_v28  ;;  %2240 = vrot.lane.b32.xlu1 %v1995_v50, %s16503_s24  ;;  %2010 = vrot.lane.b32.xlu0 %v1995_v50, %s16508_s10 }
 0x45f   :  { %15952 = vmatmul.mubr.msk.bf16.vlgmr.msra.gmra.mxu0 %vm8467_vm1, %v8412_v60  ;;  %v20070_v60 = vld [vmem:[#allocation74_spill] sm:$0xff] }
 0x460   :  { %15963 = vmatprep.subr.bf16.mxu0 %v8464_v38  ;;  %v5882_v39 = vpop.permute.xlu1 %5881  ;;  %v5763_v43 = vpop.permute.xlu0 %5762 }
 0x461   :  { %15964 = vmatpush3.bf16.msra.mxu0 %v8464_v38  ;;  %5898 = vst.msk [vmem:[#allocation5 + $0xf3] sm:$0x1] %vm1837_vm0, %v5882_v39  ;;  %5781 = vst.msk [vmem:[#allocation4 + $0xb3] sm:$0x1] %vm1837_vm0, %v5763_v43  ;;  %v6115_v38 = vrot.slane %v20070_v60, %v16647_v14 }
 0x462   :  { %2834 = vrot.lane.b32.xlu1 %v2819_v63, %s16508_s10  ;;  %2470 = vrot.lane.b32.xlu0 %v1995_v50, %s16490_s25 }
 0x464   :  { %v6246_v26 = vpop.permute.xlu1 %6245  ;;  %v6127_v36 = vpop.permute.xlu0 %6126 }
 0x465   :  { %6262 = vst.msk [vmem:[#allocation5 + $0xf5] sm:$0x1] %vm1837_vm0, %v6246_v26  ;;  %6145 = vst.msk [vmem:[#allocation4 + $0xb5] sm:$0x1] %vm1837_vm0, %v6127_v36 }
 0x466   :  { %3294 = vrot.lane.b32.xlu1 %v2819_v63, %s16490_s25  ;;  %3064 = vrot.lane.b32.xlu0 %v2819_v63, %s16503_s24 }
 0x467   :  { %v15921_v30 = vpop.f32.mrf.mxu1 }
 0x468   :  { %8910 = vst.msk [vmem:[#allocation6 + $0x10] sm:$0xff] %vm8467_vm1, %v15921_v30  ;;  %v6476_v24 = vpop.permute.xlu1 %6475  ;;  %v6357_v41 = vpop.permute.xlu0 %6356 }
 0x469   :  { %6492 = vst.msk [vmem:[#allocation5 + $0xf6] sm:$0x1] %vm1837_vm0, %v6476_v24  ;;  %6375 = vst.msk [vmem:[#allocation4 + $0xb6] sm:$0x1] %vm1837_vm0, %v6357_v41  ;;  %v8508_v57 = vpop.f32.mrf.mxu1  ;;  %v20071_v24 = vld [vmem:[#allocation75_spill] sm:$0xff] }
 0x46a   :  { %8908 = vst.msk [vmem:[#allocation6] sm:$0xff] %vm8467_vm1, %v8508_v57  ;;  %3888 = vrot.lane.b32.xlu1 %v3643_v35, %s16503_s24  ;;  %3658 = vrot.lane.b32.xlu0 %v3643_v35, %s16508_s10  ;;  %v6939_v41 = vrot.slane %v20071_v24, %v16647_v14  ;;  %v20072_v57 = vld [vmem:[#allocation76_spill] sm:$0xff] }
 0x46b   :  { %v15922_v51 = vpop.f32.mrf.mxu1 }
 0x46c   :  { %8911 = vst.msk [vmem:[#allocation6 + $0x18] sm:$0xff] %vm8467_vm1, %v15922_v51  ;;  %v6706_v25 = vpop.permute.xlu1 %6705  ;;  %v6587_v55 = vpop.permute.xlu0 %6586  ;;  %v7763_v51 = vrot.slane %v20072_v57, %v16647_v14 }
 0x46d   :  { %6722 = vst.msk [vmem:[#allocation5 + $0xf7] sm:$0x1] %vm1837_vm0, %v6706_v25  ;;  %6605 = vst.msk [vmem:[#allocation4 + $0xb7] sm:$0x1] %vm1837_vm0, %v6587_v55  ;;  %v8511_v44 = vpop.f32.mrf.mxu1 }
 0x46e   :  { %8909 = vst.msk [vmem:[#allocation6 + $0x8] sm:$0xff] %vm8467_vm1, %v8511_v44  ;;  %4482 = vrot.lane.b32.xlu1 %v4467_v5, %s16508_s10  ;;  %4118 = vrot.lane.b32.xlu0 %v3643_v35, %s16490_s25 }
 0x46f   :  { %v15929_v15 = vpop.f32.mrf.mxu1 }
 0x470   :  { %8914 = vst.msk [vmem:[#allocation6 + $0x30] sm:$0xff] %vm8467_vm1, %v15929_v15  ;;  %v7070_v62 = vpop.permute.xlu1 %7069  ;;  %v6951_v9 = vpop.permute.xlu0 %6950 }
 0x471   :  { %7086 = vst.msk [vmem:[#allocation5 + $0xf9] sm:$0x1] %vm1837_vm0, %v7070_v62  ;;  %6969 = vst.msk [vmem:[#allocation4 + $0xb9] sm:$0x1] %vm1837_vm0, %v6951_v9  ;;  %v8563_v7 = vpop.f32.mrf.mxu1 }
 0x472   :  { %8912 = vst.msk [vmem:[#allocation6 + $0x20] sm:$0xff] %vm8467_vm1, %v8563_v7  ;;  %4942 = vrot.lane.b32.xlu1 %v4467_v5, %s16490_s25  ;;  %4712 = vrot.lane.b32.xlu0 %v4467_v5, %s16503_s24 }
 0x473   :  { %v15930_v45 = vpop.f32.mrf.mxu1 }
 0x474   :  { %8915 = vst.msk [vmem:[#allocation6 + $0x38] sm:$0xff] %vm8467_vm1, %v15930_v45  ;;  %v7300_v52 = vpop.permute.xlu1 %7299  ;;  %v7181_v22 = vpop.permute.xlu0 %7180  ;;  %v8393_v40 = vld [vmem:[#allocation4 + $0xb0] sm:$0xff] }
 0x475   :  { %7316 = vst.msk [vmem:[#allocation5 + $0xfa] sm:$0x1] %vm1837_vm0, %v7300_v52  ;;  %7199 = vst.msk [vmem:[#allocation4 + $0xba] sm:$0x1] %vm1837_vm0, %v7181_v22  ;;  %v8566_v17 = vpop.f32.mrf.mxu1  ;;  %v8449_v4 = vld [vmem:[#allocation5 + $0xf0] sm:$0xff] }
 0x476   :  { %8913 = vst.msk [vmem:[#allocation6 + $0x28] sm:$0xff] %vm8467_vm1, %v8566_v17  ;;  %5534 = vrot.lane.b32.xlu1 %v5287_v0, %s16503_s24  ;;  %5304 = vrot.lane.b32.xlu0 %v5287_v0, %s16508_s10 }
 0x477   :  { %v15937_v32 = vpop.f32.mrf.mxu1 }
 0x478   :  { %8918 = vst.msk [vmem:[#allocation6 + $0x50] sm:$0xff] %vm8467_vm1, %v15937_v32  ;;  %v7530_v21 = vpop.permute.xlu1 %7529  ;;  %v7411_v13 = vpop.permute.xlu0 %7410 }
 0x479   :  { %7546 = vst.msk [vmem:[#allocation5 + $0xfb] sm:$0x1] %vm1837_vm0, %v7530_v21  ;;  %7429 = vst.msk [vmem:[#allocation4 + $0xbb] sm:$0x1] %vm1837_vm0, %v7411_v13  ;;  %v8618_v31 = vpop.f32.mrf.mxu1 }
 0x47a   :  { %8916 = vst.msk [vmem:[#allocation6 + $0x40] sm:$0xff] %vm8467_vm1, %v8618_v31  ;;  %6128 = vrot.lane.b32.xlu1 %v6111_v53, %s16508_s10  ;;  %5764 = vrot.lane.b32.xlu0 %v5287_v0, %s16490_s25 }
 0x47b   :  { %v15938_v19 = vpop.f32.mrf.mxu1  ;;  %v18788_v14 = vld [vmem:[#allocation6 + $0x3e] sm:$0x1] }
 0x47c   :  { %8919 = vst.msk [vmem:[#allocation6 + $0x58] sm:$0xff] %vm8467_vm1, %v15938_v19  ;;  %v7894_v54 = vpop.permute.xlu1 %7893  ;;  %v7775_v1 = vpop.permute.xlu0 %7774 }
 0x47d   :  { %7910 = vst.msk [vmem:[#allocation5 + $0xfd] sm:$0x1] %vm1837_vm0, %v7894_v54  ;;  %7793 = vst.msk [vmem:[#allocation4 + $0xbd] sm:$0x1] %vm1837_vm0, %v7775_v1  ;;  %v8621_v58 = vpop.f32.mrf.mxu1 }
 0x47e   :  { %8917 = vst.msk [vmem:[#allocation6 + $0x48] sm:$0xff] %vm8467_vm1, %v8621_v58  ;;  %6588 = vrot.lane.b32.xlu1 %v6111_v53, %s16490_s25  ;;  %6358 = vrot.lane.b32.xlu0 %v6111_v53, %s16503_s24 }
 0x480   :  { %v8124_v61 = vpop.permute.xlu1 %8123  ;;  %v8005_v33 = vpop.permute.xlu0 %8004 }
 0x481   :  { %8140 = vst.msk [vmem:[#allocation5 + $0xfe] sm:$0x1] %vm1837_vm0, %v8124_v61  ;;  %8023 = vst.msk [vmem:[#allocation4 + $0xbe] sm:$0x1] %vm1837_vm0, %v8005_v33 }
 0x482   :  { %7182 = vrot.lane.b32.xlu1 %v6935_v20, %s16503_s24  ;;  %6952 = vrot.lane.b32.xlu0 %v6935_v20, %s16508_s10 }
 0x484   :  { %v8354_v8 = vpop.permute.xlu1 %8353  ;;  %v8235_v42 = vpop.permute.xlu0 %8234 }
 0x485   :  { %8370 = vst.msk [vmem:[#allocation5 + $0xff] sm:$0x1] %vm1837_vm0, %v8354_v8  ;;  %8253 = vst.msk [vmem:[#allocation4 + $0xbf] sm:$0x1] %vm1837_vm0, %v8235_v42 }
 0x486   :  { %7776 = vrot.lane.b32.xlu1 %v7759_v46, %s16508_s10  ;;  %7412 = vrot.lane.b32.xlu0 %v6935_v20, %s16490_s25 }
 0x488   :  { %v2354_v27 = vpop.permute.xlu1 %2353  ;;  %v2124_v49 = vpop.permute.xlu0 %2123 }
 0x489   :  { %2371 = vst.msk [vmem:[#allocation5 + $0xc2] sm:$0x1] %vm1837_vm0, %v2354_v27  ;;  %2141 = vst.msk [vmem:[#allocation5 + $0xc1] sm:$0x1] %vm1837_vm0, %v2124_v49 }
 0x48a   :  { %8236 = vrot.lane.b32.xlu1 %v7759_v46, %s16490_s25  ;;  %8006 = vrot.lane.b32.xlu0 %v7759_v46, %s16503_s24 }
 0x48c   :  { %v2948_v11 = vpop.permute.xlu1 %2947  ;;  %v2584_v18 = vpop.permute.xlu0 %2583  ;;  %v8394_v29 = vld [vmem:[#allocation4 + $0xb8] sm:$0xff] }
 0x48d   :  { %v8450_v47 = vld [vmem:[#allocation5 + $0xf8] sm:$0xff]  ;;  %2965 = vst.msk [vmem:[#allocation5 + $0xc5] sm:$0x1] %vm1837_vm0, %v2948_v11  ;;  %2601 = vst.msk [vmem:[#allocation5 + $0xc3] sm:$0x1] %vm1837_vm0, %v2584_v18  ;;  %v8414_v16 = vpack.c.bf16 %v8394_v29, %v8393_v40 }
 0x48e   :  { %v8466_v50 = vpack.c.bf16 %v8450_v47, %v8449_v4  ;;  %5536 = vrot.lane.b32.xlu1 %v5291_v56, %s16503_s24  ;;  %5306 = vrot.lane.b32.xlu0 %v5291_v56, %s16508_s10 }
 0x48f   :  { %15960 = vmatmul.mubr.msk.bf16.vlgmr.msra.gmra.mxu1 %vm8467_vm1, %v8414_v16 }
 0x490   :  { %v15945_v2 = vpop.f32.mrf.mxu1  ;;  %15971 = vmatprep.subr.bf16.mxu1 %v8466_v50  ;;  %v3408_v28 = vpop.permute.xlu1 %3407 }
 0x491   :  { %8922 = vst.msk [vmem:[#allocation6 + $0x70] sm:$0xff] %vm8467_vm1, %v15945_v2  ;;  %v3178_v59 = vpop.permute.xlu0 %3177  ;;  %15972 = vmatpush3.bf16.msra.mxu1 %v8466_v50 }
 0x492   :  { %3425 = vst.msk [vmem:[#allocation5 + $0xc7] sm:$0x1] %vm1837_vm0, %v3408_v28  ;;  %3195 = vst.msk [vmem:[#allocation5 + $0xc6] sm:$0x1] %vm1837_vm0, %v3178_v59  ;;  %v8673_v39 = vpop.f32.mrf.mxu1  ;;  %6130 = vrot.lane.b32.xlu1 %v6115_v38, %s16508_s10  ;;  %5766 = vrot.lane.b32.xlu0 %v5291_v56, %s16490_s25 }
 0x493   :  { %8920 = vst.msk [vmem:[#allocation6 + $0x60] sm:$0xff] %vm8467_vm1, %v8673_v39 }
 0x494   :  { %v15946_v43 = vpop.f32.mrf.mxu1  ;;  %v4002_v6 = vpop.permute.xlu1 %4001 }
 0x495   :  { %8923 = vst.msk [vmem:[#allocation6 + $0x78] sm:$0xff] %vm8467_vm1, %v15946_v43  ;;  %v3772_v63 = vpop.permute.xlu0 %3771 }
 0x496   :  { %4019 = vst.msk [vmem:[#allocation5 + $0xca] sm:$0x1] %vm1837_vm0, %v4002_v6  ;;  %3789 = vst.msk [vmem:[#allocation5 + $0xc9] sm:$0x1] %vm1837_vm0, %v3772_v63  ;;  %v8676_v26 = vpop.f32.mrf.mxu1  ;;  %6590 = vrot.lane.b32.xlu1 %v6115_v38, %s16490_s25  ;;  %6360 = vrot.lane.b32.xlu0 %v6115_v38, %s16503_s24 }
 0x497   :  { %8921 = vst.msk [vmem:[#allocation6 + $0x68] sm:$0xff] %vm8467_vm1, %v8676_v26 }
 0x498   :  { %v4596_v36 = vpop.permute.xlu1 %4595 }
 0x499   :  { %v4232_v30 = vpop.permute.xlu0 %4231  ;;  %4613 = vst.msk [vmem:[#allocation5 + $0xcd] sm:$0x1] %vm1837_vm0, %v4596_v36  ;;  %v8443_v44 = vld [vmem:[#allocation5 + $0xc0] sm:$0xff] }
 0x49a   :  { %4249 = vst.msk [vmem:[#allocation5 + $0xcb] sm:$0x1] %vm1837_vm0, %v4232_v30  ;;  %7184 = vrot.lane.b32.xlu1 %v6939_v41, %s16503_s24  ;;  %6954 = vrot.lane.b32.xlu0 %v6939_v41, %s16508_s10 }
 0x49c   :  { %v5056_v23 = vpop.permute.xlu1 %5055 }
 0x49d   :  { %v4826_v35 = vpop.permute.xlu0 %4825  ;;  %5073 = vst.msk [vmem:[#allocation5 + $0xcf] sm:$0x1] %vm1837_vm0, %v5056_v23 }
 0x49e   :  { %4843 = vst.msk [vmem:[#allocation5 + $0xce] sm:$0x1] %vm1837_vm0, %v4826_v35  ;;  %7778 = vrot.lane.b32.xlu1 %v7763_v51, %s16508_s10  ;;  %7414 = vrot.lane.b32.xlu0 %v6939_v41, %s16490_s25 }
 0x4a0   :  { %v2356_v25 = vpop.permute.xlu1 %2355 }
 0x4a1   :  { %v2126_v55 = vpop.permute.xlu0 %2125  ;;  %2372 = vst.msk [vmem:[#allocation5 + $0xe2] sm:$0x1] %vm1837_vm0, %v2356_v25 }
 0x4a2   :  { %2142 = vst.msk [vmem:[#allocation5 + $0xe1] sm:$0x1] %vm1837_vm0, %v2126_v55  ;;  %8238 = vrot.lane.b32.xlu1 %v7763_v51, %s16490_s25  ;;  %8008 = vrot.lane.b32.xlu0 %v7763_v51, %s16503_s24 }
 0x4a4   :  { %v2950_v37 = vpop.permute.xlu1 %2949 }
 0x4a5   :  { %v2586_v5 = vpop.permute.xlu0 %2585  ;;  %v8444_v15 = vld [vmem:[#allocation5 + $0xc8] sm:$0xff]  ;;  %2966 = vst.msk [vmem:[#allocation5 + $0xe5] sm:$0x1] %vm1837_vm0, %v2950_v37 }
 0x4a6   :  { %2602 = vst.msk [vmem:[#allocation5 + $0xe3] sm:$0x1] %vm1837_vm0, %v2586_v5  ;;  %v8463_v62 = vpack.c.bf16 %v8444_v15, %v8443_v44 }
 0x4a8   :  { %15965 = vmatprep.subr.bf16.mxu0 %v8463_v62  ;;  %v3410_v9 = vpop.permute.xlu1 %3409 }
 0x4a9   :  { %15966 = vmatpush3.bf16.msra.mxu0 %v8463_v62  ;;  %v3180_v7 = vpop.permute.xlu0 %3179  ;;  %3426 = vst.msk [vmem:[#allocation5 + $0xe7] sm:$0x1] %vm1837_vm0, %v3410_v9 }
 0x4aa   :  { %3196 = vst.msk [vmem:[#allocation5 + $0xe6] sm:$0x1] %vm1837_vm0, %v3180_v7 }
 0x4ac   :  { %v4004_v45 = vpop.permute.xlu1 %4003 }
 0x4ad   :  { %v3774_v52 = vpop.permute.xlu0 %3773  ;;  %4020 = vst.msk [vmem:[#allocation5 + $0xea] sm:$0x1] %vm1837_vm0, %v4004_v45 }
 0x4ae   :  { %3790 = vst.msk [vmem:[#allocation5 + $0xe9] sm:$0x1] %vm1837_vm0, %v3774_v52 }
 0x4b0   :  { %v4598_v22 = vpop.permute.xlu1 %4597 }
 0x4b1   :  { %v4234_v34 = vpop.permute.xlu0 %4233  ;;  %4614 = vst.msk [vmem:[#allocation5 + $0xed] sm:$0x1] %vm1837_vm0, %v4598_v22  ;;  %v8447_v53 = vld [vmem:[#allocation5 + $0xe0] sm:$0xff] }
 0x4b2   :  { %4250 = vst.msk [vmem:[#allocation5 + $0xeb] sm:$0x1] %vm1837_vm0, %v4234_v34 }
 0x4b4   :  { %v5058_v0 = vpop.permute.xlu1 %5057 }
 0x4b5   :  { %v4828_v17 = vpop.permute.xlu0 %4827  ;;  %5074 = vst.msk [vmem:[#allocation5 + $0xef] sm:$0x1] %vm1837_vm0, %v5058_v0 }
 0x4b6   :  { %4844 = vst.msk [vmem:[#allocation5 + $0xee] sm:$0x1] %vm1837_vm0, %v4828_v17 }
 0x4b8   :  { %v2239_v32 = vpop.permute.xlu1 %2238 }
 0x4b9   :  { %v2009_v21 = vpop.permute.xlu0 %2008  ;;  %2256 = vst.msk [vmem:[#allocation4 + $0xc2] sm:$0x1] %vm1837_vm0, %v2239_v32 }
 0x4ba   :  { %2026 = vst.msk [vmem:[#allocation4 + $0xc1] sm:$0x1] %vm1837_vm0, %v2009_v21 }
 0x4bc   :  { %v2833_v13 = vpop.permute.xlu1 %2832 }
 0x4bd   :  { %v2469_v3 = vpop.permute.xlu0 %2468  ;;  %v8448_v31 = vld [vmem:[#allocation5 + $0xe8] sm:$0xff]  ;;  %2850 = vst.msk [vmem:[#allocation4 + $0xc5] sm:$0x1] %vm1837_vm0, %v2833_v13 }
 0x4be   :  { %2486 = vst.msk [vmem:[#allocation4 + $0xc3] sm:$0x1] %vm1837_vm0, %v2469_v3  ;;  %v8465_v19 = vpack.c.bf16 %v8448_v31, %v8447_v53 }
 0x4c0   :  { %15973 = vmatprep.subr.bf16.mxu1 %v8465_v19  ;;  %v3293_v54 = vpop.permute.xlu1 %3292 }
 0x4c1   :  { %v3063_v1 = vpop.permute.xlu0 %3062  ;;  %15974 = vmatpush3.bf16.msra.mxu1 %v8465_v19  ;;  %3310 = vst.msk [vmem:[#allocation4 + $0xc7] sm:$0x1] %vm1837_vm0, %v3293_v54 }
 0x4c2   :  { %3080 = vst.msk [vmem:[#allocation4 + $0xc6] sm:$0x1] %vm1837_vm0, %v3063_v1  ;;  %v18612_v1 = vld [vmem:[#allocation6 + $0x32] sm:$0x1] }
 0x4c4   :  { %v3887_v58 = vpop.permute.xlu1 %3886 }
 0x4c5   :  { %v3657_v61 = vpop.permute.xlu0 %3656  ;;  %3904 = vst.msk [vmem:[#allocation4 + $0xca] sm:$0x1] %vm1837_vm0, %v3887_v58  ;;  %v18614_v58 = vld [vmem:[#allocation6 + $0x25] sm:$0x1] }
 0x4c6   :  { %3674 = vst.msk [vmem:[#allocation4 + $0xc9] sm:$0x1] %vm1837_vm0, %v3657_v61  ;;  %v18616_v61 = vld [vmem:[#allocation6 + $0x31] sm:$0x1] }
 0x4c8   :  { %v4481_v33 = vpop.permute.xlu1 %4480 }
 0x4c9   :  { %v4117_v12 = vpop.permute.xlu0 %4116  ;;  %4498 = vst.msk [vmem:[#allocation4 + $0xcd] sm:$0x1] %vm1837_vm0, %v4481_v33  ;;  %v8395_v49 = vld [vmem:[#allocation4 + $0xc0] sm:$0xff]  ;;  %v18618_v33 = vld [vmem:[#allocation6 + $0x35] sm:$0x1] }
 0x4ca   :  { %4134 = vst.msk [vmem:[#allocation4 + $0xcb] sm:$0x1] %vm1837_vm0, %v4117_v12  ;;  %v18620_v12 = vld [vmem:[#allocation6 + $0x21] sm:$0x1] }
 0x4cc   :  { %v4941_v20 = vpop.permute.xlu1 %4940 }
 0x4cd   :  { %v4711_v8 = vpop.permute.xlu0 %4710  ;;  %4958 = vst.msk [vmem:[#allocation4 + $0xcf] sm:$0x1] %vm1837_vm0, %v4941_v20  ;;  %v18622_v20 = vld [vmem:[#allocation6 + $0x26] sm:$0x1] }
 0x4ce   :  { %4728 = vst.msk [vmem:[#allocation4 + $0xce] sm:$0x1] %vm1837_vm0, %v4711_v8  ;;  %v18624_v8 = vld [vmem:[#allocation6 + $0x22] sm:$0x1] }
 0x4d0   :  { %v2241_v42 = vpop.permute.xlu1 %2240 }
 0x4d1   :  { %v2011_v48 = vpop.permute.xlu0 %2010  ;;  %2257 = vst.msk [vmem:[#allocation4 + $0xe2] sm:$0x1] %vm1837_vm0, %v2241_v42  ;;  %v18626_v42 = vld [vmem:[#allocation6 + $0x27] sm:$0x1] }
 0x4d2   :  { %2027 = vst.msk [vmem:[#allocation4 + $0xe1] sm:$0x1] %vm1837_vm0, %v2011_v48  ;;  %v18628_v48 = vld [vmem:[#allocation6 + $0x33] sm:$0x1] }
 0x4d4   :  { %v2835_v46 = vpop.permute.xlu1 %2834 }
 0x4d5   :  { %v2471_v27 = vpop.permute.xlu0 %2470  ;;  %v8396_v40 = vld [vmem:[#allocation4 + $0xc8] sm:$0xff]  ;;  %2851 = vst.msk [vmem:[#allocation4 + $0xe5] sm:$0x1] %vm1837_vm0, %v2835_v46  ;;  %v9568_v46 = vrot.slane %v18612_v1, 7 }
 0x4d6   :  { %2487 = vst.msk [vmem:[#allocation4 + $0xe3] sm:$0x1] %vm1837_vm0, %v2471_v27  ;;  %v8415_v11 = vpack.c.bf16 %v8396_v40, %v8395_v49  ;;  %v9534_v27 = vrot.slane %v18616_v61, 7  ;;  %v9668_v49 = vrot.slane %v18618_v33, 7  ;;  %v9132_v40 = vrot.slane %v18614_v58, 7 }
 0x4d8   :  { %15967 = vmatprep.mubr.msk.bf16.mxu0 %vm8467_vm1, %v8415_v11  ;;  %v3295_v18 = vpop.permute.xlu1 %3294  ;;  %v8995_v11 = vrot.slane %v18620_v12, 7  ;;  %v9049_v12 = vld [vmem:[#allocation6 + $0x3] sm:$0x1] }
 0x4d9   :  { %v3065_v10 = vpop.permute.xlu0 %3064  ;;  %3311 = vst.msk [vmem:[#allocation4 + $0xe7] sm:$0x1] %vm1837_vm0, %v3295_v18  ;;  %v9166_v18 = vrot.slane %v18622_v20, 7 }
 0x4da   :  { %3081 = vst.msk [vmem:[#allocation4 + $0xe6] sm:$0x1] %vm1837_vm0, %v3065_v10  ;;  %v9030_v10 = vrot.slane %v18624_v8, 7 }
 0x4dc   :  { %v3889_v56 = vpop.permute.xlu1 %3888 }
 0x4dd   :  { %v3659_v29 = vpop.permute.xlu0 %3658  ;;  %3905 = vst.msk [vmem:[#allocation4 + $0xea] sm:$0x1] %vm1837_vm0, %v3889_v56  ;;  %v9200_v56 = vrot.slane %v18626_v42, 7  ;;  %v9384_v42 = vld [vmem:[#allocation6 + $0xd] sm:$0x1] }
 0x4de   :  { %3675 = vst.msk [vmem:[#allocation4 + $0xe9] sm:$0x1] %vm1837_vm0, %v3659_v29  ;;  %v18638_v29 = vld [vmem:[#allocation6 + $0x23] sm:$0x1] }
 0x4e0   :  { %v4483_v4 = vpop.permute.xlu1 %4482 }
 0x4e1   :  { %v4119_v47 = vpop.permute.xlu0 %4118  ;;  %4499 = vst.msk [vmem:[#allocation4 + $0xed] sm:$0x1] %vm1837_vm0, %v4483_v4  ;;  %v8399_v38 = vld [vmem:[#allocation4 + $0xe0] sm:$0xff]  ;;  %v9602_v4 = vrot.slane %v18628_v48, 7 }
 0x4e2   :  { %4135 = vst.msk [vmem:[#allocation4 + $0xeb] sm:$0x1] %vm1837_vm0, %v4119_v47  ;;  %v18641_v47 = vld [vmem:[#allocation6 + $0x37] sm:$0x1] }
 0x4e4   :  { %v4943_v16 = vpop.permute.xlu1 %4942 }
 0x4e5   :  { %v4713_v50 = vpop.permute.xlu0 %4712  ;;  %4959 = vst.msk [vmem:[#allocation4 + $0xef] sm:$0x1] %vm1837_vm0, %v4943_v16  ;;  %v18643_v16 = vld [vmem:[#allocation6 + $0x2a] sm:$0x1] }
 0x4e6   :  { %4729 = vst.msk [vmem:[#allocation4 + $0xee] sm:$0x1] %vm1837_vm0, %v4713_v50  ;;  %v18645_v50 = vld [vmem:[#allocation6 + $0x29] sm:$0x1] }
 0x4e8   :  { %v5535_v2 = vpop.permute.xlu1 %5534 }
 0x4e9   :  { %v5305_v28 = vpop.permute.xlu0 %5304  ;;  %5552 = vst.msk [vmem:[#allocation4 + $0xd2] sm:$0x1] %vm1837_vm0, %v5535_v2  ;;  %v18647_v2 = vld [vmem:[#allocation6 + $0x2d] sm:$0x1] }
 0x4ea   :  { %5322 = vst.msk [vmem:[#allocation4 + $0xd1] sm:$0x1] %vm1837_vm0, %v5305_v28  ;;  %v18649_v28 = vld [vmem:[#allocation6 + $0x2b] sm:$0x1] }
 0x4ec   :  { %v6129_v59 = vpop.permute.xlu1 %6128 }
 0x4ed   :  { %v5765_v60 = vpop.permute.xlu0 %5764  ;;  %v8400_v39 = vld [vmem:[#allocation4 + $0xe8] sm:$0xff]  ;;  %6146 = vst.msk [vmem:[#allocation4 + $0xd5] sm:$0x1] %vm1837_vm0, %v6129_v59 }
 0x4ee   :  { %5782 = vst.msk [vmem:[#allocation4 + $0xd3] sm:$0x1] %vm1837_vm0, %v5765_v60  ;;  %v8417_v43 = vpack.c.bf16 %v8400_v39, %v8399_v38  ;;  %v18651_v59 = vld [vmem:[#allocation6 + $0x2f] sm:$0x1]  ;;  %v18653_v60 = vld [vmem:[#allocation6 + $0x2e] sm:$0x1] }
 0x4ef   :  { %v18655_v38 = vld [vmem:[#allocation6 + $0x45] sm:$0x1]  ;;  %v18657_v39 = vld [vmem:[#allocation6 + $0x41] sm:$0x1] }
 0x4f0   :  { %15975 = vmatprep.mubr.msk.bf16.mxu1 %vm8467_vm1, %v8417_v43  ;;  %v6589_v6 = vpop.permute.xlu1 %6588  ;;  %v9065_v43 = vrot.slane %v18638_v29, 7  ;;  %v20076_v29 = vrot.slane %v18645_v50, 7 }
 0x4f1   :  { %v6359_v63 = vpop.permute.xlu0 %6358  ;;  %6606 = vst.msk [vmem:[#allocation4 + $0xd7] sm:$0x1] %vm1837_vm0, %v6589_v6  ;;  %v18778_v6 = vld [vmem:[#allocation6 + $0x5f] sm:$0x1] }
 0x4f2   :  { %6376 = vst.msk [vmem:[#allocation4 + $0xd6] sm:$0x1] %vm1837_vm0, %v6359_v63  ;;  %v18661_v63 = vld [vmem:[#allocation6 + $0x46] sm:$0x1]  ;;  %v9066_v48 = vsel %vm8957_vm2, %v9065_v43, %v9049_v12 }
 0x4f4   :  { %v7183_v26 = vpop.permute.xlu1 %7182 }
 0x4f5   :  { %v6953_v36 = vpop.permute.xlu0 %6952  ;;  %7200 = vst.msk [vmem:[#allocation4 + $0xda] sm:$0x1] %vm1837_vm0, %v7183_v26  ;;  %v18663_v26 = vld [vmem:[#allocation6 + $0x42] sm:$0x1] }
 0x4f6   :  { %6970 = vst.msk [vmem:[#allocation4 + $0xd9] sm:$0x1] %vm1837_vm0, %v6953_v36  ;;  %v18717_v36 = vld [vmem:[#allocation6 + $0x3a] sm:$0x1] }
 0x4f8   :  { %v7777_v30 = vpop.permute.xlu1 %7776 }
 0x4f9   :  { %v7413_v24 = vpop.permute.xlu0 %7412  ;;  %7794 = vst.msk [vmem:[#allocation4 + $0xdd] sm:$0x1] %vm1837_vm0, %v7777_v30  ;;  %v8397_v55 = vld [vmem:[#allocation4 + $0xd0] sm:$0xff] }
 0x4fa   :  { %7430 = vst.msk [vmem:[#allocation4 + $0xdb] sm:$0x1] %vm1837_vm0, %v7413_v24  ;;  %v18715_v30 = vld [vmem:[#allocation6 + $0x56] sm:$0x1]  ;;  %v18734_v24 = vld [vmem:[#allocation6 + $0x39] sm:$0x1] }
 0x4fc   :  { %v8237_v41 = vpop.permute.xlu1 %8236 }
 0x4fd   :  { %v8007_v23 = vpop.permute.xlu0 %8006  ;;  %8254 = vst.msk [vmem:[#allocation4 + $0xdf] sm:$0x1] %vm1837_vm0, %v8237_v41  ;;  %v9586_v41 = vld [vmem:[#allocation6 + $0x13] sm:$0x1] }
 0x4fe   :  { %8024 = vst.msk [vmem:[#allocation4 + $0xde] sm:$0x1] %vm1837_vm0, %v8007_v23  ;;  %v18736_v23 = vld [vmem:[#allocation6 + $0x59] sm:$0x1]  ;;  %v18762_v20 = vsel %vm8957_vm2, %v9602_v4, %v9586_v41  ;;  %v20074_v4 = vrot.slane %v18641_v47, 7  ;;  %v20077_v47 = vrot.slane %v18647_v2, 7 }
 0x500   :  { %v5537_v35 = vpop.permute.xlu1 %5536  ;;  %v9401_v12 = vsel %vm8957_vm2, %v20077_v47, %v9384_v42 }
 0x501   :  { %v5307_v57 = vpop.permute.xlu0 %5306  ;;  %5553 = vst.msk [vmem:[#allocation4 + $0xf2] sm:$0x1] %vm1837_vm0, %v5537_v35  ;;  %v9014_v35 = vld [vmem:[#allocation6 + $0x2] sm:$0x1] }
 0x502   :  { %5323 = vst.msk [vmem:[#allocation4 + $0xf1] sm:$0x1] %vm1837_vm0, %v5307_v57  ;;  %v9184_v57 = vld [vmem:[#allocation6 + $0x7] sm:$0x1] }
 0x503   :  { %v9201_v58 = vsel %vm8957_vm2, %v9200_v56, %v9184_v57  ;;  %v9452_v57 = vld [vmem:[#allocation6 + $0xf] sm:$0x1]  ;;  %v18804_v56 = vld [vmem:[#allocation6 + $0x24] sm:$0x1] }
 0x504   :  { %v6131_v51 = vpop.permute.xlu1 %6130 }
 0x505   :  { %v5767_v25 = vpop.permute.xlu0 %5766  ;;  %v8398_v37 = vld [vmem:[#allocation4 + $0xd8] sm:$0xff]  ;;  %6147 = vst.msk [vmem:[#allocation4 + $0xf5] sm:$0x1] %vm1837_vm0, %v6131_v51 }
 0x506   :  { %5783 = vst.msk [vmem:[#allocation4 + $0xf3] sm:$0x1] %vm1837_vm0, %v5767_v25  ;;  %v8416_v5 = vpack.c.bf16 %v8398_v37, %v8397_v55  ;;  %v18673_v25 = vld [vmem:[#allocation6 + $0x52] sm:$0x1]  ;;  %v18675_v55 = vld [vmem:[#allocation6 + $0x51] sm:$0x1] }
 0x507   :  { %v9150_v37 = vld [vmem:[#allocation6 + $0x6] sm:$0x1]  ;;  %v20086_v47 = vrot.slane %v18673_v25, 6 }
 0x508   :  { %15968 = vmatmul.mubr.msk.bf16.vlgmr.msra.gmra.mxu0 %vm8467_vm1, %v8416_v5  ;;  %v6591_v44 = vpop.permute.xlu1 %6590  ;;  %v18705_v5 = vld [vmem:[#allocation6 + $0x36] sm:$0x1]  ;;  %v9167_v33 = vsel %vm8957_vm2, %v9166_v18, %v9150_v37  ;;  %v18766_v18 = vld [vmem:[#allocation6 + $0x5b] sm:$0x1]  ;;  %v9250_v37 = vld [vmem:[#allocation6 + $0x9] sm:$0x1] }
 0x509   :  { %v6361_v15 = vpop.permute.xlu0 %6360  ;;  %6607 = vst.msk [vmem:[#allocation4 + $0xf7] sm:$0x1] %vm1837_vm0, %v6591_v44  ;;  %v18679_v44 = vld [vmem:[#allocation6 + $0x47] sm:$0x1]  ;;  %20073 = vst [vmem:[#allocation78_spill] sm:$0xff] %v18766_v18  ;;  %v9267_v43 = vsel %vm8957_vm2, %v20076_v29, %v9250_v37  ;;  %v20082_v37 = vrot.slane %v18653_v60, 7 }
 0x50a   :  { %6377 = vst.msk [vmem:[#allocation4 + $0xf6] sm:$0x1] %vm1837_vm0, %v6361_v15  ;;  %v18681_v15 = vld [vmem:[#allocation6 + $0x43] sm:$0x1]  ;;  %v18808_v18 = vld [vmem:[#allocation6 + $0x20] sm:$0x1] }
 0x50b   :  { %v18828_v29 = vld [vmem:[#allocation6 + $0x28] sm:$0x1]  ;;  %v20085_v60 = vrot.slane %v18679_v44, 6 }
 0x50c   :  { %v7185_v62 = vpop.permute.xlu1 %7184 }
 0x50d   :  { %v6955_v9 = vpop.permute.xlu0 %6954  ;;  %7201 = vst.msk [vmem:[#allocation4 + $0xfa] sm:$0x1] %vm1837_vm0, %v7185_v62  ;;  %v18683_v62 = vld [vmem:[#allocation6 + $0x4a] sm:$0x1] }
 0x50e   :  { %6971 = vst.msk [vmem:[#allocation4 + $0xf9] sm:$0x1] %vm1837_vm0, %v6955_v9  ;;  %v18685_v9 = vld [vmem:[#allocation6 + $0x49] sm:$0x1] }
 0x510   :  { %v7779_v7 = vpop.permute.xlu1 %7778 }
 0x511   :  { %v7415_v45 = vpop.permute.xlu0 %7414  ;;  %7795 = vst.msk [vmem:[#allocation4 + $0xfd] sm:$0x1] %vm1837_vm0, %v7779_v7  ;;  %v8401_v34 = vld [vmem:[#allocation4 + $0xf0] sm:$0xff]  ;;  %v18687_v7 = vld [vmem:[#allocation6 + $0x4d] sm:$0x1] }
 0x512   :  { %7431 = vst.msk [vmem:[#allocation4 + $0xfb] sm:$0x1] %vm1837_vm0, %v7415_v45  ;;  %v18689_v45 = vld [vmem:[#allocation6 + $0x4b] sm:$0x1] }
 0x514   :  { %v8239_v52 = vpop.permute.xlu1 %8238 }
 0x515   :  { %v8009_v22 = vpop.permute.xlu0 %8008  ;;  %8255 = vst.msk [vmem:[#allocation4 + $0xff] sm:$0x1] %vm1837_vm0, %v8239_v52  ;;  %v18691_v52 = vld [vmem:[#allocation6 + $0x4f] sm:$0x1] }
 0x516   :  { %8025 = vst.msk [vmem:[#allocation4 + $0xfe] sm:$0x1] %vm1837_vm0, %v8009_v22  ;;  %v18693_v22 = vld [vmem:[#allocation6 + $0x4e] sm:$0x1] }
 0x51d   :  { %v8402_v0 = vld [vmem:[#allocation4 + $0xf8] sm:$0xff] }
 0x51e   :  { %v8418_v17 = vpack.c.bf16 %v8402_v0, %v8401_v34  ;;  %v9116_v34 = vld [vmem:[#allocation6 + $0x5] sm:$0x1]  ;;  %v8979_v0 = vld [vmem:[#allocation6 + $0x1] sm:$0x1] }
 0x51f   :  { %v15953_v32 = vpop.f32.mrf.mxu0  ;;  %v9133_v1 = vsel %vm8957_vm2, %v9132_v40, %v9116_v34  ;;  %v8996_v61 = vsel %vm8957_vm2, %v8995_v11, %v8979_v0  ;;  %v9720_v40 = vld [vmem:[#allocation6 + $0x17] sm:$0x1]  ;;  %v9318_v34 = vld [vmem:[#allocation6 + $0xb] sm:$0x1]  ;;  %v9418_v0 = vld [vmem:[#allocation6 + $0xe] sm:$0x1] }
 0x520   :  { %15976 = vmatmul.mubr.msk.bf16.vlgmr.msra.gmra.mxu1 %vm8467_vm1, %v8418_v17  ;;  %8926 = vst.msk [vmem:[#allocation6 + $0x90] sm:$0xff] %vm8467_vm1, %v15953_v32  ;;  %v18697_v17 = vld [vmem:[#allocation6 + $0x55] sm:$0x1]  ;;  %v18699_v32 = vld [vmem:[#allocation6 + $0x53] sm:$0x1]  ;;  %v9737_v41 = vsel %vm8957_vm2, %v20074_v4, %v9720_v40  ;;  %v20075_v11 = vrot.slane %v18643_v16, 7  ;;  %v9435_v42 = vsel %vm8957_vm2, %v20082_v37, %v9418_v0 }
 0x521   :  { %v8728_v21 = vpop.f32.mrf.mxu0  ;;  %v20078_v40 = vrot.slane %v18649_v28, 7  ;;  %v20079_v16 = vrot.slane %v18655_v38, 6  ;;  %v20081_v28 = vrot.slane %v18651_v59, 7  ;;  %v18830_v38 = vld [vmem:[#allocation6 + $0x48] sm:$0x1] }
 0x522   :  { %8924 = vst.msk [vmem:[#allocation6 + $0x80] sm:$0xff] %vm8467_vm1, %v8728_v21  ;;  %v18732_v21 = vld [vmem:[#allocation6 + $0x5a] sm:$0x1]  ;;  %v18847_v0 = vld [vmem:[#allocation6 + $0x72] sm:$0x1] }
 0x523   :  { %v15954_v13 = vpop.f32.mrf.mxu0  ;;  %v9335_v4 = vsel %vm8957_vm2, %v20078_v40, %v9318_v34  ;;  %v18813_v50 = vsel %vm8960_vm3, %v20079_v16, %v9133_v1  ;;  %v18826_v34 = vld [vmem:[#allocation6 + $0x40] sm:$0x1]  ;;  %v20083_v1 = vrot.slane %v18661_v63, 6  ;;  %v18854_v63 = vld [vmem:[#allocation6 + $0x71] sm:$0x1] }
 0x524   :  { %8927 = vst.msk [vmem:[#allocation6 + $0x98] sm:$0xff] %vm8467_vm1, %v15954_v13  ;;  %v18874_v16 = vld [vmem:[#allocation6 + $0x61] sm:$0x1] }
 0x525   :  { %v8731_v3 = vpop.f32.mrf.mxu0 }
 0x526   :  { %8925 = vst.msk [vmem:[#allocation6 + $0x88] sm:$0xff] %vm8467_vm1, %v8731_v3  ;;  %v18711_v3 = vld [vmem:[#allocation6 + $0x57] sm:$0x1] }
 0x54f   :  { %v15961_v53 = vpop.f32.mrf.mxu1 }
 0x550   :  { %8930 = vst.msk [vmem:[#allocation6 + $0xb0] sm:$0xff] %vm8467_vm1, %v15961_v53  ;;  %v9552_v53 = vld [vmem:[#allocation6 + $0x12] sm:$0x1] }
 0x551   :  { %v8783_v31 = vpop.f32.mrf.mxu1  ;;  %v9569_v51 = vsel %vm8957_vm2, %v9568_v46, %v9552_v53  ;;  %v9031_v46 = vsel %vm8957_vm2, %v9030_v10, %v9014_v35  ;;  %v18754_v53 = vld [vmem:[#allocation6 + $0x3b] sm:$0x1]  ;;  %v18768_v10 = vld [vmem:[#allocation6 + $0x3f] sm:$0x1]  ;;  %v9284_v35 = vld [vmem:[#allocation6 + $0xa] sm:$0x1] }
 0x552   :  { %8928 = vst.msk [vmem:[#allocation6 + $0xa0] sm:$0xff] %vm8467_vm1, %v8783_v31  ;;  %v9518_v31 = vld [vmem:[#allocation6 + $0x11] sm:$0x1]  ;;  %v9301_v8 = vsel %vm8957_vm2, %v20075_v11, %v9284_v35  ;;  %v20080_v11 = vrot.slane %v18657_v39, 6  ;;  %v9469_v35 = vsel %vm8957_vm2, %v20081_v28, %v9452_v57  ;;  %v18835_v39 = vsel %vm8960_vm3, %v20083_v1, %v9167_v33  ;;  %v18856_v33 = vld [vmem:[#allocation6 + $0x2c] sm:$0x1] }
 0x553   :  { %v15962_v19 = vpop.f32.mrf.mxu1  ;;  %v18725_v13 = vsel %vm8957_vm2, %v9534_v27, %v9518_v31  ;;  %v18750_v27 = vld [vmem:[#allocation6 + $0x3d] sm:$0x1]  ;;  %v18806_v31 = vld [vmem:[#allocation6 + $0x44] sm:$0x1]  ;;  %v18845_v57 = vsel %vm8960_vm3, %v20085_v60, %v9201_v58  ;;  %v18852_v40 = vsel %vm8960_vm3, %v20086_v47, %v9569_v51  ;;  %v18868_v1 = vld [vmem:[#allocation6 + $0x75] sm:$0x1] }
 0x554   :  { %8931 = vst.msk [vmem:[#allocation6 + $0xb8] sm:$0xff] %vm8467_vm1, %v15962_v19  ;;  %v18818_v2 = vsel %vm8960_vm3, %v20080_v11, %v8996_v61  ;;  %v20084_v61 = vrot.slane %v18663_v26, 6  ;;  %v18872_v58 = vld [vmem:[#allocation6 + $0x65] sm:$0x1]  ;;  %v20087_v11 = vrot.slane %v18681_v15, 6  ;;  %v20088_v28 = vrot.slane %v18683_v62, 6 }
 0x555   :  { %v8786_v54 = vpop.f32.mrf.mxu1  ;;  %v20089_v51 = vrot.slane %v18685_v9, 6  ;;  %v20090_v47 = vrot.slane %v18675_v55, 6  ;;  %v18897_v15 = vld [vmem:[#allocation6 + $0x73] sm:$0x1]  ;;  %v18901_v62 = vld [vmem:[#allocation6 + $0x62] sm:$0x1] }
 0x556   :  { %8929 = vst.msk [vmem:[#allocation6 + $0xa8] sm:$0xff] %vm8467_vm1, %v8786_v54  ;;  %v9652_v54 = vld [vmem:[#allocation6 + $0x15] sm:$0x1]  ;;  %v18840_v59 = vsel %vm8960_vm3, %v20084_v61, %v9031_v46  ;;  %v9686_v61 = vld [vmem:[#allocation6 + $0x16] sm:$0x1]  ;;  %v18879_v25 = vsel %vm8960_vm3, %v20087_v11, %v9066_v48  ;;  %v18884_v37 = vsel %vm8960_vm3, %v20088_v28, %v9301_v8  ;;  %v20091_v9 = vrot.slane %v18687_v7, 6 }
 0x557   :  { %v18730_v19 = vsel %vm8957_vm2, %v9668_v49, %v9652_v54  ;;  %v18752_v49 = vld [vmem:[#allocation6 + $0x5d] sm:$0x1]  ;;  %v18790_v54 = vld [vmem:[#allocation6 + $0x5e] sm:$0x1]  ;;  %v18889_v60 = vsel %vm8960_vm3, %v20089_v51, %v9267_v43  ;;  %v18895_v44 = vsel %vm8960_vm3, %v20090_v47, %v18725_v13  ;;  %v9820_v48 = vld [vmem:[#allocation6 + $0x1a] sm:$0x1] }
 0x558   :  { %v18899_v11 = vld [vmem:[#allocation6 + $0x66] sm:$0x1]  ;;  %v18903_v8 = vld [vmem:[#allocation6 + $0x67] sm:$0x1]  ;;  %v18908_v43 = vsel %vm8960_vm3, %v20091_v9, %v9401_v12  ;;  %v20092_v51 = vrot.slane %v18689_v45, 6  ;;  %v20094_v13 = vrot.slane %v18691_v52, 6 }
 0x559   :  { %v20096_v47 = vrot.slane %v18693_v22, 6  ;;  %v18925_v26 = vld [vmem:[#allocation6 + $0x63] sm:$0x1]  ;;  %v18927_v7 = vld [vmem:[#allocation6 + $0x6a] sm:$0x1]  ;;  %v20098_v45 = vrot.slane %v18697_v17, 6 }
 0x55a   :  { %v18913_v55 = vsel %vm8960_vm3, %v20092_v51, %v9335_v4  ;;  %v18918_v28 = vsel %vm8960_vm3, %v20094_v13, %v9469_v35  ;;  %v20099_v52 = vrot.slane %v18699_v32, 6  ;;  %v18941_v22 = vld [vmem:[#allocation6 + $0x77] sm:$0x1]  ;;  %v20100_v35 = vrot.slane %v18711_v3, 6  ;;  %v18952_v51 = vld [vmem:[#allocation6 + $0x69] sm:$0x1] }
 0x55b   :  { %20093 = vst [vmem:[#allocation77_spill] sm:$0xff] %v18913_v55  ;;  %20095 = vst [vmem:[#allocation80_spill] sm:$0xff] %v18918_v28  ;;  %v18923_v46 = vsel %vm8960_vm3, %v20096_v47, %v9435_v42  ;;  %v18933_v12 = vsel %vm8960_vm3, %v20098_v45, %v18730_v19  ;;  %v20101_v9 = vrot.slane %v18705_v5, 7  ;;  %v18954_v32 = vld [vmem:[#allocation6 + $0x6d] sm:$0x1]  ;;  %v20103_v13 = vrot.slane %v18715_v30, 6 }
 0x55c   :  { %20097 = vst [vmem:[#allocation82_spill] sm:$0xff] %v18923_v46  ;;  %v18939_v4 = vsel %vm8960_vm3, %v20099_v52, %v18762_v20  ;;  %v18946_v42 = vsel %vm8960_vm3, %v20100_v35, %v9737_v41  ;;  %20102 = vst [vmem:[#allocation79_spill] sm:$0xff] %v18954_v32  ;;  %v20105_v41 = vrot.slane %v18717_v36, 7  ;;  %v9786_v47 = vld [vmem:[#allocation6 + $0x19] sm:$0x1]  ;;  %v20106_v30 = vrot.slane %v18732_v21, 6 }
 0x55d   :  { %v9703_v17 = vsel %vm8957_vm2, %v20101_v9, %v9686_v61  ;;  %v9920_v9 = vld [vmem:[#allocation6 + $0x1d] sm:$0x1]  ;;  %v9854_v20 = vld [vmem:[#allocation6 + $0x1b] sm:$0x1]  ;;  %v9988_v19 = vld [vmem:[#allocation6 + $0x1f] sm:$0x1] }
 0x55e   :  { %v18960_v3 = vsel %vm8960_vm3, %v20103_v13, %v9703_v17  ;;  %v9837_v5 = vsel %vm8957_vm2, %v20105_v41, %v9820_v48  ;;  %v18972_v13 = vld [vmem:[#allocation6 + $0x6b] sm:$0x1]  ;;  %v18975_v41 = vld [vmem:[#allocation6 + $0x76] sm:$0x1]  ;;  %v9954_v45 = vld [vmem:[#allocation6 + $0x1e] sm:$0x1] }
 0x55f   :  { %20104 = vst [vmem:[#allocation83_spill] sm:$0xff] %v18960_v3  ;;  %v18979_v61 = vld [vmem:[#allocation6 + $0x6f] sm:$0x1]  ;;  %v18981_v3 = vld [vmem:[#allocation6 + $0x6e] sm:$0x1]  ;;  %v18986_v17 = vsel %vm8960_vm3, %v20106_v30, %v9837_v5  ;;  %v20108_v36 = vrot.slane %v18734_v24, 7 }
 0x560   :  { %20107 = vst [vmem:[#allocation81_spill] sm:$0xff] %v18986_v17  ;;  %v9084_v46 = vld [vmem:[#allocation6 + $0x4] sm:$0x1]  ;;  %v18991_v28 = vld [vmem:[#allocation6 + $0x7a] sm:$0x1]  ;;  %v20109_v35 = vrot.slane %v18736_v23, 6 }
 0x561   :  { %v9803_v48 = vsel %vm8957_vm2, %v20108_v36, %v9786_v47  ;;  %v18993_v55 = vld [vmem:[#allocation6 + $0x79] sm:$0x1]  ;;  %v19000_v32 = vld [vmem:[#allocation6 + $0x7d] sm:$0x1]  ;;  %v20111_v21 = vrot.slane %v18750_v27, 7  ;;  %v20112_v24 = vrot.slane %v18754_v53, 7 }
 0x562   :  { %v18998_v52 = vsel %vm8960_vm3, %v20109_v35, %v9803_v48  ;;  %v20113_v30 = vrot.slane %v18768_v10, 7  ;;  %v20114_v17 = vrot.slane %v18752_v49, 6  ;;  %v19016_v35 = vld [vmem:[#allocation6 + $0x7b] sm:$0x1]  ;;  %v20115_v48 = vld [vmem:[#allocation78_spill] sm:$0xff]  ;;  %v20117_v53 = vrot.slane %v18778_v6, 6 }
 0x563   :  { %20110 = vst [vmem:[#allocation41_spill] sm:$0xff] %v18998_v52  ;;  %v9937_v5 = vsel %vm8957_vm2, %v20111_v21, %v9920_v9  ;;  %v9871_v47 = vsel %vm8957_vm2, %v20112_v24, %v9854_v20  ;;  %v20116_v52 = vrot.slane %v20115_v48, 6  ;;  %v19023_v9 = vld [vmem:[#allocation6 + $0x7f] sm:$0x1]  ;;  %v20118_v49 = vrot.slane %v18788_v14, 7 }
 0x564   :  { %v10005_v36 = vsel %vm8957_vm2, %v20113_v30, %v9988_v19  ;;  %v19014_v23 = vsel %vm8960_vm3, %v20114_v17, %v9937_v5  ;;  %v19030_v19 = vld [vmem:[#allocation6 + $0x7e] sm:$0x1]  ;;  %v19042_v24 = vld [vmem:[#allocation6 + $0x64] sm:$0x1]  ;;  %v20120_v6 = vrot.slane %v18804_v56, 7  ;;  %v20121_v48 = vrot.slane %v18808_v18, 7 }
 0x565   :  { %v19021_v27 = vsel %vm8960_vm3, %v20116_v52, %v9871_v47  ;;  %v19028_v10 = vsel %vm8960_vm3, %v20117_v53, %v10005_v36  ;;  %v9971_v20 = vsel %vm8957_vm2, %v20118_v49, %v9954_v45  ;;  %v20119_v52 = vrot.slane %v18790_v54, 6  ;;  %v8940_v30 = vld [vmem:[#allocation6] sm:$0x1]  ;;  %v9218_v14 = vld [vmem:[#allocation6 + $0x8] sm:$0x1] }
 0x566   :  { %v9101_v47 = vsel %vm8957_vm2, %v20120_v6, %v9084_v46  ;;  %v19047_v36 = vld [vmem:[#allocation6 + $0x60] sm:$0x1]  ;;  %v9352_v49 = vld [vmem:[#allocation6 + $0xc] sm:$0x1]  ;;  %v8958_v53 = vsel %vm8957_vm2, %v20121_v48, %v8940_v30  ;;  %v19064_v17 = vld [vmem:[#allocation6 + $0x68] sm:$0x1] }
 0x567   :  { %v19040_v5 = vsel %vm8960_vm3, %v20119_v52, %v9971_v20  ;;  %v19057_v6 = vld [vmem:[#allocation6 + $0x4c] sm:$0x1]  ;;  %v20122_v20 = vrot.slane %v18828_v29, 7  ;;  %v20123_v46 = vrot.slane %v18806_v31, 6  ;;  %v20124_v18 = vrot.slane %v18826_v34, 6 }
 0x568   :  { %v19069_v56 = vld [vmem:[#allocation6 + $0x6c] sm:$0x1]  ;;  %v20125_v48 = vrot.slane %v18830_v38, 6  ;;  %v19094_v31 = vld [vmem:[#allocation6 + $0x50] sm:$0x1] }
 0x569   :  { %v9235_v52 = vsel %vm8957_vm2, %v20122_v20, %v9218_v14  ;;  %v19075_v45 = vsel %vm8960_vm3, %v20123_v46, %v9101_v47  ;;  %v19080_v30 = vsel %vm8960_vm3, %v20124_v18, %v8958_v53  ;;  %v20126_v14 = vrot.slane %v18856_v33, 7  ;;  %v19096_v47 = vld [vmem:[#allocation6 + $0x70] sm:$0x1] }
 0x56a   :  { %v19085_v29 = vsel %vm8960_vm3, %v20125_v48, %v9235_v52  ;;  %v20127_v53 = vrot.slane %v18872_v58, 5  ;;  %v20128_v52 = vrot.slane %v18847_v0, 5  ;;  %v20130_v18 = vrot.slane %v18868_v1, 5  ;;  %v19124_v48 = vld [vmem:[#allocation6 + $0x54] sm:$0x1] }
 0x56b   :  { %v19090_v20 = vsel %vm8957_vm2, %v20126_v14, %v9352_v49  ;;  %v20129_v49 = vrot.slane %v18854_v63, 5  ;;  %v19126_v0 = vld [vmem:[#allocation6 + $0x74] sm:$0x1] }
 0x56c   :  { %v19102_v38 = vsel %vm8963_vm4, %v20127_v53, %v18813_v50  ;;  %v19108_v33 = vsel %vm8963_vm4, %v20128_v52, %v18852_v40  ;;  %v19120_v58 = vsel %vm8963_vm4, %v20130_v18, %v18933_v12  ;;  %v19122_v50 = vld [vmem:[#allocation6 + $0x34] sm:$0x1]  ;;  %v20131_v40 = vrot.slane %v18874_v16, 5  ;;  %v19155_v53 = vld [vmem:[#allocation6 + $0x58] sm:$0x1] }
 0x56d   :  { %v19114_v46 = vsel %vm8963_vm4, %v20129_v49, %v18895_v44  ;;  %v20132_v44 = vrot.slane %v18899_v11, 5  ;;  %v20133_v12 = vrot.slane %v18901_v62, 5  ;;  %v19157_v11 = vld [vmem:[#allocation6 + $0x78] sm:$0x1]  ;;  %v9636_v18 = vrot.slane %v19122_v50, 7 }
 0x56e   :  { %v19133_v63 = vsel %vm8963_vm4, %v20131_v40, %v18818_v2  ;;  %v19153_v2 = vld [vmem:[#allocation6 + $0x38] sm:$0x1]  ;;  %v20137_v50 = vrot.slane %v18925_v26, 5  ;;  %v19201_v26 = vld [vmem:[#allocation6 + $0x7c] sm:$0x1]  ;;  %v20147_v49 = vrot.slane %v18979_v61, 5 }
 0x56f   :  { %v19139_v1 = vsel %vm8963_vm4, %v20132_v44, %v18835_v39  ;;  %v19145_v14 = vsel %vm8963_vm4, %v20133_v12, %v18840_v59  ;;  %v20144_v59 = vld [vmem:[#allocation77_spill] sm:$0xff]  ;;  %v20145_v12 = vrot.slane %v18972_v13, 5  ;;  %v20146_v52 = vld [vmem:[#allocation80_spill] sm:$0xff] }
 0x570   :  { %v19183_v40 = vsel %vm8963_vm4, %v20137_v50, %v18879_v25  ;;  %v19203_v25 = vld [vmem:[#allocation6 + $0x85] sm:$0x1]  ;;  %v19205_v50 = vld [vmem:[#allocation6 + $0x81] sm:$0x1] }
 0x5c8   :  { %v15969_v21 = vpop.f32.mrf.mxu0 }
 0x5c9   :  { %8934 = vst.msk [vmem:[#allocation6 + $0xd0] sm:$0xff] %vm8467_vm1, %v15969_v21  ;;  %v19092_v21 = vld [vmem:[#allocation6 + $0x30] sm:$0x1] }
 0x5ca   :  { %v8838_v34 = vpop.f32.mrf.mxu0 }
 0x5cb   :  { %8932 = vst.msk [vmem:[#allocation6 + $0xc0] sm:$0xff] %vm8467_vm1, %v8838_v34  ;;  %v20134_v34 = vrot.slane %v18897_v15, 5  ;;  %v19225_v15 = vsel %vm8963_vm4, %v20145_v12, %v20144_v59  ;;  %v20150_v59 = vld [vmem:[#allocation83_spill] sm:$0xff]  ;;  %v20151_v12 = vrot.slane %v18975_v41, 5 }
 0x5cc   :  { %v15970_v39 = vpop.f32.mrf.mxu0  ;;  %v19267_v41 = vld [vmem:[#allocation6 + $0x8d] sm:$0x1] }
 0x5cd   :  { %v19151_v16 = vsel %vm8963_vm4, %v20134_v34, %v18939_v4  ;;  %8935 = vst.msk [vmem:[#allocation6 + $0xd8] sm:$0xff] %vm8467_vm1, %v15970_v39  ;;  %v20136_v39 = vrot.slane %v18903_v8, 5  ;;  %v20138_v34 = vrot.slane %v18927_v7, 5  ;;  %v19207_v7 = vld [vmem:[#allocation6 + $0x86] sm:$0x1]  ;;  %v19249_v61 = vsel %vm8963_vm4, %v20151_v12, %v20150_v59 }
 0x5ce   :  { %20135 = vst [vmem:[#allocation43_spill] sm:$0xff] %v19151_v16  ;;  %v8841_v44 = vpop.f32.mrf.mxu0  ;;  %v20155_v16 = vrot.slane %v18993_v55, 5  ;;  %v20157_v59 = vrot.slane %v19000_v32, 5  ;;  %v20159_v12 = vrot.slane %v19016_v35, 5 }
 0x5cf   :  { %8933 = vst.msk [vmem:[#allocation6 + $0xc8] sm:$0xff] %vm8467_vm1, %v8841_v44  ;;  %v19177_v4 = vsel %vm8963_vm4, %v20136_v39, %v18845_v57  ;;  %v19189_v62 = vsel %vm8963_vm4, %v20138_v34, %v18884_v37  ;;  %v20139_v44 = vrot.slane %v18941_v22, 5  ;;  %v19197_v57 = vld [vmem:[#allocation6 + $0x3c] sm:$0x1]  ;;  %v20141_v37 = vrot.slane %v18952_v51, 5 }
 0x5d0   :  { %v19199_v39 = vld [vmem:[#allocation6 + $0x5c] sm:$0x1]  ;;  %v19231_v51 = vsel %vm8963_vm4, %v20147_v49, %v20146_v52  ;;  %v20153_v49 = vrot.slane %v18991_v28, 5  ;;  %v19273_v28 = vsel %vm8963_vm4, %v20157_v59, %v19014_v23  ;;  %v19279_v55 = vsel %vm8963_vm4, %v20159_v12, %v19021_v27  ;;  %v9754_v59 = vld [vmem:[#allocation6 + $0x18] sm:$0x1] }
 0x5d1   :  { %v19195_v8 = vsel %vm8963_vm4, %v20139_v44, %v18946_v42  ;;  %v19213_v22 = vsel %vm8963_vm4, %v20141_v37, %v18889_v60  ;;  %v20142_v42 = vld [vmem:[#allocation79_spill] sm:$0xff]  ;;  %v19233_v60 = vld [vmem:[#allocation6 + $0x82] sm:$0x1]  ;;  %v19235_v37 = vld [vmem:[#allocation6 + $0x87] sm:$0x1]  ;;  %20158 = vst [vmem:[#allocation47_spill] sm:$0xff] %v19273_v28 }
 0x5d2   :  { %20140 = vst [vmem:[#allocation42_spill] sm:$0xff] %v19195_v8  ;;  %v20143_v34 = vrot.slane %v20142_v42, 5  ;;  %v19237_v42 = vld [vmem:[#allocation6 + $0x83] sm:$0x1]  ;;  %20160 = vst [vmem:[#allocation44_spill] sm:$0xff] %v19279_v55  ;;  %v9138_v23 = vrot.slane %v19203_v25, 4 }
 0x5d3   :  { %v20152_v52 = vld [vmem:[#allocation81_spill] sm:$0xff]  ;;  %v9904_v35 = vrot.slane %v19197_v57, 7  ;;  %v9906_v27 = vrot.slane %v19199_v39, 6  ;;  %v9036_v12 = vrot.slane %v19233_v60, 4  ;;  %v20165_v60 = vrot.slane %v19042_v24, 5 }
 0x5d4   :  { %v19219_v44 = vsel %vm8963_vm4, %v20143_v34, %v18908_v43  ;;  %v20148_v43 = vld [vmem:[#allocation82_spill] sm:$0xff]  ;;  %v20149_v34 = vrot.slane %v18981_v3, 5  ;;  %v19255_v54 = vsel %vm8963_vm4, %v20153_v49, %v20152_v52  ;;  %v20154_v8 = vld [vmem:[#allocation41_spill] sm:$0xff]  ;;  %v20163_v52 = vrot.slane %v19030_v19, 5  ;;  %v9486_v49 = vld [vmem:[#allocation6 + $0x10] sm:$0x1] }
 0x5d5   :  { %v19261_v3 = vsel %vm8963_vm4, %v20155_v16, %v20154_v8  ;;  %v20161_v16 = vrot.slane %v19023_v9, 5  ;;  %v9001_v9 = vrot.slane %v19205_v50, 4  ;;  %v9206_v19 = vrot.slane %v19235_v37, 4  ;;  %v19309_v50 = vld [vmem:[#allocation6 + $0x8e] sm:$0x1] }
 0x5d6   :  { %v19243_v13 = vsel %vm8963_vm4, %v20149_v34, %v20148_v43  ;;  %20156 = vst [vmem:[#allocation45_spill] sm:$0xff] %v19261_v3  ;;  %v19263_v43 = vld [vmem:[#allocation6 + $0x8a] sm:$0x1]  ;;  %v19265_v34 = vld [vmem:[#allocation6 + $0x89] sm:$0x1]  ;;  %v19291_v32 = vsel %vm8963_vm4, %v20163_v52, %v19040_v5  ;;  %v19317_v37 = vsel %vm8963_vm4, %v20165_v60, %v19075_v45  ;;  %v20167_v39 = vrot.slane %v19092_v21, 7 }
 0x5d7   :  { %v19285_v8 = vsel %vm8963_vm4, %v20161_v16, %v19028_v10  ;;  %20164 = vst [vmem:[#allocation46_spill] sm:$0xff] %v19291_v32  ;;  %v9172_v10 = vrot.slane %v19207_v7, 4  ;;  %v9620_v5 = vld [vmem:[#allocation6 + $0x14] sm:$0x1]  ;;  %v9071_v16 = vrot.slane %v19237_v42, 4  ;;  %v9306_v25 = vrot.slane %v19263_v43, 4 }
 0x5d8   :  { %20162 = vst [vmem:[#allocation48_spill] sm:$0xff] %v19285_v8  ;;  %v19305_v52 = vld [vmem:[#allocation6 + $0x8b] sm:$0x1]  ;;  %v19307_v32 = vld [vmem:[#allocation6 + $0x8f] sm:$0x1]  ;;  %v20166_v42 = vrot.slane %v19047_v36, 5  ;;  %v9503_v57 = vsel %vm8957_vm2, %v20167_v39, %v9486_v49  ;;  %v9637_v8 = vsel %vm8957_vm2, %v9636_v18, %v9620_v5 }
 0x5d9   :  { %v19311_v7 = vld [vmem:[#allocation6 + $0x84] sm:$0x1]  ;;  %v9888_v55 = vld [vmem:[#allocation6 + $0x1c] sm:$0x1]  ;;  %v19329_v28 = vld [vmem:[#allocation6 + $0x80] sm:$0x1] }
 0x5da   :  { %v19323_v43 = vsel %vm8963_vm4, %v20166_v42, %v19080_v30  ;;  %v19331_v3 = vld [vmem:[#allocation6 + $0x88] sm:$0x1]  ;;  %v20168_v24 = vrot.slane %v19064_v17, 5  ;;  %v19339_v36 = vld [vmem:[#allocation6 + $0x8c] sm:$0x1]  ;;  %v20169_v30 = vrot.slane %v19057_v6, 6 }
 0x5db   :  { %v20170_v18 = vrot.slane %v19094_v31, 6  ;;  %v20171_v5 = vrot.slane %v19124_v48, 6  ;;  %v20172_v17 = vrot.slane %v19069_v56, 5  ;;  %v19356_v60 = vld [vmem:[#allocation6 + $0x90] sm:$0x1]  ;;  %v20173_v42 = vrot.slane %v19096_v47, 5 }
 0x5dc   :  { %v19337_v45 = vsel %vm8963_vm4, %v20168_v24, %v19085_v29  ;;  %v9371_v21 = vsel %vm8960_vm3, %v20169_v30, %v19090_v20  ;;  %v19363_v20 = vld [vmem:[#allocation6 + $0x94] sm:$0x1]  ;;  %v20174_v31 = vrot.slane %v19126_v0, 5  ;;  %v20175_v56 = vrot.slane %v19153_v2, 7  ;;  %v19375_v24 = vld [vmem:[#allocation6 + $0xa5] sm:$0x1] }
 0x5dd   :  { %v9505_v49 = vsel %vm8960_vm3, %v20170_v18, %v9503_v57  ;;  %v9639_v39 = vsel %vm8960_vm3, %v20171_v5, %v9637_v8  ;;  %v19354_v29 = vsel %vm8963_vm4, %v20172_v17, %v9371_v21  ;;  %v19370_v8 = vld [vmem:[#allocation6 + $0x98] sm:$0x1]  ;;  %v9340_v47 = vrot.slane %v19305_v52, 4  ;;  %v19382_v0 = vld [vmem:[#allocation6 + $0x9c] sm:$0x1] }
 0x5de   :  { %v19361_v6 = vsel %vm8963_vm4, %v20173_v42, %v9505_v49  ;;  %v19368_v48 = vsel %vm8963_vm4, %v20174_v31, %v9639_v39  ;;  %v9771_v57 = vsel %vm8957_vm2, %v20175_v56, %v9754_v59  ;;  %v9474_v30 = vrot.slane %v19307_v32, 4  ;;  %v9019_v56 = vld [vmem:[#allocation6 + $0xa2] sm:$0x1]  ;;  %v9256_v5 = vld [vmem:[#allocation6 + $0xc9] sm:$0x1] }
 0x5df   :  { %v20176_v21 = vrot.slane %v19155_v53, 6  ;;  %v9905_v49 = vsel %vm8957_vm2, %v9904_v35, %v9888_v55  ;;  %v9106_v2 = vrot.slane %v19311_v7, 4  ;;  %v8965_v59 = vrot.slane %v19329_v28, 4  ;;  %v19394_v55 = vld [vmem:[#allocation6 + $0xa1] sm:$0x1] }
 0x5e0   :  { %v9240_v39 = vrot.slane %v19331_v3, 4  ;;  %v9374_v52 = vrot.slane %v19339_v36, 4  ;;  %v9508_v17 = vrot.slane %v19356_v60, 4  ;;  %v9642_v53 = vrot.slane %v19363_v20, 4  ;;  %v19396_v35 = vld [vmem:[#allocation6 + $0xa6] sm:$0x1] }
 0x5e1   :  { %v9773_v18 = vsel %vm8960_vm3, %v20176_v21, %v9771_v57  ;;  %v9776_v42 = vrot.slane %v19370_v8, 4  ;;  %v9140_v31 = vrot.slane %v19375_v24, 3  ;;  %v20177_v7 = vrot.slane %v19157_v11, 5  ;;  %v9189_v57 = vld [vmem:[#allocation6 + $0xa7] sm:$0x1] }
 0x5e2   :  { %v9907_v3 = vsel %vm8960_vm3, %v9906_v27, %v9905_v49  ;;  %v9910_v36 = vrot.slane %v19382_v0, 4  ;;  %v9139_v60 = vsel %vm8966_vm5, %v9138_v23, %v19102_v38  ;;  %v9002_v20 = vsel %vm8966_vm5, %v9001_v9, %v19133_v63  ;;  %v19409_v24 = vld [vmem:[#allocation6 + $0xa3] sm:$0x1]  ;;  %v9289_v23 = vld [vmem:[#allocation6 + $0xaa] sm:$0x1] }
 0x5e3   :  { %v9775_v28 = vsel %vm8963_vm4, %v20177_v7, %v9773_v18  ;;  %v9173_v8 = vsel %vm8966_vm5, %v9172_v10, %v19139_v1  ;;  %v20178_v11 = vrot.slane %v19201_v26, 5  ;;  %v9037_v27 = vsel %vm8966_vm5, %v9036_v12, %v19145_v14  ;;  %v19422_v9 = vld [vmem:[#allocation6 + $0xa9] sm:$0x1]  ;;  %v19424_v10 = vld [vmem:[#allocation6 + $0xad] sm:$0x1] }
 0x5e4   :  { %v9207_v38 = vsel %vm8966_vm5, %v9206_v19, %v19177_v4  ;;  %v9072_v63 = vsel %vm8966_vm5, %v9071_v16, %v19183_v40  ;;  %v9307_v1 = vsel %vm8966_vm5, %v9306_v25, %v19189_v62  ;;  %v9003_v26 = vrot.slane %v19394_v55, 3  ;;  %v19440_v62 = vld [vmem:[#allocation6 + $0xab] sm:$0x1]  ;;  %v19442_v19 = vld [vmem:[#allocation6 + $0xa4] sm:$0x1]  ;;  %v15977_v16 = vpop.f32.mrf.mxu1 }
 0x5e5   :  { %v9909_v21 = vsel %vm8963_vm4, %v20178_v11, %v9907_v3  ;;  %v9174_v18 = vrot.slane %v19396_v35, 3  ;;  %v20179_v14 = vrot.slane %v19265_v34, 4  ;;  %v20180_v40 = vrot.slane %v19267_v41, 4  ;;  %v19452_v34 = vld [vmem:[#allocation6 + $0xa0] sm:$0x1]  ;;  %8938 = vst.msk [vmem:[#allocation6 + $0xf0] sm:$0xff] %vm8467_vm1, %v15977_v16 }
 0x5e6   :  { %v9038_v25 = vrot.slane %v9019_v56, 3  ;;  %v9208_v0 = vrot.slane %v9189_v57, 3  ;;  %v19446_v49 = vsel %vm8966_vm5, %v9340_v47, %v19225_v15  ;;  %v19454_v41 = vld [vmem:[#allocation6 + $0xa8] sm:$0x1]  ;;  %v9308_v55 = vrot.slane %v9289_v23, 3  ;;  %v8893_v3 = vpop.f32.mrf.mxu1 }
 0x5e7   :  { %v19432_v4 = vsel %vm8966_vm5, %v20179_v14, %v19213_v22  ;;  %v19438_v12 = vsel %vm8966_vm5, %v20180_v40, %v19219_v44  ;;  %v19450_v22 = vsel %vm8966_vm5, %v9106_v2, %v19317_v37  ;;  %v9073_v44 = vrot.slane %v19409_v24, 3  ;;  %v9357_v56 = vld [vmem:[#allocation6 + $0xac] sm:$0x1]  ;;  %v9491_v57 = vld [vmem:[#allocation6 + $0xb0] sm:$0x1]  ;;  %8936 = vst.msk [vmem:[#allocation6 + $0xe0] sm:$0xff] %vm8467_vm1, %v8893_v3 }
 0x5e8   :  { %v9274_v35 = vrot.slane %v19422_v9, 3  ;;  %v9408_v7 = vrot.slane %v19424_v10, 3  ;;  %v9342_v15 = vrot.slane %v19440_v62, 3  ;;  %v9108_v47 = vrot.slane %v19442_v19, 3  ;;  %v9625_v14 = vld [vmem:[#allocation6 + $0xb4] sm:$0x1] }
 0x5e9   :  { %v8967_v37 = vsel %vm8966_vm5, %v8965_v59, %v19323_v43  ;;  %v9241_v2 = vsel %vm8966_vm5, %v9240_v39, %v19337_v45  ;;  %v8968_v24 = vrot.slane %v19452_v34, 3  ;;  %v9242_v11 = vrot.slane %v19454_v41, 3  ;;  %v9759_v43 = vld [vmem:[#allocation6 + $0xb8] sm:$0x1]  ;;  %v15978_v59 = vpop.f32.mrf.mxu1  ;;  %v9122_v45 = vld [vmem:[#allocation6 + $0xc5] sm:$0x1] }
 0x5ea   :  { %v9375_v23 = vsel %vm8966_vm5, %v9374_v52, %v19354_v29  ;;  %v9509_v9 = vsel %vm8966_vm5, %v9508_v17, %v19361_v6  ;;  %v9141_v39 = vsel %vm8969_vm6, %v9140_v31, %v9139_v60  ;;  %v8985_v40 = vld [vmem:[#allocation6 + $0xc1] sm:$0x1]  ;;  %v9643_v19 = vsel %vm8966_vm5, %v9642_v53, %v19368_v48  ;;  %v19477_v34 = vld [vmem:[#allocation6 + $0xbc] sm:$0x1]  ;;  %8939 = vst.msk [vmem:[#allocation6 + $0xf8] sm:$0xff] %vm8467_vm1, %v15978_v59 }
 0x5eb   :  { %v9777_v16 = vsel %vm8966_vm5, %v9776_v42, %v9775_v28  ;;  %v19480_v29 = vsel %vm8966_vm5, %v9910_v36, %v9909_v21  ;;  %v9004_v6 = vsel %vm8969_vm6, %v9003_v26, %v9002_v20  ;;  %v9156_v52 = vld [vmem:[#allocation6 + $0xc6] sm:$0x1]  ;;  %v9175_v17 = vsel %vm8969_vm6, %v9174_v18, %v9173_v8  ;;  %v9020_v41 = vld [vmem:[#allocation6 + $0xc2] sm:$0x1]  ;;  %v9190_v60 = vld [vmem:[#allocation6 + $0xc7] sm:$0x1]  ;;  %v8896_v53 = vpop.f32.mrf.mxu1 }
 0x5ec   :  { %v9039_v31 = vsel %vm8969_vm6, %v9038_v25, %v9037_v27  ;;  %v9209_v48 = vsel %vm8969_vm6, %v9208_v0, %v9207_v38  ;;  %v19487_v42 = vld [vmem:[#allocation6 + $0xc3] sm:$0x1]  ;;  %v9074_v28 = vsel %vm8969_vm6, %v9073_v44, %v9072_v63  ;;  %v19490_v36 = vld [vmem:[#allocation6 + $0xca] sm:$0x1]  ;;  %v9309_v21 = vsel %vm8969_vm6, %v9308_v55, %v9307_v1  ;;  %8937 = vst.msk [vmem:[#allocation6 + $0xe8] sm:$0xff] %vm8467_vm1, %v8896_v53 }
 0x5ed   :  { %v9376_v3 = vrot.slane %v9357_v56, 3  ;;  %v9510_v20 = vrot.slane %v9491_v57, 3  ;;  %v9142_v8 = vrot.slane %v9122_v45, 2  ;;  %v9644_v26 = vrot.slane %v9625_v14, 3  ;;  %v19499_v55 = vld [vmem:[#allocation6 + $0xcd] sm:$0x1] }
 0x5ee   :  { %v9778_v18 = vrot.slane %v9759_v43, 3  ;;  %v9912_v27 = vrot.slane %v19477_v34, 3  ;;  %v9005_v25 = vrot.slane %v8985_v40, 2  ;;  %v9176_v38 = vrot.slane %v9156_v52, 2  ;;  %v19501_v56 = vld [vmem:[#allocation6 + $0xcb] sm:$0x1] }
 0x5ef   :  { %v9040_v0 = vrot.slane %v9020_v41, 2  ;;  %v9210_v59 = vrot.slane %v9190_v60, 2  ;;  %v9075_v63 = vrot.slane %v19487_v42, 2  ;;  %v9310_v44 = vrot.slane %v19490_v36, 2  ;;  %v9123_v14 = vld [vmem:[#allocation6 + $0xe5] sm:$0x1] }
 0x5f0   :  { %v9275_v1 = vsel %vm8969_vm6, %v9274_v35, %v19432_v4  ;;  %v9109_v57 = vsel %vm8969_vm6, %v9108_v47, %v19450_v22  ;;  %v8986_v43 = vld [vmem:[#allocation6 + $0xe1] sm:$0x1]  ;;  %v9157_v45 = vld [vmem:[#allocation6 + $0xe6] sm:$0x1]  ;;  %v8970_v40 = vsel %vm8969_vm6, %v8968_v24, %v8967_v37  ;;  %v9243_v34 = vsel %vm8969_vm6, %v9242_v11, %v9241_v2  ;;  %v9021_v35 = vld [vmem:[#allocation6 + $0xe2] sm:$0x1] }
 0x5f1   :  { %v9377_v52 = vsel %vm8969_vm6, %v9376_v3, %v9375_v23  ;;  %v9511_v41 = vsel %vm8969_vm6, %v9510_v20, %v9509_v9  ;;  %v9144_v60 = vrot.slane %v9123_v14, 1  ;;  %v9007_v4 = vrot.slane %v8986_v43, 1  ;;  %v9090_v53 = vld [vmem:[#allocation6 + $0xc4] sm:$0x1]  ;;  %v8946_v11 = vld [vmem:[#allocation6 + $0xc0] sm:$0x1] }
 0x5f2   :  { %v19510_v42 = vsel %vm8969_vm6, %v9644_v26, %v9643_v19  ;;  %v19513_v22 = vsel %vm8969_vm6, %v9778_v18, %v9777_v16  ;;  %v9143_v47 = vsel %vm8972_vm7, %v9142_v8, %v9141_v39  ;;  %v9006_v37 = vsel %vm8972_vm7, %v9005_v25, %v9004_v6  ;;  %v9224_v23 = vld [vmem:[#allocation6 + $0xc8] sm:$0x1]  ;;  %v9358_v19 = vld [vmem:[#allocation6 + $0xcc] sm:$0x1]  ;;  %v9492_v26 = vld [vmem:[#allocation6 + $0xd0] sm:$0x1] }
 0x5f3   :  { %v9276_v24 = vrot.slane %v9256_v5, 2  ;;  %v9410_v2 = vrot.slane %v19499_v55, 2  ;;  %v9145_v9 = vsel %vm8975_vm8, %v9144_v60, %v9143_v47  ;;  %v9008_v36 = vsel %vm8975_vm8, %v9007_v4, %v9006_v37  ;;  %v9191_v16 = vld [vmem:[#allocation6 + $0xe7] sm:$0x1]  ;;  %v9056_v5 = vld [vmem:[#allocation6 + $0xe3] sm:$0x1] }
 0x5f4   :  { %v9178_v3 = vrot.slane %v9157_v45, 1  ;;  %v9042_v20 = vrot.slane %v9021_v35, 1  ;;  %9146 = vrot.lane.b32.xlu1 %v9145_v9, %s16490_s25  ;;  %9009 = vrot.lane.b32.xlu0 %v9008_v36, %s16490_s25  ;;  %v9177_v39 = vsel %vm8972_vm7, %v9176_v38, %v9175_v17  ;;  %v9344_v6 = vrot.slane %v19501_v56, 2  ;;  %v9626_v60 = vld [vmem:[#allocation6 + $0xd4] sm:$0x1] }
 0x5f5   :  { %v9110_v8 = vrot.slane %v9090_v53, 2  ;;  %v19526_v18 = vsel %vm8969_vm6, %v9912_v27, %v19480_v29  ;;  %v9041_v25 = vsel %vm8972_vm7, %v9040_v0, %v9039_v31  ;;  %v9211_v14 = vsel %vm8972_vm7, %v9210_v59, %v9209_v48  ;;  %v9760_v4 = vld [vmem:[#allocation6 + $0xd8] sm:$0x1]  ;;  %v9291_v17 = vld [vmem:[#allocation6 + $0xea] sm:$0x1] }
 0x5f6   :  { %v8971_v43 = vrot.slane %v8946_v11, 2  ;;  %v9244_v45 = vrot.slane %v9224_v23, 2  ;;  %v9076_v35 = vsel %vm8972_vm7, %v9075_v63, %v9074_v28  ;;  %v9311_v38 = vsel %vm8972_vm7, %v9310_v44, %v9309_v21  ;;  %v19532_v53 = vld [vmem:[#allocation6 + $0xdc] sm:$0x1]  ;;  %v9257_v48 = vld [vmem:[#allocation6 + $0xe9] sm:$0x1] }
 0x5f7   :  { %v9378_v47 = vrot.slane %v9358_v19, 2  ;;  %v9512_v37 = vrot.slane %v9492_v26, 2  ;;  %v9179_v29 = vsel %vm8975_vm8, %v9178_v3, %v9177_v39  ;;  %v9043_v27 = vsel %vm8975_vm8, %v9042_v20, %v9041_v25  ;;  %v19536_v59 = vld [vmem:[#allocation6 + $0xed] sm:$0x1]  ;;  %v19541_v21 = vld [vmem:[#allocation6 + $0xeb] sm:$0x1] }
 0x5f8   :  { %v9212_v31 = vrot.slane %v9191_v16, 1  ;;  %v9077_v0 = vrot.slane %v9056_v5, 1  ;;  %9180 = vrot.lane.b32.xlu1 %v9179_v29, %s16503_s24  ;;  %9044 = vrot.lane.b32.xlu0 %v9043_v27, %s16503_s24  ;;  %v9277_v28 = vsel %vm8972_vm7, %v9276_v24, %v9275_v1  ;;  %v9111_v63 = vsel %vm8972_vm7, %v9110_v8, %v9109_v57  ;;  %v9091_v26 = vld [vmem:[#allocation6 + $0xe4] sm:$0x1]  ;;  %v8947_v39 = vld [vmem:[#allocation6 + $0xe0] sm:$0x1] }
 0x5f9   :  { %v9646_v44 = vrot.slane %v9626_v60, 2  ;;  %v9780_v11 = vrot.slane %v9760_v4, 2  ;;  %v9312_v23 = vrot.slane %v9291_v17, 1  ;;  %v8973_v9 = vsel %vm8972_vm7, %v8971_v43, %v8970_v40  ;;  %v19553_v40 = vld [vmem:[#allocation6 + $0xaf] sm:$0x1] }
 0x5fa   :  { %v9245_v36 = vsel %vm8972_vm7, %v9244_v45, %v9243_v34  ;;  %v9914_v3 = vrot.slane %v19532_v53, 2  ;;  %v9278_v20 = vrot.slane %v9257_v48, 1  ;;  %v9412_v19 = vrot.slane %v19536_v59, 1  ;;  %v9225_v8 = vld [vmem:[#allocation6 + $0xe8] sm:$0x1] }
 0x5fb   :  { %v9379_v1 = vsel %vm8972_vm7, %v9378_v47, %v9377_v52  ;;  %v9513_v24 = vsel %vm8972_vm7, %v9512_v37, %v9511_v41  ;;  %v9213_v57 = vsel %vm8975_vm8, %v9212_v31, %v9211_v14  ;;  %v9078_v16 = vsel %vm8975_vm8, %v9077_v0, %v9076_v35  ;;  %v9359_v25 = vld [vmem:[#allocation6 + $0xec] sm:$0x1]  ;;  %v9493_v52 = vld [vmem:[#allocation6 + $0xf0] sm:$0x1]  ;;  %v9627_v60 = vld [vmem:[#allocation6 + $0xf4] sm:$0x1] }
 0x5fc   :  { %v9346_v5 = vrot.slane %v19541_v21, 1  ;;  %v9112_v34 = vrot.slane %v9091_v26, 1  ;;  %9214 = vrot.lane.b32.xlu1 %v9213_v57, %s16508_s10  ;;  %9079 = vrot.lane.b32.xlu0 %v9078_v16, %s16508_s10  ;;  %v8974_v43 = vrot.slane %v8947_v39, 1  ;;  %v9246_v45 = vrot.slane %v9225_v8, 1  ;;  %v9761_v37 = vld [vmem:[#allocation6 + $0xf8] sm:$0x1] }
 0x5fd   :  { %v9647_v41 = vsel %vm8972_vm7, %v9646_v44, %v19510_v42  ;;  %v9781_v14 = vsel %vm8972_vm7, %v9780_v11, %v19513_v22  ;;  %v9313_v4 = vsel %vm8975_vm8, %v9312_v23, %v9311_v38  ;;  %v9380_v17 = vrot.slane %v9359_v25, 1  ;;  %v9895_v53 = vld [vmem:[#allocation6 + $0xfc] sm:$0x1]  ;;  %v9423_v29 = vld [vmem:[#allocation6 + $0xae] sm:$0x1] }
 0x5fe   :  { %v9113_v35 = vsel %vm8975_vm8, %v9112_v34, %v9111_v63  ;;  %v9514_v47 = vrot.slane %v9493_v52, 1  ;;  %v8976_v27 = vsel %vm8975_vm8, %v8974_v43, %v8973_v9  ;;  %v9247_v31 = vsel %vm8975_vm8, %v9246_v45, %v9245_v36  ;;  %v9458_v22 = vld [vmem:[#allocation6 + $0xcf] sm:$0x1]  ;;  %v9424_v21 = vld [vmem:[#allocation6 + $0xce] sm:$0x1] }
 0x5ff   :  { %9115 = vst.msk [vmem:[#allocation7 + $0x8] sm:$0xff] %vm8467_vm1, %v9113_v35  ;;  %v9648_v0 = vrot.slane %v9627_v60, 1  ;;  %v9782_v42 = vrot.slane %v9761_v37, 1  ;;  %v9279_v48 = vsel %vm8975_vm8, %v9278_v20, %v9277_v28  ;;  %8978 = vst.msk [vmem:[#allocation7] sm:$0xff] %vm8467_vm1, %v8976_v27  ;;  %v9381_v38 = vsel %vm8975_vm8, %v9380_v17, %v9379_v1  ;;  %v9459_v11 = vld [vmem:[#allocation6 + $0xef] sm:$0x1] }
 0x600   :  { %9249 = vst.msk [vmem:[#allocation7 + $0x10] sm:$0xff] %vm8467_vm1, %v9247_v31  ;;  %v9515_v63 = vsel %vm8975_vm8, %v9514_v47, %v9513_v24  ;;  %v9916_v44 = vrot.slane %v9895_v53, 1  ;;  %9314 = vrot.lane.b32.xlu1 %v9313_v4, %s16503_s24  ;;  %9280 = vrot.lane.b32.xlu0 %v9279_v48, %s16490_s25  ;;  %v9476_v23 = vrot.slane %v19553_v40, 3  ;;  %v9425_v9 = vld [vmem:[#allocation6 + $0xee] sm:$0x1]  ;;  %9383 = vst.msk [vmem:[#allocation7 + $0x18] sm:$0xff] %vm8467_vm1, %v9381_v38 }
 0x601   :  { %9517 = vst.msk [vmem:[#allocation7 + $0x20] sm:$0xff] %vm8467_vm1, %v9515_v63  ;;  %v9649_v28 = vsel %vm8975_vm8, %v9648_v0, %v9647_v41  ;;  %v9783_v36 = vsel %vm8975_vm8, %v9782_v42, %v9781_v14  ;;  %v9915_v20 = vsel %vm8972_vm7, %v9914_v3, %v19526_v18  ;;  %v9409_v26 = vsel %vm8969_vm6, %v9408_v7, %v19438_v12  ;;  %v9556_v24 = vld [vmem:[#allocation6 + $0x92] sm:$0x1]  ;;  %v9522_v57 = vld [vmem:[#allocation6 + $0x91] sm:$0x1] }
 0x602   :  { %v9343_v39 = vsel %vm8969_vm6, %v9342_v15, %v19446_v49  ;;  %v9442_v1 = vrot.slane %v9423_v29, 3  ;;  %9651 = vst.msk [vmem:[#allocation7 + $0x28] sm:$0xff] %vm8467_vm1, %v9649_v28  ;;  %9785 = vst.msk [vmem:[#allocation7 + $0x30] sm:$0xff] %vm8467_vm1, %v9783_v36  ;;  %v9917_v16 = vsel %vm8975_vm8, %v9916_v44, %v9915_v20  ;;  %v9411_v10 = vsel %vm8972_vm7, %v9410_v2, %v9409_v26  ;;  %v9557_v49 = vld [vmem:[#allocation6 + $0xb2] sm:$0x1] }
 0x603   :  { %v9345_v12 = vsel %vm8972_vm7, %v9344_v6, %v9343_v39  ;;  %v9478_v62 = vrot.slane %v9458_v22, 2  ;;  %v9444_v7 = vrot.slane %v9424_v21, 2  ;;  %v9523_v15 = vld [vmem:[#allocation6 + $0xb1] sm:$0x1]  ;;  %9919 = vst.msk [vmem:[#allocation7 + $0x38] sm:$0xff] %vm8467_vm1, %v9917_v16  ;;  %v9413_v18 = vsel %vm8975_vm8, %v9412_v19, %v9411_v10 }
 0x604   :  { %v9347_v3 = vsel %vm8975_vm8, %v9346_v5, %v9345_v12  ;;  %v9480_v40 = vrot.slane %v9459_v11, 1  ;;  %v9446_v55 = vrot.slane %v9425_v9, 1  ;;  %v9558_v34 = vld [vmem:[#allocation6 + $0xd2] sm:$0x1]  ;;  %v9524_v2 = vld [vmem:[#allocation6 + $0xd1] sm:$0x1]  ;;  %9414 = vrot.lane.b32.xlu1 %v9413_v18, %s16490_s25  ;;  %v9475_v56 = vsel %vm8966_vm5, %v9474_v30, %v19231_v51 }
 0x605   :  { %9348 = vrot.lane.b32.xlu0 %v9347_v3, %s16508_s10  ;;  %v20181_v6 = vrot.slane %v19309_v50, 4  ;;  %v9559_v19 = vld [vmem:[#allocation6 + $0xf2] sm:$0x1]  ;;  %v9574_v5 = vrot.slane %v9556_v24, 4  ;;  %v9525_v8 = vld [vmem:[#allocation6 + $0xf1] sm:$0x1]  ;;  %v9477_v43 = vsel %vm8969_vm6, %v9476_v23, %v9475_v56 }
 0x606   :  { %v9540_v25 = vrot.slane %v9522_v57, 4  ;;  %v9576_v52 = vrot.slane %v9557_v49, 3  ;;  %v9542_v60 = vrot.slane %v9523_v15, 3  ;;  %v9656_v41 = vld [vmem:[#allocation6 + $0x95] sm:$0x1]  ;;  %v9479_v32 = vsel %vm8972_vm7, %v9478_v62, %v9477_v43  ;;  %v20182_v12 = vld [vmem:[#allocation43_spill] sm:$0xff] }
 0x607   :  { %v9441_v59 = vsel %vm8966_vm5, %v20181_v6, %v19243_v13  ;;  %v9590_v14 = vld [vmem:[#allocation6 + $0x93] sm:$0x1]  ;;  %v9578_v30 = vrot.slane %v9558_v34, 2  ;;  %v9544_v50 = vrot.slane %v9524_v2, 2  ;;  %v9657_v4 = vld [vmem:[#allocation6 + $0xb5] sm:$0x1]  ;;  %v9481_v35 = vsel %vm8975_vm8, %v9480_v40, %v9479_v32 }
 0x608   :  { %v9443_v45 = vsel %vm8969_vm6, %v9442_v1, %v9441_v59  ;;  %v9591_v13 = vld [vmem:[#allocation6 + $0xb3] sm:$0x1]  ;;  %v9580_v47 = vrot.slane %v9559_v19, 1  ;;  %v9546_v37 = vrot.slane %v9525_v8, 1  ;;  %v9658_v53 = vld [vmem:[#allocation6 + $0xd5] sm:$0x1]  ;;  %9482 = vrot.lane.b32.xlu1 %v9481_v35, %s16508_s10  ;;  %v9575_v27 = vsel %vm8966_vm5, %v9574_v5, %v19108_v33 }
 0x609   :  { %v9445_v51 = vsel %vm8972_vm7, %v9444_v7, %v9443_v45  ;;  %v9592_v29 = vld [vmem:[#allocation6 + $0xd3] sm:$0x1]  ;;  %v9541_v31 = vsel %vm8966_vm5, %v9540_v25, %v19114_v46  ;;  %v9659_v0 = vld [vmem:[#allocation6 + $0xf5] sm:$0x1]  ;;  %v9674_v42 = vrot.slane %v9656_v41, 4  ;;  %v9608_v22 = vrot.slane %v9590_v14, 4 }
 0x60a   :  { %v9447_v17 = vsel %vm8975_vm8, %v9446_v55, %v9445_v51  ;;  %v9593_v48 = vld [vmem:[#allocation6 + $0xf3] sm:$0x1]  ;;  %v9577_v21 = vsel %vm8969_vm6, %v9576_v52, %v9575_v27  ;;  %v9543_v38 = vsel %vm8969_vm6, %v9542_v60, %v9541_v31  ;;  %v9676_v63 = vrot.slane %v9657_v4, 3  ;;  %v9724_v11 = vld [vmem:[#allocation6 + $0x97] sm:$0x1]  ;;  %v20183_v14 = vld [vmem:[#allocation42_spill] sm:$0xff] }
 0x60b   :  { %9448 = vrot.lane.b32.xlu0 %v9447_v17, %s16503_s24  ;;  %v9610_v44 = vrot.slane %v9591_v13, 3  ;;  %v9690_v23 = vld [vmem:[#allocation6 + $0x96] sm:$0x1]  ;;  %v9579_v9 = vsel %vm8972_vm7, %v9578_v30, %v9577_v21  ;;  %v9545_v28 = vsel %vm8972_vm7, %v9544_v50, %v9543_v38  ;;  %v9678_v33 = vrot.slane %v9658_v53, 2  ;;  %v9725_v20 = vld [vmem:[#allocation6 + $0xb7] sm:$0x1] }
 0x60c   :  { %v9612_v36 = vrot.slane %v9592_v29, 2  ;;  %v9691_v46 = vld [vmem:[#allocation6 + $0xb6] sm:$0x1]  ;;  %v9581_v26 = vsel %vm8975_vm8, %v9580_v47, %v9579_v9  ;;  %v9547_v39 = vsel %vm8975_vm8, %v9546_v37, %v9545_v28  ;;  %v9680_v1 = vrot.slane %v9659_v0, 1  ;;  %v9726_v57 = vld [vmem:[#allocation6 + $0xd7] sm:$0x1] }
 0x60d   :  { %v9614_v24 = vrot.slane %v9593_v48, 1  ;;  %v9692_v16 = vld [vmem:[#allocation6 + $0xd6] sm:$0x1]  ;;  %9582 = vrot.lane.b32.xlu1 %v9581_v26, %s16503_s24  ;;  %v9675_v10 = vsel %vm8966_vm5, %v9674_v42, %v19120_v58  ;;  %v9609_v62 = vsel %vm8966_vm5, %v9608_v22, %v20182_v12  ;;  %v9727_v7 = vld [vmem:[#allocation6 + $0xf7] sm:$0x1]  ;;  %v9742_v49 = vrot.slane %v9724_v11, 4 }
 0x60e   :  { %v9693_v15 = vld [vmem:[#allocation6 + $0xf6] sm:$0x1]  ;;  %v9708_v18 = vrot.slane %v9690_v23, 4  ;;  %v9677_v3 = vsel %vm8969_vm6, %v9676_v63, %v9675_v10  ;;  %v9611_v40 = vsel %vm8969_vm6, %v9610_v44, %v9609_v62  ;;  %v9744_v55 = vrot.slane %v9725_v20, 3  ;;  %v9824_v2 = vld [vmem:[#allocation6 + $0x9a] sm:$0x1] }
 0x60f   :  { %9548 = vrot.lane.b32.xlu0 %v9547_v39, %s16490_s25  ;;  %v9710_v34 = vrot.slane %v9691_v46, 3  ;;  %v9790_v56 = vld [vmem:[#allocation6 + $0x99] sm:$0x1]  ;;  %v9679_v6 = vsel %vm8972_vm7, %v9678_v33, %v9677_v3  ;;  %v9613_v59 = vsel %vm8972_vm7, %v9612_v36, %v9611_v40  ;;  %v9746_v58 = vrot.slane %v9726_v57, 2  ;;  %v9825_v5 = vld [vmem:[#allocation6 + $0xba] sm:$0x1] }
 0x610   :  { %v9712_v19 = vrot.slane %v9692_v16, 2  ;;  %v9791_v8 = vld [vmem:[#allocation6 + $0xb9] sm:$0x1]  ;;  %v9681_v25 = vsel %vm8975_vm8, %v9680_v1, %v9679_v6  ;;  %v9615_v43 = vsel %vm8975_vm8, %v9614_v24, %v9613_v59  ;;  %v9748_v45 = vrot.slane %v9727_v7, 1  ;;  %v9826_v60 = vld [vmem:[#allocation6 + $0xda] sm:$0x1] }
 0x611   :  { %v9714_v52 = vrot.slane %v9693_v15, 1  ;;  %v9792_v41 = vld [vmem:[#allocation6 + $0xd9] sm:$0x1]  ;;  %9682 = vrot.lane.b32.xlu1 %v9681_v25, %s16490_s25  ;;  %v9743_v32 = vsel %vm8966_vm5, %v9742_v49, %v20183_v14  ;;  %v9709_v51 = vsel %vm8966_vm5, %v9708_v18, %v19249_v61  ;;  %v9827_v30 = vld [vmem:[#allocation6 + $0xfa] sm:$0x1]  ;;  %v9842_v50 = vrot.slane %v9824_v2, 4 }
 0x612   :  { %v9793_v4 = vld [vmem:[#allocation6 + $0xf9] sm:$0x1]  ;;  %v9808_v13 = vrot.slane %v9790_v56, 4  ;;  %v9745_v35 = vsel %vm8969_vm6, %v9744_v55, %v9743_v32  ;;  %v9711_v17 = vsel %vm8969_vm6, %v9710_v34, %v9709_v51  ;;  %v9844_v47 = vrot.slane %v9825_v5, 3  ;;  %v9924_v53 = vld [vmem:[#allocation6 + $0x9d] sm:$0x1] }
 0x613   :  { %9616 = vrot.lane.b32.xlu0 %v9615_v43, %s16508_s10  ;;  %v9810_v37 = vrot.slane %v9791_v8, 3  ;;  %v9858_v29 = vld [vmem:[#allocation6 + $0x9b] sm:$0x1]  ;;  %v9747_v27 = vsel %vm8972_vm7, %v9746_v58, %v9745_v35  ;;  %v9713_v31 = vsel %vm8972_vm7, %v9712_v19, %v9711_v17  ;;  %v9846_v0 = vrot.slane %v9826_v60, 2  ;;  %v9925_v48 = vld [vmem:[#allocation6 + $0xbd] sm:$0x1] }
 0x614   :  { %v9812_v42 = vrot.slane %v9792_v41, 2  ;;  %v9859_v61 = vld [vmem:[#allocation6 + $0xbb] sm:$0x1]  ;;  %v9749_v22 = vsel %vm8975_vm8, %v9748_v45, %v9747_v27  ;;  %v9715_v21 = vsel %vm8975_vm8, %v9714_v52, %v9713_v31  ;;  %v9848_v38 = vrot.slane %v9827_v30, 1  ;;  %v9926_v44 = vld [vmem:[#allocation6 + $0xdd] sm:$0x1] }
 0x615   :  { %v9814_v63 = vrot.slane %v9793_v4, 1  ;;  %v9860_v11 = vld [vmem:[#allocation6 + $0xdb] sm:$0x1]  ;;  %9750 = vrot.lane.b32.xlu1 %v9749_v22, %s16508_s10  ;;  %v9843_v23 = vsel %vm8966_vm5, %v9842_v50, %v19255_v54  ;;  %v20184_v9 = vld [vmem:[#allocation45_spill] sm:$0xff]  ;;  %v9942_v36 = vrot.slane %v9924_v53, 4  ;;  %v9876_v46 = vrot.slane %v9858_v29, 4 }
 0x616   :  { %v9809_v28 = vsel %vm8966_vm5, %v9808_v13, %v20184_v9  ;;  %v9927_v33 = vld [vmem:[#allocation6 + $0xfd] sm:$0x1]  ;;  %v9861_v20 = vld [vmem:[#allocation6 + $0xfb] sm:$0x1]  ;;  %v9845_v26 = vsel %vm8969_vm6, %v9844_v47, %v9843_v23  ;;  %v9944_v1 = vrot.slane %v9925_v48, 3  ;;  %v9878_v24 = vrot.slane %v9859_v61, 3 }
 0x617   :  { %9716 = vrot.lane.b32.xlu0 %v9715_v21, %s16503_s24  ;;  %v9811_v39 = vsel %vm8969_vm6, %v9810_v37, %v9809_v28  ;;  %v9992_v57 = vld [vmem:[#allocation6 + $0x9f] sm:$0x1]  ;;  %v9958_v16 = vld [vmem:[#allocation6 + $0x9e] sm:$0x1]  ;;  %v9847_v10 = vsel %vm8972_vm7, %v9846_v0, %v9845_v26  ;;  %v9946_v54 = vrot.slane %v9926_v44, 2  ;;  %v9880_v62 = vrot.slane %v9860_v11, 2 }
 0x618   :  { %v9813_v12 = vsel %vm8972_vm7, %v9812_v42, %v9811_v39  ;;  %v9993_v7 = vld [vmem:[#allocation6 + $0xbf] sm:$0x1]  ;;  %v9959_v49 = vld [vmem:[#allocation6 + $0xbe] sm:$0x1]  ;;  %v9849_v15 = vsel %vm8975_vm8, %v9848_v38, %v9847_v10  ;;  %v9948_v3 = vrot.slane %v9927_v33, 1  ;;  %v9882_v40 = vrot.slane %v9861_v20, 1 }
 0x619   :  { %v9815_v18 = vsel %vm8975_vm8, %v9814_v63, %v9813_v12  ;;  %v9994_v55 = vld [vmem:[#allocation6 + $0xdf] sm:$0x1]  ;;  %v9960_v34 = vld [vmem:[#allocation6 + $0xde] sm:$0x1]  ;;  %9850 = vrot.lane.b32.xlu1 %v9849_v15, %s16503_s24  ;;  %v20185_v2 = vld [vmem:[#allocation47_spill] sm:$0xff]  ;;  %v10010_v19 = vrot.slane %v9992_v57, 4 }
 0x61a   :  { %v9943_v56 = vsel %vm8966_vm5, %v9942_v36, %v20185_v2  ;;  %v20186_v6 = vld [vmem:[#allocation44_spill] sm:$0xff]  ;;  %v9995_v58 = vld [vmem:[#allocation6 + $0xff] sm:$0x1]  ;;  %v9961_v5 = vld [vmem:[#allocation6 + $0xfe] sm:$0x1]  ;;  %v9976_v8 = vrot.slane %v9958_v16, 4 }
 0x61b   :  { %9816 = vrot.lane.b32.xlu0 %v9815_v18, %s16490_s25  ;;  %v9877_v59 = vsel %vm8966_vm5, %v9876_v46, %v20186_v6  ;;  %v9945_v25 = vsel %vm8969_vm6, %v9944_v1, %v9943_v56  ;;  %v10012_v45 = vrot.slane %v9993_v7, 3  ;;  %v9978_v52 = vrot.slane %v9959_v49, 3  ;;  %v20187_v13 = vld [vmem:[#allocation48_spill] sm:$0xff]  ;;  %v20188_v17 = vld [vmem:[#allocation46_spill] sm:$0xff] }
 0x61c   :  { %v9879_v43 = vsel %vm8969_vm6, %v9878_v24, %v9877_v59  ;;  %v9947_v60 = vsel %vm8972_vm7, %v9946_v54, %v9945_v25  ;;  %v10014_v14 = vrot.slane %v9994_v55, 2  ;;  %v9980_v32 = vrot.slane %v9960_v34, 2  ;;  %v10121_v42 = vld [vmem:[#allocation19 + $0x1c0] sm:$0xff] }
 0x61d   :  { %v9881_v41 = vsel %vm8972_vm7, %v9880_v62, %v9879_v43  ;;  %v9949_v51 = vsel %vm8975_vm8, %v9948_v3, %v9947_v60  ;;  %v10016_v50 = vrot.slane %v9995_v58, 1  ;;  %v9982_v4 = vrot.slane %v9961_v5, 1  ;;  %v10125_v48 = vld [vmem:[#allocation19 + $0x1e0] sm:$0xff] }
 0x61e   :  { %v9883_v30 = vsel %vm8975_vm8, %v9882_v40, %v9881_v41  ;;  %9950 = vrot.lane.b32.xlu1 %v9949_v51, %s16490_s25  ;;  %v10011_v35 = vsel %vm8966_vm5, %v10010_v19, %v20187_v13  ;;  %v9977_v47 = vsel %vm8966_vm5, %v9976_v8, %v20188_v17  ;;  %v10249_v61 = vld [vmem:[#allocation19 + $0x5c0] sm:$0xff]  ;;  %v15260_v22 = vcombine.low %v10121_v42, %v10125_v48  ;;  %s14981_s25 = sshll.u32 %s16509_s11, 4  ;;  %s14982_s25 = int_to_ptr.vmem [resolvable:$true] %s14981_s25 }
 0x61f   :  { %9884 = vrot.lane.b32.xlu0 %v9883_v30, %s16508_s10  ;;  %v10013_v37 = vsel %vm8969_vm6, %v10012_v45, %v10011_v35  ;;  %v9979_v53 = vsel %vm8969_vm6, %v9978_v52, %v9977_v47  ;;  %v15261_v21 = vcombine.high %v10121_v42, %v10125_v48  ;;  %v10253_v38 = vld [vmem:[#allocation19 + $0x5e0] sm:$0xff]  ;;  %s16452_s21 = scalar_lea.vmem %s14982_s25, 128  ;;  %p16457_p5 = scmp.lt.s32.totalorder %s14982_s25, %s14982_s25 }
 0x620   :  { %v10015_v29 = vsel %vm8972_vm7, %v10014_v14, %v10013_v37  ;;  %v9981_v27 = vsel %vm8972_vm7, %v9980_v32, %v9979_v53  ;;  %v10113_v63 = vld [vmem:[#allocation19 + $0x180] sm:$0xff]  ;;  %v15388_v11 = vcombine.low %v10249_v61, %v10253_v38  ;;  %v15389_v23 = vcombine.high %v10249_v61, %v10253_v38  ;;  %p16453_p4 = scmp.ne.s32.totalorder %s14982_s25, %s16452_s21  ;;  %p16458_p6 = scmp.lt.s32.totalorder %s16452_s21, %s16452_s21 }
 0x621   :  { %v10017_v31 = vsel %vm8975_vm8, %v10016_v50, %v10015_v29  ;;  %v9983_v0 = vsel %vm8975_vm8, %v9982_v4, %v9981_v27  ;;  %v10117_v44 = vld [vmem:[#allocation19 + $0x1a0] sm:$0xff]  ;;  %13179 = vmatprep.subr.bf16.mxu0 %v15261_v21 }
 0x622   :  { %10018 = vrot.lane.b32.xlu1 %v10017_v31, %s16508_s10  ;;  %v15253_v9 = vcombine.high %v10113_v63, %v10117_v44  ;;  %v10241_v28 = vld [vmem:[#allocation19 + $0x580] sm:$0xff]  ;;  %13220 = vmatprep.subr.bf16.mxu1 %v15389_v23  ;;  %v15252_v1 = vcombine.low %v10113_v63, %v10117_v44  ;;  %p16459_p7 = por %p16458_p6, %p16457_p5 }
 0x623   :  { %9984 = vrot.lane.b32.xlu0 %v9983_v0, %s16503_s24  ;;  %v10245_v33 = vld [vmem:[#allocation19 + $0x5a0] sm:$0xff]  ;;  %13180 = vmatpush1.bf16.msra.mxu0 %v15260_v22 }
 0x624   :  { %v10105_v36 = vld [vmem:[#allocation19 + $0x140] sm:$0xff]  ;;  %v15381_v20 = vcombine.high %v10241_v28, %v10245_v33  ;;  %13221 = vmatpush1.bf16.msra.mxu1 %v15388_v11  ;;  %13181 = vmatprep.subr.bf16.mxu0 %v15253_v9  ;;  %v15380_v24 = vcombine.low %v10241_v28, %v10245_v33  ;;  %p16460_p8 = pnand %p16459_p7, %p16453_p4 }
 0x625   :  { %v10109_v46 = vld [vmem:[#allocation19 + $0x160] sm:$0xff] }
 0x626   :  { %v10233_v26 = vld [vmem:[#allocation19 + $0x540] sm:$0xff]  ;;  %v15245_v57 = vcombine.high %v10105_v36, %v10109_v46  ;;  %13222 = vmatprep.subr.bf16.mxu1 %v15381_v20  ;;  %v15244_v7 = vcombine.low %v10105_v36, %v10109_v46 }
 0x627   :  { %v10237_v39 = vld [vmem:[#allocation19 + $0x560] sm:$0xff]  ;;  %13182 = vmatpush1.bf16.msra.mxu0 %v15252_v1 }
 0x628   :  { %v15373_v16 = vcombine.high %v10233_v26, %v10237_v39  ;;  %v10097_v10 = vld [vmem:[#allocation19 + $0x100] sm:$0xff]  ;;  %13223 = vmatpush1.bf16.msra.mxu1 %v15380_v24  ;;  %13183 = vmatprep.subr.bf16.mxu0 %v15245_v57  ;;  %v15372_v49 = vcombine.low %v10233_v26, %v10237_v39 }
 0x629   :  { %v10101_v12 = vld [vmem:[#allocation19 + $0x120] sm:$0xff] }
 0x62a   :  { %v10225_v54 = vld [vmem:[#allocation19 + $0x500] sm:$0xff]  ;;  %v15237_v15 = vcombine.high %v10097_v10, %v10101_v12  ;;  %13224 = vmatprep.subr.bf16.mxu1 %v15373_v16  ;;  %v15236_v2 = vcombine.low %v10097_v10, %v10101_v12 }
 0x62b   :  { %v10229_v62 = vld [vmem:[#allocation19 + $0x520] sm:$0xff]  ;;  %13184 = vmatpush1.bf16.msra.mxu0 %v15244_v7 }
 0x62c   :  { %v15365_v18 = vcombine.high %v10225_v54, %v10229_v62  ;;  %v10089_v3 = vld [vmem:[#allocation19 + $0xc0] sm:$0xff]  ;;  %13225 = vmatpush1.bf16.msra.mxu1 %v15372_v49  ;;  %13185 = vmatprep.subr.bf16.mxu0 %v15237_v15  ;;  %v15364_v56 = vcombine.low %v10225_v54, %v10229_v62 }
 0x62d   :  { %v10093_v40 = vld [vmem:[#allocation19 + $0xe0] sm:$0xff] }
 0x62e   :  { %v10217_v55 = vld [vmem:[#allocation19 + $0x4c0] sm:$0xff]  ;;  %v15229_v6 = vcombine.high %v10089_v3, %v10093_v40  ;;  %13226 = vmatprep.subr.bf16.mxu1 %v15365_v18  ;;  %v15228_v25 = vcombine.low %v10089_v3, %v10093_v40 }
 0x62f   :  { %v10221_v34 = vld [vmem:[#allocation19 + $0x4e0] sm:$0xff]  ;;  %13186 = vmatpush1.bf16.msra.mxu0 %v15236_v2 }
 0x630   :  { %v15357_v59 = vcombine.high %v10217_v55, %v10221_v34  ;;  %v10081_v58 = vld [vmem:[#allocation19 + $0x80] sm:$0xff]  ;;  %13227 = vmatpush1.bf16.msra.mxu1 %v15364_v56  ;;  %13187 = vmatprep.subr.bf16.mxu0 %v15229_v6  ;;  %v15356_v43 = vcombine.low %v10217_v55, %v10221_v34 }
 0x631   :  { %v10085_v19 = vld [vmem:[#allocation19 + $0xa0] sm:$0xff] }
 0x632   :  { %v10209_v5 = vld [vmem:[#allocation19 + $0x480] sm:$0xff]  ;;  %v15221_v45 = vcombine.high %v10081_v58, %v10085_v19  ;;  %13228 = vmatprep.subr.bf16.mxu1 %v15357_v59  ;;  %v15220_v51 = vcombine.low %v10081_v58, %v10085_v19 }
 0x633   :  { %v10213_v8 = vld [vmem:[#allocation19 + $0x4a0] sm:$0xff]  ;;  %13188 = vmatpush1.bf16.msra.mxu0 %v15228_v25 }
 0x634   :  { %v15349_v52 = vcombine.high %v10209_v5, %v10213_v8  ;;  %v10073_v60 = vld [vmem:[#allocation19 + $0x40] sm:$0xff]  ;;  %13229 = vmatpush1.bf16.msra.mxu1 %v15356_v43  ;;  %13189 = vmatprep.subr.bf16.mxu0 %v15221_v45  ;;  %v15348_v30 = vcombine.low %v10209_v5, %v10213_v8 }
 0x635   :  { %v10077_v41 = vld [vmem:[#allocation19 + $0x60] sm:$0xff] }
 0x636   :  { %v10201_v14 = vld [vmem:[#allocation19 + $0x440] sm:$0xff]  ;;  %v15213_v50 = vcombine.high %v10073_v60, %v10077_v41  ;;  %13230 = vmatprep.subr.bf16.mxu1 %v15349_v52  ;;  %v15212_v37 = vcombine.low %v10073_v60, %v10077_v41 }
 0x637   :  { %v10205_v32 = vld [vmem:[#allocation19 + $0x460] sm:$0xff]  ;;  %13190 = vmatpush1.bf16.msra.mxu0 %v15220_v51 }
 0x638   :  { %v15341_v4 = vcombine.high %v10201_v14, %v10205_v32  ;;  %v10065_v13 = vld [vmem:[#allocation19] sm:$0xff]  ;;  %13231 = vmatpush1.bf16.msra.mxu1 %v15348_v30  ;;  %13191 = vmatprep.subr.bf16.mxu0 %v15213_v50  ;;  %v15340_v53 = vcombine.low %v10201_v14, %v10205_v32 }
 0x639   :  { %v10069_v35 = vld [vmem:[#allocation19 + $0x20] sm:$0xff] }
 0x63a   :  { %v10193_v17 = vld [vmem:[#allocation19 + $0x400] sm:$0xff]  ;;  %v15205_v29 = vcombine.high %v10065_v13, %v10069_v35  ;;  %13232 = vmatprep.subr.bf16.mxu1 %v15341_v4  ;;  %v15204_v61 = vcombine.low %v10065_v13, %v10069_v35 }
 0x63b   :  { %v10197_v47 = vld [vmem:[#allocation19 + $0x420] sm:$0xff]  ;;  %13192 = vmatpush1.bf16.msra.mxu0 %v15212_v37 }
 0x63c   :  { %v15333_v27 = vcombine.high %v10193_v17, %v10197_v47  ;;  %v10185_v31 = vld [vmem:[#allocation19 + $0x3c0] sm:$0xff]  ;;  %13233 = vmatpush1.bf16.msra.mxu1 %v15340_v53  ;;  %13193 = vmatprep.subr.bf16.mxu0 %v15205_v29  ;;  %v15332_v22 = vcombine.low %v10193_v17, %v10197_v47 }
 0x63d   :  { %v10189_v0 = vld [vmem:[#allocation19 + $0x3e0] sm:$0xff] }
 0x63e   :  { %v10313_v42 = vld [vmem:[#allocation19 + $0x7c0] sm:$0xff]  ;;  %v15325_v21 = vcombine.high %v10185_v31, %v10189_v0  ;;  %13234 = vmatprep.subr.bf16.mxu1 %v15333_v27  ;;  %v15324_v9 = vcombine.low %v10185_v31, %v10189_v0 }
 0x63f   :  { %v10317_v48 = vld [vmem:[#allocation19 + $0x7e0] sm:$0xff]  ;;  %13194 = vmatpush1.bf16.msra.mxu0 %v15204_v61 }
 0x640   :  { %v15453_v38 = vcombine.high %v10313_v42, %v10317_v48  ;;  %v10177_v63 = vld [vmem:[#allocation19 + $0x380] sm:$0xff]  ;;  %13235 = vmatpush1.bf16.msra.mxu1 %v15332_v22  ;;  %13195 = vmatprep.subr.bf16.mxu0 %v15325_v21  ;;  %v15452_v28 = vcombine.low %v10313_v42, %v10317_v48 }
 0x641   :  { %v10181_v44 = vld [vmem:[#allocation19 + $0x3a0] sm:$0xff] }
 0x642   :  { %v10305_v11 = vld [vmem:[#allocation19 + $0x780] sm:$0xff]  ;;  %v15317_v33 = vcombine.high %v10177_v63, %v10181_v44  ;;  %13236 = vmatprep.subr.bf16.mxu1 %v15453_v38  ;;  %v15316_v1 = vcombine.low %v10177_v63, %v10181_v44 }
 0x643   :  { %v10309_v23 = vld [vmem:[#allocation19 + $0x7a0] sm:$0xff]  ;;  %13196 = vmatpush2.bf16.msra.mxu0 %v15324_v9 }
 0x644   :  { %v15445_v36 = vcombine.high %v10305_v11, %v10309_v23  ;;  %v10169_v20 = vld [vmem:[#allocation19 + $0x340] sm:$0xff]  ;;  %13237 = vmatpush2.bf16.msra.mxu1 %v15452_v28  ;;  %13197 = vmatprep.subr.bf16.mxu0 %v15317_v33  ;;  %v15444_v24 = vcombine.low %v10305_v11, %v10309_v23 }
 0x645   :  { %v10173_v46 = vld [vmem:[#allocation19 + $0x360] sm:$0xff] }
 0x646   :  { %v10297_v26 = vld [vmem:[#allocation19 + $0x740] sm:$0xff]  ;;  %v15309_v57 = vcombine.high %v10169_v20, %v10173_v46  ;;  %13238 = vmatprep.subr.bf16.mxu1 %v15445_v36  ;;  %v15308_v10 = vcombine.low %v10169_v20, %v10173_v46 }
 0x647   :  { %v10301_v39 = vld [vmem:[#allocation19 + $0x760] sm:$0xff]  ;;  %13198 = vmatpush2.bf16.msra.mxu0 %v15316_v1 }
 0x648   :  { %v15437_v16 = vcombine.high %v10297_v26, %v10301_v39  ;;  %13239 = vmatpush2.bf16.msra.mxu1 %v15444_v24  ;;  %13199 = vmatprep.subr.bf16.mxu0 %v15309_v57  ;;  %v15436_v12 = vcombine.low %v10297_v26, %v10301_v39  ;;  %v10161_v44 = vld [vmem:[#allocation19 + $0x300] sm:$0xff] }
 0x649   :  { %v10165_v11 = vld [vmem:[#allocation19 + $0x320] sm:$0xff] }
 0x64a   :  { %13240 = vmatprep.subr.bf16.mxu1 %v15437_v16  ;;  %v10289_v23 = vld [vmem:[#allocation19 + $0x700] sm:$0xff]  ;;  %v15300_v9 = vcombine.low %v10161_v44, %v10165_v11  ;;  %v15301_v28 = vcombine.high %v10161_v44, %v10165_v11 }
 0x64b   :  { %13200 = vmatpush2.bf16.msra.mxu0 %v15308_v10  ;;  %v10293_v33 = vld [vmem:[#allocation19 + $0x720] sm:$0xff] }
 0x64c   :  { %13241 = vmatpush2.bf16.msra.mxu1 %v15436_v12  ;;  %v10153_v36 = vld [vmem:[#allocation19 + $0x2c0] sm:$0xff]  ;;  %v15428_v46 = vcombine.low %v10289_v23, %v10293_v33  ;;  %v15429_v26 = vcombine.high %v10289_v23, %v10293_v33  ;;  %13201 = vmatprep.subr.bf16.mxu0 %v15301_v28 }
 0x64d   :  { %v10157_v20 = vld [vmem:[#allocation19 + $0x2e0] sm:$0xff] }
 0x64e   :  { %v15293_v39 = vcombine.high %v10153_v36, %v10157_v20  ;;  %v10281_v1 = vld [vmem:[#allocation19 + $0x6c0] sm:$0xff]  ;;  %13242 = vmatprep.subr.bf16.mxu1 %v15429_v26 }
 0x64f   :  { %v10285_v24 = vld [vmem:[#allocation19 + $0x6e0] sm:$0xff]  ;;  %13202 = vmatpush2.bf16.msra.mxu0 %v15300_v9 }
 0x650   :  { %v10145_v57 = vld [vmem:[#allocation19 + $0x280] sm:$0xff]  ;;  %v15421_v16 = vcombine.high %v10281_v1, %v10285_v24  ;;  %13243 = vmatpush2.bf16.msra.mxu1 %v15428_v46  ;;  %13203 = vmatprep.subr.bf16.mxu0 %v15293_v39 }
 0x651   :  { %v10149_v10 = vld [vmem:[#allocation19 + $0x2a0] sm:$0xff] }
 0x652   :  { %v10273_v12 = vld [vmem:[#allocation19 + $0x680] sm:$0xff]  ;;  %13244 = vmatprep.subr.bf16.mxu1 %v15421_v16 }
 0x653   :  { %v10373_v23 = vld [vmem:[#allocation19 + $0x9a0] sm:$0xff] }
 0x654   :  { %v10497_v9 = vld [vmem:[#allocation19 + $0xd80] sm:$0xff] }
 0x655   :  { %v10501_v28 = vld [vmem:[#allocation19 + $0xda0] sm:$0xff] }
 0x656   :  { %v10493_v46 = vld [vmem:[#allocation19 + $0xd60] sm:$0xff] }
 0x666   :  { %v9147_v54 = vpop.permute.xlu1 %9146  ;;  %v9010_v62 = vpop.permute.xlu0 %9009 }
 0x667   :  { %9149 = vst.msk [vmem:[#allocation7 + $0x8] sm:$0xff] %vm9012_vm9, %v9147_v54  ;;  %9013 = vst.msk [vmem:[#allocation7] sm:$0xff] %vm9012_vm9, %v9010_v62  ;;  %v10277_v54 = vld [vmem:[#allocation19 + $0x6a0] sm:$0xff]  ;;  %v15292_v62 = vcombine.low %v10153_v36, %v10157_v20 }
 0x668   :  { %v10361_v36 = vld [vmem:[#allocation19 + $0x940] sm:$0xff] }
 0x669   :  { %13204 = vmatpush2.bf16.msra.mxu0 %v15292_v62  ;;  %v10365_v20 = vld [vmem:[#allocation19 + $0x960] sm:$0xff] }
 0x66a   :  { %v9181_v7 = vpop.permute.xlu1 %9180  ;;  %v9045_v49 = vpop.permute.xlu0 %9044  ;;  %v10485_v62 = vld [vmem:[#allocation19 + $0xd20] sm:$0xff] }
 0x66b   :  { %9183 = vst.msk [vmem:[#allocation7 + $0x8] sm:$0xff] %vm9047_vm10, %v9181_v7  ;;  %9048 = vst.msk [vmem:[#allocation7] sm:$0xff] %vm9047_vm10, %v9045_v49  ;;  %v15420_v7 = vcombine.low %v10281_v1, %v10285_v24  ;;  %v15285_v49 = vcombine.high %v10145_v57, %v10149_v10  ;;  %v15636_v24 = vcombine.low %v10497_v9, %v10501_v28 }
 0x66d   :  { %13245 = vmatpush2.bf16.msra.mxu1 %v15420_v7  ;;  %13205 = vmatprep.subr.bf16.mxu0 %v15285_v49  ;;  %v15500_v7 = vcombine.low %v10361_v36, %v10365_v20 }
 0x66e   :  { %v9215_v15 = vpop.permute.xlu1 %9214  ;;  %v9080_v18 = vpop.permute.xlu0 %9079 }
 0x66f   :  { %9217 = vst.msk [vmem:[#allocation7 + $0x8] sm:$0xff] %vm9082_vm11, %v9215_v15  ;;  %9083 = vst.msk [vmem:[#allocation7] sm:$0xff] %vm9082_vm11, %v9080_v18  ;;  %v15413_v15 = vcombine.high %v10273_v12, %v10277_v54  ;;  %v10137_v18 = vld [vmem:[#allocation19 + $0x240] sm:$0xff] }
 0x671   :  { %13246 = vmatprep.subr.bf16.mxu1 %v15413_v15 }
 0x672   :  { %v9315_v3 = vpop.permute.xlu1 %9314  ;;  %v9281_v40 = vpop.permute.xlu0 %9280 }
 0x673   :  { %9283 = vst.msk [vmem:[#allocation7 + $0x10] sm:$0xff] %vm9012_vm9, %v9281_v40  ;;  %v10265_v40 = vld [vmem:[#allocation19 + $0x640] sm:$0xff] }
 0x674   :  { %9317 = vst.msk [vmem:[#allocation7 + $0x10] sm:$0xff] %vm9047_vm10, %v9315_v3  ;;  %v10141_v3 = vld [vmem:[#allocation19 + $0x260] sm:$0xff] }
 0x676   :  { %v9415_v55 = vpop.permute.xlu1 %9414  ;;  %v19711_v45 = vld [vmem:[#allocation7] sm:$0xff]  ;;  %v19713_v52 = vld [vmem:[#allocation7 + $0x8] sm:$0xff] }
 0x677   :  { %v9349_v34 = vpop.permute.xlu0 %9348  ;;  %9417 = vst.msk [vmem:[#allocation7 + $0x18] sm:$0xff] %vm9012_vm9, %v9415_v55  ;;  %v10030_v32 = vmul.f32 %v19711_v45, %v19711_v45  ;;  %v10031_v51 = vmul.f32 %v19713_v52, %v19713_v52  ;;  %v10269_v55 = vld [vmem:[#allocation19 + $0x660] sm:$0xff] }
 0x678   :  { %9351 = vst.msk [vmem:[#allocation7 + $0x10] sm:$0xff] %vm9082_vm11, %v9349_v34  ;;  %v15284_v34 = vcombine.low %v10145_v57, %v10149_v10  ;;  %v15501_v57 = vcombine.high %v10361_v36, %v10365_v20  ;;  %v10353_v10 = vld [vmem:[#allocation19 + $0x900] sm:$0xff] }
 0x679   :  { %v10038_v47 = vadd.f32 %v10031_v51, %v10030_v32  ;;  %v10377_v51 = vld [vmem:[#allocation19 + $0x9c0] sm:$0xff] }
 0x67a   :  { %v9483_v2 = vpop.permute.xlu1 %9482  ;;  %13206 = vmatpush2.bf16.msra.mxu0 %v15284_v34  ;;  %v10477_v34 = vld [vmem:[#allocation19 + $0xce0] sm:$0xff] }
 0x67b   :  { %v10433_v20 = vld [vmem:[#allocation19 + $0xb80] sm:$0xff] }
 0x67d   :  { %v9449_v56 = vpop.permute.xlu0 %9448 }
 0x67e   :  { %9451 = vst.msk [vmem:[#allocation7 + $0x18] sm:$0xff] %vm9047_vm10, %v9449_v56  ;;  %v15277_v56 = vcombine.high %v10137_v18, %v10141_v3 }
 0x67f   :  { %9485 = vst.msk [vmem:[#allocation7 + $0x18] sm:$0xff] %vm9082_vm11, %v9483_v2  ;;  %v9583_v6 = vpop.permute.xlu1 %9582  ;;  %v19716_v60 = vld [vmem:[#allocation7 + $0x10] sm:$0xff]  ;;  %v15412_v2 = vcombine.low %v10273_v12, %v10277_v54  ;;  %v10357_v12 = vld [vmem:[#allocation19 + $0x920] sm:$0xff] }
 0x680   :  { %v10032_v50 = vmul.f32 %v19716_v60, %v19716_v60  ;;  %13207 = vmatprep.subr.bf16.mxu0 %v15277_v56  ;;  %v10481_v54 = vld [vmem:[#allocation19 + $0xd00] sm:$0xff]  ;;  %v15493_v15 = vcombine.high %v10353_v10, %v10357_v12 }
 0x681   :  { %v9549_v59 = vpop.permute.xlu0 %9548  ;;  %13247 = vmatpush2.bf16.msra.mxu1 %v15412_v2  ;;  %v15492_v2 = vcombine.low %v10353_v10, %v10357_v12  ;;  %v15620_v56 = vcombine.low %v10481_v54, %v10485_v62  ;;  %v10425_v12 = vld [vmem:[#allocation19 + $0xb40] sm:$0xff] }
 0x682   :  { %9551 = vst.msk [vmem:[#allocation7 + $0x20] sm:$0xff] %vm9012_vm9, %v9549_v59  ;;  %v10039_v29 = vadd.f32 %v10038_v47, %v10032_v50  ;;  %v10129_v59 = vld [vmem:[#allocation19 + $0x200] sm:$0xff] }
 0x683   :  { %9585 = vst.msk [vmem:[#allocation7 + $0x20] sm:$0xff] %vm9047_vm10, %v9583_v6  ;;  %v9683_v58 = vpop.permute.xlu1 %9682  ;;  %v15405_v6 = vcombine.high %v10265_v40, %v10269_v55  ;;  %v10381_v50 = vld [vmem:[#allocation19 + $0x9e0] sm:$0xff] }
 0x684   :  { %9685 = vst.msk [vmem:[#allocation7 + $0x28] sm:$0xff] %vm9012_vm9, %v9683_v58  ;;  %v10133_v58 = vld [vmem:[#allocation19 + $0x220] sm:$0xff] }
 0x685   :  { %v9617_v19 = vpop.permute.xlu0 %9616  ;;  %13248 = vmatprep.subr.bf16.mxu1 %v15405_v6  ;;  %v10509_v47 = vld [vmem:[#allocation19 + $0xde0] sm:$0xff] }
 0x686   :  { %9619 = vst.msk [vmem:[#allocation7 + $0x20] sm:$0xff] %vm9082_vm11, %v9617_v19  ;;  %v19724_v30 = vld [vmem:[#allocation7 + $0x18] sm:$0xff]  ;;  %v10257_v19 = vld [vmem:[#allocation19 + $0x600] sm:$0xff] }
 0x687   :  { %v9751_v5 = vpop.permute.xlu1 %9750  ;;  %v10033_v17 = vmul.f32 %v19724_v30, %v19724_v30 }
 0x689   :  { %v9717_v8 = vpop.permute.xlu0 %9716  ;;  %v10040_v0 = vadd.f32 %v10039_v29, %v10033_v17  ;;  %v15517_v17 = vcombine.high %v10377_v51, %v10381_v50 }
 0x68a   :  { %9719 = vst.msk [vmem:[#allocation7 + $0x28] sm:$0xff] %vm9047_vm10, %v9717_v8  ;;  %v15276_v8 = vcombine.low %v10137_v18, %v10141_v3  ;;  %v15621_v18 = vcombine.high %v10481_v54, %v10485_v62  ;;  %v10345_v3 = vld [vmem:[#allocation19 + $0x8c0] sm:$0xff] }
 0x68b   :  { %9753 = vst.msk [vmem:[#allocation7 + $0x28] sm:$0xff] %vm9082_vm11, %v9751_v5  ;;  %v9851_v25 = vpop.permute.xlu1 %9850  ;;  %v10261_v5 = vld [vmem:[#allocation19 + $0x620] sm:$0xff] }
 0x68c   :  { %13208 = vmatpush2.bf16.msra.mxu0 %v15276_v8  ;;  %v15396_v32 = vcombine.low %v10257_v19, %v10261_v5  ;;  %v10469_v8 = vld [vmem:[#allocation19 + $0xca0] sm:$0xff] }
 0x68d   :  { %v9817_v43 = vpop.permute.xlu0 %9816  ;;  %v19728_v4 = vld [vmem:[#allocation7 + $0x20] sm:$0xff]  ;;  %v10429_v54 = vld [vmem:[#allocation19 + $0xb60] sm:$0xff] }
 0x68e   :  { %9819 = vst.msk [vmem:[#allocation7 + $0x30] sm:$0xff] %vm9012_vm9, %v9817_v43  ;;  %v10034_v53 = vmul.f32 %v19728_v4, %v19728_v4  ;;  %v15269_v43 = vcombine.high %v10129_v59, %v10133_v58  ;;  %v10553_v62 = vld [vmem:[#allocation19 + $0xf40] sm:$0xff] }
 0x68f   :  { %9853 = vst.msk [vmem:[#allocation7 + $0x30] sm:$0xff] %vm9047_vm10, %v9851_v25  ;;  %v15404_v25 = vcombine.low %v10265_v40, %v10269_v55  ;;  %v10349_v40 = vld [vmem:[#allocation19 + $0x8e0] sm:$0xff] }
 0x690   :  { %v9951_v41 = vpop.permute.xlu1 %9950  ;;  %v10041_v48 = vadd.f32 %v10040_v0, %v10034_v53  ;;  %13209 = vmatprep.subr.bf16.mxu0 %v15269_v43  ;;  %v10473_v55 = vld [vmem:[#allocation19 + $0xcc0] sm:$0xff]  ;;  %v15485_v6 = vcombine.high %v10345_v3, %v10349_v40 }
 0x691   :  { %v9885_v14 = vpop.permute.xlu0 %9884  ;;  %9953 = vst.msk [vmem:[#allocation7 + $0x38] sm:$0xff] %vm9012_vm9, %v9951_v41  ;;  %v15397_v41 = vcombine.high %v10257_v19, %v10261_v5  ;;  %13249 = vmatpush2.bf16.msra.mxu1 %v15404_v25  ;;  %v10341_v19 = vld [vmem:[#allocation19 + $0x8a0] sm:$0xff]  ;;  %v15484_v25 = vcombine.low %v10345_v3, %v10349_v40  ;;  %v15612_v43 = vcombine.low %v10473_v55, %v10477_v34 }
 0x692   :  { %9887 = vst.msk [vmem:[#allocation7 + $0x30] sm:$0xff] %vm9082_vm11, %v9885_v14  ;;  %v19733_v37 = vld [vmem:[#allocation7 + $0x28] sm:$0xff]  ;;  %v15268_v14 = vcombine.low %v10129_v59, %v10133_v58  ;;  %v15613_v59 = vcombine.high %v10473_v55, %v10477_v34 }
 0x693   :  { %v10035_v31 = vmul.f32 %v19733_v37, %v19733_v37  ;;  %13250 = vmatprep.subr.bf16.mxu1 %v15397_v41  ;;  %v10337_v58 = vld [vmem:[#allocation19 + $0x880] sm:$0xff] }
 0x694   :  { %v10019_v13 = vpop.permute.xlu1 %10018  ;;  %13210 = vmatpush2.bf16.msra.mxu0 %v15268_v14  ;;  %v10465_v5 = vld [vmem:[#allocation19 + $0xc80] sm:$0xff]  ;;  %v15477_v41 = vcombine.high %v10337_v58, %v10341_v19 }
 0x695   :  { %v9985_v35 = vpop.permute.xlu0 %9984  ;;  %v10042_v61 = vadd.f32 %v10041_v48, %v10035_v31  ;;  %13251 = vmatpush2.bf16.msra.mxu1 %v15396_v32  ;;  %13261 = vmatprep.subr.bf16.mxu0 %v15517_v17  ;;  %v15605_v14 = vcombine.high %v10465_v5, %v10469_v8  ;;  %v10329_v32 = vld [vmem:[#allocation19 + $0x840] sm:$0xff]  ;;  %v15604_v17 = vcombine.low %v10465_v5, %v10469_v8 }
 0x696   :  { %9987 = vst.msk [vmem:[#allocation7 + $0x38] sm:$0xff] %vm9047_vm10, %v9985_v35  ;;  %v15516_v35 = vcombine.low %v10377_v51, %v10381_v50  ;;  %v10333_v51 = vld [vmem:[#allocation19 + $0x860] sm:$0xff] }
 0x697   :  { %10021 = vst.msk [vmem:[#allocation7 + $0x38] sm:$0xff] %vm9082_vm11, %v10019_v13  ;;  %v10505_v13 = vld [vmem:[#allocation19 + $0xdc0] sm:$0xff] }
 0x698   :  { %v15644_v53 = vcombine.low %v10505_v13, %v10509_v47  ;;  %v15645_v29 = vcombine.high %v10505_v13, %v10509_v47  ;;  %v10457_v50 = vld [vmem:[#allocation19 + $0xc40] sm:$0xff]  ;;  %v15469_v47 = vcombine.high %v10329_v32, %v10333_v51 }
 0x699   :  { %v19738_v27 = vld [vmem:[#allocation7 + $0x30] sm:$0xff]  ;;  %v10461_v13 = vld [vmem:[#allocation19 + $0xc60] sm:$0xff] }
 0x69a   :  { %v10036_v42 = vmul.f32 %v19738_v27, %v19738_v27  ;;  %13302 = vmatprep.subr.bf16.mxu1 %v15645_v29  ;;  %v10321_v29 = vld [vmem:[#allocation19 + $0x800] sm:$0xff] }
 0x69b   :  { %v10417_v40 = vld [vmem:[#allocation19 + $0xb00] sm:$0xff] }
 0x69c   :  { %v10043_v38 = vadd.f32 %v10042_v61, %v10036_v42  ;;  %v10421_v55 = vld [vmem:[#allocation19 + $0xb20] sm:$0xff] }
 0x69d   :  { %v10545_v34 = vld [vmem:[#allocation19 + $0xf00] sm:$0xff] }
 0x69e   :  { %v19744_v22 = vld [vmem:[#allocation7 + $0x38] sm:$0xff]  ;;  %v10413_v5 = vld [vmem:[#allocation19 + $0xae0] sm:$0xff] }
 0x69f   :  { %v10037_v21 = vmul.f32 %v19744_v22, %v19744_v22  ;;  %v10537_v8 = vld [vmem:[#allocation19 + $0xec0] sm:$0xff] }
 0x6a1   :  { %v10044_v63 = vadd.f32 %v10043_v38, %v10037_v21 }
 0x6a3   :  { %10045 = vadd.xlane.f32.xlu0 %v10044_v63  ;;  %v10369_v63 = vld [vmem:[#allocation19 + $0x980] sm:$0xff] }
 0x6a4   :  { %v15508_v1 = vcombine.low %v10369_v63, %v10373_v23 }
 0x72c   :  { %v10046_v31 = vpop.xlane.xlu0 %10045 }
 0x72d   :  { %v10047_v0 = vmax.f32 %v10046_v31, 1e-24  ;;  %v10325_v31 = vld [vmem:[#allocation19 + $0x820] sm:$0xff] }
 0x72f   :  { %16209 = vrsqrt.f32 %v10047_v0  ;;  %v10449_v0 = vld [vmem:[#allocation19 + $0xc00] sm:$0xff] }
 0x73c   :  { %v19748_v42 = vpop.eup %16209 }
 0x73d   :  { %v10050_v48 = vmul.f32 %v19748_v42, %v19713_v52  ;;  %v10052_v61 = vmul.f32 %v19748_v42, %v19724_v30  ;;  %v10049_v21 = vmul.f32 %v19748_v42, %v19711_v45  ;;  %v10051_v38 = vmul.f32 %v19748_v42, %v19716_v60 }
 0x73e   :  { %v10054_v44 = vmul.f32 %v19748_v42, %v19733_v37  ;;  %v10056_v11 = vmul.f32 %v19748_v42, %v19744_v22  ;;  %v15509_v60 = vcombine.high %v10369_v63, %v10373_v23  ;;  %v15637_v37 = vcombine.high %v10497_v9, %v10501_v28  ;;  %v10489_v22 = vld [vmem:[#allocation19 + $0xd40] sm:$0xff] }
 0x73f   :  { %v19762_v52 = vpack.c.bf16 %v10050_v48, %v10050_v48  ;;  %v19764_v33 = vpack.c.bf16 %v10052_v61, %v10052_v61  ;;  %v19766_v30 = vpack.c.bf16 %v10049_v21, %v10049_v21  ;;  %v19768_v45 = vpack.c.bf16 %v10051_v38, %v10051_v38  ;;  %v10453_v48 = vld [vmem:[#allocation19 + $0xc20] sm:$0xff] }
 0x740   :  { %v19774_v26 = vpack.c.bf16 %v10054_v44, %v10054_v44  ;;  %v19776_v39 = vpack.c.bf16 %v10056_v11, %v10056_v11  ;;  %v15629_v16 = vcombine.high %v10489_v22, %v10493_v46  ;;  %v15628_v49 = vcombine.low %v10489_v22, %v10493_v46  ;;  %v10441_v44 = vld [vmem:[#allocation19 + $0xbc0] sm:$0xff] }
 0x741   :  { %13211 = vmatprep.mubr.bf16.mxu0 %v19762_v52  ;;  %13252 = vmatprep.mubr.bf16.mxu1 %v19764_v33  ;;  %v15468_v61 = vcombine.low %v10329_v32, %v10333_v51  ;;  %v15596_v21 = vcombine.low %v10457_v50, %v10461_v13  ;;  %v15461_v38 = vcombine.high %v10321_v29, %v10325_v31  ;;  %v10445_v11 = vld [vmem:[#allocation19 + $0xbe0] sm:$0xff] }
 0x742   :  { %13212 = vmatmul.mubr.bf16.vlgmr.msra.gmra.mxu0 %v19766_v30  ;;  %13253 = vmatmul.mubr.bf16.vlgmr.msra.gmra.mxu1 %v19768_v45  ;;  %v15589_v63 = vcombine.high %v10449_v0, %v10453_v48  ;;  %v10569_v23 = vld [vmem:[#allocation19 + $0xfc0] sm:$0xff]  ;;  %v15460_v28 = vcombine.low %v10321_v29, %v10325_v31  ;;  %v15588_v36 = vcombine.low %v10449_v0, %v10453_v48 }
 0x743   :  { %13262 = vmatpush1.bf16.msra.mxu0 %v15516_v35  ;;  %13303 = vmatpush1.bf16.msra.mxu1 %v15644_v53  ;;  %v15476_v35 = vcombine.low %v10337_v58, %v10341_v19  ;;  %v15597_v53 = vcombine.high %v10457_v50, %v10461_v13  ;;  %v10573_v9 = vld [vmem:[#allocation19 + $0xfe0] sm:$0xff] }
 0x744   :  { %13293 = vmatprep.mubr.bf16.mxu0 %v19774_v26  ;;  %13334 = vmatprep.mubr.bf16.mxu1 %v19776_v39  ;;  %v10437_v22 = vld [vmem:[#allocation19 + $0xba0] sm:$0xff] }
 0x745   :  { %13263 = vmatprep.subr.bf16.mxu0 %v15509_v60  ;;  %13304 = vmatprep.subr.bf16.mxu1 %v15637_v37  ;;  %v15581_v60 = vcombine.high %v10441_v44, %v10445_v11  ;;  %v15709_v37 = vcombine.high %v10569_v23, %v10573_v9  ;;  %v10561_v46 = vld [vmem:[#allocation19 + $0xf80] sm:$0xff] }
 0x746   :  { %v10409_v19 = vld [vmem:[#allocation19 + $0xac0] sm:$0xff] }
 0x747   :  { %13264 = vmatpush1.bf16.msra.mxu0 %v15508_v1  ;;  %13305 = vmatpush1.bf16.msra.mxu1 %v15636_v24  ;;  %v10565_v1 = vld [vmem:[#allocation19 + $0xfa0] sm:$0xff]  ;;  %v15580_v24 = vcombine.low %v10441_v44, %v10445_v11 }
 0x748   :  { %13265 = vmatprep.subr.bf16.mxu0 %v15501_v57  ;;  %13306 = vmatprep.subr.bf16.mxu1 %v15629_v16  ;;  %v15708_v57 = vcombine.low %v10569_v23, %v10573_v9  ;;  %v15573_v16 = vcombine.high %v10433_v20, %v10437_v22  ;;  %v15701_v10 = vcombine.high %v10561_v46, %v10565_v1  ;;  %v10401_v51 = vld [vmem:[#allocation19 + $0xa80] sm:$0xff] }
 0x749   :  { %v10405_v50 = vld [vmem:[#allocation19 + $0xaa0] sm:$0xff] }
 0x74a   :  { %v10529_v13 = vld [vmem:[#allocation19 + $0xe80] sm:$0xff] }
 0x74b   :  { %13266 = vmatpush1.bf16.msra.mxu0 %v15500_v7  ;;  %13307 = vmatpush1.bf16.msra.mxu1 %v15628_v49  ;;  %v10557_v7 = vld [vmem:[#allocation19 + $0xf60] sm:$0xff]  ;;  %v15572_v49 = vcombine.low %v10433_v20, %v10437_v22  ;;  %v10122_v22 = vld [vmem:[#allocation19 + $0x1c8] sm:$0xff] }
 0x74c   :  { %13267 = vmatprep.subr.bf16.mxu0 %v15493_v15  ;;  %13308 = vmatprep.subr.bf16.mxu1 %v15621_v18  ;;  %v15700_v15 = vcombine.low %v10561_v46, %v10565_v1  ;;  %v15565_v18 = vcombine.high %v10425_v12, %v10429_v54  ;;  %v15693_v3 = vcombine.high %v10553_v62, %v10557_v7  ;;  %v10393_v31 = vld [vmem:[#allocation19 + $0xa40] sm:$0xff]  ;;  %v10126_v46 = vld [vmem:[#allocation19 + $0x1e8] sm:$0xff] }
 0x74d   :  { %v10397_v0 = vld [vmem:[#allocation19 + $0xa60] sm:$0xff]  ;;  %v10250_v1 = vld [vmem:[#allocation19 + $0x5c8] sm:$0xff] }
 0x74e   :  { %v10521_v48 = vld [vmem:[#allocation19 + $0xe40] sm:$0xff] }
 0x74f   :  { %13268 = vmatpush1.bf16.msra.mxu0 %v15492_v2  ;;  %13309 = vmatpush1.bf16.msra.mxu1 %v15620_v56  ;;  %v10549_v2 = vld [vmem:[#allocation19 + $0xf20] sm:$0xff]  ;;  %v15564_v56 = vcombine.low %v10425_v12, %v10429_v54  ;;  %v10053_v12 = vmul.f32 %v19748_v42, %v19728_v4  ;;  %v10055_v54 = vmul.f32 %v19748_v42, %v19738_v27  ;;  %v10234_v27 = vld [vmem:[#allocation19 + $0x548] sm:$0xff] }
 0x750   :  { %13269 = vmatprep.subr.bf16.mxu0 %v15485_v6  ;;  %13310 = vmatprep.subr.bf16.mxu1 %v15613_v59  ;;  %v15692_v6 = vcombine.low %v10553_v62, %v10557_v7  ;;  %v15557_v59 = vcombine.high %v10417_v40, %v10421_v55  ;;  %v15685_v58 = vcombine.high %v10545_v34, %v10549_v2  ;;  %v10385_v11 = vld [vmem:[#allocation19 + $0xa00] sm:$0xff]  ;;  %v10114_v7 = vld [vmem:[#allocation19 + $0x188] sm:$0xff] }
 0x751   :  { %v10389_v23 = vld [vmem:[#allocation19 + $0xa20] sm:$0xff]  ;;  %v10238_v42 = vld [vmem:[#allocation19 + $0x568] sm:$0xff] }
 0x752   :  { %v10513_v9 = vld [vmem:[#allocation19 + $0xe00] sm:$0xff] }
 0x753   :  { %13270 = vmatpush1.bf16.msra.mxu0 %v15484_v25  ;;  %13311 = vmatpush1.bf16.msra.mxu1 %v15612_v43  ;;  %v10541_v25 = vld [vmem:[#allocation19 + $0xee0] sm:$0xff]  ;;  %v15556_v43 = vcombine.low %v10417_v40, %v10421_v55  ;;  %v19784_v40 = vpack.c.bf16 %v10053_v12, %v10053_v12  ;;  %v19786_v55 = vpack.c.bf16 %v10055_v54, %v10055_v54 }
 0x754   :  { %13271 = vmatprep.subr.bf16.mxu0 %v15477_v41  ;;  %13312 = vmatprep.subr.bf16.mxu1 %v15605_v14  ;;  %v15684_v41 = vcombine.low %v10545_v34, %v10549_v2  ;;  %v15549_v14 = vcombine.high %v10409_v19, %v10413_v5  ;;  %v15677_v32 = vcombine.high %v10537_v8, %v10541_v25 }
 0x757   :  { %13272 = vmatpush1.bf16.msra.mxu0 %v15476_v35  ;;  %13313 = vmatpush1.bf16.msra.mxu1 %v15604_v17  ;;  %v10533_v35 = vld [vmem:[#allocation19 + $0xea0] sm:$0xff]  ;;  %v15548_v17 = vcombine.low %v10409_v19, %v10413_v5  ;;  %v15375_v5 = vcombine.high %v10234_v27, %v10238_v42 }
 0x758   :  { %13273 = vmatprep.subr.bf16.mxu0 %v15469_v47  ;;  %13314 = vmatprep.subr.bf16.mxu1 %v15597_v53  ;;  %v15676_v47 = vcombine.low %v10537_v8, %v10541_v25  ;;  %v15541_v53 = vcombine.high %v10401_v51, %v10405_v50  ;;  %v15669_v29 = vcombine.high %v10529_v13, %v10533_v35  ;;  %v10098_v8 = vld [vmem:[#allocation19 + $0x108] sm:$0xff] }
 0x759   :  { %v10102_v25 = vld [vmem:[#allocation19 + $0x128] sm:$0xff] }
 0x75b   :  { %13274 = vmatpush1.bf16.msra.mxu0 %v15468_v61  ;;  %13315 = vmatpush1.bf16.msra.mxu1 %v15596_v21  ;;  %v10525_v61 = vld [vmem:[#allocation19 + $0xe60] sm:$0xff]  ;;  %v15540_v21 = vcombine.low %v10401_v51, %v10405_v50  ;;  %v15239_v51 = vcombine.high %v10098_v8, %v10102_v25 }
 0x75c   :  { %13275 = vmatprep.subr.bf16.mxu0 %v15461_v38  ;;  %13316 = vmatprep.subr.bf16.mxu1 %v15589_v63  ;;  %v15668_v38 = vcombine.low %v10529_v13, %v10533_v35  ;;  %v15533_v63 = vcombine.high %v10393_v31, %v10397_v0  ;;  %v15661_v44 = vcombine.high %v10521_v48, %v10525_v61  ;;  %v10090_v13 = vld [vmem:[#allocation19 + $0xc8] sm:$0xff] }
 0x75d   :  { %v10094_v35 = vld [vmem:[#allocation19 + $0xe8] sm:$0xff] }
 0x75f   :  { %13276 = vmatpush1.bf16.msra.mxu0 %v15460_v28  ;;  %13317 = vmatpush1.bf16.msra.mxu1 %v15588_v36  ;;  %v10517_v28 = vld [vmem:[#allocation19 + $0xe20] sm:$0xff]  ;;  %v15532_v36 = vcombine.low %v10393_v31, %v10397_v0  ;;  %v15231_v31 = vcombine.high %v10090_v13, %v10094_v35 }
 0x760   :  { %13277 = vmatprep.subr.bf16.mxu0 %v15581_v60  ;;  %13318 = vmatprep.subr.bf16.mxu1 %v15709_v37  ;;  %v15660_v60 = vcombine.low %v10521_v48, %v10525_v61  ;;  %v15525_v37 = vcombine.high %v10385_v11, %v10389_v23  ;;  %v15653_v20 = vcombine.high %v10513_v9, %v10517_v28  ;;  %v10082_v48 = vld [vmem:[#allocation19 + $0x88] sm:$0xff] }
 0x761   :  { %v10086_v61 = vld [vmem:[#allocation19 + $0xa8] sm:$0xff] }
 0x763   :  { %13278 = vmatpush2.bf16.msra.mxu0 %v15580_v24  ;;  %13319 = vmatpush2.bf16.msra.mxu1 %v15708_v57  ;;  %v10254_v24 = vld [vmem:[#allocation19 + $0x5e8] sm:$0xff]  ;;  %v15524_v57 = vcombine.low %v10385_v11, %v10389_v23  ;;  %v15223_v11 = vcombine.high %v10082_v48, %v10086_v61 }
 0x764   :  { %13279 = vmatprep.subr.bf16.mxu0 %v15573_v16  ;;  %13320 = vmatprep.subr.bf16.mxu1 %v15701_v10  ;;  %v15652_v16 = vcombine.low %v10513_v9, %v10517_v28  ;;  %v15263_v10 = vcombine.high %v10122_v22, %v10126_v46  ;;  %v15391_v62 = vcombine.high %v10250_v1, %v10254_v24  ;;  %v10074_v9 = vld [vmem:[#allocation19 + $0x48] sm:$0xff] }
 0x765   :  { %v15390_v34 = vcombine.low %v10250_v1, %v10254_v24  ;;  %v10078_v28 = vld [vmem:[#allocation19 + $0x68] sm:$0xff] }
 0x766   :  { %v10066_v1 = vld [vmem:[#allocation19 + $0x8] sm:$0xff] }
 0x767   :  { %13280 = vmatpush2.bf16.msra.mxu0 %v15572_v49  ;;  %13321 = vmatpush2.bf16.msra.mxu1 %v15700_v15  ;;  %v10118_v49 = vld [vmem:[#allocation19 + $0x1a8] sm:$0xff] }
 0x768   :  { %13281 = vmatprep.subr.bf16.mxu0 %v15565_v18  ;;  %13322 = vmatprep.subr.bf16.mxu1 %v15693_v3  ;;  %v10242_v15 = vld [vmem:[#allocation19 + $0x588] sm:$0xff]  ;;  %v15262_v3 = vcombine.low %v10122_v22, %v10126_v46  ;;  %v15255_v2 = vcombine.high %v10114_v7, %v10118_v49  ;;  %v15215_v22 = vcombine.high %v10074_v9, %v10078_v28 }
 0x769   :  { %v10246_v18 = vld [vmem:[#allocation19 + $0x5a8] sm:$0xff] }
 0x76a   :  { %v15383_v4 = vcombine.high %v10242_v15, %v10246_v18  ;;  %v10070_v24 = vld [vmem:[#allocation19 + $0x28] sm:$0xff] }
 0x76b   :  { %13282 = vmatpush2.bf16.msra.mxu0 %v15564_v56  ;;  %13323 = vmatpush2.bf16.msra.mxu1 %v15692_v6  ;;  %v10106_v56 = vld [vmem:[#allocation19 + $0x148] sm:$0xff]  ;;  %v15207_v54 = vcombine.high %v10066_v1, %v10070_v24 }
 0x76c   :  { %13283 = vmatprep.subr.bf16.mxu0 %v15557_v59  ;;  %13324 = vmatprep.subr.bf16.mxu1 %v15685_v58  ;;  %v10110_v6 = vld [vmem:[#allocation19 + $0x168] sm:$0xff]  ;;  %v15254_v59 = vcombine.low %v10114_v7, %v10118_v49  ;;  %v15382_v58 = vcombine.low %v10242_v15, %v10246_v18 }
 0x76d   :  { %v15247_v19 = vcombine.high %v10106_v56, %v10110_v6  ;;  %v10186_v7 = vld [vmem:[#allocation19 + $0x3c8] sm:$0xff] }
 0x76e   :  { %v10190_v49 = vld [vmem:[#allocation19 + $0x3e8] sm:$0xff] }
 0x76f   :  { %13284 = vmatpush2.bf16.msra.mxu0 %v15556_v43  ;;  %13325 = vmatpush2.bf16.msra.mxu1 %v15684_v41  ;;  %v10226_v43 = vld [vmem:[#allocation19 + $0x508] sm:$0xff] }
 0x770   :  { %13285 = vmatprep.subr.bf16.mxu0 %v15549_v14  ;;  %13326 = vmatprep.subr.bf16.mxu1 %v15677_v32  ;;  %v10230_v41 = vld [vmem:[#allocation19 + $0x528] sm:$0xff]  ;;  %v15246_v14 = vcombine.low %v10106_v56, %v10110_v6  ;;  %v15374_v32 = vcombine.low %v10234_v27, %v10238_v42 }
 0x771   :  { %v15367_v50 = vcombine.high %v10226_v43, %v10230_v41  ;;  %v10314_v15 = vld [vmem:[#allocation19 + $0x7c8] sm:$0xff] }
 0x772   :  { %v10318_v18 = vld [vmem:[#allocation19 + $0x7e8] sm:$0xff] }
 0x773   :  { %13286 = vmatpush2.bf16.msra.mxu0 %v15548_v17  ;;  %13327 = vmatpush2.bf16.msra.mxu1 %v15676_v47  ;;  %v10218_v17 = vld [vmem:[#allocation19 + $0x4c8] sm:$0xff] }
 0x774   :  { %13287 = vmatprep.subr.bf16.mxu0 %v15541_v53  ;;  %13328 = vmatprep.subr.bf16.mxu1 %v15669_v29  ;;  %v10222_v47 = vld [vmem:[#allocation19 + $0x4e8] sm:$0xff]  ;;  %v15238_v53 = vcombine.low %v10098_v8, %v10102_v25  ;;  %v15366_v29 = vcombine.low %v10226_v43, %v10230_v41 }
 0x775   :  { %v15359_v0 = vcombine.high %v10218_v17, %v10222_v47  ;;  %v10178_v56 = vld [vmem:[#allocation19 + $0x388] sm:$0xff] }
 0x776   :  { %v10182_v6 = vld [vmem:[#allocation19 + $0x3a8] sm:$0xff] }
 0x777   :  { %13288 = vmatpush2.bf16.msra.mxu0 %v15540_v21  ;;  %13329 = vmatpush2.bf16.msra.mxu1 %v15668_v38  ;;  %v10210_v21 = vld [vmem:[#allocation19 + $0x488] sm:$0xff] }
 0x778   :  { %13289 = vmatprep.subr.bf16.mxu0 %v15533_v63  ;;  %13330 = vmatprep.subr.bf16.mxu1 %v15661_v44  ;;  %v10214_v38 = vld [vmem:[#allocation19 + $0x4a8] sm:$0xff]  ;;  %v15230_v63 = vcombine.low %v10090_v13, %v10094_v35  ;;  %v15358_v44 = vcombine.low %v10218_v17, %v10222_v47 }
 0x779   :  { %v15351_v23 = vcombine.high %v10210_v21, %v10214_v38  ;;  %v10306_v27 = vld [vmem:[#allocation19 + $0x788] sm:$0xff] }
 0x77a   :  { %v10310_v42 = vld [vmem:[#allocation19 + $0x7a8] sm:$0xff] }
 0x77b   :  { %13290 = vmatpush2.bf16.msra.mxu0 %v15532_v36  ;;  %13331 = vmatpush2.bf16.msra.mxu1 %v15660_v60  ;;  %v10202_v36 = vld [vmem:[#allocation19 + $0x448] sm:$0xff] }
 0x77c   :  { %13291 = vmatprep.subr.bf16.mxu0 %v15525_v37  ;;  %13332 = vmatprep.subr.bf16.mxu1 %v15653_v20  ;;  %v10206_v60 = vld [vmem:[#allocation19 + $0x468] sm:$0xff]  ;;  %v15222_v37 = vcombine.low %v10082_v48, %v10086_v61  ;;  %v15350_v20 = vcombine.low %v10210_v21, %v10214_v38 }
 0x77d   :  { %v15343_v46 = vcombine.high %v10202_v36, %v10206_v60  ;;  %v15342_v12 = vcombine.low %v10202_v36, %v10206_v60  ;;  %v10170_v8 = vld [vmem:[#allocation19 + $0x348] sm:$0xff] }
 0x77e   :  { %v10174_v25 = vld [vmem:[#allocation19 + $0x368] sm:$0xff] }
 0x77f   :  { %13292 = vmatpush2.bf16.msra.mxu0 %v15524_v57  ;;  %13333 = vmatpush2.bf16.msra.mxu1 %v15652_v16  ;;  %v10194_v57 = vld [vmem:[#allocation19 + $0x408] sm:$0xff] }
 0x780   :  { %13343 = vmatprep.subr.bf16.mxu0 %v15263_v10  ;;  %13384 = vmatprep.subr.bf16.mxu1 %v15391_v62  ;;  %v10198_v16 = vld [vmem:[#allocation19 + $0x428] sm:$0xff]  ;;  %v15214_v10 = vcombine.low %v10074_v9, %v10078_v28 }
 0x781   :  { %v15335_v62 = vcombine.high %v10194_v57, %v10198_v16  ;;  %v10298_v43 = vld [vmem:[#allocation19 + $0x748] sm:$0xff] }
 0x782   :  { %13294 = vmatmul.mubr.bf16.vlgmr.msra.gmra.mxu0 %v19784_v40  ;;  %13335 = vmatmul.mubr.bf16.vlgmr.msra.gmra.mxu1 %v19786_v55  ;;  %v10302_v41 = vld [vmem:[#allocation19 + $0x768] sm:$0xff] }
 0x783   :  { %13344 = vmatpush1.bf16.msra.mxu0 %v15262_v3  ;;  %13375 = vmatprep.mubr.bf16.mxu0 %v19762_v52  ;;  %v15206_v3 = vcombine.low %v10066_v1, %v10070_v24  ;;  %v10162_v13 = vld [vmem:[#allocation19 + $0x308] sm:$0xff] }
 0x784   :  { %13385 = vmatpush1.bf16.msra.mxu1 %v15390_v34  ;;  %13416 = vmatprep.mubr.bf16.mxu1 %v19764_v33  ;;  %v15334_v34 = vcombine.low %v10194_v57, %v10198_v16  ;;  %v10166_v35 = vld [vmem:[#allocation19 + $0x328] sm:$0xff] }
 0x785   :  { %13345 = vmatprep.subr.bf16.mxu0 %v15255_v2  ;;  %13386 = vmatprep.subr.bf16.mxu1 %v15383_v4  ;;  %v15327_v2 = vcombine.high %v10186_v7, %v10190_v49  ;;  %v15455_v4 = vcombine.high %v10314_v15, %v10318_v18  ;;  %v10290_v17 = vld [vmem:[#allocation19 + $0x708] sm:$0xff] }
 0x786   :  { %v10294_v47 = vld [vmem:[#allocation19 + $0x728] sm:$0xff] }
 0x787   :  { %13346 = vmatpush1.bf16.msra.mxu0 %v15254_v59  ;;  %v15326_v59 = vcombine.low %v10186_v7, %v10190_v49  ;;  %v10154_v48 = vld [vmem:[#allocation19 + $0x2c8] sm:$0xff] }
 0x788   :  { %13387 = vmatpush1.bf16.msra.mxu1 %v15382_v58  ;;  %13347 = vmatprep.subr.bf16.mxu0 %v15247_v19  ;;  %v15454_v58 = vcombine.low %v10314_v15, %v10318_v18  ;;  %v15319_v19 = vcombine.high %v10178_v56, %v10182_v6  ;;  %v10158_v61 = vld [vmem:[#allocation19 + $0x2e8] sm:$0xff] }
 0x789   :  { %13388 = vmatprep.subr.bf16.mxu1 %v15375_v5  ;;  %v15447_v5 = vcombine.high %v10306_v27, %v10310_v42  ;;  %v10282_v21 = vld [vmem:[#allocation19 + $0x6c8] sm:$0xff] }
 0x78a   :  { %v10286_v38 = vld [vmem:[#allocation19 + $0x6e8] sm:$0xff] }
 0x78b   :  { %13348 = vmatpush1.bf16.msra.mxu0 %v15246_v14  ;;  %v15318_v14 = vcombine.low %v10178_v56, %v10182_v6  ;;  %v10146_v9 = vld [vmem:[#allocation19 + $0x288] sm:$0xff] }
 0x78c   :  { %13389 = vmatpush1.bf16.msra.mxu1 %v15374_v32  ;;  %13349 = vmatprep.subr.bf16.mxu0 %v15239_v51  ;;  %v15446_v32 = vcombine.low %v10306_v27, %v10310_v42  ;;  %v15311_v51 = vcombine.high %v10170_v8, %v10174_v25  ;;  %v10150_v28 = vld [vmem:[#allocation19 + $0x2a8] sm:$0xff] }
 0x78d   :  { %13390 = vmatprep.subr.bf16.mxu1 %v15367_v50  ;;  %v15439_v50 = vcombine.high %v10298_v43, %v10302_v41  ;;  %v10274_v36 = vld [vmem:[#allocation19 + $0x688] sm:$0xff] }
 0x78e   :  { %v10278_v60 = vld [vmem:[#allocation19 + $0x6a8] sm:$0xff] }
 0x78f   :  { %13350 = vmatpush1.bf16.msra.mxu0 %v15238_v53  ;;  %v15310_v53 = vcombine.low %v10170_v8, %v10174_v25  ;;  %v10138_v1 = vld [vmem:[#allocation19 + $0x248] sm:$0xff] }
 0x790   :  { %13391 = vmatpush1.bf16.msra.mxu1 %v15366_v29  ;;  %13351 = vmatprep.subr.bf16.mxu0 %v15231_v31  ;;  %v15438_v29 = vcombine.low %v10298_v43, %v10302_v41  ;;  %v15303_v31 = vcombine.high %v10162_v13, %v10166_v35  ;;  %v10142_v24 = vld [vmem:[#allocation19 + $0x268] sm:$0xff] }
 0x791   :  { %13392 = vmatprep.subr.bf16.mxu1 %v15359_v0  ;;  %v15431_v0 = vcombine.high %v10290_v17, %v10294_v47  ;;  %v10266_v57 = vld [vmem:[#allocation19 + $0x648] sm:$0xff] }
 0x792   :  { %v10270_v16 = vld [vmem:[#allocation19 + $0x668] sm:$0xff] }
 0x793   :  { %13352 = vmatpush1.bf16.msra.mxu0 %v15230_v63  ;;  %v15302_v63 = vcombine.low %v10162_v13, %v10166_v35  ;;  %v10130_v7 = vld [vmem:[#allocation19 + $0x208] sm:$0xff] }
 0x794   :  { %13393 = vmatpush1.bf16.msra.mxu1 %v15358_v44  ;;  %13353 = vmatprep.subr.bf16.mxu0 %v15223_v11  ;;  %v15430_v44 = vcombine.low %v10290_v17, %v10294_v47  ;;  %v15295_v11 = vcombine.high %v10154_v48, %v10158_v61  ;;  %v10134_v49 = vld [vmem:[#allocation19 + $0x228] sm:$0xff] }
 0x795   :  { %13394 = vmatprep.subr.bf16.mxu1 %v15351_v23  ;;  %v15423_v23 = vcombine.high %v10282_v21, %v10286_v38  ;;  %v10258_v15 = vld [vmem:[#allocation19 + $0x608] sm:$0xff] }
 0x796   :  { %v10262_v18 = vld [vmem:[#allocation19 + $0x628] sm:$0xff] }
 0x797   :  { %13354 = vmatpush1.bf16.msra.mxu0 %v15222_v37  ;;  %v15294_v37 = vcombine.low %v10154_v48, %v10158_v61  ;;  %v10378_v56 = vld [vmem:[#allocation19 + $0x9c8] sm:$0xff] }
 0x798   :  { %13395 = vmatpush1.bf16.msra.mxu1 %v15350_v20  ;;  %13355 = vmatprep.subr.bf16.mxu0 %v15215_v22  ;;  %v15422_v20 = vcombine.low %v10282_v21, %v10286_v38  ;;  %v15287_v22 = vcombine.high %v10146_v9, %v10150_v28  ;;  %v10382_v6 = vld [vmem:[#allocation19 + $0x9e8] sm:$0xff] }
 0x799   :  { %13396 = vmatprep.subr.bf16.mxu1 %v15343_v46  ;;  %v15415_v46 = vcombine.high %v10274_v36, %v10278_v60  ;;  %v10506_v27 = vld [vmem:[#allocation19 + $0xdc8] sm:$0xff]  ;;  %v15518_v43 = vcombine.low %v10378_v56, %v10382_v6 }
 0x79a   :  { %v10510_v42 = vld [vmem:[#allocation19 + $0xde8] sm:$0xff] }
 0x79b   :  { %13356 = vmatpush1.bf16.msra.mxu0 %v15214_v10  ;;  %v15286_v10 = vcombine.low %v10146_v9, %v10150_v28  ;;  %v10370_v8 = vld [vmem:[#allocation19 + $0x988] sm:$0xff] }
 0x79c   :  { %13397 = vmatpush1.bf16.msra.mxu1 %v15342_v12  ;;  %13357 = vmatprep.subr.bf16.mxu0 %v15207_v54  ;;  %v15414_v12 = vcombine.low %v10274_v36, %v10278_v60  ;;  %v15279_v54 = vcombine.high %v10138_v1, %v10142_v24  ;;  %v10374_v25 = vld [vmem:[#allocation19 + $0x9a8] sm:$0xff] }
 0x79d   :  { %13398 = vmatprep.subr.bf16.mxu1 %v15335_v62  ;;  %v15407_v62 = vcombine.high %v10266_v57, %v10270_v16  ;;  %v10498_v41 = vld [vmem:[#allocation19 + $0xd88] sm:$0xff] }
 0x79e   :  { %v10366_v13 = vld [vmem:[#allocation19 + $0x968] sm:$0xff] }
 0x79f   :  { %13358 = vmatpush1.bf16.msra.mxu0 %v15206_v3  ;;  %v15278_v3 = vcombine.low %v10138_v1, %v10142_v24  ;;  %v10490_v17 = vld [vmem:[#allocation19 + $0xd48] sm:$0xff] }
 0x7a0   :  { %13399 = vmatpush1.bf16.msra.mxu1 %v15334_v34  ;;  %13359 = vmatprep.subr.bf16.mxu0 %v15327_v2  ;;  %v15406_v34 = vcombine.low %v10266_v57, %v10270_v16  ;;  %v15271_v2 = vcombine.high %v10130_v7, %v10134_v49  ;;  %v10494_v47 = vld [vmem:[#allocation19 + $0xd68] sm:$0xff] }
 0x7a1   :  { %13400 = vmatprep.subr.bf16.mxu1 %v15455_v4  ;;  %v15399_v4 = vcombine.high %v10258_v15, %v10262_v18  ;;  %v10354_v48 = vld [vmem:[#allocation19 + $0x908] sm:$0xff] }
 0x7a2   :  { %v10358_v61 = vld [vmem:[#allocation19 + $0x928] sm:$0xff] }
 0x7a3   :  { %13360 = vmatpush2.bf16.msra.mxu0 %v15326_v59  ;;  %v15270_v59 = vcombine.low %v10130_v7, %v10134_v49  ;;  %v10482_v21 = vld [vmem:[#allocation19 + $0xd08] sm:$0xff] }
 0x7a4   :  { %13401 = vmatpush2.bf16.msra.mxu1 %v15454_v58  ;;  %13361 = vmatprep.subr.bf16.mxu0 %v15319_v19  ;;  %v15398_v58 = vcombine.low %v10258_v15, %v10262_v18  ;;  %v15519_v19 = vcombine.high %v10378_v56, %v10382_v6  ;;  %v10486_v38 = vld [vmem:[#allocation19 + $0xd28] sm:$0xff] }
 0x7a5   :  { %13402 = vmatprep.subr.bf16.mxu1 %v15447_v5  ;;  %v15647_v5 = vcombine.high %v10506_v27, %v10510_v42  ;;  %v10346_v9 = vld [vmem:[#allocation19 + $0x8c8] sm:$0xff] }
 0x7a6   :  { %v10350_v28 = vld [vmem:[#allocation19 + $0x8e8] sm:$0xff] }
 0x7a7   :  { %13362 = vmatpush2.bf16.msra.mxu0 %v15318_v14  ;;  %v10502_v14 = vld [vmem:[#allocation19 + $0xda8] sm:$0xff] }
 0x7a8   :  { %13403 = vmatpush2.bf16.msra.mxu1 %v15446_v32  ;;  %13363 = vmatprep.subr.bf16.mxu0 %v15311_v51  ;;  %v15646_v32 = vcombine.low %v10506_v27, %v10510_v42  ;;  %v15511_v51 = vcombine.high %v10370_v8, %v10374_v25  ;;  %v15639_v35 = vcombine.high %v10498_v41, %v10502_v14  ;;  %v10474_v36 = vld [vmem:[#allocation19 + $0xcc8] sm:$0xff] }
 0x7a9   :  { %13404 = vmatprep.subr.bf16.mxu1 %v15439_v50  ;;  %v10362_v50 = vld [vmem:[#allocation19 + $0x948] sm:$0xff] }
 0x7aa   :  { %v10478_v60 = vld [vmem:[#allocation19 + $0xce8] sm:$0xff] }
 0x7ab   :  { %13364 = vmatpush2.bf16.msra.mxu0 %v15310_v53  ;;  %v15510_v53 = vcombine.low %v10370_v8, %v10374_v25  ;;  %v10338_v1 = vld [vmem:[#allocation19 + $0x888] sm:$0xff] }
 0x7ac   :  { %13405 = vmatpush2.bf16.msra.mxu1 %v15438_v29  ;;  %13365 = vmatprep.subr.bf16.mxu0 %v15303_v31  ;;  %v15638_v29 = vcombine.low %v10498_v41, %v10502_v14  ;;  %v15503_v31 = vcombine.high %v10362_v50, %v10366_v13  ;;  %v10342_v24 = vld [vmem:[#allocation19 + $0x8a8] sm:$0xff] }
 0x7ad   :  { %13406 = vmatprep.subr.bf16.mxu1 %v15431_v0  ;;  %v15631_v0 = vcombine.high %v10490_v17, %v10494_v47  ;;  %v10466_v57 = vld [vmem:[#allocation19 + $0xc88] sm:$0xff] }
 0x7ae   :  { %v10470_v16 = vld [vmem:[#allocation19 + $0xca8] sm:$0xff] }
 0x7af   :  { %13366 = vmatpush2.bf16.msra.mxu0 %v15302_v63  ;;  %v15502_v63 = vcombine.low %v10362_v50, %v10366_v13  ;;  %v10330_v7 = vld [vmem:[#allocation19 + $0x848] sm:$0xff] }
 0x7b0   :  { %13407 = vmatpush2.bf16.msra.mxu1 %v15430_v44  ;;  %13367 = vmatprep.subr.bf16.mxu0 %v15295_v11  ;;  %v15630_v44 = vcombine.low %v10490_v17, %v10494_v47  ;;  %v15495_v11 = vcombine.high %v10354_v48, %v10358_v61  ;;  %v10334_v49 = vld [vmem:[#allocation19 + $0x868] sm:$0xff] }
 0x7b1   :  { %13408 = vmatprep.subr.bf16.mxu1 %v15423_v23  ;;  %v15623_v23 = vcombine.high %v10482_v21, %v10486_v38  ;;  %v10458_v15 = vld [vmem:[#allocation19 + $0xc48] sm:$0xff] }
 0x7b2   :  { %v10462_v18 = vld [vmem:[#allocation19 + $0xc68] sm:$0xff] }
 0x7b3   :  { %13368 = vmatpush2.bf16.msra.mxu0 %v15294_v37  ;;  %v15494_v37 = vcombine.low %v10354_v48, %v10358_v61  ;;  %v10322_v56 = vld [vmem:[#allocation19 + $0x808] sm:$0xff] }
 0x7b4   :  { %13409 = vmatpush2.bf16.msra.mxu1 %v15422_v20  ;;  %13369 = vmatprep.subr.bf16.mxu0 %v15287_v22  ;;  %v15622_v20 = vcombine.low %v10482_v21, %v10486_v38  ;;  %v15487_v22 = vcombine.high %v10346_v9, %v10350_v28  ;;  %v10326_v6 = vld [vmem:[#allocation19 + $0x828] sm:$0xff] }
 0x7b5   :  { %13410 = vmatprep.subr.bf16.mxu1 %v15415_v46  ;;  %v15615_v46 = vcombine.high %v10474_v36, %v10478_v60  ;;  %v10450_v27 = vld [vmem:[#allocation19 + $0xc08] sm:$0xff]  ;;  %v15462_v14 = vcombine.low %v10322_v56, %v10326_v6 }
 0x7b6   :  { %v10454_v42 = vld [vmem:[#allocation19 + $0xc28] sm:$0xff] }
 0x7b7   :  { %13370 = vmatpush2.bf16.msra.mxu0 %v15286_v10  ;;  %v15486_v10 = vcombine.low %v10346_v9, %v10350_v28  ;;  %v10442_v8 = vld [vmem:[#allocation19 + $0xbc8] sm:$0xff] }
 0x7b8   :  { %13411 = vmatpush2.bf16.msra.mxu1 %v15414_v12  ;;  %13371 = vmatprep.subr.bf16.mxu0 %v15279_v54  ;;  %v15614_v12 = vcombine.low %v10474_v36, %v10478_v60  ;;  %v15479_v54 = vcombine.high %v10338_v1, %v10342_v24  ;;  %v10446_v25 = vld [vmem:[#allocation19 + $0xbe8] sm:$0xff] }
 0x7b9   :  { %13412 = vmatprep.subr.bf16.mxu1 %v15407_v62  ;;  %v15607_v62 = vcombine.high %v10466_v57, %v10470_v16  ;;  %v10574_v41 = vld [vmem:[#allocation19 + $0xfe8] sm:$0xff] }
 0x7ba   :  { %v10434_v13 = vld [vmem:[#allocation19 + $0xb88] sm:$0xff] }
 0x7bb   :  { %13372 = vmatpush2.bf16.msra.mxu0 %v15278_v3  ;;  %v15478_v3 = vcombine.low %v10338_v1, %v10342_v24  ;;  %v10562_v17 = vld [vmem:[#allocation19 + $0xf88] sm:$0xff] }
 0x7bc   :  { %13413 = vmatpush2.bf16.msra.mxu1 %v15406_v34  ;;  %13373 = vmatprep.subr.bf16.mxu0 %v15271_v2  ;;  %v15606_v34 = vcombine.low %v10466_v57, %v10470_v16  ;;  %v15471_v2 = vcombine.high %v10330_v7, %v10334_v49  ;;  %v10566_v47 = vld [vmem:[#allocation19 + $0xfa8] sm:$0xff] }
 0x7bd   :  { %13414 = vmatprep.subr.bf16.mxu1 %v15399_v4  ;;  %v15599_v4 = vcombine.high %v10458_v15, %v10462_v18  ;;  %v10426_v48 = vld [vmem:[#allocation19 + $0xb48] sm:$0xff] }
 0x7be   :  { %v10430_v61 = vld [vmem:[#allocation19 + $0xb68] sm:$0xff] }
 0x7bf   :  { %13374 = vmatpush2.bf16.msra.mxu0 %v15270_v59  ;;  %v15470_v59 = vcombine.low %v10330_v7, %v10334_v49  ;;  %v10554_v21 = vld [vmem:[#allocation19 + $0xf48] sm:$0xff] }
 0x7c0   :  { %13415 = vmatpush2.bf16.msra.mxu1 %v15398_v58  ;;  %13425 = vmatprep.subr.bf16.mxu0 %v15519_v19  ;;  %v15598_v58 = vcombine.low %v10458_v15, %v10462_v18  ;;  %v15463_v19 = vcombine.high %v10322_v56, %v10326_v6  ;;  %v10558_v38 = vld [vmem:[#allocation19 + $0xf68] sm:$0xff] }
 0x7c1   :  { %13466 = vmatprep.subr.bf16.mxu1 %v15647_v5  ;;  %v15591_v5 = vcombine.high %v10450_v27, %v10454_v42  ;;  %v10418_v9 = vld [vmem:[#allocation19 + $0xb08] sm:$0xff] }
 0x7c2   :  { %13376 = vmatmul.mubr.bf16.vlgmr.msra.gmra.mxu0 %v19766_v30  ;;  %v10422_v28 = vld [vmem:[#allocation19 + $0xb28] sm:$0xff] }
 0x7c3   :  { %13417 = vmatmul.mubr.bf16.vlgmr.msra.gmra.mxu1 %v19768_v45  ;;  %13426 = vmatpush1.bf16.msra.mxu0 %v15518_v43  ;;  %v10570_v43 = vld [vmem:[#allocation19 + $0xfc8] sm:$0xff] }
 0x7c4   :  { %13457 = vmatprep.mubr.bf16.mxu0 %v19774_v26  ;;  %13467 = vmatpush1.bf16.msra.mxu1 %v15646_v32  ;;  %v15590_v32 = vcombine.low %v10450_v27, %v10454_v42  ;;  %v15711_v50 = vcombine.high %v10570_v43, %v10574_v41  ;;  %v10546_v36 = vld [vmem:[#allocation19 + $0xf08] sm:$0xff] }
 0x7c5   :  { %13498 = vmatprep.mubr.bf16.mxu1 %v19776_v39  ;;  %13427 = vmatprep.subr.bf16.mxu0 %v15511_v51  ;;  %v15583_v51 = vcombine.high %v10442_v8, %v10446_v25  ;;  %v10550_v60 = vld [vmem:[#allocation19 + $0xf28] sm:$0xff] }
 0x7c6   :  { %13468 = vmatprep.subr.bf16.mxu1 %v15639_v35  ;;  %v10438_v35 = vld [vmem:[#allocation19 + $0xba8] sm:$0xff] }
 0x7c7   :  { %13428 = vmatpush1.bf16.msra.mxu0 %v15510_v53  ;;  %v15582_v53 = vcombine.low %v10442_v8, %v10446_v25  ;;  %v10410_v1 = vld [vmem:[#allocation19 + $0xac8] sm:$0xff] }
 0x7c8   :  { %13469 = vmatpush1.bf16.msra.mxu1 %v15638_v29  ;;  %13429 = vmatprep.subr.bf16.mxu0 %v15503_v31  ;;  %v15710_v29 = vcombine.low %v10570_v43, %v10574_v41  ;;  %v15575_v31 = vcombine.high %v10434_v13, %v10438_v35  ;;  %v10414_v24 = vld [vmem:[#allocation19 + $0xae8] sm:$0xff] }
 0x7c9   :  { %13470 = vmatprep.subr.bf16.mxu1 %v15631_v0  ;;  %v15703_v0 = vcombine.high %v10562_v17, %v10566_v47  ;;  %v10538_v57 = vld [vmem:[#allocation19 + $0xec8] sm:$0xff] }
 0x7ca   :  { %v10542_v16 = vld [vmem:[#allocation19 + $0xee8] sm:$0xff] }
 0x7cb   :  { %13430 = vmatpush1.bf16.msra.mxu0 %v15502_v63  ;;  %v15574_v63 = vcombine.low %v10434_v13, %v10438_v35  ;;  %v10402_v7 = vld [vmem:[#allocation19 + $0xa88] sm:$0xff]  ;;  %v10123_v13 = vld [vmem:[#allocation19 + $0x1d0] sm:$0xff] }
 0x7cc   :  { %13471 = vmatpush1.bf16.msra.mxu1 %v15630_v44  ;;  %13431 = vmatprep.subr.bf16.mxu0 %v15495_v11  ;;  %v15702_v44 = vcombine.low %v10562_v17, %v10566_v47  ;;  %v15567_v11 = vcombine.high %v10426_v48, %v10430_v61  ;;  %v10406_v49 = vld [vmem:[#allocation19 + $0xaa8] sm:$0xff]  ;;  %v10127_v35 = vld [vmem:[#allocation19 + $0x1f0] sm:$0xff] }
 0x7cd   :  { %13472 = vmatprep.subr.bf16.mxu1 %v15623_v23  ;;  %v15695_v23 = vcombine.high %v10554_v21, %v10558_v38  ;;  %v10530_v15 = vld [vmem:[#allocation19 + $0xe88] sm:$0xff]  ;;  %v10251_v17 = vld [vmem:[#allocation19 + $0x5d0] sm:$0xff] }
 0x7ce   :  { %v10534_v18 = vld [vmem:[#allocation19 + $0xea8] sm:$0xff]  ;;  %v10255_v47 = vld [vmem:[#allocation19 + $0x5f0] sm:$0xff] }
 0x7cf   :  { %13432 = vmatpush1.bf16.msra.mxu0 %v15494_v37  ;;  %v15566_v37 = vcombine.low %v10426_v48, %v10430_v61  ;;  %v10394_v56 = vld [vmem:[#allocation19 + $0xa48] sm:$0xff]  ;;  %v15393_v48 = vcombine.high %v10251_v17, %v10255_v47  ;;  %v10115_v61 = vld [vmem:[#allocation19 + $0x190] sm:$0xff] }
 0x7d0   :  { %13473 = vmatpush1.bf16.msra.mxu1 %v15622_v20  ;;  %13433 = vmatprep.subr.bf16.mxu0 %v15487_v22  ;;  %v15694_v20 = vcombine.low %v10554_v21, %v10558_v38  ;;  %v15559_v22 = vcombine.high %v10418_v9, %v10422_v28  ;;  %v10398_v6 = vld [vmem:[#allocation19 + $0xa68] sm:$0xff]  ;;  %v10119_v21 = vld [vmem:[#allocation19 + $0x1b0] sm:$0xff]  ;;  %v15264_v38 = vcombine.low %v10123_v13, %v10127_v35 }
 0x7d1   :  { %13474 = vmatprep.subr.bf16.mxu1 %v15615_v46  ;;  %v15687_v46 = vcombine.high %v10546_v36, %v10550_v60  ;;  %v10522_v27 = vld [vmem:[#allocation19 + $0xe48] sm:$0xff] }
 0x7d2   :  { %v10526_v42 = vld [vmem:[#allocation19 + $0xe68] sm:$0xff] }
 0x7d3   :  { %13434 = vmatpush1.bf16.msra.mxu0 %v15486_v10  ;;  %v15558_v10 = vcombine.low %v10418_v9, %v10422_v28  ;;  %v10386_v8 = vld [vmem:[#allocation19 + $0xa08] sm:$0xff]  ;;  %v15392_v9 = vcombine.low %v10251_v17, %v10255_v47  ;;  %v10087_v17 = vld [vmem:[#allocation19 + $0xb0] sm:$0xff] }
 0x7d4   :  { %13475 = vmatpush1.bf16.msra.mxu1 %v15614_v12  ;;  %13435 = vmatprep.subr.bf16.mxu0 %v15479_v54  ;;  %v15686_v12 = vcombine.low %v10546_v36, %v10550_v60  ;;  %v15551_v54 = vcombine.high %v10410_v1, %v10414_v24  ;;  %v10390_v25 = vld [vmem:[#allocation19 + $0xa28] sm:$0xff]  ;;  %v15257_v60 = vcombine.high %v10115_v61, %v10119_v21  ;;  %v10211_v47 = vld [vmem:[#allocation19 + $0x490] sm:$0xff] }
 0x7d5   :  { %13476 = vmatprep.subr.bf16.mxu1 %v15607_v62  ;;  %v15679_v62 = vcombine.high %v10538_v57, %v10542_v16  ;;  %v10514_v43 = vld [vmem:[#allocation19 + $0xe08] sm:$0xff] }
 0x7d6   :  { %v10518_v41 = vld [vmem:[#allocation19 + $0xe28] sm:$0xff] }
 0x7d7   :  { %13436 = vmatpush1.bf16.msra.mxu0 %v15478_v3  ;;  %v15550_v3 = vcombine.low %v10410_v1, %v10414_v24  ;;  %v20190_v28 = vld [vmem:[#allocation39_spill] sm:$0xff]  ;;  %v10235_v24 = vld [vmem:[#allocation19 + $0x550] sm:$0xff] }
 0x7d8   :  { %13477 = vmatpush1.bf16.msra.mxu1 %v15606_v34  ;;  %13437 = vmatprep.subr.bf16.mxu0 %v15471_v2  ;;  %v15678_v34 = vcombine.low %v10538_v57, %v10542_v16  ;;  %v15543_v2 = vcombine.high %v10402_v7, %v10406_v49  ;;  %v10239_v57 = vld [vmem:[#allocation19 + $0x570] sm:$0xff] }
 0x7d9   :  { %13478 = vmatprep.subr.bf16.mxu1 %v15599_v4  ;;  %v15671_v4 = vcombine.high %v10530_v15, %v10534_v18 }
 0x7db   :  { %13438 = vmatpush1.bf16.msra.mxu0 %v15470_v59  ;;  %v15542_v59 = vcombine.low %v10402_v7, %v10406_v49 }
 0x7dc   :  { %13479 = vmatpush1.bf16.msra.mxu1 %v15598_v58  ;;  %13439 = vmatprep.subr.bf16.mxu0 %v15463_v19  ;;  %v15670_v58 = vcombine.low %v10530_v15, %v10534_v18  ;;  %v15535_v19 = vcombine.high %v10394_v56, %v10398_v6  ;;  %v15377_v18 = vcombine.high %v10235_v24, %v10239_v57 }
 0x7dd   :  { %13480 = vmatprep.subr.bf16.mxu1 %v15591_v5  ;;  %v15663_v5 = vcombine.high %v10522_v27, %v10526_v42 }
 0x7df   :  { %13440 = vmatpush1.bf16.msra.mxu0 %v15462_v14  ;;  %v15534_v14 = vcombine.low %v10394_v56, %v10398_v6  ;;  %v10227_v56 = vld [vmem:[#allocation19 + $0x510] sm:$0xff] }
 0x7e0   :  { %13481 = vmatpush1.bf16.msra.mxu1 %v15590_v32  ;;  %13441 = vmatprep.subr.bf16.mxu0 %v15583_v51  ;;  %v15662_v32 = vcombine.low %v10522_v27, %v10526_v42  ;;  %v15527_v51 = vcombine.high %v10386_v8, %v10390_v25  ;;  %v10231_v6 = vld [vmem:[#allocation19 + $0x530] sm:$0xff] }
 0x7e1   :  { %13482 = vmatprep.subr.bf16.mxu1 %v15711_v50  ;;  %v15655_v50 = vcombine.high %v10514_v43, %v10518_v41 }
 0x7e3   :  { %13442 = vmatpush2.bf16.msra.mxu0 %v15582_v53  ;;  %v15526_v53 = vcombine.low %v10386_v8, %v10390_v25  ;;  %v15369_v8 = vcombine.high %v10227_v56, %v10231_v6  ;;  %v10091_v25 = vld [vmem:[#allocation19 + $0xd0] sm:$0xff] }
 0x7e4   :  { %13483 = vmatpush2.bf16.msra.mxu1 %v15710_v29  ;;  %13443 = vmatprep.subr.bf16.mxu0 %v15575_v31  ;;  %v15654_v29 = vcombine.low %v10514_v43, %v10518_v41  ;;  %v15265_v31 = vcombine.high %v10123_v13, %v10127_v35  ;;  %v10095_v43 = vld [vmem:[#allocation19 + $0xf0] sm:$0xff] }
 0x7e5   :  { %13484 = vmatprep.subr.bf16.mxu1 %v15703_v0  ;;  %v19796_v0 = vld [vmem:[#allocation20] sm:$0xff]  ;;  %v10219_v41 = vld [vmem:[#allocation19 + $0x4d0] sm:$0xff] }
 0x7e6   :  { %v10586_v36 = vrot.slane %v19796_v0, %v20190_v28  ;;  %v10083_v35 = vld [vmem:[#allocation19 + $0x90] sm:$0xff] }
 0x7e7   :  { %13444 = vmatpush2.bf16.msra.mxu0 %v15574_v63  ;;  %v20189_v63 = vld [vmem:[#allocation37_spill] sm:$0xff] }
 0x7e8   :  { %13485 = vmatpush2.bf16.msra.mxu1 %v15702_v44  ;;  %13445 = vmatprep.subr.bf16.mxu0 %v15567_v11  ;;  %v10582_v44 = vrot.slane %v19796_v0, %v20189_v63  ;;  %v10243_v11 = vld [vmem:[#allocation19 + $0x590] sm:$0xff] }
 0x7e9   :  { %13486 = vmatprep.subr.bf16.mxu1 %v15695_v23  ;;  %v10247_v23 = vld [vmem:[#allocation19 + $0x5b0] sm:$0xff] }
 0x7ea   :  { %v15385_v1 = vcombine.high %v10243_v11, %v10247_v23 }
 0x7eb   :  { %13446 = vmatpush2.bf16.msra.mxu0 %v15566_v37  ;;  %v10107_v37 = vld [vmem:[#allocation19 + $0x150] sm:$0xff] }
 0x7ec   :  { %13487 = vmatpush2.bf16.msra.mxu1 %v15694_v20  ;;  %13447 = vmatprep.subr.bf16.mxu0 %v15559_v22  ;;  %v10111_v20 = vld [vmem:[#allocation19 + $0x170] sm:$0xff] }
 0x7ed   :  { %13488 = vmatprep.subr.bf16.mxu1 %v15687_v46  ;;  %v15249_v7 = vcombine.high %v10107_v37, %v10111_v20  ;;  %v15248_v42 = vcombine.low %v10107_v37, %v10111_v20  ;;  %v10067_v37 = vld [vmem:[#allocation19 + $0x10] sm:$0xff] }
 0x7ee   :  { %v10071_v20 = vld [vmem:[#allocation19 + $0x30] sm:$0xff] }
 0x7ef   :  { %13448 = vmatpush2.bf16.msra.mxu0 %v15558_v10  ;;  %v15256_v10 = vcombine.low %v10115_v61, %v10119_v21  ;;  %v10075_v21 = vld [vmem:[#allocation19 + $0x50] sm:$0xff] }
 0x7f0   :  { %13489 = vmatpush2.bf16.msra.mxu1 %v15686_v12  ;;  %13449 = vmatprep.subr.bf16.mxu0 %v15551_v54 }
 0x7f1   :  { %13490 = vmatprep.subr.bf16.mxu1 %v15679_v62  ;;  %v15384_v62 = vcombine.low %v10243_v11, %v10247_v23  ;;  %v10207_v11 = vld [vmem:[#allocation19 + $0x470] sm:$0xff]  ;;  %v15224_v23 = vcombine.low %v10083_v35, %v10087_v17 }
 0x7f3   :  { %13450 = vmatpush2.bf16.msra.mxu0 %v15550_v3  ;;  %v10099_v3 = vld [vmem:[#allocation19 + $0x110] sm:$0xff] }
 0x7f4   :  { %13491 = vmatpush2.bf16.msra.mxu1 %v15678_v34  ;;  %13451 = vmatprep.subr.bf16.mxu0 %v15543_v2  ;;  %v10103_v34 = vld [vmem:[#allocation19 + $0x130] sm:$0xff] }
 0x7f5   :  { %13492 = vmatprep.subr.bf16.mxu1 %v15671_v4 }
 0x7f7   :  { %13452 = vmatpush2.bf16.msra.mxu0 %v15542_v59 }
 0x7f8   :  { %13493 = vmatpush2.bf16.msra.mxu1 %v15670_v58  ;;  %13453 = vmatprep.subr.bf16.mxu0 %v15535_v19  ;;  %v15376_v19 = vcombine.low %v10235_v24, %v10239_v57  ;;  %v15209_v57 = vcombine.high %v10067_v37, %v10071_v20 }
 0x7f9   :  { %13494 = vmatprep.subr.bf16.mxu1 %v15663_v5  ;;  %v15241_v5 = vcombine.high %v10099_v3, %v10103_v34 }
 0x7fb   :  { %13454 = vmatpush2.bf16.msra.mxu0 %v15534_v14  ;;  %v10223_v14 = vld [vmem:[#allocation19 + $0x4f0] sm:$0xff] }
 0x7fc   :  { %13495 = vmatpush2.bf16.msra.mxu1 %v15662_v32  ;;  %13455 = vmatprep.subr.bf16.mxu0 %v15527_v51  ;;  %v15240_v32 = vcombine.low %v10099_v3, %v10103_v34  ;;  %v15368_v51 = vcombine.low %v10227_v56, %v10231_v6  ;;  %v15361_v13 = vcombine.high %v10219_v41, %v10223_v14  ;;  %v10179_v34 = vld [vmem:[#allocation19 + $0x390] sm:$0xff] }
 0x7fd   :  { %13496 = vmatprep.subr.bf16.mxu1 %v15655_v50  ;;  %v15233_v50 = vcombine.high %v10091_v25, %v10095_v43  ;;  %v10311_v56 = vld [vmem:[#allocation19 + $0x7b0] sm:$0xff] }
 0x7ff   :  { %13456 = vmatpush2.bf16.msra.mxu0 %v15526_v53  ;;  %v10215_v53 = vld [vmem:[#allocation19 + $0x4b0] sm:$0xff] }
 0x800   :  { %13497 = vmatpush2.bf16.msra.mxu1 %v15654_v29  ;;  %13507 = vmatprep.subr.bf16.mxu0 %v15265_v31  ;;  %v15232_v29 = vcombine.low %v10091_v25, %v10095_v43  ;;  %v15360_v31 = vcombine.low %v10219_v41, %v10223_v14  ;;  %v15353_v61 = vcombine.high %v10211_v47, %v10215_v53  ;;  %v10303_v25 = vld [vmem:[#allocation19 + $0x770] sm:$0xff] }
 0x801   :  { %13548 = vmatprep.subr.bf16.mxu1 %v15393_v48  ;;  %v15225_v48 = vcombine.high %v10083_v35, %v10087_v17  ;;  %v10295_v35 = vld [vmem:[#allocation19 + $0x730] sm:$0xff] }
 0x802   :  { %13458 = vmatmul.mubr.bf16.vlgmr.msra.gmra.mxu0 %v19784_v40  ;;  %v13213_v22 = vpop.f32.mrf.mxu0  ;;  %v13254_v46 = vpop.f32.mrf.mxu1 }
 0x803   :  { %13499 = vmatmul.mubr.bf16.vlgmr.msra.gmra.mxu1 %v19786_v55  ;;  %v13214_v16 = vadd.f32 %v13213_v22, %v10582_v44  ;;  %13508 = vmatpush1.bf16.msra.mxu0 %v15264_v38  ;;  %v10079_v38 = vld [vmem:[#allocation19 + $0x70] sm:$0xff] }
 0x804   :  { %13539 = vmatprep.mubr.bf16.mxu0 %v19762_v52  ;;  %13549 = vmatpush1.bf16.msra.mxu1 %v15392_v9  ;;  %v13215_v12 = vpop.f32.mrf.mxu0  ;;  %v13256_v54 = vpop.f32.mrf.mxu1  ;;  %v10203_v44 = vld [vmem:[#allocation19 + $0x450] sm:$0xff]  ;;  %v15352_v9 = vcombine.low %v10211_v47, %v10215_v53 }
 0x805   :  { %v19805_v49 = vadd.f32 %v13254_v46, %v13214_v16  ;;  %13580 = vmatprep.mubr.bf16.mxu1 %v19764_v33  ;;  %v13216_v15 = vadd.f32 %v13215_v12, %v10586_v36  ;;  %13509 = vmatprep.subr.bf16.mxu0 %v15257_v60  ;;  %v15217_v36 = vcombine.high %v10075_v21, %v10079_v38  ;;  %v10195_v22 = vld [vmem:[#allocation19 + $0x410] sm:$0xff] }
 0x806   :  { %13550 = vmatprep.subr.bf16.mxu1 %v15385_v1  ;;  %v13217_v2 = vpop.f32.mrf.mxu0  ;;  %v13258_v4 = vpop.f32.mrf.mxu1  ;;  %v15345_v60 = vcombine.high %v10203_v44, %v10207_v11  ;;  %v10199_v46 = vld [vmem:[#allocation19 + $0x430] sm:$0xff]  ;;  %v15216_v1 = vcombine.low %v10075_v21, %v10079_v38  ;;  %v15344_v24 = vcombine.low %v10203_v44, %v10207_v11 }
 0x807   :  { %v19808_v27 = vadd.f32 %v13256_v54, %v13216_v15  ;;  %13510 = vmatpush1.bf16.msra.mxu0 %v15256_v10  ;;  %v15337_v16 = vcombine.high %v10195_v22, %v10199_v46  ;;  %v10187_v10 = vld [vmem:[#allocation19 + $0x3d0] sm:$0xff]  ;;  %v15336_v15 = vcombine.low %v10195_v22, %v10199_v46 }
 0x808   :  { %13551 = vmatpush1.bf16.msra.mxu1 %v15384_v62  ;;  %v13218_v59 = vpop.f32.mrf.mxu0  ;;  %v13259_v58 = vpop.f32.mrf.mxu1  ;;  %13511 = vmatprep.subr.bf16.mxu0 %v15249_v7  ;;  %v10191_v12 = vld [vmem:[#allocation19 + $0x3f0] sm:$0xff]  ;;  %v15208_v7 = vcombine.low %v10067_v37, %v10071_v20 }
 0x809   :  { %13552 = vmatprep.subr.bf16.mxu1 %v15377_v18  ;;  %v10315_v54 = vld [vmem:[#allocation19 + $0x7d0] sm:$0xff]  ;;  %v15329_v18 = vcombine.high %v10187_v10, %v10191_v12  ;;  %v15328_v6 = vcombine.low %v10187_v10, %v10191_v12 }
 0x80a   :  { %v10319_v62 = vld [vmem:[#allocation19 + $0x7f0] sm:$0xff] }
 0x80b   :  { %13512 = vmatpush1.bf16.msra.mxu0 %v15248_v42  ;;  %v15457_v3 = vcombine.high %v10315_v54, %v10319_v62  ;;  %v10183_v2 = vld [vmem:[#allocation19 + $0x3b0] sm:$0xff]  ;;  %v15456_v42 = vcombine.low %v10315_v54, %v10319_v62 }
 0x80c   :  { %13553 = vmatpush1.bf16.msra.mxu1 %v15376_v19  ;;  %13513 = vmatprep.subr.bf16.mxu0 %v15241_v5  ;;  %v10307_v4 = vld [vmem:[#allocation19 + $0x790] sm:$0xff]  ;;  %v15321_v59 = vcombine.high %v10179_v34, %v10183_v2  ;;  %v15320_v43 = vcombine.low %v10179_v34, %v10183_v2 }
 0x80d   :  { %13554 = vmatprep.subr.bf16.mxu1 %v15369_v8  ;;  %v15449_v58 = vcombine.high %v10307_v4, %v10311_v56  ;;  %v10171_v19 = vld [vmem:[#allocation19 + $0x350] sm:$0xff]  ;;  %v15448_v41 = vcombine.low %v10307_v4, %v10311_v56 }
 0x80e   :  { %v10175_v5 = vld [vmem:[#allocation19 + $0x370] sm:$0xff] }
 0x80f   :  { %13514 = vmatpush1.bf16.msra.mxu0 %v15240_v32  ;;  %v10299_v8 = vld [vmem:[#allocation19 + $0x750] sm:$0xff]  ;;  %v15313_v14 = vcombine.high %v10171_v19, %v10175_v5  ;;  %v15312_v17 = vcombine.low %v10171_v19, %v10175_v5 }
 0x810   :  { %13555 = vmatpush1.bf16.msra.mxu1 %v15368_v51  ;;  %13515 = vmatprep.subr.bf16.mxu0 %v15233_v50  ;;  %v15441_v32 = vcombine.high %v10299_v8, %v10303_v25  ;;  %v10163_v51 = vld [vmem:[#allocation19 + $0x310] sm:$0xff]  ;;  %v15440_v47 = vcombine.low %v10299_v8, %v10303_v25 }
 0x811   :  { %13556 = vmatprep.subr.bf16.mxu1 %v15361_v13  ;;  %v10167_v50 = vld [vmem:[#allocation19 + $0x330] sm:$0xff] }
 0x812   :  { %v10291_v13 = vld [vmem:[#allocation19 + $0x710] sm:$0xff]  ;;  %v15305_v53 = vcombine.high %v10163_v51, %v10167_v50  ;;  %v15304_v38 = vcombine.low %v10163_v51, %v10167_v50 }
 0x813   :  { %13516 = vmatpush1.bf16.msra.mxu0 %v15232_v29  ;;  %v15433_v29 = vcombine.high %v10291_v13, %v10295_v35  ;;  %v10287_v21 = vld [vmem:[#allocation19 + $0x6f0] sm:$0xff]  ;;  %v15432_v44 = vcombine.low %v10291_v13, %v10295_v35 }
 0x814   :  { %13557 = vmatpush1.bf16.msra.mxu1 %v15360_v31  ;;  %13517 = vmatprep.subr.bf16.mxu0 %v15225_v48  ;;  %v10155_v31 = vld [vmem:[#allocation19 + $0x2d0] sm:$0xff] }
 0x815   :  { %13558 = vmatprep.subr.bf16.mxu1 %v15353_v61  ;;  %v10159_v48 = vld [vmem:[#allocation19 + $0x2f0] sm:$0xff] }
 0x816   :  { %v10283_v61 = vld [vmem:[#allocation19 + $0x6d0] sm:$0xff]  ;;  %v15297_v11 = vcombine.high %v10155_v31, %v10159_v48  ;;  %v15296_v20 = vcombine.low %v10155_v31, %v10159_v48 }
 0x817   :  { %13518 = vmatpush1.bf16.msra.mxu0 %v15224_v23  ;;  %v15425_v23 = vcombine.high %v10283_v61, %v10287_v21  ;;  %v10279_v37 = vld [vmem:[#allocation19 + $0x6b0] sm:$0xff]  ;;  %v15424_v22 = vcombine.low %v10283_v61, %v10287_v21 }
 0x818   :  { %13559 = vmatpush1.bf16.msra.mxu1 %v15352_v9  ;;  %13519 = vmatprep.subr.bf16.mxu0 %v15217_v36  ;;  %v10147_v9 = vld [vmem:[#allocation19 + $0x290] sm:$0xff] }
 0x819   :  { %13560 = vmatprep.subr.bf16.mxu1 %v15345_v60  ;;  %v10151_v36 = vld [vmem:[#allocation19 + $0x2b0] sm:$0xff] }
 0x81a   :  { %v10275_v60 = vld [vmem:[#allocation19 + $0x690] sm:$0xff]  ;;  %v15289_v46 = vcombine.high %v10147_v9, %v10151_v36  ;;  %v15288_v12 = vcombine.low %v10147_v9, %v10151_v36 }
 0x81b   :  { %13520 = vmatpush1.bf16.msra.mxu0 %v15216_v1  ;;  %v15417_v1 = vcombine.high %v10275_v60, %v10279_v37  ;;  %v10271_v10 = vld [vmem:[#allocation19 + $0x670] sm:$0xff]  ;;  %v15416_v54 = vcombine.low %v10275_v60, %v10279_v37 }
 0x81c   :  { %13561 = vmatpush1.bf16.msra.mxu1 %v15344_v24  ;;  %13521 = vmatprep.subr.bf16.mxu0 %v15209_v57  ;;  %v10139_v24 = vld [vmem:[#allocation19 + $0x250] sm:$0xff] }
 0x81d   :  { %13562 = vmatprep.subr.bf16.mxu1 %v15337_v16  ;;  %v10143_v57 = vld [vmem:[#allocation19 + $0x270] sm:$0xff] }
 0x81e   :  { %v10267_v16 = vld [vmem:[#allocation19 + $0x650] sm:$0xff]  ;;  %v15281_v62 = vcombine.high %v10139_v24, %v10143_v57  ;;  %v15280_v2 = vcombine.low %v10139_v24, %v10143_v57 }
 0x81f   :  { %13522 = vmatpush1.bf16.msra.mxu0 %v15208_v7  ;;  %v15409_v7 = vcombine.high %v10267_v16, %v10271_v10  ;;  %v10263_v34 = vld [vmem:[#allocation19 + $0x630] sm:$0xff]  ;;  %v15408_v4 = vcombine.low %v10267_v16, %v10271_v10 }
 0x820   :  { %13563 = vmatpush1.bf16.msra.mxu1 %v15336_v15  ;;  %13523 = vmatprep.subr.bf16.mxu0 %v15329_v18  ;;  %v10131_v15 = vld [vmem:[#allocation19 + $0x210] sm:$0xff] }
 0x821   :  { %13564 = vmatprep.subr.bf16.mxu1 %v15457_v3  ;;  %v10135_v18 = vld [vmem:[#allocation19 + $0x230] sm:$0xff] }
 0x822   :  { %v10259_v3 = vld [vmem:[#allocation19 + $0x610] sm:$0xff]  ;;  %v15273_v56 = vcombine.high %v10131_v15, %v10135_v18  ;;  %v15272_v5 = vcombine.low %v10131_v15, %v10135_v18 }
 0x823   :  { %13524 = vmatpush2.bf16.msra.mxu0 %v15328_v6  ;;  %v15401_v6 = vcombine.high %v10259_v3, %v10263_v34  ;;  %v10511_v19 = vld [vmem:[#allocation19 + $0xdf0] sm:$0xff]  ;;  %v15400_v8 = vcombine.low %v10259_v3, %v10263_v34 }
 0x824   :  { %13565 = vmatpush2.bf16.msra.mxu1 %v15456_v42  ;;  %13525 = vmatprep.subr.bf16.mxu0 %v15321_v59  ;;  %v10379_v42 = vld [vmem:[#allocation19 + $0x9d0] sm:$0xff] }
 0x825   :  { %13566 = vmatprep.subr.bf16.mxu1 %v15449_v58  ;;  %v10383_v59 = vld [vmem:[#allocation19 + $0x9f0] sm:$0xff] }
 0x826   :  { %v10507_v58 = vld [vmem:[#allocation19 + $0xdd0] sm:$0xff]  ;;  %v15521_v25 = vcombine.high %v10379_v42, %v10383_v59 }
 0x827   :  { %13526 = vmatpush2.bf16.msra.mxu0 %v15320_v43  ;;  %v15649_v43 = vcombine.high %v10507_v58, %v10511_v19  ;;  %v10499_v51 = vld [vmem:[#allocation19 + $0xd90] sm:$0xff]  ;;  %v15648_v13 = vcombine.low %v10507_v58, %v10511_v19 }
 0x828   :  { %13567 = vmatpush2.bf16.msra.mxu1 %v15448_v41  ;;  %13527 = vmatprep.subr.bf16.mxu0 %v15313_v14  ;;  %v10371_v41 = vld [vmem:[#allocation19 + $0x990] sm:$0xff] }
 0x829   :  { %13568 = vmatprep.subr.bf16.mxu1 %v15441_v32  ;;  %v10375_v14 = vld [vmem:[#allocation19 + $0x9b0] sm:$0xff]  ;;  %v15520_v32 = vcombine.low %v10379_v42, %v10383_v59 }
 0x82a   :  { %v10503_v50 = vld [vmem:[#allocation19 + $0xdb0] sm:$0xff]  ;;  %v15513_v35 = vcombine.high %v10371_v41, %v10375_v14 }
 0x82b   :  { %13528 = vmatpush2.bf16.msra.mxu0 %v15312_v17  ;;  %v10363_v17 = vld [vmem:[#allocation19 + $0x950] sm:$0xff]  ;;  %v15641_v31 = vcombine.high %v10499_v51, %v10503_v50 }
 0x82c   :  { %13569 = vmatpush2.bf16.msra.mxu1 %v15440_v47  ;;  %13529 = vmatprep.subr.bf16.mxu0 %v15305_v53  ;;  %v10367_v47 = vld [vmem:[#allocation19 + $0x970] sm:$0xff] }
 0x82d   :  { %13570 = vmatprep.subr.bf16.mxu1 %v15433_v29  ;;  %v10491_v48 = vld [vmem:[#allocation19 + $0xd50] sm:$0xff]  ;;  %v15505_v9 = vcombine.high %v10363_v17, %v10367_v47  ;;  %v15504_v16 = vcombine.low %v10363_v17, %v10367_v47 }
 0x82e   :  { %v10495_v61 = vld [vmem:[#allocation19 + $0xd70] sm:$0xff] }
 0x82f   :  { %13530 = vmatpush2.bf16.msra.mxu0 %v15304_v38  ;;  %v15512_v38 = vcombine.low %v10371_v41, %v10375_v14  ;;  %v15633_v37 = vcombine.high %v10491_v48, %v10495_v61  ;;  %v10487_v24 = vld [vmem:[#allocation19 + $0xd30] sm:$0xff] }
 0x830   :  { %13571 = vmatpush2.bf16.msra.mxu1 %v15432_v44  ;;  %13531 = vmatprep.subr.bf16.mxu0 %v15297_v11  ;;  %v10351_v15 = vld [vmem:[#allocation19 + $0x8f0] sm:$0xff] }
 0x831   :  { %13572 = vmatprep.subr.bf16.mxu1 %v15425_v23  ;;  %v15640_v23 = vcombine.low %v10499_v51, %v10503_v50  ;;  %v10475_v18 = vld [vmem:[#allocation19 + $0xcd0] sm:$0xff] }
 0x832   :  { %v10479_v3 = vld [vmem:[#allocation19 + $0xcf0] sm:$0xff] }
 0x833   :  { %13532 = vmatpush2.bf16.msra.mxu0 %v15296_v20  ;;  %v10359_v20 = vld [vmem:[#allocation19 + $0x930] sm:$0xff] }
 0x834   :  { %13573 = vmatpush2.bf16.msra.mxu1 %v15424_v22  ;;  %13533 = vmatprep.subr.bf16.mxu0 %v15289_v46  ;;  %v10343_v42 = vld [vmem:[#allocation19 + $0x8b0] sm:$0xff] }
 0x835   :  { %13574 = vmatprep.subr.bf16.mxu1 %v15417_v1  ;;  %v10483_v1 = vld [vmem:[#allocation19 + $0xd10] sm:$0xff] }
 0x836   :  { %v10467_v59 = vld [vmem:[#allocation19 + $0xc90] sm:$0xff] }
 0x837   :  { %13534 = vmatpush2.bf16.msra.mxu0 %v15288_v12  ;;  %v10471_v58 = vld [vmem:[#allocation19 + $0xcb0] sm:$0xff] }
 0x838   :  { %13575 = vmatpush2.bf16.msra.mxu1 %v15416_v54  ;;  %13535 = vmatprep.subr.bf16.mxu0 %v15281_v62  ;;  %v15632_v54 = vcombine.low %v10491_v48, %v10495_v61  ;;  %v10335_v41 = vld [vmem:[#allocation19 + $0x870] sm:$0xff]  ;;  %v15608_v50 = vcombine.low %v10467_v59, %v10471_v58 }
 0x839   :  { %13576 = vmatprep.subr.bf16.mxu1 %v15409_v7  ;;  %v10347_v7 = vld [vmem:[#allocation19 + $0x8d0] sm:$0xff] }
 0x83a   :  { %v15488_v19 = vcombine.low %v10347_v7, %v10351_v15  ;;  %v10459_v14 = vld [vmem:[#allocation19 + $0xc50] sm:$0xff] }
 0x83b   :  { %13536 = vmatpush2.bf16.msra.mxu0 %v15280_v2  ;;  %v15624_v2 = vcombine.low %v10483_v1, %v10487_v24  ;;  %v10323_v17 = vld [vmem:[#allocation19 + $0x810] sm:$0xff] }
 0x83c   :  { %13577 = vmatpush2.bf16.msra.mxu1 %v15408_v4  ;;  %13537 = vmatprep.subr.bf16.mxu0 %v15273_v56  ;;  %v15489_v4 = vcombine.high %v10347_v7, %v10351_v15  ;;  %v15617_v56 = vcombine.high %v10475_v18, %v10479_v3  ;;  %v10327_v47 = vld [vmem:[#allocation19 + $0x830] sm:$0xff] }
 0x83d   :  { %13578 = vmatprep.subr.bf16.mxu1 %v15401_v6  ;;  %v10339_v6 = vld [vmem:[#allocation19 + $0x890] sm:$0xff]  ;;  %v15465_v61 = vcombine.high %v10323_v17, %v10327_v47 }
 0x83e   :  { %v15480_v51 = vcombine.low %v10339_v6, %v10343_v42  ;;  %v10559_v7 = vld [vmem:[#allocation19 + $0xf70] sm:$0xff] }
 0x83f   :  { %13538 = vmatpush2.bf16.msra.mxu0 %v15272_v5  ;;  %v15616_v5 = vcombine.low %v10475_v18, %v10479_v3 }
 0x840   :  { %13579 = vmatpush2.bf16.msra.mxu1 %v15400_v8  ;;  %13589 = vmatprep.subr.bf16.mxu0 %v15521_v25  ;;  %v15481_v8 = vcombine.high %v10339_v6, %v10343_v42  ;;  %v15609_v25 = vcombine.high %v10467_v59, %v10471_v58  ;;  %v10551_v6 = vld [vmem:[#allocation19 + $0xf30] sm:$0xff] }
 0x841   :  { %13630 = vmatprep.subr.bf16.mxu1 %v15649_v43  ;;  %v10331_v43 = vld [vmem:[#allocation19 + $0x850] sm:$0xff] }
 0x842   :  { %v13295_v53 = vpop.f32.mrf.mxu0  ;;  %v13336_v29 = vpop.f32.mrf.mxu1  ;;  %13540 = vmatmul.mubr.bf16.vlgmr.msra.gmra.mxu0 %v19766_v30 }
 0x843   :  { %v13296_v21 = vadd.f32 %v13295_v53, %v19805_v49  ;;  %13581 = vmatmul.mubr.bf16.vlgmr.msra.gmra.mxu1 %v19768_v45  ;;  %13590 = vmatpush1.bf16.msra.mxu0 %v15520_v32  ;;  %v10355_v49 = vld [vmem:[#allocation19 + $0x910] sm:$0xff] }
 0x844   :  { %13621 = vmatprep.mubr.bf16.mxu0 %v19774_v26  ;;  %13631 = vmatpush1.bf16.msra.mxu1 %v15648_v13  ;;  %v13297_v44 = vpop.f32.mrf.mxu0  ;;  %v13338_v11 = vpop.f32.mrf.mxu1  ;;  %v15497_v62 = vcombine.high %v10355_v49, %v10359_v20  ;;  %v15496_v34 = vcombine.low %v10355_v49, %v10359_v20  ;;  %v10463_v32 = vld [vmem:[#allocation19 + $0xc70] sm:$0xff]  ;;  %v15473_v13 = vcombine.high %v10331_v43, %v10335_v41 }
 0x845   :  { %v19814_v36 = vadd.f32 %v13336_v29, %v13296_v21  ;;  %13662 = vmatprep.mubr.bf16.mxu1 %v19776_v39  ;;  %v13298_v60 = vadd.f32 %v13297_v44, %v19808_v27  ;;  %13591 = vmatprep.subr.bf16.mxu0 %v15513_v35  ;;  %v15625_v27 = vcombine.high %v10483_v1, %v10487_v24  ;;  %v10451_v53 = vld [vmem:[#allocation19 + $0xc10] sm:$0xff] }
 0x846   :  { %v13299_v22 = vpop.f32.mrf.mxu0  ;;  %v13340_v46 = vpop.f32.mrf.mxu1  ;;  %13632 = vmatprep.subr.bf16.mxu1 %v15641_v31  ;;  %v15601_v35 = vcombine.high %v10459_v14, %v10463_v32  ;;  %v10455_v29 = vld [vmem:[#allocation19 + $0xc30] sm:$0xff]  ;;  %v15472_v31 = vcombine.low %v10331_v43, %v10335_v41  ;;  %v15600_v48 = vcombine.low %v10459_v14, %v10463_v32 }
 0x847   :  { %v19818_v57 = vadd.f32 %v13338_v11, %v13298_v60  ;;  %13592 = vmatpush1.bf16.msra.mxu0 %v15512_v38  ;;  %v15593_v21 = vcombine.high %v10451_v53, %v10455_v29  ;;  %v10443_v38 = vld [vmem:[#allocation19 + $0xbd0] sm:$0xff]  ;;  %v15592_v60 = vcombine.low %v10451_v53, %v10455_v29 }
 0x848   :  { %13633 = vmatpush1.bf16.msra.mxu1 %v15640_v23  ;;  %v13300_v10 = vpop.f32.mrf.mxu0  ;;  %v13341_v12 = vpop.f32.mrf.mxu1  ;;  %13593 = vmatprep.subr.bf16.mxu0 %v15505_v9  ;;  %v10447_v44 = vld [vmem:[#allocation19 + $0xbf0] sm:$0xff]  ;;  %v15464_v9 = vcombine.low %v10323_v17, %v10327_v47 }
 0x849   :  { %13634 = vmatprep.subr.bf16.mxu1 %v15633_v37  ;;  %v10571_v11 = vld [vmem:[#allocation19 + $0xfd0] sm:$0xff]  ;;  %v15585_v37 = vcombine.high %v10443_v38, %v10447_v44  ;;  %v15584_v24 = vcombine.low %v10443_v38, %v10447_v44 }
 0x84a   :  { %v10575_v23 = vld [vmem:[#allocation19 + $0xff0] sm:$0xff] }
 0x84b   :  { %13594 = vmatpush1.bf16.msra.mxu0 %v15504_v16  ;;  %v15713_v49 = vcombine.high %v10571_v11, %v10575_v23  ;;  %v10435_v20 = vld [vmem:[#allocation19 + $0xb90] sm:$0xff]  ;;  %v15712_v16 = vcombine.low %v10571_v11, %v10575_v23 }
 0x84c   :  { %13635 = vmatpush1.bf16.msra.mxu1 %v15632_v54  ;;  %13595 = vmatprep.subr.bf16.mxu0 %v15497_v62  ;;  %v10439_v22 = vld [vmem:[#allocation19 + $0xbb0] sm:$0xff] }
 0x84d   :  { %13636 = vmatprep.subr.bf16.mxu1 %v15625_v27  ;;  %v10563_v46 = vld [vmem:[#allocation19 + $0xf90] sm:$0xff]  ;;  %v15577_v10 = vcombine.high %v10435_v20, %v10439_v22  ;;  %v15576_v15 = vcombine.low %v10435_v20, %v10439_v22 }
 0x84e   :  { %v10567_v1 = vld [vmem:[#allocation19 + $0xfb0] sm:$0xff] }
 0x84f   :  { %13596 = vmatpush1.bf16.msra.mxu0 %v15496_v34  ;;  %v15705_v12 = vcombine.high %v10563_v46, %v10567_v1  ;;  %v10427_v54 = vld [vmem:[#allocation19 + $0xb50] sm:$0xff]  ;;  %v15704_v18 = vcombine.low %v10563_v46, %v10567_v1 }
 0x850   :  { %13637 = vmatpush1.bf16.msra.mxu1 %v15624_v2  ;;  %13597 = vmatprep.subr.bf16.mxu0 %v15489_v4  ;;  %v10431_v62 = vld [vmem:[#allocation19 + $0xb70] sm:$0xff] }
 0x851   :  { %13638 = vmatprep.subr.bf16.mxu1 %v15617_v56  ;;  %v10555_v27 = vld [vmem:[#allocation19 + $0xf50] sm:$0xff]  ;;  %v15569_v3 = vcombine.high %v10427_v54, %v10431_v62  ;;  %v15568_v42 = vcombine.low %v10427_v54, %v10431_v62  ;;  %v10256_v54 = vld [vmem:[#allocation19 + $0x5f8] sm:$0xff] }
 0x852   :  { %v15697_v34 = vcombine.high %v10555_v27, %v10559_v7  ;;  %v10419_v2 = vld [vmem:[#allocation19 + $0xb10] sm:$0xff]  ;;  %v15696_v59 = vcombine.low %v10555_v27, %v10559_v7 }
 0x853   :  { %13598 = vmatpush1.bf16.msra.mxu0 %v15488_v19  ;;  %v10423_v4 = vld [vmem:[#allocation19 + $0xb30] sm:$0xff] }
 0x854   :  { %13639 = vmatpush1.bf16.msra.mxu1 %v15616_v5  ;;  %13599 = vmatprep.subr.bf16.mxu0 %v15481_v8  ;;  %v10547_v56 = vld [vmem:[#allocation19 + $0xf10] sm:$0xff]  ;;  %v15561_v58 = vcombine.high %v10419_v2, %v10423_v4  ;;  %v15560_v41 = vcombine.low %v10419_v2, %v10423_v4 }
 0x855   :  { %13640 = vmatprep.subr.bf16.mxu1 %v15609_v25  ;;  %v15689_v19 = vcombine.high %v10547_v56, %v10551_v6  ;;  %v10411_v5 = vld [vmem:[#allocation19 + $0xad0] sm:$0xff]  ;;  %v15688_v14 = vcombine.low %v10547_v56, %v10551_v6  ;;  %v10244_v56 = vld [vmem:[#allocation19 + $0x598] sm:$0xff] }
 0x856   :  { %v10415_v8 = vld [vmem:[#allocation19 + $0xaf0] sm:$0xff]  ;;  %v10248_v6 = vld [vmem:[#allocation19 + $0x5b8] sm:$0xff] }
 0x857   :  { %13600 = vmatpush1.bf16.msra.mxu0 %v15480_v51  ;;  %v10539_v25 = vld [vmem:[#allocation19 + $0xed0] sm:$0xff]  ;;  %v15553_v32 = vcombine.high %v10411_v5, %v10415_v8  ;;  %v15552_v47 = vcombine.low %v10411_v5, %v10415_v8  ;;  %v10108_v5 = vld [vmem:[#allocation19 + $0x158] sm:$0xff] }
 0x858   :  { %13641 = vmatpush1.bf16.msra.mxu1 %v15608_v50  ;;  %13601 = vmatprep.subr.bf16.mxu0 %v15473_v13  ;;  %v10543_v43 = vld [vmem:[#allocation19 + $0xef0] sm:$0xff]  ;;  %v10112_v8 = vld [vmem:[#allocation19 + $0x178] sm:$0xff] }
 0x859   :  { %13642 = vmatprep.subr.bf16.mxu1 %v15601_v35  ;;  %v15681_v51 = vcombine.high %v10539_v25, %v10543_v43  ;;  %v10403_v50 = vld [vmem:[#allocation19 + $0xa90] sm:$0xff]  ;;  %v15680_v53 = vcombine.low %v10539_v25, %v10543_v43  ;;  %v15387_v43 = vcombine.high %v10244_v56, %v10248_v6 }
 0x85a   :  { %v10407_v13 = vld [vmem:[#allocation19 + $0xab0] sm:$0xff] }
 0x85b   :  { %13602 = vmatpush1.bf16.msra.mxu0 %v15472_v31  ;;  %v10531_v35 = vld [vmem:[#allocation19 + $0xe90] sm:$0xff]  ;;  %v15545_v29 = vcombine.high %v10403_v50, %v10407_v13  ;;  %v15544_v44 = vcombine.low %v10403_v50, %v10407_v13 }
 0x85c   :  { %13643 = vmatpush1.bf16.msra.mxu1 %v15600_v48  ;;  %13603 = vmatprep.subr.bf16.mxu0 %v15465_v61  ;;  %v10535_v17 = vld [vmem:[#allocation19 + $0xeb0] sm:$0xff] }
 0x85d   :  { %13644 = vmatprep.subr.bf16.mxu1 %v15593_v21  ;;  %v15673_v31 = vcombine.high %v10531_v35, %v10535_v17  ;;  %v10395_v48 = vld [vmem:[#allocation19 + $0xa50] sm:$0xff]  ;;  %v15672_v11 = vcombine.low %v10531_v35, %v10535_v17  ;;  %v15251_v35 = vcombine.high %v10108_v5, %v10112_v8 }
 0x85e   :  { %v10399_v61 = vld [vmem:[#allocation19 + $0xa70] sm:$0xff] }
 0x85f   :  { %13604 = vmatpush1.bf16.msra.mxu0 %v15464_v9  ;;  %v10523_v21 = vld [vmem:[#allocation19 + $0xe50] sm:$0xff]  ;;  %v15537_v23 = vcombine.high %v10395_v48, %v10399_v61  ;;  %v15536_v22 = vcombine.low %v10395_v48, %v10399_v61  ;;  %v10104_v48 = vld [vmem:[#allocation19 + $0x138] sm:$0xff] }
 0x860   :  { %13645 = vmatpush1.bf16.msra.mxu1 %v15592_v60  ;;  %13605 = vmatprep.subr.bf16.mxu0 %v15585_v37  ;;  %v10527_v38 = vld [vmem:[#allocation19 + $0xe70] sm:$0xff] }
 0x861   :  { %13646 = vmatprep.subr.bf16.mxu1 %v15713_v49  ;;  %v15665_v9 = vcombine.high %v10523_v21, %v10527_v38  ;;  %v10387_v60 = vld [vmem:[#allocation19 + $0xa10] sm:$0xff]  ;;  %v15664_v46 = vcombine.low %v10523_v21, %v10527_v38  ;;  %v10228_v21 = vld [vmem:[#allocation19 + $0x518] sm:$0xff] }
 0x862   :  { %v10391_v37 = vld [vmem:[#allocation19 + $0xa30] sm:$0xff]  ;;  %v10232_v38 = vld [vmem:[#allocation19 + $0x538] sm:$0xff] }
 0x863   :  { %13606 = vmatpush2.bf16.msra.mxu0 %v15584_v24  ;;  %v10515_v49 = vld [vmem:[#allocation19 + $0xe10] sm:$0xff]  ;;  %v15529_v1 = vcombine.high %v10387_v60, %v10391_v37  ;;  %v15528_v62 = vcombine.low %v10387_v60, %v10391_v37  ;;  %v15371_v37 = vcombine.high %v10228_v21, %v10232_v38 }
 0x864   :  { %13647 = vmatpush2.bf16.msra.mxu1 %v15712_v16  ;;  %13607 = vmatprep.subr.bf16.mxu0 %v15577_v10  ;;  %v10519_v20 = vld [vmem:[#allocation19 + $0xe30] sm:$0xff]  ;;  %v10124_v16 = vld [vmem:[#allocation19 + $0x1d8] sm:$0xff] }
 0x865   :  { %13648 = vmatprep.subr.bf16.mxu1 %v15705_v12  ;;  %v15657_v24 = vcombine.high %v10515_v49, %v10519_v20  ;;  %v10128_v10 = vld [vmem:[#allocation19 + $0x1f8] sm:$0xff]  ;;  %v15656_v27 = vcombine.low %v10515_v49, %v10519_v20 }
 0x866   :  { %v10252_v12 = vld [vmem:[#allocation19 + $0x5d8] sm:$0xff]  ;;  %v15267_v7 = vcombine.high %v10124_v16, %v10128_v10  ;;  %v15266_v4 = vcombine.low %v10124_v16, %v10128_v10 }
 0x867   :  { %13608 = vmatpush2.bf16.msra.mxu0 %v15576_v15  ;;  %v15395_v15 = vcombine.high %v10252_v12, %v10256_v54  ;;  %v10092_v49 = vld [vmem:[#allocation19 + $0xd8] sm:$0xff] }
 0x868   :  { %13649 = vmatpush2.bf16.msra.mxu1 %v15704_v18  ;;  %13609 = vmatprep.subr.bf16.mxu0 %v15569_v3  ;;  %v10116_v18 = vld [vmem:[#allocation19 + $0x198] sm:$0xff] }
 0x869   :  { %13650 = vmatprep.subr.bf16.mxu1 %v15697_v34  ;;  %v10120_v3 = vld [vmem:[#allocation19 + $0x1b8] sm:$0xff] }
 0x86a   :  { %v20191_v34 = vld [vmem:[#allocation38_spill] sm:$0xff]  ;;  %v15258_v50 = vcombine.low %v10116_v18, %v10120_v3 }
 0x86b   :  { %13610 = vmatpush2.bf16.msra.mxu0 %v15568_v42  ;;  %v10590_v2 = vrot.slane %v19796_v0, %v20191_v34  ;;  %v15394_v42 = vcombine.low %v10252_v12, %v10256_v54  ;;  %v10096_v20 = vld [vmem:[#allocation19 + $0xf8] sm:$0xff] }
 0x86c   :  { %13651 = vmatpush2.bf16.msra.mxu1 %v15696_v59  ;;  %13611 = vmatprep.subr.bf16.mxu0 %v15561_v58  ;;  %v20192_v59 = vld [vmem:[#allocation40_spill] sm:$0xff]  ;;  %v15235_v16 = vcombine.high %v10092_v49, %v10096_v20  ;;  %v10084_v12 = vld [vmem:[#allocation19 + $0x98] sm:$0xff] }
 0x86d   :  { %13652 = vmatprep.subr.bf16.mxu1 %v15689_v19  ;;  %v10594_v58 = vrot.slane %v19796_v0, %v20192_v59  ;;  %v15259_v19 = vcombine.high %v10116_v18, %v10120_v3  ;;  %v15386_v0 = vcombine.low %v10244_v56, %v10248_v6  ;;  %v10088_v54 = vld [vmem:[#allocation19 + $0xb8] sm:$0xff] }
 0x86e   :  { %v15227_v18 = vcombine.high %v10084_v12, %v10088_v54  ;;  %v10076_v34 = vld [vmem:[#allocation19 + $0x58] sm:$0xff]  ;;  %v15226_v6 = vcombine.low %v10084_v12, %v10088_v54 }
 0x86f   :  { %13612 = vmatpush2.bf16.msra.mxu0 %v15560_v41  ;;  %v10236_v41 = vld [vmem:[#allocation19 + $0x558] sm:$0xff] }
 0x870   :  { %13653 = vmatpush2.bf16.msra.mxu1 %v15688_v14  ;;  %13613 = vmatprep.subr.bf16.mxu0 %v15553_v32  ;;  %v10240_v14 = vld [vmem:[#allocation19 + $0x578] sm:$0xff] }
 0x871   :  { %13654 = vmatprep.subr.bf16.mxu1 %v15681_v51  ;;  %v10208_v56 = vld [vmem:[#allocation19 + $0x478] sm:$0xff] }
 0x873   :  { %13614 = vmatpush2.bf16.msra.mxu0 %v15552_v47 }
 0x874   :  { %13655 = vmatpush2.bf16.msra.mxu1 %v15680_v53  ;;  %13615 = vmatprep.subr.bf16.mxu0 %v15545_v29  ;;  %v15379_v29 = vcombine.high %v10236_v41, %v10240_v14 }
 0x875   :  { %13656 = vmatprep.subr.bf16.mxu1 %v15673_v31  ;;  %v10100_v31 = vld [vmem:[#allocation19 + $0x118] sm:$0xff] }
 0x877   :  { %13616 = vmatpush2.bf16.msra.mxu0 %v15544_v44 }
 0x878   :  { %13657 = vmatpush2.bf16.msra.mxu1 %v15672_v11  ;;  %13617 = vmatprep.subr.bf16.mxu0 %v15537_v23  ;;  %v15250_v11 = vcombine.low %v10108_v5, %v10112_v8  ;;  %v10072_v5 = vld [vmem:[#allocation19 + $0x38] sm:$0xff] }
 0x879   :  { %13658 = vmatprep.subr.bf16.mxu1 %v15665_v9  ;;  %v15378_v9 = vcombine.low %v10236_v41, %v10240_v14  ;;  %v10196_v8 = vld [vmem:[#allocation19 + $0x418] sm:$0xff] }
 0x87b   :  { %13618 = vmatpush2.bf16.msra.mxu0 %v15536_v22  ;;  %v10220_v22 = vld [vmem:[#allocation19 + $0x4d8] sm:$0xff] }
 0x87c   :  { %13659 = vmatpush2.bf16.msra.mxu1 %v15664_v46  ;;  %13619 = vmatprep.subr.bf16.mxu0 %v15529_v1  ;;  %v10224_v46 = vld [vmem:[#allocation19 + $0x4f8] sm:$0xff]  ;;  %v15242_v1 = vcombine.low %v10100_v31, %v10104_v48 }
 0x87d   :  { %13660 = vmatprep.subr.bf16.mxu1 %v15657_v24  ;;  %v15370_v24 = vcombine.low %v10228_v21, %v10232_v38  ;;  %v15363_v10 = vcombine.high %v10220_v22, %v10224_v46  ;;  %v10312_v21 = vld [vmem:[#allocation19 + $0x7b8] sm:$0xff] }
 0x87f   :  { %13620 = vmatpush2.bf16.msra.mxu0 %v15528_v62  ;;  %v10212_v62 = vld [vmem:[#allocation19 + $0x498] sm:$0xff] }
 0x880   :  { %13661 = vmatpush2.bf16.msra.mxu1 %v15656_v27  ;;  %13671 = vmatprep.subr.bf16.mxu0 %v15267_v7  ;;  %v10216_v27 = vld [vmem:[#allocation19 + $0x4b8] sm:$0xff]  ;;  %v15234_v7 = vcombine.low %v10092_v49, %v10096_v20 }
 0x881   :  { %13712 = vmatprep.subr.bf16.mxu1 %v15395_v15  ;;  %v15362_v15 = vcombine.low %v10220_v22, %v10224_v46  ;;  %v15355_v3 = vcombine.high %v10212_v62, %v10216_v27 }
 0x882   :  { %v13377_v25 = vpop.f32.mrf.mxu0  ;;  %13622 = vmatmul.mubr.bf16.vlgmr.msra.gmra.mxu0 %v19784_v40 }
 0x883   :  { %v13378_v32 = vadd.f32 %v13377_v25, %v10590_v2  ;;  %v13418_v51 = vpop.f32.mrf.mxu1  ;;  %13663 = vmatmul.mubr.bf16.vlgmr.msra.gmra.mxu1 %v19786_v55  ;;  %13672 = vmatpush1.bf16.msra.mxu0 %v15266_v4  ;;  %v10080_v2 = vld [vmem:[#allocation19 + $0x78] sm:$0xff] }
 0x884   :  { %13703 = vmatprep.mubr.bf16.mxu0 %v19762_v52  ;;  %13713 = vmatpush1.bf16.msra.mxu1 %v15394_v42  ;;  %v13379_v13 = vpop.f32.mrf.mxu0  ;;  %v10204_v4 = vld [vmem:[#allocation19 + $0x458] sm:$0xff]  ;;  %v15354_v42 = vcombine.low %v10212_v62, %v10216_v27  ;;  %v15219_v59 = vcombine.high %v10076_v34, %v10080_v2 }
 0x885   :  { %v19827_v17 = vadd.f32 %v13418_v51, %v13378_v32  ;;  %13744 = vmatprep.mubr.bf16.mxu1 %v19764_v33  ;;  %v13380_v47 = vadd.f32 %v13379_v13, %v10594_v58  ;;  %v13420_v53 = vpop.f32.mrf.mxu1  ;;  %13673 = vmatprep.subr.bf16.mxu0 %v15259_v19  ;;  %v15243_v33 = vcombine.high %v10100_v31, %v10104_v48  ;;  %v10068_v19 = vld [vmem:[#allocation19 + $0x18] sm:$0xff] }
 0x886   :  { %v13381_v61 = vpop.f32.mrf.mxu0  ;;  %13714 = vmatprep.subr.bf16.mxu1 %v15387_v43  ;;  %v15347_v58 = vcombine.high %v10204_v4, %v10208_v56  ;;  %v10200_v25 = vld [vmem:[#allocation19 + $0x438] sm:$0xff]  ;;  %v15218_v43 = vcombine.low %v10076_v34, %v10080_v2  ;;  %v15346_v41 = vcombine.low %v10204_v4, %v10208_v56  ;;  %v15211_v14 = vcombine.high %v10068_v19, %v10072_v5 }
 0x887   :  { %v19830_v44 = vadd.f32 %v13420_v53, %v13380_v47  ;;  %v13422_v52 = vpop.f32.mrf.mxu1  ;;  %13674 = vmatpush1.bf16.msra.mxu0 %v15258_v50  ;;  %v15339_v32 = vcombine.high %v10196_v8, %v10200_v25  ;;  %v10188_v51 = vld [vmem:[#allocation19 + $0x3d8] sm:$0xff]  ;;  %v15338_v47 = vcombine.low %v10196_v8, %v10200_v25 }
 0x888   :  { %13715 = vmatpush1.bf16.msra.mxu1 %v15386_v0  ;;  %v13382_v23 = vpop.f32.mrf.mxu0  ;;  %13675 = vmatprep.subr.bf16.mxu0 %v15251_v35  ;;  %v10192_v50 = vld [vmem:[#allocation19 + $0x3f8] sm:$0xff]  ;;  %v15210_v35 = vcombine.low %v10068_v19, %v10072_v5 }
 0x889   :  { %v13423_v60 = vpop.f32.mrf.mxu1  ;;  %13716 = vmatprep.subr.bf16.mxu1 %v15379_v29  ;;  %v10316_v13 = vld [vmem:[#allocation19 + $0x7d8] sm:$0xff]  ;;  %v15331_v53 = vcombine.high %v10188_v51, %v10192_v50  ;;  %v15330_v38 = vcombine.low %v10188_v51, %v10192_v50 }
 0x88a   :  { %v10320_v0 = vld [vmem:[#allocation19 + $0x7f8] sm:$0xff] }
 0x88b   :  { %13676 = vmatpush1.bf16.msra.mxu0 %v15250_v11  ;;  %v15459_v29 = vcombine.high %v10316_v13, %v10320_v0  ;;  %v10180_v31 = vld [vmem:[#allocation19 + $0x398] sm:$0xff]  ;;  %v15458_v52 = vcombine.low %v10316_v13, %v10320_v0 }
 0x88c   :  { %13717 = vmatpush1.bf16.msra.mxu1 %v15378_v9  ;;  %13677 = vmatprep.subr.bf16.mxu0 %v15243_v33  ;;  %v10184_v48 = vld [vmem:[#allocation19 + $0x3b8] sm:$0xff] }
 0x88d   :  { %13718 = vmatprep.subr.bf16.mxu1 %v15371_v37  ;;  %v10308_v61 = vld [vmem:[#allocation19 + $0x798] sm:$0xff]  ;;  %v15323_v11 = vcombine.high %v10180_v31, %v10184_v48  ;;  %v15322_v49 = vcombine.low %v10180_v31, %v10184_v48 }
 0x88e   :  { %v15451_v23 = vcombine.high %v10308_v61, %v10312_v21  ;;  %v10172_v9 = vld [vmem:[#allocation19 + $0x358] sm:$0xff]  ;;  %v15450_v20 = vcombine.low %v10308_v61, %v10312_v21 }
 0x88f   :  { %13678 = vmatpush1.bf16.msra.mxu0 %v15242_v1  ;;  %v10176_v33 = vld [vmem:[#allocation19 + $0x378] sm:$0xff] }
 0x890   :  { %13719 = vmatpush1.bf16.msra.mxu1 %v15370_v24  ;;  %13679 = vmatprep.subr.bf16.mxu0 %v15235_v16  ;;  %v10300_v60 = vld [vmem:[#allocation19 + $0x758] sm:$0xff]  ;;  %v15315_v22 = vcombine.high %v10172_v9, %v10176_v33  ;;  %v15314_v12 = vcombine.low %v10172_v9, %v10176_v33 }
 0x891   :  { %13720 = vmatprep.subr.bf16.mxu1 %v15363_v10  ;;  %v10304_v37 = vld [vmem:[#allocation19 + $0x778] sm:$0xff] }
 0x892   :  { %v15443_v46 = vcombine.high %v10300_v60, %v10304_v37  ;;  %v10164_v1 = vld [vmem:[#allocation19 + $0x318] sm:$0xff]  ;;  %v15442_v54 = vcombine.low %v10300_v60, %v10304_v37 }
 0x893   :  { %13680 = vmatpush1.bf16.msra.mxu0 %v15234_v7  ;;  %v10168_v24 = vld [vmem:[#allocation19 + $0x338] sm:$0xff] }
 0x894   :  { %13721 = vmatpush1.bf16.msra.mxu1 %v15362_v15  ;;  %13681 = vmatprep.subr.bf16.mxu0 %v15227_v18  ;;  %v10292_v16 = vld [vmem:[#allocation19 + $0x718] sm:$0xff]  ;;  %v15307_v62 = vcombine.high %v10164_v1, %v10168_v24  ;;  %v15306_v34 = vcombine.low %v10164_v1, %v10168_v24 }
 0x895   :  { %13722 = vmatprep.subr.bf16.mxu1 %v15355_v3  ;;  %v10296_v10 = vld [vmem:[#allocation19 + $0x738] sm:$0xff] }
 0x896   :  { %v15435_v27 = vcombine.high %v10292_v16, %v10296_v10  ;;  %v10156_v7 = vld [vmem:[#allocation19 + $0x2d8] sm:$0xff]  ;;  %v15434_v2 = vcombine.low %v10292_v16, %v10296_v10 }
 0x897   :  { %13682 = vmatpush1.bf16.msra.mxu0 %v15226_v6  ;;  %v10160_v15 = vld [vmem:[#allocation19 + $0x2f8] sm:$0xff] }
 0x898   :  { %13723 = vmatpush1.bf16.msra.mxu1 %v15354_v42  ;;  %13683 = vmatprep.subr.bf16.mxu0 %v15219_v59  ;;  %v10284_v18 = vld [vmem:[#allocation19 + $0x6d8] sm:$0xff]  ;;  %v15299_v4 = vcombine.high %v10156_v7, %v10160_v15  ;;  %v15298_v19 = vcombine.low %v10156_v7, %v10160_v15 }
 0x899   :  { %13724 = vmatprep.subr.bf16.mxu1 %v15347_v58  ;;  %v10288_v3 = vld [vmem:[#allocation19 + $0x6f8] sm:$0xff] }
 0x89a   :  { %v15427_v56 = vcombine.high %v10284_v18, %v10288_v3  ;;  %v10148_v6 = vld [vmem:[#allocation19 + $0x298] sm:$0xff]  ;;  %v15426_v5 = vcombine.low %v10284_v18, %v10288_v3 }
 0x89b   :  { %13684 = vmatpush1.bf16.msra.mxu0 %v15218_v43  ;;  %v10152_v42 = vld [vmem:[#allocation19 + $0x2b8] sm:$0xff] }
 0x89c   :  { %13725 = vmatpush1.bf16.msra.mxu1 %v15346_v41  ;;  %13685 = vmatprep.subr.bf16.mxu0 %v15211_v14  ;;  %v10276_v59 = vld [vmem:[#allocation19 + $0x698] sm:$0xff]  ;;  %v15291_v8 = vcombine.high %v10148_v6, %v10152_v42  ;;  %v15290_v51 = vcombine.low %v10148_v6, %v10152_v42 }
 0x89d   :  { %13726 = vmatprep.subr.bf16.mxu1 %v15339_v32  ;;  %v10280_v58 = vld [vmem:[#allocation19 + $0x6b8] sm:$0xff] }
 0x89e   :  { %v15419_v25 = vcombine.high %v10276_v59, %v10280_v58  ;;  %v10140_v43 = vld [vmem:[#allocation19 + $0x258] sm:$0xff]  ;;  %v15418_v50 = vcombine.low %v10276_v59, %v10280_v58 }
 0x89f   :  { %13686 = vmatpush1.bf16.msra.mxu0 %v15210_v35  ;;  %v10144_v41 = vld [vmem:[#allocation19 + $0x278] sm:$0xff] }
 0x8a0   :  { %13727 = vmatpush1.bf16.msra.mxu1 %v15338_v47  ;;  %13687 = vmatprep.subr.bf16.mxu0 %v15331_v53  ;;  %v10268_v14 = vld [vmem:[#allocation19 + $0x658] sm:$0xff]  ;;  %v15283_v13 = vcombine.high %v10140_v43, %v10144_v41  ;;  %v15282_v31 = vcombine.low %v10140_v43, %v10144_v41 }
 0x8a1   :  { %13728 = vmatprep.subr.bf16.mxu1 %v15459_v29  ;;  %v10272_v32 = vld [vmem:[#allocation19 + $0x678] sm:$0xff] }
 0x8a2   :  { %v15411_v0 = vcombine.high %v10268_v14, %v10272_v32  ;;  %v10132_v35 = vld [vmem:[#allocation19 + $0x218] sm:$0xff]  ;;  %v15410_v48 = vcombine.low %v10268_v14, %v10272_v32 }
 0x8a3   :  { %13688 = vmatpush2.bf16.msra.mxu0 %v15330_v38  ;;  %v10136_v47 = vld [vmem:[#allocation19 + $0x238] sm:$0xff] }
 0x8a4   :  { %13729 = vmatpush2.bf16.msra.mxu1 %v15458_v52  ;;  %13689 = vmatprep.subr.bf16.mxu0 %v15323_v11  ;;  %v10260_v53 = vld [vmem:[#allocation19 + $0x618] sm:$0xff]  ;;  %v15275_v61 = vcombine.high %v10132_v35, %v10136_v47  ;;  %v15274_v9 = vcombine.low %v10132_v35, %v10136_v47 }
 0x8a5   :  { %13730 = vmatprep.subr.bf16.mxu1 %v15451_v23  ;;  %v10264_v29 = vld [vmem:[#allocation19 + $0x638] sm:$0xff] }
 0x8a6   :  { %v15403_v21 = vcombine.high %v10260_v53, %v10264_v29  ;;  %v10380_v38 = vld [vmem:[#allocation19 + $0x9d8] sm:$0xff]  ;;  %v15402_v33 = vcombine.low %v10260_v53, %v10264_v29 }
 0x8a7   :  { %13690 = vmatpush2.bf16.msra.mxu0 %v15322_v49  ;;  %v10384_v52 = vld [vmem:[#allocation19 + $0x9f8] sm:$0xff] }
 0x8a8   :  { %13731 = vmatpush2.bf16.msra.mxu1 %v15450_v20  ;;  %13691 = vmatprep.subr.bf16.mxu0 %v15315_v22  ;;  %v10508_v11 = vld [vmem:[#allocation19 + $0xdd8] sm:$0xff]  ;;  %v15523_v60 = vcombine.high %v10380_v38, %v10384_v52  ;;  %v15522_v22 = vcombine.low %v10380_v38, %v10384_v52 }
 0x8a9   :  { %13732 = vmatprep.subr.bf16.mxu1 %v15443_v46  ;;  %v10512_v23 = vld [vmem:[#allocation19 + $0xdf8] sm:$0xff] }
 0x8aa   :  { %v15651_v37 = vcombine.high %v10508_v11, %v10512_v23  ;;  %v10372_v49 = vld [vmem:[#allocation19 + $0x998] sm:$0xff]  ;;  %v15650_v24 = vcombine.low %v10508_v11, %v10512_v23 }
 0x8ab   :  { %13692 = vmatpush2.bf16.msra.mxu0 %v15314_v12  ;;  %v10376_v20 = vld [vmem:[#allocation19 + $0x9b8] sm:$0xff] }
 0x8ac   :  { %13733 = vmatpush2.bf16.msra.mxu1 %v15442_v54  ;;  %13693 = vmatprep.subr.bf16.mxu0 %v15307_v62  ;;  %v10500_v46 = vld [vmem:[#allocation19 + $0xd98] sm:$0xff]  ;;  %v15515_v16 = vcombine.high %v10372_v49, %v10376_v20  ;;  %v15514_v3 = vcombine.low %v10372_v49, %v10376_v20 }
 0x8ad   :  { %13734 = vmatprep.subr.bf16.mxu1 %v15435_v27  ;;  %v10504_v1 = vld [vmem:[#allocation19 + $0xdb8] sm:$0xff] }
 0x8ae   :  { %v10364_v10 = vld [vmem:[#allocation19 + $0x958] sm:$0xff]  ;;  %v15643_v62 = vcombine.high %v10500_v46, %v10504_v1 }
 0x8af   :  { %13694 = vmatpush2.bf16.msra.mxu0 %v15306_v34  ;;  %v10368_v12 = vld [vmem:[#allocation19 + $0x978] sm:$0xff] }
 0x8b0   :  { %13735 = vmatpush2.bf16.msra.mxu1 %v15434_v2  ;;  %13695 = vmatprep.subr.bf16.mxu0 %v15299_v4  ;;  %v10492_v27 = vld [vmem:[#allocation19 + $0xd58] sm:$0xff]  ;;  %v15642_v2 = vcombine.low %v10500_v46, %v10504_v1  ;;  %v15507_v4 = vcombine.high %v10364_v10, %v10368_v12 }
 0x8b1   :  { %13736 = vmatprep.subr.bf16.mxu1 %v15427_v56  ;;  %v10496_v7 = vld [vmem:[#allocation19 + $0xd78] sm:$0xff] }
 0x8b2   :  { %v10356_v6 = vld [vmem:[#allocation19 + $0x918] sm:$0xff] }
 0x8b3   :  { %13696 = vmatpush2.bf16.msra.mxu0 %v15298_v19  ;;  %v10360_v42 = vld [vmem:[#allocation19 + $0x938] sm:$0xff]  ;;  %v15506_v19 = vcombine.low %v10364_v10, %v10368_v12 }
 0x8b4   :  { %13737 = vmatpush2.bf16.msra.mxu1 %v15426_v5  ;;  %13697 = vmatprep.subr.bf16.mxu0 %v15291_v8  ;;  %v10484_v59 = vld [vmem:[#allocation19 + $0xd18] sm:$0xff]  ;;  %v15634_v8 = vcombine.low %v10492_v27, %v10496_v7 }
 0x8b5   :  { %13738 = vmatprep.subr.bf16.mxu1 %v15419_v25  ;;  %v10488_v58 = vld [vmem:[#allocation19 + $0xd38] sm:$0xff]  ;;  %v15499_v25 = vcombine.high %v10356_v6, %v10360_v42 }
 0x8b6   :  { %v10348_v41 = vld [vmem:[#allocation19 + $0x8d8] sm:$0xff] }
 0x8b7   :  { %13698 = vmatpush2.bf16.msra.mxu0 %v15290_v51  ;;  %v10352_v14 = vld [vmem:[#allocation19 + $0x8f8] sm:$0xff] }
 0x8b8   :  { %13739 = vmatpush2.bf16.msra.mxu1 %v15418_v50  ;;  %13699 = vmatprep.subr.bf16.mxu0 %v15283_v13  ;;  %v10476_v32 = vld [vmem:[#allocation19 + $0xcd8] sm:$0xff]  ;;  %v15498_v50 = vcombine.low %v10356_v6, %v10360_v42  ;;  %v15626_v13 = vcombine.low %v10484_v59, %v10488_v58 }
 0x8b9   :  { %13740 = vmatprep.subr.bf16.mxu1 %v15411_v0  ;;  %v10480_v51 = vld [vmem:[#allocation19 + $0xcf8] sm:$0xff]  ;;  %v15491_v0 = vcombine.high %v10348_v41, %v10352_v14 }
 0x8ba   :  { %v15619_v35 = vcombine.high %v10476_v32, %v10480_v51  ;;  %v10340_v47 = vld [vmem:[#allocation19 + $0x898] sm:$0xff] }
 0x8bb   :  { %13700 = vmatpush2.bf16.msra.mxu0 %v15282_v31  ;;  %v10344_v53 = vld [vmem:[#allocation19 + $0x8b8] sm:$0xff] }
 0x8bc   :  { %13741 = vmatpush2.bf16.msra.mxu1 %v15410_v48  ;;  %13701 = vmatprep.subr.bf16.mxu0 %v15275_v61  ;;  %v10468_v29 = vld [vmem:[#allocation19 + $0xc98] sm:$0xff]  ;;  %v15490_v48 = vcombine.low %v10348_v41, %v10352_v14  ;;  %v15618_v61 = vcombine.low %v10476_v32, %v10480_v51 }
 0x8bd   :  { %13742 = vmatprep.subr.bf16.mxu1 %v15403_v21  ;;  %v10472_v31 = vld [vmem:[#allocation19 + $0xcb8] sm:$0xff]  ;;  %v15483_v21 = vcombine.high %v10340_v47, %v10344_v53 }
 0x8be   :  { %v15611_v38 = vcombine.high %v10468_v29, %v10472_v31  ;;  %v10332_v52 = vld [vmem:[#allocation19 + $0x858] sm:$0xff] }
 0x8bf   :  { %13702 = vmatpush2.bf16.msra.mxu0 %v15274_v9  ;;  %v10336_v11 = vld [vmem:[#allocation19 + $0x878] sm:$0xff] }
 0x8c0   :  { %13743 = vmatpush2.bf16.msra.mxu1 %v15402_v33  ;;  %13753 = vmatprep.subr.bf16.mxu0 %v15523_v60  ;;  %v10460_v23 = vld [vmem:[#allocation19 + $0xc58] sm:$0xff]  ;;  %v15482_v33 = vcombine.low %v10340_v47, %v10344_v53  ;;  %v15610_v60 = vcombine.low %v10468_v29, %v10472_v31 }
 0x8c1   :  { %13794 = vmatprep.subr.bf16.mxu1 %v15651_v37  ;;  %v10464_v9 = vld [vmem:[#allocation19 + $0xc78] sm:$0xff]  ;;  %v15475_v37 = vcombine.high %v10332_v52, %v10336_v11 }
 0x8c2   :  { %v13459_v54 = vpop.f32.mrf.mxu0  ;;  %13704 = vmatmul.mubr.bf16.vlgmr.msra.gmra.mxu0 %v19766_v30  ;;  %v15603_v49 = vcombine.high %v10460_v23, %v10464_v9  ;;  %v10324_v20 = vld [vmem:[#allocation19 + $0x818] sm:$0xff] }
 0x8c3   :  { %v13460_v15 = vadd.f32 %v13459_v54, %v19827_v17  ;;  %v13500_v18 = vpop.f32.mrf.mxu1  ;;  %13745 = vmatmul.mubr.bf16.vlgmr.msra.gmra.mxu1 %v19768_v45  ;;  %13754 = vmatpush1.bf16.msra.mxu0 %v15522_v22  ;;  %v15635_v17 = vcombine.high %v10492_v27, %v10496_v7  ;;  %v10328_v22 = vld [vmem:[#allocation19 + $0x838] sm:$0xff] }
 0x8c4   :  { %13785 = vmatprep.mubr.bf16.mxu0 %v19774_v26  ;;  %13795 = vmatpush1.bf16.msra.mxu1 %v15650_v24  ;;  %v19836_v34 = vpop.f32.mrf.mxu0  ;;  %v10452_v46 = vld [vmem:[#allocation19 + $0xc18] sm:$0xff]  ;;  %v15474_v24 = vcombine.low %v10332_v52, %v10336_v11  ;;  %v15467_v10 = vcombine.high %v10324_v20, %v10328_v22 }
 0x8c5   :  { %v19838_v56 = vadd.f32 %v13500_v18, %v13460_v15  ;;  %13826 = vmatprep.mubr.bf16.mxu1 %v19776_v39  ;;  %v19841_v30 = vpop.f32.mrf.mxu1  ;;  %13755 = vmatprep.subr.bf16.mxu0 %v15515_v16  ;;  %v15627_v39 = vcombine.high %v10484_v59, %v10488_v58  ;;  %v10456_v1 = vld [vmem:[#allocation19 + $0xc38] sm:$0xff]  ;;  %v15602_v16 = vcombine.low %v10460_v23, %v10464_v9 }
 0x8c6   :  { %v13463_v45 = vpop.f32.mrf.mxu0  ;;  %13796 = vmatprep.subr.bf16.mxu1 %v15643_v62  ;;  %v15595_v12 = vcombine.high %v10452_v46, %v10456_v1  ;;  %v10444_v54 = vld [vmem:[#allocation19 + $0xbd8] sm:$0xff]  ;;  %v15466_v15 = vcombine.low %v10324_v20, %v10328_v22  ;;  %v15594_v18 = vcombine.low %v10452_v46, %v10456_v1 }
 0x8c7   :  { %v13504_v26 = vpop.f32.mrf.mxu1  ;;  %13756 = vmatpush1.bf16.msra.mxu0 %v15514_v3  ;;  %v10448_v62 = vld [vmem:[#allocation19 + $0xbf8] sm:$0xff] }
 0x8c8   :  { %13797 = vmatpush1.bf16.msra.mxu1 %v15642_v2  ;;  %v13464_v5 = vpop.f32.mrf.mxu0  ;;  %13757 = vmatprep.subr.bf16.mxu0 %v15507_v4  ;;  %v10572_v27 = vld [vmem:[#allocation19 + $0xfd8] sm:$0xff]  ;;  %v15587_v3 = vcombine.high %v10444_v54, %v10448_v62  ;;  %v15586_v45 = vcombine.low %v10444_v54, %v10448_v62 }
 0x8c9   :  { %v13505_v43 = vpop.f32.mrf.mxu1  ;;  %13798 = vmatprep.subr.bf16.mxu1 %v15635_v17  ;;  %v10576_v7 = vld [vmem:[#allocation19 + $0xff8] sm:$0xff] }
 0x8ca   :  { %v15715_v2 = vcombine.high %v10572_v27, %v10576_v7  ;;  %v10436_v4 = vld [vmem:[#allocation19 + $0xb98] sm:$0xff]  ;;  %v15714_v59 = vcombine.low %v10572_v27, %v10576_v7 }
 0x8cb   :  { %13758 = vmatpush1.bf16.msra.mxu0 %v15506_v19  ;;  %v10440_v17 = vld [vmem:[#allocation19 + $0xbb8] sm:$0xff] }
 0x8cc   :  { %13799 = vmatpush1.bf16.msra.mxu1 %v15634_v8  ;;  %13759 = vmatprep.subr.bf16.mxu0 %v15499_v25  ;;  %v10564_v6 = vld [vmem:[#allocation19 + $0xf98] sm:$0xff]  ;;  %v15579_v58 = vcombine.high %v10436_v4, %v10440_v17  ;;  %v15578_v43 = vcombine.low %v10436_v4, %v10440_v17 }
 0x8cd   :  { %13800 = vmatprep.subr.bf16.mxu1 %v15627_v39  ;;  %v10568_v42 = vld [vmem:[#allocation19 + $0xfb8] sm:$0xff] }
 0x8ce   :  { %v15707_v26 = vcombine.high %v10564_v6, %v10568_v42  ;;  %v10428_v19 = vld [vmem:[#allocation19 + $0xb58] sm:$0xff]  ;;  %v15706_v39 = vcombine.low %v10564_v6, %v10568_v42 }
 0x8cf   :  { %13760 = vmatpush1.bf16.msra.mxu0 %v15498_v50  ;;  %v10432_v5 = vld [vmem:[#allocation19 + $0xb78] sm:$0xff] }
 0x8d0   :  { %13801 = vmatpush1.bf16.msra.mxu1 %v15626_v13  ;;  %13761 = vmatprep.subr.bf16.mxu0 %v15491_v0  ;;  %v10556_v8 = vld [vmem:[#allocation19 + $0xf58] sm:$0xff]  ;;  %v15571_v41 = vcombine.high %v10428_v19, %v10432_v5  ;;  %v15570_v0 = vcombine.low %v10428_v19, %v10432_v5  ;;  %v19847_v19 = vld [vmem:[#allocation20] sm:$0xff] }
 0x8d1   :  { %13802 = vmatprep.subr.bf16.mxu1 %v15619_v35  ;;  %v10560_v25 = vld [vmem:[#allocation19 + $0xf78] sm:$0xff] }
 0x8d2   :  { %v15699_v14 = vcombine.high %v10556_v8, %v10560_v25  ;;  %v10420_v32 = vld [vmem:[#allocation19 + $0xb18] sm:$0xff]  ;;  %v15698_v35 = vcombine.low %v10556_v8, %v10560_v25 }
 0x8d3   :  { %13762 = vmatpush1.bf16.msra.mxu0 %v15490_v48  ;;  %v10424_v51 = vld [vmem:[#allocation19 + $0xb38] sm:$0xff] }
 0x8d4   :  { %13803 = vmatpush1.bf16.msra.mxu1 %v15618_v61  ;;  %13763 = vmatprep.subr.bf16.mxu0 %v15483_v21  ;;  %v10548_v50 = vld [vmem:[#allocation19 + $0xf18] sm:$0xff]  ;;  %v15563_v47 = vcombine.high %v10420_v32, %v10424_v51  ;;  %v15562_v21 = vcombine.low %v10420_v32, %v10424_v51 }
 0x8d5   :  { %13804 = vmatprep.subr.bf16.mxu1 %v15611_v38  ;;  %v10552_v13 = vld [vmem:[#allocation19 + $0xf38] sm:$0xff] }
 0x8d6   :  { %v15691_v53 = vcombine.high %v10548_v50, %v10552_v13  ;;  %v10412_v29 = vld [vmem:[#allocation19 + $0xad8] sm:$0xff]  ;;  %v15690_v38 = vcombine.low %v10548_v50, %v10552_v13  ;;  %v16007_v50 = vld [vmem:[#allocation22 + $0x60] ss:$8 sps:$4 sm:$0xff]  }
 0x8d7   :  { %13764 = vmatpush1.bf16.msra.mxu0 %v15482_v33  ;;  %v10416_v31 = vld [vmem:[#allocation19 + $0xaf8] sm:$0xff] }
 0x8d8   :  { %13805 = vmatpush1.bf16.msra.mxu1 %v15610_v60  ;;  %13765 = vmatprep.subr.bf16.mxu0 %v15475_v37  ;;  %v10540_v48 = vld [vmem:[#allocation19 + $0xed8] sm:$0xff]  ;;  %v15555_v52 = vcombine.high %v10412_v29, %v10416_v31  ;;  %v15554_v37 = vcombine.low %v10412_v29, %v10416_v31 }
 0x8d9   :  { %13806 = vmatprep.subr.bf16.mxu1 %v15603_v49  ;;  %v10544_v61 = vld [vmem:[#allocation19 + $0xef8] sm:$0xff] }
 0x8da   :  { %v15683_v11 = vcombine.high %v10540_v48, %v10544_v61  ;;  %v10404_v23 = vld [vmem:[#allocation19 + $0xa98] sm:$0xff]  ;;  %v15682_v49 = vcombine.low %v10540_v48, %v10544_v61 }
 0x8db   :  { %13766 = vmatpush1.bf16.msra.mxu0 %v15474_v24  ;;  %v10408_v9 = vld [vmem:[#allocation19 + $0xab8] sm:$0xff] }
 0x8dc   :  { %13807 = vmatpush1.bf16.msra.mxu1 %v15602_v16  ;;  %13767 = vmatprep.subr.bf16.mxu0 %v15467_v10  ;;  %v10532_v33 = vld [vmem:[#allocation19 + $0xe98] sm:$0xff]  ;;  %v15547_v20 = vcombine.high %v10404_v23, %v10408_v9  ;;  %v15546_v10 = vcombine.low %v10404_v23, %v10408_v9  ;;  %v16022_v23 = vld [vmem:[#allocation22 + $0x140] ss:$8 sps:$4 sm:$0xff]  }
 0x8dd   :  { %13808 = vmatprep.subr.bf16.mxu1 %v15595_v12  ;;  %v10536_v60 = vld [vmem:[#allocation19 + $0xeb8] sm:$0xff] }
 0x8de   :  { %v15675_v22 = vcombine.high %v10532_v33, %v10536_v60  ;;  %v10396_v46 = vld [vmem:[#allocation19 + $0xa58] sm:$0xff]  ;;  %v15674_v12 = vcombine.low %v10532_v33, %v10536_v60 }
 0x8df   :  { %13768 = vmatpush1.bf16.msra.mxu0 %v15466_v15  ;;  %v10400_v1 = vld [vmem:[#allocation19 + $0xa78] sm:$0xff] }
 0x8e0   :  { %13809 = vmatpush1.bf16.msra.mxu1 %v15594_v18  ;;  %13769 = vmatprep.subr.bf16.mxu0 %v15587_v3  ;;  %v10524_v24 = vld [vmem:[#allocation19 + $0xe58] sm:$0xff]  ;;  %v15539_v54 = vcombine.high %v10396_v46, %v10400_v1  ;;  %v13462_v3 = vadd.f32 %v19836_v34, %v19830_v44  ;;  %v13836_v44 = vmax.f32 %v19818_v57, 0.0 }
 0x8e1   :  { %13810 = vmatprep.subr.bf16.mxu1 %v15715_v2  ;;  %v10528_v16 = vld [vmem:[#allocation19 + $0xe78] sm:$0xff]  ;;  %v15538_v2 = vcombine.low %v10396_v46, %v10400_v1  ;;  %v16034_v46 = vld [vmem:[#allocation22 + $0x120] ss:$8 sps:$4 sm:$0xff]  }
 0x8e2   :  { %v15667_v62 = vcombine.high %v10524_v24, %v10528_v16  ;;  %v10388_v27 = vld [vmem:[#allocation19 + $0xa18] sm:$0xff]  ;;  %v15666_v4 = vcombine.low %v10524_v24, %v10528_v16  ;;  %v13503_v42 = vadd.f32 %v19841_v30, %v13462_v3 }
 0x8e3   :  { %13770 = vmatpush2.bf16.msra.mxu0 %v15586_v45  ;;  %v10392_v7 = vld [vmem:[#allocation19 + $0xa38] sm:$0xff] }
 0x8e4   :  { %13811 = vmatpush2.bf16.msra.mxu1 %v15714_v59  ;;  %13771 = vmatprep.subr.bf16.mxu0 %v15579_v58  ;;  %v10516_v15 = vld [vmem:[#allocation19 + $0xe18] sm:$0xff]  ;;  %v15531_v17 = vcombine.high %v10388_v27, %v10392_v7  ;;  %v15530_v45 = vcombine.low %v10388_v27, %v10392_v7  ;;  %v13838_v34 = vmax.f32 %v13503_v42, 0.0  ;;  %v16046_v27 = vld [vmem:[#allocation22 + $0x100] ss:$8 sps:$4 sm:$0xff]  }
 0x8e5   :  { %13812 = vmatprep.subr.bf16.mxu1 %v15707_v26  ;;  %v10520_v18 = vld [vmem:[#allocation19 + $0xe38] sm:$0xff] }
 0x8e6   :  { %v15659_v6 = vcombine.high %v10516_v15, %v10520_v18  ;;  %v15658_v59 = vcombine.low %v10516_v15, %v10520_v18  ;;  %v16003_v58 = vld [vmem:[#allocation22 + $0x74] ss:$8 sps:$4 sm:$0xff]   ;;  %v20193_v5 = vld [vmem:[#allocation57_spill] sm:$0xff]  ;;  %v13846_v32 = vpack.c.bf16 %v13838_v34, %v13838_v34  ;;  %v16067_v34 = vld [vmem:[#allocation22 + $0xc0] ss:$8 sps:$4 sm:$0xff]  }
 0x8e7   :  { %13772 = vmatpush2.bf16.msra.mxu0 %v15578_v43  ;;  %v16006_v26 = vld [vmem:[#allocation22 + $0x174] ss:$8 sps:$4 sm:$0xff]   ;;  %v10598_v8 = vrot.slane %v19847_v19, %v20193_v5  ;;  %v16001_v25 = vld [vmem:[#allocation22 + $0x70] ss:$8 sps:$4 sm:$0xff]   ;;  %v16009_v43 = vld [vmem:[#allocation22 + $0x64] ss:$8 sps:$4 sm:$0xff]  }
 0x8e8   :  { %13813 = vmatpush2.bf16.msra.mxu1 %v15706_v39  ;;  %13773 = vmatprep.subr.bf16.mxu0 %v15571_v41  ;;  %v16004_v30 = vld [vmem:[#allocation22 + $0x170] ss:$8 sps:$4 sm:$0xff]   ;;  %v13844_v39 = vpack.c.bf16 %v13836_v44, %v13836_v44  ;;  %v16027_v9 = vld [vmem:[#allocation22 + $0x34] ss:$8 sps:$4 sm:$0xff]   ;;  %v16072_v44 = vld [vmem:[#allocation22 + $0x1c4] ss:$8 sps:$4 sm:$0xff]  }
 0x8e9   :  { %13814 = vmatprep.subr.bf16.mxu1 %v15699_v14  ;;  %v16012_v14 = vld [vmem:[#allocation22 + $0x164] ss:$8 sps:$4 sm:$0xff]   ;;  %v16016_v61 = vld [vmem:[#allocation22 + $0x150] ss:$8 sps:$4 sm:$0xff]   ;;  %v16030_v33 = vld [vmem:[#allocation22 + $0x134] ss:$8 sps:$4 sm:$0xff]  }
 0x8ea   :  { %v16025_v60 = vld [vmem:[#allocation22 + $0x30] ss:$8 sps:$4 sm:$0xff]   ;;  %v16039_v1 = vld [vmem:[#allocation22 + $0x14] ss:$8 sps:$4 sm:$0xff]   ;;  %v16070_v5 = vld [vmem:[#allocation22 + $0x1c0] ss:$8 sps:$4 sm:$0xff]  }
 0x8eb   :  { %13774 = vmatpush2.bf16.msra.mxu0 %v15570_v0  ;;  %v16010_v0 = vld [vmem:[#allocation22 + $0x160] ss:$8 sps:$4 sm:$0xff]   ;;  %v16042_v24 = vld [vmem:[#allocation22 + $0x114] ss:$8 sps:$4 sm:$0xff]   ;;  %v16037_v16 = vld [vmem:[#allocation22 + $0x10] ss:$8 sps:$4 sm:$0xff]  }
 0x8ec   :  { %13815 = vmatpush2.bf16.msra.mxu1 %v15698_v35  ;;  %13775 = vmatprep.subr.bf16.mxu0 %v15563_v47  ;;  %v16015_v35 = vld [vmem:[#allocation22 + $0x54] ss:$8 sps:$4 sm:$0xff]   ;;  %v16049_v18 = vld [vmem:[#allocation22 + $0xf0] ss:$8 sps:$4 sm:$0xff]  }
 0x8ed   :  { %13816 = vmatprep.subr.bf16.mxu1 %v15691_v53  ;;  %v16051_v7 = vld [vmem:[#allocation22 + $0xf4] ss:$8 sps:$4 sm:$0xff]   ;;  %v16052_v3 = vld [vmem:[#allocation22 + $0x1f0] ss:$8 sps:$4 sm:$0xff]  }
 0x8ee   :  { %v16054_v15 = vld [vmem:[#allocation22 + $0x1f4] ss:$8 sps:$4 sm:$0xff]  }
 0x8ef   :  { %13776 = vmatpush2.bf16.msra.mxu0 %v15562_v21  ;;  %v16021_v21 = vld [vmem:[#allocation22 + $0x44] ss:$8 sps:$4 sm:$0xff]   ;;  %v16063_v42 = vld [vmem:[#allocation22 + $0xd4] ss:$8 sps:$4 sm:$0xff]  }
 0x8f0   :  { %13817 = vmatpush2.bf16.msra.mxu1 %v15690_v38  ;;  %13777 = vmatprep.subr.bf16.mxu0 %v15555_v52  ;;  %v16024_v52 = vld [vmem:[#allocation22 + $0x144] ss:$8 sps:$4 sm:$0xff]  }
 0x8f1   :  { %13818 = vmatprep.subr.bf16.mxu1 %v15683_v11  ;;  %v16019_v11 = vld [vmem:[#allocation22 + $0x40] ss:$8 sps:$4 sm:$0xff]  }
 0x8f3   :  { %13778 = vmatpush2.bf16.msra.mxu0 %v15554_v37  ;;  %v16028_v37 = vld [vmem:[#allocation22 + $0x130] ss:$8 sps:$4 sm:$0xff]  }
 0x8f4   :  { %13819 = vmatpush2.bf16.msra.mxu1 %v15682_v49  ;;  %13779 = vmatprep.subr.bf16.mxu0 %v15547_v20  ;;  %v16033_v49 = vld [vmem:[#allocation22 + $0x24] ss:$8 sps:$4 sm:$0xff]  }
 0x8f5   :  { %13820 = vmatprep.subr.bf16.mxu1 %v15675_v22  ;;  %v16036_v20 = vld [vmem:[#allocation22 + $0x124] ss:$8 sps:$4 sm:$0xff]   ;;  %v16031_v22 = vld [vmem:[#allocation22 + $0x20] ss:$8 sps:$4 sm:$0xff]  }
 0x8f7   :  { %13780 = vmatpush2.bf16.msra.mxu0 %v15546_v10  ;;  %v16040_v10 = vld [vmem:[#allocation22 + $0x110] ss:$8 sps:$4 sm:$0xff]  }
 0x8f8   :  { %13821 = vmatpush2.bf16.msra.mxu1 %v15674_v12  ;;  %13781 = vmatprep.subr.bf16.mxu0 %v15539_v54  ;;  %v16045_v12 = vld [vmem:[#allocation22 + $0x4] ss:$8 sps:$4 sm:$0xff]  }
 0x8f9   :  { %13822 = vmatprep.subr.bf16.mxu1 %v15667_v62  ;;  %v16048_v54 = vld [vmem:[#allocation22 + $0x104] ss:$8 sps:$4 sm:$0xff]   ;;  %v16043_v62 = vld [vmem:[#allocation22] ss:$8 sps:$4 sm:$0xff]  }
 0x8fb   :  { %13782 = vmatpush2.bf16.msra.mxu0 %v15538_v2  ;;  %v16057_v2 = vld [vmem:[#allocation22 + $0xe4] ss:$8 sps:$4 sm:$0xff]  }
 0x8fc   :  { %13823 = vmatpush2.bf16.msra.mxu1 %v15666_v4  ;;  %13783 = vmatprep.subr.bf16.mxu0 %v15531_v17  ;;  %v16060_v4 = vld [vmem:[#allocation22 + $0x1e4] ss:$8 sps:$4 sm:$0xff]   ;;  %v16055_v17 = vld [vmem:[#allocation22 + $0xe0] ss:$8 sps:$4 sm:$0xff]  }
 0x8fd   :  { %13824 = vmatprep.subr.bf16.mxu1 %v15659_v6  ;;  %v16058_v6 = vld [vmem:[#allocation22 + $0x1e0] ss:$8 sps:$4 sm:$0xff]  }
 0x8ff   :  { %13784 = vmatpush2.bf16.msra.mxu0 %v15530_v45  ;;  %v16066_v45 = vld [vmem:[#allocation22 + $0x1d4] ss:$8 sps:$4 sm:$0xff]  }
 0x900   :  { %13825 = vmatpush2.bf16.msra.mxu1 %v15658_v59  ;;  %14631 = vmatprep.subr.bf16.mxu0 %v16003_v58  ;;  %v16061_v59 = vld [vmem:[#allocation22 + $0xd0] ss:$8 sps:$4 sm:$0xff]  }
 0x901   :  { %14672 = vmatprep.subr.bf16.mxu1 %v16006_v26  ;;  %v16064_v58 = vld [vmem:[#allocation22 + $0x1d0] ss:$8 sps:$4 sm:$0xff]   ;;  %v16069_v26 = vld [vmem:[#allocation22 + $0xc4] ss:$8 sps:$4 sm:$0xff]  }
 0x902   :  { %v13541_v41 = vpop.f32.mrf.mxu0  ;;  %13786 = vmatmul.mubr.bf16.vlgmr.msra.gmra.mxu0 %v19784_v40  ;;  %v16018_v40 = vld [vmem:[#allocation22 + $0x154] ss:$8 sps:$4 sm:$0xff]  }
 0x903   :  { %v13542_v57 = vadd.f32 %v13541_v41, %v10598_v8  ;;  %v13582_v51 = vpop.f32.mrf.mxu1  ;;  %13827 = vmatmul.mubr.bf16.vlgmr.msra.gmra.mxu1 %v19786_v55  ;;  %14632 = vmatpush1.bf16.msra.mxu0 %v16001_v25  ;;  %v16013_v55 = vld [vmem:[#allocation22 + $0x50] ss:$8 sps:$4 sm:$0xff]   ;;  %v16075_v8 = vld [vmem:[#allocation22 + $0xb4] ss:$8 sps:$4 sm:$0xff]   ;;  %v16084_v41 = vld [vmem:[#allocation22 + $0x1a4] ss:$8 sps:$4 sm:$0xff]  }
 0x904   :  { %14663 = vmatprep.mubr.bf16.mxu0 %v13844_v39  ;;  %14673 = vmatpush1.bf16.msra.mxu1 %v16004_v30  ;;  %v19853_v13 = vpop.f32.mrf.mxu0  ;;  %v16078_v25 = vld [vmem:[#allocation22 + $0x1b4] ss:$8 sps:$4 sm:$0xff]   ;;  %v16073_v30 = vld [vmem:[#allocation22 + $0xb0] ss:$8 sps:$4 sm:$0xff]   ;;  %v16081_v39 = vld [vmem:[#allocation22 + $0xa4] ss:$8 sps:$4 sm:$0xff]  }
 0x905   :  { %v19855_v47 = vadd.f32 %v13582_v51, %v13542_v57  ;;  %14704 = vmatprep.mubr.bf16.mxu1 %v13846_v32  ;;  %v19857_v53 = vpop.f32.mrf.mxu1  ;;  %14633 = vmatprep.subr.bf16.mxu0 %v16009_v43  ;;  %v16076_v43 = vld [vmem:[#allocation22 + $0x1b0] ss:$8 sps:$4 sm:$0xff]   ;;  %v16082_v32 = vld [vmem:[#allocation22 + $0x1a0] ss:$8 sps:$4 sm:$0xff]   ;;  %v16087_v57 = vld [vmem:[#allocation22 + $0x94] ss:$8 sps:$4 sm:$0xff]  }
 0x906   :  { %v13545_v29 = vpop.f32.mrf.mxu0  ;;  %14674 = vmatprep.subr.bf16.mxu1 %v16012_v14  ;;  %v16079_v14 = vld [vmem:[#allocation22 + $0xa0] ss:$8 sps:$4 sm:$0xff]   ;;  %v16090_v51 = vld [vmem:[#allocation22 + $0x194] ss:$8 sps:$4 sm:$0xff]  }
 0x907   :  { %v13586_v31 = vpop.f32.mrf.mxu1  ;;  %14634 = vmatpush1.bf16.msra.mxu0 %v16007_v50  ;;  %v16085_v50 = vld [vmem:[#allocation22 + $0x90] ss:$8 sps:$4 sm:$0xff]   ;;  %v20194_v29 = vld [vmem:[#allocation59_spill] sm:$0xff] }
 0x908   :  { %14675 = vmatpush1.bf16.msra.mxu1 %v16010_v0  ;;  %v13546_v48 = vpop.f32.mrf.mxu0  ;;  %14635 = vmatprep.subr.bf16.mxu0 %v16015_v35  ;;  %v16088_v0 = vld [vmem:[#allocation22 + $0x190] ss:$8 sps:$4 sm:$0xff]   ;;  %v16093_v35 = vld [vmem:[#allocation22 + $0x84] ss:$8 sps:$4 sm:$0xff]   ;;  %v10602_v31 = vrot.slane %v19847_v19, %v20194_v29  ;;  %v16124_v29 = vld [vmem:[#allocation22 + $0x2e0] ss:$8 sps:$4 sm:$0xff]  }
 0x909   :  { %v13587_v38 = vpop.f32.mrf.mxu1  ;;  %14676 = vmatprep.subr.bf16.mxu1 %v16018_v40  ;;  %v16096_v40 = vld [vmem:[#allocation22 + $0x184] ss:$8 sps:$4 sm:$0xff]   ;;  %v13835_v48 = vmax.f32 %v19814_v36, 0.0 }
 0x90a   :  { %v13837_v38 = vmax.f32 %v19838_v56, 0.0  ;;  %v16150_v36 = vld [vmem:[#allocation22 + $0x364] ss:$8 sps:$4 sm:$0xff]  }
 0x90b   :  { %14636 = vmatpush1.bf16.msra.mxu0 %v16013_v55  ;;  %v16091_v55 = vld [vmem:[#allocation22 + $0x80] ss:$8 sps:$4 sm:$0xff]  }
 0x90c   :  { %14677 = vmatpush1.bf16.msra.mxu1 %v16016_v61  ;;  %14637 = vmatprep.subr.bf16.mxu0 %v16021_v21  ;;  %v16094_v61 = vld [vmem:[#allocation22 + $0x180] ss:$8 sps:$4 sm:$0xff]   ;;  %v16099_v21 = vld [vmem:[#allocation22 + $0x274] ss:$8 sps:$4 sm:$0xff]  }
 0x90d   :  { %14678 = vmatprep.subr.bf16.mxu1 %v16024_v52  ;;  %v16147_v52 = vld [vmem:[#allocation22 + $0x374] ss:$8 sps:$4 sm:$0xff]  }
 0x90f   :  { %14638 = vmatpush1.bf16.msra.mxu0 %v16019_v11  ;;  %v13544_v11 = vadd.f32 %v19853_v13, %v10602_v31  ;;  %v16100_v13 = vld [vmem:[#allocation22 + $0x260] ss:$8 sps:$4 sm:$0xff]   ;;  %v16129_v31 = vld [vmem:[#allocation22 + $0x2d4] ss:$8 sps:$4 sm:$0xff]  }
 0x910   :  { %14679 = vmatpush1.bf16.msra.mxu1 %v16022_v23  ;;  %14639 = vmatprep.subr.bf16.mxu0 %v16027_v9  ;;  %v16097_v23 = vld [vmem:[#allocation22 + $0x270] ss:$8 sps:$4 sm:$0xff]   ;;  %v13843_v9 = vpack.c.bf16 %v13835_v48, %v13835_v48  ;;  %v16177_v48 = vld [vmem:[#allocation22 + $0x3d4] ss:$8 sps:$4 sm:$0xff]  }
 0x911   :  { %14680 = vmatprep.subr.bf16.mxu1 %v16030_v33  ;;  %v16102_v33 = vld [vmem:[#allocation22 + $0x264] ss:$8 sps:$4 sm:$0xff]  }
 0x913   :  { %14640 = vmatpush1.bf16.msra.mxu0 %v16025_v60  ;;  %v16145_v60 = vld [vmem:[#allocation22 + $0x370] ss:$8 sps:$4 sm:$0xff]  }
 0x914   :  { %14681 = vmatpush1.bf16.msra.mxu1 %v16028_v37  ;;  %14641 = vmatprep.subr.bf16.mxu0 %v16033_v49  ;;  %v13845_v37 = vpack.c.bf16 %v13837_v38, %v13837_v38  ;;  %v16175_v38 = vld [vmem:[#allocation22 + $0x3d0] ss:$8 sps:$4 sm:$0xff]  }
 0x915   :  { %14682 = vmatprep.subr.bf16.mxu1 %v16036_v20  ;;  %v13585_v20 = vadd.f32 %v19857_v53, %v13544_v11  ;;  %v16130_v11 = vld [vmem:[#allocation22 + $0x2c0] ss:$8 sps:$4 sm:$0xff]  }
 0x917   :  { %14642 = vmatpush1.bf16.msra.mxu0 %v16031_v22 }
 0x918   :  { %14683 = vmatpush1.bf16.msra.mxu1 %v16034_v46  ;;  %14643 = vmatprep.subr.bf16.mxu0 %v16039_v1  ;;  %v16105_v46 = vld [vmem:[#allocation22 + $0x254] ss:$8 sps:$4 sm:$0xff]   ;;  %v16148_v1 = vld [vmem:[#allocation22 + $0x360] ss:$8 sps:$4 sm:$0xff]  }
 0x919   :  { %14684 = vmatprep.subr.bf16.mxu1 %v16042_v24 }
 0x91b   :  { %14644 = vmatpush1.bf16.msra.mxu0 %v16037_v16 }
 0x91c   :  { %14685 = vmatpush1.bf16.msra.mxu1 %v16040_v10  ;;  %14645 = vmatprep.subr.bf16.mxu0 %v16045_v12  ;;  %v16153_v10 = vld [vmem:[#allocation22 + $0x354] ss:$8 sps:$4 sm:$0xff]  }
 0x91d   :  { %14686 = vmatprep.subr.bf16.mxu1 %v16048_v54 }
 0x91f   :  { %14646 = vmatpush1.bf16.msra.mxu0 %v16043_v62 }
 0x920   :  { %14687 = vmatpush1.bf16.msra.mxu1 %v16046_v27  ;;  %14647 = vmatprep.subr.bf16.mxu0 %v16051_v7  ;;  %v16103_v27 = vld [vmem:[#allocation22 + $0x250] ss:$8 sps:$4 sm:$0xff]   ;;  %v16108_v7 = vld [vmem:[#allocation22 + $0x244] ss:$8 sps:$4 sm:$0xff]  }
 0x921   :  { %14688 = vmatprep.subr.bf16.mxu1 %v16054_v15  ;;  %v16151_v15 = vld [vmem:[#allocation22 + $0x350] ss:$8 sps:$4 sm:$0xff]  }
 0x923   :  { %14648 = vmatpush2.bf16.msra.mxu0 %v16049_v18 }
 0x924   :  { %14689 = vmatpush2.bf16.msra.mxu1 %v16052_v3  ;;  %14649 = vmatprep.subr.bf16.mxu0 %v16057_v2  ;;  %v16156_v2 = vld [vmem:[#allocation22 + $0x344] ss:$8 sps:$4 sm:$0xff]  }
 0x925   :  { %14690 = vmatprep.subr.bf16.mxu1 %v16060_v4 }
 0x927   :  { %14650 = vmatpush2.bf16.msra.mxu0 %v16055_v17  ;;  %v16106_v17 = vld [vmem:[#allocation22 + $0x240] ss:$8 sps:$4 sm:$0xff]  }
 0x928   :  { %14691 = vmatpush2.bf16.msra.mxu1 %v16058_v6  ;;  %14651 = vmatprep.subr.bf16.mxu0 %v16063_v42  ;;  %v16111_v6 = vld [vmem:[#allocation22 + $0x234] ss:$8 sps:$4 sm:$0xff]   ;;  %v16154_v42 = vld [vmem:[#allocation22 + $0x340] ss:$8 sps:$4 sm:$0xff]  }
 0x929   :  { %14692 = vmatprep.subr.bf16.mxu1 %v16066_v45  ;;  %v16159_v45 = vld [vmem:[#allocation22 + $0x334] ss:$8 sps:$4 sm:$0xff]  }
 0x92b   :  { %14652 = vmatpush2.bf16.msra.mxu0 %v16061_v59  ;;  %v16109_v59 = vld [vmem:[#allocation22 + $0x230] ss:$8 sps:$4 sm:$0xff]  }
 0x92c   :  { %14693 = vmatpush2.bf16.msra.mxu1 %v16064_v58  ;;  %14653 = vmatprep.subr.bf16.mxu0 %v16069_v26  ;;  %v16114_v58 = vld [vmem:[#allocation22 + $0x224] ss:$8 sps:$4 sm:$0xff]   ;;  %v16157_v26 = vld [vmem:[#allocation22 + $0x330] ss:$8 sps:$4 sm:$0xff]  }
 0x92d   :  { %14694 = vmatprep.subr.bf16.mxu1 %v16072_v44  ;;  %v16162_v44 = vld [vmem:[#allocation22 + $0x324] ss:$8 sps:$4 sm:$0xff]  }
 0x92f   :  { %14654 = vmatpush2.bf16.msra.mxu0 %v16067_v34  ;;  %v16112_v34 = vld [vmem:[#allocation22 + $0x220] ss:$8 sps:$4 sm:$0xff]  }
 0x930   :  { %14695 = vmatpush2.bf16.msra.mxu1 %v16070_v5  ;;  %14655 = vmatprep.subr.bf16.mxu0 %v16075_v8  ;;  %v16117_v5 = vld [vmem:[#allocation22 + $0x214] ss:$8 sps:$4 sm:$0xff]   ;;  %v16160_v8 = vld [vmem:[#allocation22 + $0x320] ss:$8 sps:$4 sm:$0xff]  }
 0x931   :  { %14696 = vmatprep.subr.bf16.mxu1 %v16078_v25  ;;  %v16165_v25 = vld [vmem:[#allocation22 + $0x314] ss:$8 sps:$4 sm:$0xff]  }
 0x933   :  { %14656 = vmatpush2.bf16.msra.mxu0 %v16073_v30  ;;  %v16115_v30 = vld [vmem:[#allocation22 + $0x210] ss:$8 sps:$4 sm:$0xff]  }
 0x934   :  { %14697 = vmatpush2.bf16.msra.mxu1 %v16076_v43  ;;  %14657 = vmatprep.subr.bf16.mxu0 %v16081_v39  ;;  %v16120_v43 = vld [vmem:[#allocation22 + $0x204] ss:$8 sps:$4 sm:$0xff]   ;;  %v16163_v39 = vld [vmem:[#allocation22 + $0x310] ss:$8 sps:$4 sm:$0xff]  }
 0x935   :  { %14698 = vmatprep.subr.bf16.mxu1 %v16084_v41  ;;  %v16168_v41 = vld [vmem:[#allocation22 + $0x304] ss:$8 sps:$4 sm:$0xff]  }
 0x937   :  { %14658 = vmatpush2.bf16.msra.mxu0 %v16079_v14  ;;  %v16118_v14 = vld [vmem:[#allocation22 + $0x200] ss:$8 sps:$4 sm:$0xff]  }
 0x938   :  { %14699 = vmatpush2.bf16.msra.mxu1 %v16082_v32  ;;  %14659 = vmatprep.subr.bf16.mxu0 %v16087_v57  ;;  %v16123_v32 = vld [vmem:[#allocation22 + $0x2f4] ss:$8 sps:$4 sm:$0xff]   ;;  %v16166_v57 = vld [vmem:[#allocation22 + $0x300] ss:$8 sps:$4 sm:$0xff]  }
 0x939   :  { %14700 = vmatprep.subr.bf16.mxu1 %v16090_v51  ;;  %v16171_v51 = vld [vmem:[#allocation22 + $0x3f4] ss:$8 sps:$4 sm:$0xff]  }
 0x93b   :  { %14660 = vmatpush2.bf16.msra.mxu0 %v16085_v50  ;;  %v16121_v50 = vld [vmem:[#allocation22 + $0x2f0] ss:$8 sps:$4 sm:$0xff]  }
 0x93c   :  { %14701 = vmatpush2.bf16.msra.mxu1 %v16088_v0  ;;  %14661 = vmatprep.subr.bf16.mxu0 %v16093_v35  ;;  %v16126_v0 = vld [vmem:[#allocation22 + $0x2e4] ss:$8 sps:$4 sm:$0xff]   ;;  %v16169_v35 = vld [vmem:[#allocation22 + $0x3f0] ss:$8 sps:$4 sm:$0xff]  }
 0x93d   :  { %14702 = vmatprep.subr.bf16.mxu1 %v16096_v40  ;;  %v16174_v40 = vld [vmem:[#allocation22 + $0x3e4] ss:$8 sps:$4 sm:$0xff]  }
 0x93f   :  { %14662 = vmatpush2.bf16.msra.mxu0 %v16091_v55  ;;  %v16172_v55 = vld [vmem:[#allocation22 + $0x3e0] ss:$8 sps:$4 sm:$0xff]  }
 0x940   :  { %14703 = vmatpush2.bf16.msra.mxu1 %v16094_v61  ;;  %14713 = vmatprep.subr.bf16.mxu0 %v16099_v21  ;;  %v16127_v61 = vld [vmem:[#allocation22 + $0x2d0] ss:$8 sps:$4 sm:$0xff]   ;;  %v16132_v21 = vld [vmem:[#allocation22 + $0x2c4] ss:$8 sps:$4 sm:$0xff]  }
 0x941   :  { %14754 = vmatprep.subr.bf16.mxu1 %v16147_v52  ;;  %v16180_v52 = vld [vmem:[#allocation22 + $0x3c4] ss:$8 sps:$4 sm:$0xff]  }
 0x942   :  { %v19864_v49 = vpop.f32.mrf.mxu0  ;;  %14664 = vmatmul.mubr.bf16.vlgmr.msra.gmra.mxu0 %v13843_v9  ;;  %v16178_v9 = vld [vmem:[#allocation22 + $0x3c0] ss:$8 sps:$4 sm:$0xff]  }
 0x943   :  { %v19867_v56 = vpop.f32.mrf.mxu1  ;;  %14705 = vmatmul.mubr.bf16.vlgmr.msra.gmra.mxu1 %v13845_v37  ;;  %14714 = vmatpush1.bf16.msra.mxu0 %v16097_v23  ;;  %v16135_v23 = vld [vmem:[#allocation22 + $0x2b4] ss:$8 sps:$4 sm:$0xff]   ;;  %v16138_v37 = vld [vmem:[#allocation22 + $0x2a4] ss:$8 sps:$4 sm:$0xff]  }
 0x944   :  { %v13625_v22 = vpop.f32.mrf.mxu0  ;;  %14715 = vmatprep.subr.bf16.mxu0 %v16102_v33  ;;  %14755 = vmatpush1.bf16.msra.mxu1 %v16145_v60  ;;  %v16183_v33 = vld [vmem:[#allocation22 + $0x3b4] ss:$8 sps:$4 sm:$0xff]   ;;  %v16133_v60 = vld [vmem:[#allocation22 + $0x2b0] ss:$8 sps:$4 sm:$0xff]  }
 0x945   :  { %v13626_v24 = vadd.f32 %v13625_v22, %v13585_v20  ;;  %v13666_v16 = vpop.f32.mrf.mxu1  ;;  %14756 = vmatprep.subr.bf16.mxu1 %v16150_v36  ;;  %v16181_v36 = vld [vmem:[#allocation22 + $0x3b0] ss:$8 sps:$4 sm:$0xff]   ;;  %v16186_v20 = vld [vmem:[#allocation22 + $0x3a4] ss:$8 sps:$4 sm:$0xff]   ;;  %v13624_v22 = vadd.f32 %v19864_v49, %v19855_v47  ;;  %v16190_v47 = vld [vmem:[#allocation22 + $0x380] ss:$8 sps:$4 sm:$0xff]  }
 0x946   :  { %v13627_v12 = vpop.f32.mrf.mxu0 }
 0x947   :  { %v13667_v54 = vadd.f32 %v13666_v16, %v13626_v24  ;;  %v13668_v62 = vpop.f32.mrf.mxu1  ;;  %14716 = vmatpush1.bf16.msra.mxu0 %v16100_v13  ;;  %v16136_v13 = vld [vmem:[#allocation22 + $0x2a0] ss:$8 sps:$4 sm:$0xff]   ;;  %v16189_v24 = vld [vmem:[#allocation22 + $0x394] ss:$8 sps:$4 sm:$0xff]   ;;  %v16139_v16 = vld [vmem:[#allocation22 + $0x290] ss:$8 sps:$4 sm:$0xff]  }
 0x948   :  { %v13628_v53 = vpop.f32.mrf.mxu0  ;;  %14717 = vmatprep.subr.bf16.mxu0 %v16105_v46  ;;  %14757 = vmatpush1.bf16.msra.mxu1 %v16148_v1  ;;  %v16141_v46 = vld [vmem:[#allocation22 + $0x294] ss:$8 sps:$4 sm:$0xff]   ;;  %v16184_v1 = vld [vmem:[#allocation22 + $0x3a0] ss:$8 sps:$4 sm:$0xff]   ;;  %v16144_v12 = vld [vmem:[#allocation22 + $0x284] ss:$8 sps:$4 sm:$0xff]  }
 0x949   :  { %v13840_v18 = vmax.f32 %v13667_v54, 0.0  ;;  %v13669_v3 = vpop.f32.mrf.mxu1  ;;  %14758 = vmatprep.subr.bf16.mxu1 %v16153_v10  ;;  %v13665_v10 = vadd.f32 %v19867_v56, %v13624_v22  ;;  %v16187_v54 = vld [vmem:[#allocation22 + $0x390] ss:$8 sps:$4 sm:$0xff]   ;;  %v16192_v62 = vld [vmem:[#allocation22 + $0x384] ss:$8 sps:$4 sm:$0xff]  }
 0x94b   :  { %v13848_v4 = vpack.c.bf16 %v13840_v18, %v13840_v18  ;;  %14718 = vmatpush1.bf16.msra.mxu0 %v16103_v27  ;;  %v16142_v27 = vld [vmem:[#allocation22 + $0x280] ss:$8 sps:$4 sm:$0xff]   ;;  %v13839_v53 = vmax.f32 %v13665_v10, 0.0 }
 0x94c   :  { %14719 = vmatprep.subr.bf16.mxu0 %v16108_v7  ;;  %14759 = vmatpush1.bf16.msra.mxu1 %v16151_v15 }
 0x94d   :  { %14745 = vmatprep.mubr.bf16.mxu0 %v13848_v4  ;;  %14760 = vmatprep.subr.bf16.mxu1 %v16156_v2  ;;  %v13847_v49 = vpack.c.bf16 %v13839_v53, %v13839_v53  ;;  %v16205_v53 = vld [vmem:[#allocation25 + $0x48] sm:$0xff]  }
 0x94f   :  { %14720 = vmatpush1.bf16.msra.mxu0 %v16106_v17 }
 0x950   :  { %14721 = vmatprep.subr.bf16.mxu0 %v16111_v6  ;;  %14761 = vmatpush1.bf16.msra.mxu1 %v16154_v42  ;;  %v20195_v6 = vld [vmem:[#allocation58_spill] sm:$0xff] }
 0x951   :  { %14762 = vmatprep.subr.bf16.mxu1 %v16159_v45  ;;  %v10606_v42 = vrot.slane %v19847_v19, %v20195_v6  ;;  %v20196_v45 = vld [vmem:[#allocation60_spill] sm:$0xff] }
 0x953   :  { %14722 = vmatpush1.bf16.msra.mxu0 %v16109_v59  ;;  %v10610_v59 = vrot.slane %v19847_v19, %v20196_v45 }
 0x954   :  { %14723 = vmatprep.subr.bf16.mxu0 %v16114_v58  ;;  %14763 = vmatpush1.bf16.msra.mxu1 %v16157_v26 }
 0x955   :  { %14764 = vmatprep.subr.bf16.mxu1 %v16162_v44 }
 0x957   :  { %14724 = vmatpush1.bf16.msra.mxu0 %v16112_v34 }
 0x958   :  { %14725 = vmatprep.subr.bf16.mxu0 %v16117_v5  ;;  %14765 = vmatpush1.bf16.msra.mxu1 %v16160_v8 }
 0x959   :  { %14766 = vmatprep.subr.bf16.mxu1 %v16165_v25 }
 0x95b   :  { %14726 = vmatpush1.bf16.msra.mxu0 %v16115_v30 }
 0x95c   :  { %14727 = vmatprep.subr.bf16.mxu0 %v16120_v43  ;;  %14767 = vmatpush1.bf16.msra.mxu1 %v16163_v39 }
 0x95d   :  { %14768 = vmatprep.subr.bf16.mxu1 %v16168_v41 }
 0x95f   :  { %14728 = vmatpush1.bf16.msra.mxu0 %v16118_v14 }
 0x960   :  { %14729 = vmatprep.subr.bf16.mxu0 %v16123_v32  ;;  %14769 = vmatpush1.bf16.msra.mxu1 %v16166_v57 }
 0x961   :  { %14770 = vmatprep.subr.bf16.mxu1 %v16171_v51 }
 0x963   :  { %14730 = vmatpush2.bf16.msra.mxu0 %v16121_v50 }
 0x964   :  { %14731 = vmatprep.subr.bf16.mxu0 %v16126_v0  ;;  %14771 = vmatpush2.bf16.msra.mxu1 %v16169_v35  ;;  %v16193_v0 = vld [vmem:[#allocation25 + $0x78] sm:$0xff]  }
 0x965   :  { %14772 = vmatprep.subr.bf16.mxu1 %v16174_v40  ;;  %v16194_v35 = vld [vmem:[#allocation25 + $0x38] sm:$0xff]   ;;  %v16195_v40 = vld [vmem:[#allocation25 + $0x70] sm:$0xff]  }
 0x967   :  { %14732 = vmatpush2.bf16.msra.mxu0 %v16124_v29 }
 0x968   :  { %14733 = vmatprep.subr.bf16.mxu0 %v16129_v31  ;;  %14773 = vmatpush2.bf16.msra.mxu1 %v16172_v55  ;;  %v16196_v55 = vld [vmem:[#allocation25 + $0x30] sm:$0xff]  }
 0x969   :  { %14774 = vmatprep.subr.bf16.mxu1 %v16177_v48 }
 0x96b   :  { %14734 = vmatpush2.bf16.msra.mxu0 %v16127_v61  ;;  %v16197_v61 = vld [vmem:[#allocation25 + $0x68] sm:$0xff]  }
 0x96c   :  { %14735 = vmatprep.subr.bf16.mxu0 %v16132_v21  ;;  %14775 = vmatpush2.bf16.msra.mxu1 %v16175_v38  ;;  %v16198_v21 = vld [vmem:[#allocation25 + $0x28] sm:$0xff]   ;;  %v16199_v38 = vld [vmem:[#allocation25 + $0x60] sm:$0xff]  }
 0x96d   :  { %14776 = vmatprep.subr.bf16.mxu1 %v16180_v52  ;;  %v16200_v52 = vld [vmem:[#allocation25 + $0x20] sm:$0xff]  }
 0x96f   :  { %14736 = vmatpush2.bf16.msra.mxu0 %v16130_v11  ;;  %v16201_v11 = vld [vmem:[#allocation25 + $0x58] sm:$0xff]  }
 0x970   :  { %14737 = vmatprep.subr.bf16.mxu0 %v16135_v23  ;;  %14777 = vmatpush2.bf16.msra.mxu1 %v16178_v9  ;;  %v16202_v23 = vld [vmem:[#allocation25 + $0x18] sm:$0xff]   ;;  %v16203_v9 = vld [vmem:[#allocation25 + $0x50] sm:$0xff]  }
 0x971   :  { %14778 = vmatprep.subr.bf16.mxu1 %v16183_v33  ;;  %v16204_v33 = vld [vmem:[#allocation25 + $0x10] sm:$0xff]  }
 0x973   :  { %14738 = vmatpush2.bf16.msra.mxu0 %v16133_v60  ;;  %v13979_v60 = vld [vmem:[#allocation23] sm:$0x3] }
 0x974   :  { %14739 = vmatprep.subr.bf16.mxu0 %v16138_v37  ;;  %14779 = vmatpush2.bf16.msra.mxu1 %v16181_v36  ;;  %v13984_v37 = vrot.slane %v13979_v60, %v20189_v63  ;;  %v13988_v36 = vrot.slane %v13979_v60, %v20190_v28  ;;  %v16208_v63 = vld [vmem:[#allocation25] sm:$0xff]  }
 0x975   :  { %14780 = vmatprep.subr.bf16.mxu1 %v16186_v20 }
 0x977   :  { %14740 = vmatpush2.bf16.msra.mxu0 %v16136_v13 }
 0x978   :  { %14741 = vmatprep.subr.bf16.mxu0 %v16141_v46  ;;  %14781 = vmatpush2.bf16.msra.mxu1 %v16184_v1 }
 0x979   :  { %14782 = vmatprep.subr.bf16.mxu1 %v16189_v24 }
 0x97b   :  { %14742 = vmatpush2.bf16.msra.mxu0 %v16139_v16 }
 0x97c   :  { %14743 = vmatprep.subr.bf16.mxu0 %v16144_v12  ;;  %14783 = vmatpush2.bf16.msra.mxu1 %v16187_v54 }
 0x97d   :  { %14784 = vmatprep.subr.bf16.mxu1 %v16192_v62 }
 0x97f   :  { %14744 = vmatpush2.bf16.msra.mxu0 %v16142_v27 }
 0x980   :  { %14785 = vmatpush2.bf16.msra.mxu1 %v16190_v47  ;;  %15893 = vmatprep.subr.bf16.mxu0 %v16193_v0  ;;  %v16206_v47 = vld [vmem:[#allocation25 + $0x8] sm:$0xff]  }
 0x982   :  { %v13705_v7 = vpop.f32.mrf.mxu0  ;;  %14746 = vmatmul.mubr.bf16.vlgmr.msra.gmra.mxu0 %v13847_v49  ;;  %v16207_v49 = vld [vmem:[#allocation25 + $0x40] sm:$0xff]  }
 0x983   :  { %v13746_v15 = vpop.f32.mrf.mxu1  ;;  %v13706_v58 = vadd.f32 %v13705_v7, %v10606_v42  ;;  %15894 = vmatpush3.bf16.msra.mxu0 %v16194_v35 }
 0x984   :  { %v13707_v56 = vpop.f32.mrf.mxu0  ;;  %15895 = vmatprep.subr.bf16.mxu0 %v16195_v40 }
 0x985   :  { %v13748_v18 = vpop.f32.mrf.mxu1  ;;  %v13708_v26 = vadd.f32 %v13707_v56, %v10610_v59  ;;  %v13747_v44 = vadd.f32 %v13746_v15, %v13706_v58 }
 0x986   :  { %v13709_v3 = vpop.f32.mrf.mxu0 }
 0x987   :  { %v13750_v2 = vpop.f32.mrf.mxu1  ;;  %v13749_v5 = vadd.f32 %v13748_v18, %v13708_v26  ;;  %15896 = vmatpush3.bf16.msra.mxu0 %v16196_v55 }
 0x988   :  { %v13710_v4 = vpop.f32.mrf.mxu0  ;;  %15897 = vmatprep.subr.bf16.mxu0 %v16197_v61 }
 0x989   :  { %v13751_v17 = vpop.f32.mrf.mxu1 }
 0x98b   :  { %15898 = vmatpush3.bf16.msra.mxu0 %v16198_v21 }
 0x98c   :  { %15899 = vmatprep.subr.bf16.mxu0 %v16199_v38 }
 0x98f   :  { %15900 = vmatpush3.bf16.msra.mxu0 %v16200_v52 }
 0x990   :  { %15901 = vmatprep.subr.bf16.mxu0 %v16201_v11 }
 0x993   :  { %15902 = vmatpush3.bf16.msra.mxu0 %v16202_v23 }
 0x994   :  { %15903 = vmatprep.subr.bf16.mxu0 %v16203_v9 }
 0x997   :  { %15904 = vmatpush3.bf16.msra.mxu0 %v16204_v33 }
 0x998   :  { %15905 = vmatprep.subr.bf16.mxu0 %v16205_v53 }
 0x99b   :  { %15906 = vmatpush3.bf16.msra.mxu0 %v16206_v47 }
 0x99c   :  { %15907 = vmatprep.subr.bf16.mxu0 %v16207_v49 }
 0x99f   :  { %15908 = vmatpush3.bf16.msra.mxu0 %v16208_v63 }
 0x9c2   :  { %v13787_v34 = vpop.f32.mrf.mxu0 }
 0x9c3   :  { %v13788_v8 = vadd.f32 %v13787_v34, %v13747_v44  ;;  %v13828_v25 = vpop.f32.mrf.mxu1 }
 0x9c4   :  { %v13789_v30 = vpop.f32.mrf.mxu0 }
 0x9c5   :  { %v13829_v43 = vadd.f32 %v13828_v25, %v13788_v8  ;;  %v13790_v39 = vadd.f32 %v13789_v30, %v13749_v5  ;;  %v13830_v41 = vpop.f32.mrf.mxu1  ;;  %v15844_v5 = vld [vmem:[#allocation26] ss:$0 sm:$0xff] }
 0x9c6   :  { %v13791_v14 = vpop.f32.mrf.mxu0 }
 0x9c7   :  { %v13831_v32 = vadd.f32 %v13830_v41, %v13790_v39  ;;  %v13832_v57 = vpop.f32.mrf.mxu1  ;;  %v13841_v51 = vmax.f32 %v13829_v43, 0.0 }
 0x9c8   :  { %v13792_v50 = vpop.f32.mrf.mxu0 }
 0x9c9   :  { %v13842_v19 = vmax.f32 %v13831_v32, 0.0  ;;  %v13833_v29 = vpop.f32.mrf.mxu1  ;;  %v13849_v48 = vpack.c.bf16 %v13841_v51, %v13841_v51 }
 0x9cb   :  { %v13850_v31 = vpack.c.bf16 %v13842_v19, %v13842_v19 }
 0x9cd   :  { %14786 = vmatprep.mubr.bf16.mxu1 %v13850_v31 }
 0x9ce   :  { %14787 = vmatmul.mubr.bf16.vlgmr.msra.gmra.mxu1 %v13849_v48 }
 0xa02   :  { %v14665_v20 = vpop.f32.mrf.mxu0 }
 0xa03   :  { %v14666_v13 = vadd.f32 %v14665_v20, %v13984_v37  ;;  %v14706_v22 = vpop.f32.mrf.mxu1 }
 0xa04   :  { %v14667_v46 = vpop.f32.mrf.mxu0 }
 0xa05   :  { %v14707_v1 = vadd.f32 %v14706_v22, %v14666_v13  ;;  %v14668_v24 = vadd.f32 %v14667_v46, %v13988_v36  ;;  %v14708_v16 = vpop.f32.mrf.mxu1 }
 0xa06   :  { %v14669_v10 = vpop.f32.mrf.mxu0 }
 0xa07   :  { %v14709_v12 = vadd.f32 %v14708_v16, %v14668_v24  ;;  %v14710_v54 = vpop.f32.mrf.mxu1 }
 0xa08   :  { %v14670_v62 = vpop.f32.mrf.mxu0 }
 0xa09   :  { %v14711_v27 = vpop.f32.mrf.mxu1 }
 0xa42   :  { %v14747_v28 = vpop.f32.mrf.mxu0 }
 0xa43   :  { %v14748_v7 = vadd.f32 %v14747_v28, %v14707_v1 }
 0xa44   :  { %v14749_v15 = vpop.f32.mrf.mxu0 }
 0xa45   :  { %v14750_v56 = vadd.f32 %v14749_v15, %v14709_v12 }
 0xa46   :  { %v14751_v18 = vpop.f32.mrf.mxu0 }
 0xa48   :  { %v14752_v3 = vpop.f32.mrf.mxu0 }
 0xa8e   :  { %v14788_v2 = vpop.f32.mrf.mxu1 }
 0xa8f   :  { %v14789_v4 = vadd.f32 %v14788_v2, %v14748_v7 }
 0xa90   :  { %v14790_v17 = vpop.f32.mrf.mxu1 }
 0xa91   :  { %v14791_v6 = vadd.f32 %v14790_v17, %v14750_v56  ;;  %v14795_v42 = vmax.f32 %v14789_v4, 0.0 }
 0xa92   :  { %v14792_v45 = vpop.f32.mrf.mxu1 }
 0xa93   :  { %v14796_v59 = vmax.f32 %v14791_v6, 0.0  ;;  %v14797_v44 = vpack.c.bf16 %v14795_v42, %v14795_v42 }
 0xa94   :  { %v14793_v58 = vpop.f32.mrf.mxu1 }
 0xa95   :  { %v14798_v26 = vpack.c.bf16 %v14796_v59, %v14796_v59 }
 0xa97   :  { %14966 = vmatprep.mubr.bf16.mxu0 %v14798_v26 }
 0xa98   :  { %14967 = vmatmul.mubr.bf16.vlgmr.msra.gmra.mxu0 %v14797_v44 }
 0xb58   :  { %v15909_v34 = vpop.f32.mrf.mxu0 }
 0xb5a   :  { %v15910_v8 = vpop.f32.mrf.mxu0 }
 0xb5b   :  { %v15911_v25 = vadd.f32 %v15910_v8, %v15909_v34 }
 0xb5c   :  { %v15912_v30 = vpop.f32.mrf.mxu0 }
 0xb5d   :  { %v14969_v43 = vadd.f32 %v15911_v25, %v15844_v5 }
 0xb5e   :  { %v15913_v39 = vpop.f32.mrf.mxu0 }
 0xb5f   :  { %14974 = vst [vmem:[#allocation28] sm:$0xff] %v14969_v43 }
 0xb60   :  { %16463 = shalt.err (!%p16460_p8)
}
 0xb61   :  { %14984 = dma.vmem_to_hbm [thread:$0]  %s14982_s25, 128, %s19893_s12, [#allocation10]  }
 0xb62   :  { %16486 = dma.done.wait [#allocation10], 128  }
 0xb63   :  { %16487 = vsyncadd [#allocation10], 4294967168 }
 0xb64   :  { %14988 = vsyncpa [#allocation9], 1 }
 0xb65   :  { %14989 = vsyncpa [#allocation12], 1 }
 0xb66   :  { %14990 = vsyncpa [#allocation15], 1 }
 0xb67   :  { %14991 = vsyncpa [#allocation18], 1 }
 0xb68   :  { %14992 = vsyncpa [#allocation21], 1 }
 0xb69   :  { %14993 = vsyncpa [#allocation24], 1 }
 0xb6a   :  { %14994 = vsyncpa [#allocation27], 1 }
 0xb6b   :  { %14995 = vsyncpa [#allocation10], 1 }

</bundles_post_ra>
